<compile_context>
chip_gen: v5e
topology: v5e:2x2
jax: 0.10.0
libtpu: 0.0.40
codegen_flags: <defaults>
</compile_context>

<pallas_src>
import functools
import numpy as np

import jax
import jax.numpy as jnp
from jax import lax
from jax.experimental import pallas as pl
from jax.experimental.pallas import tpu as pltpu


_PAD = 128   # lane halo on each side of the conv shift scratch (tile-aligned; must be >= 2*W+2)


# ----------------------------- fused Pallas kernel ------------------------------

def _feb_kernel(x_ref, dw1_w_ref, dw1_b_ref, dw2_w_ref, dw2_b_ref,
                mask_ref, weff_ref, w1_ref, b1_ref, w2_ref, b2_ref,
                gamma_ref, beta_ref, out_ref, xz_ref, *, W, pad, eps):
    """Fused FeatureEnhanceBlock forward, everything resident in VMEM, (B, C, H*W) layout.

    Shapes:
      x_ref      : (B, C, H*W)     flattened NCHW input (free reshape in the wrapper)
      dw?_w_ref  : (C, 25)         depthwise 5x5 taps, tap index = ky*5 + kx
      dw?_b_ref  : (C, 1)
      mask_ref   : (5, H*W)        column-validity masks (one per horizontal tap offset kx)
      weff_ref   : (1, H*W)        collapsed DCT / frequency-band spatial weights
      w1_ref     : (hid, C)   b1_ref: (hid, 1)
      w2_ref     : (C, hid)   b2_ref: (C, 1)
      gamma/beta : (C, 1)          BatchNorm affine parameters
      out_ref    : (B, C, H*W)
      xz_ref     : (B, C, H*W + 2*pad)  VMEM scratch: zero-halo, lane-shift source for the convs
    """
    B, C, HW = x_ref.shape

    weff = weff_ref[...]                                      # (1, HW), hoisted

    # Zero only the two halo bands of the shift scratch, once (interior is always overwritten;
    # pad is a multiple of 128 so these are full, unmasked lane-tile stores).
    xz_ref[:, :, :pad] = jnp.zeros((B, C, pad), jnp.float32)
    xz_ref[:, :, pad + HW:] = jnp.zeros((B, C, pad), jnp.float32)

    def dwconv(src, w_ref, b_ref):
        # Depthwise 5x5 conv (zero padding = 2) + bias + ReLU in the (B, C, H*W) layout.
        # A (ky, kx) tap is a static lane-offset window read from the zero-halo scratch;
        # vertical out-of-bounds lands in the zero halo, horizontal row-boundary wrap is
        # killed by the per-kx column mask (applied once per kx, not per tap).
        # TODO(synk): the 25 window reads could become 5 row-band loads + pltpu.roll lane
        # shifts (XLU); kept as static slice reads for lowering robustness.
        xz_ref[:, :, pad:pad + HW] = src                      # tile-aligned interior store
        acc = jnp.broadcast_to(b_ref[...], (B, C, HW))        # bias-initialized accumulator
        for kx in range(5):
            ksum = None
            for ky in range(5):
                s = (ky - 2) * W + (kx - 2)
                win = xz_ref[:, :, pad + s:pad + s + HW]      # (B, C, HW) shifted window
                t = ky * 5 + kx
                term = win * w_ref[:, t:t + 1]                # per-channel (sublane) tap scale
                ksum = term if ksum is None else ksum + term
            if kx == 2:
                acc = acc + ksum                              # centre column never wraps a row
            else:
                acc = acc + ksum * mask_ref[kx:kx + 1, :]
        return jnp.maximum(acc, 0.0)

    # ---- DWConv5x5 + ReLU, twice; second conv fused with the residual add ----
    x = x_ref[...]
    y0 = dwconv(x, dw1_w_ref, dw1_b_ref)
    x_res = dwconv(y0, dw2_w_ref, dw2_b_ref) + x              # (B, C, HW)

    # ---- Spectral feature fusion ----
    w1 = w1_ref[...]
    b1 = b1_ref[...]
    w2 = w2_ref[...]
    b2 = b2_ref[...]

    inv_n = 1.0 / float(B * HW)
    ys = []
    s1 = jnp.zeros((C, 1), jnp.float32)
    for b in range(B):                                        # B is tiny; fully unrolled
        xr = x_res[b]                                         # (C, HW)
        # collapsed 2D-DCT band descriptor: lane-axis weighted reduction per channel
        xbc = jnp.sum(xr * weff, axis=-1, keepdims=True)      # (C, 1)
        # channel-attention MLP: plain 2-D dots in natural layouts (no batched einsums,
        # no broadcast weights, no lane<->sublane relayout of the resulting scale)
        h1 = jnp.maximum(
            jnp.dot(w1, xbc, preferred_element_type=jnp.float32) + b1, 0.0)   # (hid, 1)
        g = jax.nn.sigmoid(
            jnp.dot(w2, h1, preferred_element_type=jnp.float32) + b2)         # (C, 1)
        # channel attention + residual:  y = x_res + x_res * scale
        y = xr * (1.0 + g)                                    # (C, HW)
        ys.append(y)
        s1 = s1 + jnp.sum(y, axis=-1, keepdims=True)

    # BatchNorm2d (train-mode forward), two-pass batch statistics for numerical robustness.
    # TODO(synk): running_mean/running_var buffer updates (training side-effect) not modeled.
    mean = s1 * inv_n                                         # (C, 1)
    s2 = jnp.zeros((C, 1), jnp.float32)
    for b in range(B):
        d = ys[b] - mean
        s2 = s2 + jnp.sum(d * d, axis=-1, keepdims=True)
    var = s2 * inv_n
    a = gamma_ref[...] * lax.rsqrt(var + eps)
    bsh = beta_ref[...] - mean * a
    for b in range(B):
        out_ref[b] = jax.nn.sigmoid(ys[b] * a + bsh)          # full-lane (256-wide) stores


# ------------------------------ wrapper ------------------------------------

def feature_enhance_block(x_nchw, params, eps=1e-5):
    """Forward pass of FeatureEnhanceBlock.  x_nchw: (B, C, H, W) float32 -> (B, C, H, W)."""
    B, C, H, W = x_nchw.shape
    HW = H * W
    assert 2 * W + 2 <= _PAD, "image width too large for the fixed conv halo; increase _PAD"

    # free, layout-preserving reshape (no transposes anywhere in the wrapper)
    x_flat = x_nchw.reshape(B, C, HW)

    # Fold frequency_coefficient + band divisors + DCT basis into one spatial weight vector:
    #   x_bc[b,c] = sum_{h,w} w_eff[h,w] * x_res[b,c,h,w]
    c = params['freq_coef']
    L = params['band_masks']                     # (4, 64) lowest / 2x2 / 4x4 / 8x8 indicators
    alpha = (c[0] * L[0]
             + c[1] / 3.0 * (L[1] - L[0])
             + c[2] / 12.0 * (L[2] - L[1])
             + c[3] / 48.0 * (L[3] - L[2]))      # (64,)
    weff = (alpha @ params['dct_flat']).reshape(1, HW)

    # static column-validity masks for the 5 horizontal tap offsets (zero padding at W edges)
    colw = np.arange(HW) % W
    cmask = jnp.asarray(np.stack(
        [((colw + kx - 2 >= 0) & (colw + kx - 2 < W)).astype(np.float32) for kx in range(5)]))

    # TODO(synk): for large feature maps (v7x: 64 MiB VMEM) add a batch/row grid with a 2-row
    # halo and BN accumulate/finalize under pl.when; grid-less residency is optimal at 16x16.
    vmem = pl.BlockSpec(memory_space=pltpu.MemorySpace.VMEM)
    out_flat = pl.pallas_call(
        functools.partial(_feb_kernel, W=W, pad=_PAD, eps=eps),
        out_shape=jax.ShapeDtypeStruct((B, C, HW), jnp.float32),
        in_specs=[vmem] * 13,
        out_specs=vmem,
        scratch_shapes=[pltpu.VMEM((B, C, HW + 2 * _PAD), jnp.float32)],
    )(x_flat, params['dw1_w'], params['dw1_b'], params['dw2_w'], params['dw2_b'],
      cmask, weff, params['mlp_w1'], params['mlp_b1'], params['mlp_w2'], params['mlp_b2'],
      params['bn_gamma'], params['bn_beta'])

    return out_flat.reshape(B, C, H, W)          # free reshape back to NCHW


# ------------------------- deterministic parameter init ---------------------

def build_dct_matrix(H, W, V=8, U=8):
    """Replicates SpectralFeatureFusionBlock.construct_all_frequency_matrix.
    Returns M[v, u, y, x] with shape (V, U, H, W)."""
    y = np.arange(H, dtype=np.float64).reshape(1, 1, H, 1)
    x = np.arange(W, dtype=np.float64).reshape(1, 1, 1, W)
    u = np.arange(U, dtype=np.float64).reshape(1, U, 1, 1)
    v = np.arange(V, dtype=np.float64).reshape(V, 1, 1, 1)
    basis = (np.cos((2 * x + 1) * u * np.pi / (2 * W))
             * np.cos((2 * y + 1) * v * np.pi / (2 * H)))
    cu = np.where(u == 0, 1.0 / np.sqrt(W), np.sqrt(2.0) / np.sqrt(W))
    cv = np.where(v == 0, 1.0 / np.sqrt(H), np.sqrt(2.0) / np.sqrt(H))
    return (basis * cu * cv).astype(np.float32)


def init_params(key, C, H, W, reduction):
    hid = C // reduction
    ks = jax.random.split(key, 9)
    dw1 = jax.random.normal(ks[0], (C, 5, 5), jnp.float32) * 0.1
    db1 = jax.random.normal(ks[1], (C,), jnp.float32) * 0.1
    dw2 = jax.random.normal(ks[2], (C, 5, 5), jnp.float32) * 0.1
    db2 = jax.random.normal(ks[3], (C,), jnp.float32) * 0.1
    freq = jax.random.uniform(ks[4], (4,), jnp.float32)                  # torch.rand(4)
    W1 = jax.random.normal(ks[5], (hid, C), jnp.float32) / np.sqrt(C)    # Linear(C, hid)
    b1 = jax.random.normal(ks[6], (hid,), jnp.float32) * 0.01
    W2 = jax.random.normal(ks[7], (C, hid), jnp.float32) / np.sqrt(hid)  # Linear(hid, C)
    b2 = jax.random.normal(ks[8], (C,), jnp.float32) * 0.01
    M = build_dct_matrix(H, W)                                           # (8,8,H,W)

    # static band-membership indicators for the 4 frequency areas, flattened as f = v*8 + u
    v = np.arange(8).reshape(8, 1)
    u = np.arange(8).reshape(1, 8)
    band = np.stack([
        ((v == 0) & (u == 0)).astype(np.float32),
        ((v < 2) & (u < 2)).astype(np.float32),
        ((v < 4) & (u < 4)).astype(np.float32),
        np.ones((8, 8), np.float32),
    ]).reshape(4, 64)

    return {
        # raw (PyTorch-layout) params for the pure-JAX reference
        'raw': dict(dw1=dw1, db1=db1, dw2=dw2, db2=db2, freq=freq,
                    W1=W1, b1=b1, W2=W2, b2=b2, M=jnp.asarray(M)),
        # kernel-layout params (small, lane/sublane friendly, no per-tap tile padding)
        'dw1_w': dw1.reshape(C, 25), 'dw1_b': db1.reshape(C, 1),
        'dw2_w': dw2.reshape(C, 25), 'dw2_b': db2.reshape(C, 1),
        'freq_coef': freq,
        'band_masks': jnp.asarray(band),
        'dct_flat': jnp.asarray(M.reshape(64, H * W)),
        'mlp_w1': W1, 'mlp_b1': b1.reshape(hid, 1),                      # (hid, C), (hid, 1)
        'mlp_w2': W2, 'mlp_b2': b2.reshape(C, 1),                        # (C, hid), (C, 1)
        'bn_gamma': jnp.ones((C, 1), jnp.float32),                       # BN default init
        'bn_beta': jnp.zeros((C, 1), jnp.float32),
    }


# ----------------------------- pure-JAX reference ---------------------------

def reference_forward(x, p, eps=1e-5):
    r = p['raw']
    B, C, H, W = x.shape

    def dwconv(z, w, b):
        zp = jnp.pad(z, ((0, 0), (0, 0), (2, 2), (2, 2)))
        out = jnp.zeros_like(z)
        for ky in range(5):
            for kx in range(5):
                out = out + zp[:, :, ky:ky + H, kx:kx + W] * w[None, :, ky, kx, None, None]
        return out + b[None, :, None, None]

    y0 = jnp.maximum(dwconv(x, r['dw1'], r['db1']), 0.0)
    y1 = jnp.maximum(dwconv(y0, r['dw2'], r['db2']), 0.0)
    xr = y1 + x
    xdct = jnp.einsum('bchw,vuhw->bcvu', xr, r['M'])
    lowest = xdct[:, :, 0, 0]
    low = xdct[:, :, 0:2, 0:2].sum((-1, -2))
    med = xdct[:, :, 0:4, 0:4].sum((-1, -2))
    high = xdct[:, :, 0:8, 0:8].sum((-1, -2))
    c = r['freq']
    bc = (lowest * c[0] + (low - lowest) / 3 * c[1]
          + (med - low) / 12 * c[2] + (high - med) / 48 * c[3])
    h = jnp.maximum(bc @ r['W1'].T + r['b1'], 0.0)
    s = jax.nn.sigmoid(h @ r['W2'].T + r['b2'])
    y = xr + xr * s[:, :, None, None]
    mean = y.mean((0, 2, 3), keepdims=True)
    var = ((y - mean) ** 2).mean((0, 2, 3), keepdims=True)
    yn = (y - mean) / jnp.sqrt(var + eps)
    return jax.nn.sigmoid(yn)


# ---------------------------------- main -------------------------------------

if __name__ == "__main__":
    B, C, H, W = 2, 16, 16, 16          # input_channels=16, input_size=16
    reduction = 8                       # sff_reduction_ratio -> hidden = 2

    key = jax.random.PRNGKey(0)
    kx, kp = jax.random.split(key)
    x = jax.random.normal(kx, (B, C, H, W), jnp.float32)
    params = init_params(kp, C, H, W, reduction)

    fwd = jax.jit(feature_enhance_block)
    out = jax.block_until_ready(fwd(x, params))

    assert out.shape == (B, C, H, W), out.shape
    ref = jax.block_until_ready(reference_forward(x, params))
    max_err = float(jnp.max(jnp.abs(out - ref)))
    assert np.isfinite(max_err) and max_err < 1e-3, f"max_err={max_err}"

    print("KERNEL_OK")
</pallas_src>

<mosaic_0001>
module attributes {stable_mosaic.version = 11 : i64} {
  func.func @_feb_kernel(%arg0: memref<2x16x256xf32, #tpu.memory_space<vmem>>, %arg1: memref<16x25xf32, #tpu.memory_space<vmem>>, %arg2: memref<16x1xf32, #tpu.memory_space<vmem>>, %arg3: memref<16x25xf32, #tpu.memory_space<vmem>>, %arg4: memref<16x1xf32, #tpu.memory_space<vmem>>, %arg5: memref<5x256xf32, #tpu.memory_space<vmem>>, %arg6: memref<1x256xf32, #tpu.memory_space<vmem>>, %arg7: memref<2x16xf32, #tpu.memory_space<vmem>>, %arg8: memref<2x1xf32, #tpu.memory_space<vmem>>, %arg9: memref<16x2xf32, #tpu.memory_space<vmem>>, %arg10: memref<16x1xf32, #tpu.memory_space<vmem>>, %arg11: memref<16x1xf32, #tpu.memory_space<vmem>>, %arg12: memref<16x1xf32, #tpu.memory_space<vmem>>, %arg13: memref<2x16x256xf32, #tpu.memory_space<vmem>>, %arg14: memref<2x16x512xf32, #tpu.memory_space<vmem>>) attributes {dimension_semantics = [], scalar_prefetch = 0 : i64, scratch_operands = 1 : i64, tpu.core_type = #tpu.core_type<tc>} {
    %c0 = arith.constant 0 : index
    %c0_0 = arith.constant 0 : index
    %0 = vector.load %arg6[%c0, %c0_0] : memref<1x256xf32, #tpu.memory_space<vmem>>, vector<1x256xf32>
    %cst = arith.constant 0.000000e+00 : f32
    %1 = vector.broadcast %cst : f32 to vector<2x16x128xf32>
    %c0_1 = arith.constant 0 : index
    %c0_2 = arith.constant 0 : index
    %c0_3 = arith.constant 0 : index
    %2 = vector.load %arg14[%c0_1, %c0_2, %c0_3] : memref<2x16x512xf32, #tpu.memory_space<vmem>>, vector<2x16x128xf32>
    tpu.vector_store %arg14[%c0_1, %c0_2, %c0_3], %1 {strides = array<i32>} : memref<2x16x512xf32, #tpu.memory_space<vmem>>, vector<2x16x128xf32>,
    %cst_4 = arith.constant 0.000000e+00 : f32
    %3 = vector.broadcast %cst_4 : f32 to vector<2x16x128xf32>
    %c0_5 = arith.constant 0 : index
    %c0_6 = arith.constant 0 : index
    %c384 = arith.constant 384 : index
    %4 = vector.load %arg14[%c0_5, %c0_6, %c384] : memref<2x16x512xf32, #tpu.memory_space<vmem>>, vector<2x16x128xf32>
    tpu.vector_store %arg14[%c0_5, %c0_6, %c384], %3 {strides = array<i32>} : memref<2x16x512xf32, #tpu.memory_space<vmem>>, vector<2x16x128xf32>,
    %c0_7 = arith.constant 0 : index
    %c0_8 = arith.constant 0 : index
    %c0_9 = arith.constant 0 : index
    %5 = vector.load %arg0[%c0_7, %c0_8, %c0_9] : memref<2x16x256xf32, #tpu.memory_space<vmem>>, vector<2x16x256xf32>
    %c0_10 = arith.constant 0 : index
    %c0_11 = arith.constant 0 : index
    %c128 = arith.constant 128 : index
    %6 = vector.load %arg14[%c0_10, %c0_11, %c128] : memref<2x16x512xf32, #tpu.memory_space<vmem>>, vector<2x16x256xf32>
    tpu.vector_store %arg14[%c0_10, %c0_11, %c128], %5 {strides = array<i32>} : memref<2x16x512xf32, #tpu.memory_space<vmem>>, vector<2x16x256xf32>,
    %c0_12 = arith.constant 0 : index
    %c0_13 = arith.constant 0 : index
    %7 = vector.load %arg2[%c0_12, %c0_13] : memref<16x1xf32, #tpu.memory_space<vmem>>, vector<16x1xf32>
    %8 = vector.shape_cast %7 : vector<16x1xf32> to vector<1x16x1xf32>
    %9 = vector.broadcast %8 : vector<1x16x1xf32> to vector<2x16x256xf32>
    %c0_14 = arith.constant 0 : index
    %c0_15 = arith.constant 0 : index
    %c94 = arith.constant 94 : index
    %10 = vector.load %arg14[%c0_14, %c0_15, %c94] : memref<2x16x512xf32, #tpu.memory_space<vmem>>, vector<2x16x256xf32>
    %c0_16 = arith.constant 0 : index
    %c0_17 = arith.constant 0 : index
    %11 = vector.load %arg1[%c0_16, %c0_17] : memref<16x25xf32, #tpu.memory_space<vmem>>, vector<16x1xf32>
    %12 = vector.shape_cast %11 : vector<16x1xf32> to vector<1x16x1xf32>
    %13 = vector.broadcast %12 : vector<1x16x1xf32> to vector<2x16x256xf32>
    %14 = arith.mulf %10, %13 : vector<2x16x256xf32>
    %c0_18 = arith.constant 0 : index
    %c0_19 = arith.constant 0 : index
    %c110 = arith.constant 110 : index
    %15 = vector.load %arg14[%c0_18, %c0_19, %c110] : memref<2x16x512xf32, #tpu.memory_space<vmem>>, vector<2x16x256xf32>
    %c0_20 = arith.constant 0 : index
    %c5 = arith.constant 5 : index
    %16 = vector.load %arg1[%c0_20, %c5] : memref<16x25xf32, #tpu.memory_space<vmem>>, vector<16x1xf32>
    %17 = vector.shape_cast %16 : vector<16x1xf32> to vector<1x16x1xf32>
    %18 = vector.broadcast %17 : vector<1x16x1xf32> to vector<2x16x256xf32>
    %19 = arith.mulf %15, %18 : vector<2x16x256xf32>
    %20 = arith.addf %14, %19 : vector<2x16x256xf32>
    %c0_21 = arith.constant 0 : index
    %c0_22 = arith.constant 0 : index
    %c126 = arith.constant 126 : index
    %21 = vector.load %arg14[%c0_21, %c0_22, %c126] : memref<2x16x512xf32, #tpu.memory_space<vmem>>, vector<2x16x256xf32>
    %c0_23 = arith.constant 0 : index
    %c10 = arith.constant 10 : index
    %22 = vector.load %arg1[%c0_23, %c10] : memref<16x25xf32, #tpu.memory_space<vmem>>, vector<16x1xf32>
    %23 = vector.shape_cast %22 : vector<16x1xf32> to vector<1x16x1xf32>
    %24 = vector.broadcast %23 : vector<1x16x1xf32> to vector<2x16x256xf32>
    %25 = arith.mulf %21, %24 : vector<2x16x256xf32>
    %26 = arith.addf %20, %25 : vector<2x16x256xf32>
    %c0_24 = arith.constant 0 : index
    %c0_25 = arith.constant 0 : index
    %c142 = arith.constant 142 : index
    %27 = vector.load %arg14[%c0_24, %c0_25, %c142] : memref<2x16x512xf32, #tpu.memory_space<vmem>>, vector<2x16x256xf32>
    %c0_26 = arith.constant 0 : index
    %c15 = arith.constant 15 : index
    %28 = vector.load %arg1[%c0_26, %c15] : memref<16x25xf32, #tpu.memory_space<vmem>>, vector<16x1xf32>
    %29 = vector.shape_cast %28 : vector<16x1xf32> to vector<1x16x1xf32>
    %30 = vector.broadcast %29 : vector<1x16x1xf32> to vector<2x16x256xf32>
    %31 = arith.mulf %27, %30 : vector<2x16x256xf32>
    %32 = arith.addf %26, %31 : vector<2x16x256xf32>
    %c0_27 = arith.constant 0 : index
    %c0_28 = arith.constant 0 : index
    %c158 = arith.constant 158 : index
    %33 = vector.load %arg14[%c0_27, %c0_28, %c158] : memref<2x16x512xf32, #tpu.memory_space<vmem>>, vector<2x16x256xf32>
    %c0_29 = arith.constant 0 : index
    %c20 = arith.constant 20 : index
    %34 = vector.load %arg1[%c0_29, %c20] : memref<16x25xf32, #tpu.memory_space<vmem>>, vector<16x1xf32>
    %35 = vector.shape_cast %34 : vector<16x1xf32> to vector<1x16x1xf32>
    %36 = vector.broadcast %35 : vector<1x16x1xf32> to vector<2x16x256xf32>
    %37 = arith.mulf %33, %36 : vector<2x16x256xf32>
    %38 = arith.addf %32, %37 : vector<2x16x256xf32>
    %c0_30 = arith.constant 0 : index
    %c0_31 = arith.constant 0 : index
    %39 = vector.load %arg5[%c0_30, %c0_31] : memref<5x256xf32, #tpu.memory_space<vmem>>, vector<1x256xf32>
    %40 = vector.shape_cast %39 : vector<1x256xf32> to vector<1x1x256xf32>
    %41 = vector.broadcast %40 : vector<1x1x256xf32> to vector<2x16x256xf32>
    %42 = arith.mulf %38, %41 : vector<2x16x256xf32>
    %43 = arith.addf %9, %42 : vector<2x16x256xf32>
    %c0_32 = arith.constant 0 : index
    %c0_33 = arith.constant 0 : index
    %c95 = arith.constant 95 : index
    %44 = vector.load %arg14[%c0_32, %c0_33, %c95] : memref<2x16x512xf32, #tpu.memory_space<vmem>>, vector<2x16x256xf32>
    %c0_34 = arith.constant 0 : index
    %c1 = arith.constant 1 : index
    %45 = vector.load %arg1[%c0_34, %c1] : memref<16x25xf32, #tpu.memory_space<vmem>>, vector<16x1xf32>
    %46 = vector.shape_cast %45 : vector<16x1xf32> to vector<1x16x1xf32>
    %47 = vector.broadcast %46 : vector<1x16x1xf32> to vector<2x16x256xf32>
    %48 = arith.mulf %44, %47 : vector<2x16x256xf32>
    %c0_35 = arith.constant 0 : index
    %c0_36 = arith.constant 0 : index
    %c111 = arith.constant 111 : index
    %49 = vector.load %arg14[%c0_35, %c0_36, %c111] : memref<2x16x512xf32, #tpu.memory_space<vmem>>, vector<2x16x256xf32>
    %c0_37 = arith.constant 0 : index
    %c6 = arith.constant 6 : index
    %50 = vector.load %arg1[%c0_37, %c6] : memref<16x25xf32, #tpu.memory_space<vmem>>, vector<16x1xf32>
    %51 = vector.shape_cast %50 : vector<16x1xf32> to vector<1x16x1xf32>
    %52 = vector.broadcast %51 : vector<1x16x1xf32> to vector<2x16x256xf32>
    %53 = arith.mulf %49, %52 : vector<2x16x256xf32>
    %54 = arith.addf %48, %53 : vector<2x16x256xf32>
    %c0_38 = arith.constant 0 : index
    %c0_39 = arith.constant 0 : index
    %c127 = arith.constant 127 : index
    %55 = vector.load %arg14[%c0_38, %c0_39, %c127] : memref<2x16x512xf32, #tpu.memory_space<vmem>>, vector<2x16x256xf32>
    %c0_40 = arith.constant 0 : index
    %c11 = arith.constant 11 : index
    %56 = vector.load %arg1[%c0_40, %c11] : memref<16x25xf32, #tpu.memory_space<vmem>>, vector<16x1xf32>
    %57 = vector.shape_cast %56 : vector<16x1xf32> to vector<1x16x1xf32>
    %58 = vector.broadcast %57 : vector<1x16x1xf32> to vector<2x16x256xf32>
    %59 = arith.mulf %55, %58 : vector<2x16x256xf32>
    %60 = arith.addf %54, %59 : vector<2x16x256xf32>
    %c0_41 = arith.constant 0 : index
    %c0_42 = arith.constant 0 : index
    %c143 = arith.constant 143 : index
    %61 = vector.load %arg14[%c0_41, %c0_42, %c143] : memref<2x16x512xf32, #tpu.memory_space<vmem>>, vector<2x16x256xf32>
    %c0_43 = arith.constant 0 : index
    %c16 = arith.constant 16 : index
    %62 = vector.load %arg1[%c0_43, %c16] : memref<16x25xf32, #tpu.memory_space<vmem>>, vector<16x1xf32>
    %63 = vector.shape_cast %62 : vector<16x1xf32> to vector<1x16x1xf32>
    %64 = vector.broadcast %63 : vector<1x16x1xf32> to vector<2x16x256xf32>
    %65 = arith.mulf %61, %64 : vector<2x16x256xf32>
    %66 = arith.addf %60, %65 : vector<2x16x256xf32>
    %c0_44 = arith.constant 0 : index
    %c0_45 = arith.constant 0 : index
    %c159 = arith.constant 159 : index
    %67 = vector.load %arg14[%c0_44, %c0_45, %c159] : memref<2x16x512xf32, #tpu.memory_space<vmem>>, vector<2x16x256xf32>
    %c0_46 = arith.constant 0 : index
    %c21 = arith.constant 21 : index
    %68 = vector.load %arg1[%c0_46, %c21] : memref<16x25xf32, #tpu.memory_space<vmem>>, vector<16x1xf32>
    %69 = vector.shape_cast %68 : vector<16x1xf32> to vector<1x16x1xf32>
    %70 = vector.broadcast %69 : vector<1x16x1xf32> to vector<2x16x256xf32>
    %71 = arith.mulf %67, %70 : vector<2x16x256xf32>
    %72 = arith.addf %66, %71 : vector<2x16x256xf32>
    %c1_47 = arith.constant 1 : index
    %c0_48 = arith.constant 0 : index
    %73 = vector.load %arg5[%c1_47, %c0_48] : memref<5x256xf32, #tpu.memory_space<vmem>>, vector<1x256xf32>
    %74 = vector.shape_cast %73 : vector<1x256xf32> to vector<1x1x256xf32>
    %75 = vector.broadcast %74 : vector<1x1x256xf32> to vector<2x16x256xf32>
    %76 = arith.mulf %72, %75 : vector<2x16x256xf32>
    %77 = arith.addf %43, %76 : vector<2x16x256xf32>
    %c0_49 = arith.constant 0 : index
    %c0_50 = arith.constant 0 : index
    %c96 = arith.constant 96 : index
    %78 = vector.load %arg14[%c0_49, %c0_50, %c96] : memref<2x16x512xf32, #tpu.memory_space<vmem>>, vector<2x16x256xf32>
    %c0_51 = arith.constant 0 : index
    %c2 = arith.constant 2 : index
    %79 = vector.load %arg1[%c0_51, %c2] : memref<16x25xf32, #tpu.memory_space<vmem>>, vector<16x1xf32>
    %80 = vector.shape_cast %79 : vector<16x1xf32> to vector<1x16x1xf32>
    %81 = vector.broadcast %80 : vector<1x16x1xf32> to vector<2x16x256xf32>
    %82 = arith.mulf %78, %81 : vector<2x16x256xf32>
    %c0_52 = arith.constant 0 : index
    %c0_53 = arith.constant 0 : index
    %c112 = arith.constant 112 : index
    %83 = vector.load %arg14[%c0_52, %c0_53, %c112] : memref<2x16x512xf32, #tpu.memory_space<vmem>>, vector<2x16x256xf32>
    %c0_54 = arith.constant 0 : index
    %c7 = arith.constant 7 : index
    %84 = vector.load %arg1[%c0_54, %c7] : memref<16x25xf32, #tpu.memory_space<vmem>>, vector<16x1xf32>
    %85 = vector.shape_cast %84 : vector<16x1xf32> to vector<1x16x1xf32>
    %86 = vector.broadcast %85 : vector<1x16x1xf32> to vector<2x16x256xf32>
    %87 = arith.mulf %83, %86 : vector<2x16x256xf32>
    %88 = arith.addf %82, %87 : vector<2x16x256xf32>
    %c0_55 = arith.constant 0 : index
    %c0_56 = arith.constant 0 : index
    %c128_57 = arith.constant 128 : index
    %89 = vector.load %arg14[%c0_55, %c0_56, %c128_57] : memref<2x16x512xf32, #tpu.memory_space<vmem>>, vector<2x16x256xf32>
    %c0_58 = arith.constant 0 : index
    %c12 = arith.constant 12 : index
    %90 = vector.load %arg1[%c0_58, %c12] : memref<16x25xf32, #tpu.memory_space<vmem>>, vector<16x1xf32>
    %91 = vector.shape_cast %90 : vector<16x1xf32> to vector<1x16x1xf32>
    %92 = vector.broadcast %91 : vector<1x16x1xf32> to vector<2x16x256xf32>
    %93 = arith.mulf %89, %92 : vector<2x16x256xf32>
    %94 = arith.addf %88, %93 : vector<2x16x256xf32>
    %c0_59 = arith.constant 0 : index
    %c0_60 = arith.constant 0 : index
    %c144 = arith.constant 144 : index
    %95 = vector.load %arg14[%c0_59, %c0_60, %c144] : memref<2x16x512xf32, #tpu.memory_space<vmem>>, vector<2x16x256xf32>
    %c0_61 = arith.constant 0 : index
    %c17 = arith.constant 17 : index
    %96 = vector.load %arg1[%c0_61, %c17] : memref<16x25xf32, #tpu.memory_space<vmem>>, vector<16x1xf32>
    %97 = vector.shape_cast %96 : vector<16x1xf32> to vector<1x16x1xf32>
    %98 = vector.broadcast %97 : vector<1x16x1xf32> to vector<2x16x256xf32>
    %99 = arith.mulf %95, %98 : vector<2x16x256xf32>
    %100 = arith.addf %94, %99 : vector<2x16x256xf32>
    %c0_62 = arith.constant 0 : index
    %c0_63 = arith.constant 0 : index
    %c160 = arith.constant 160 : index
    %101 = vector.load %arg14[%c0_62, %c0_63, %c160] : memref<2x16x512xf32, #tpu.memory_space<vmem>>, vector<2x16x256xf32>
    %c0_64 = arith.constant 0 : index
    %c22 = arith.constant 22 : index
    %102 = vector.load %arg1[%c0_64, %c22] : memref<16x25xf32, #tpu.memory_space<vmem>>, vector<16x1xf32>
    %103 = vector.shape_cast %102 : vector<16x1xf32> to vector<1x16x1xf32>
    %104 = vector.broadcast %103 : vector<1x16x1xf32> to vector<2x16x256xf32>
    %105 = arith.mulf %101, %104 : vector<2x16x256xf32>
    %106 = arith.addf %100, %105 : vector<2x16x256xf32>
    %107 = arith.addf %77, %106 : vector<2x16x256xf32>
    %c0_65 = arith.constant 0 : index
    %c0_66 = arith.constant 0 : index
    %c97 = arith.constant 97 : index
    %108 = vector.load %arg14[%c0_65, %c0_66, %c97] : memref<2x16x512xf32, #tpu.memory_space<vmem>>, vector<2x16x256xf32>
    %c0_67 = arith.constant 0 : index
    %c3 = arith.constant 3 : index
    %109 = vector.load %arg1[%c0_67, %c3] : memref<16x25xf32, #tpu.memory_space<vmem>>, vector<16x1xf32>
    %110 = vector.shape_cast %109 : vector<16x1xf32> to vector<1x16x1xf32>
    %111 = vector.broadcast %110 : vector<1x16x1xf32> to vector<2x16x256xf32>
    %112 = arith.mulf %108, %111 : vector<2x16x256xf32>
    %c0_68 = arith.constant 0 : index
    %c0_69 = arith.constant 0 : index
    %c113 = arith.constant 113 : index
    %113 = vector.load %arg14[%c0_68, %c0_69, %c113] : memref<2x16x512xf32, #tpu.memory_space<vmem>>, vector<2x16x256xf32>
    %c0_70 = arith.constant 0 : index
    %c8 = arith.constant 8 : index
    %114 = vector.load %arg1[%c0_70, %c8] : memref<16x25xf32, #tpu.memory_space<vmem>>, vector<16x1xf32>
    %115 = vector.shape_cast %114 : vector<16x1xf32> to vector<1x16x1xf32>
    %116 = vector.broadcast %115 : vector<1x16x1xf32> to vector<2x16x256xf32>
    %117 = arith.mulf %113, %116 : vector<2x16x256xf32>
    %118 = arith.addf %112, %117 : vector<2x16x256xf32>
    %c0_71 = arith.constant 0 : index
    %c0_72 = arith.constant 0 : index
    %c129 = arith.constant 129 : index
    %119 = vector.load %arg14[%c0_71, %c0_72, %c129] : memref<2x16x512xf32, #tpu.memory_space<vmem>>, vector<2x16x256xf32>
    %c0_73 = arith.constant 0 : index
    %c13 = arith.constant 13 : index
    %120 = vector.load %arg1[%c0_73, %c13] : memref<16x25xf32, #tpu.memory_space<vmem>>, vector<16x1xf32>
    %121 = vector.shape_cast %120 : vector<16x1xf32> to vector<1x16x1xf32>
    %122 = vector.broadcast %121 : vector<1x16x1xf32> to vector<2x16x256xf32>
    %123 = arith.mulf %119, %122 : vector<2x16x256xf32>
    %124 = arith.addf %118, %123 : vector<2x16x256xf32>
    %c0_74 = arith.constant 0 : index
    %c0_75 = arith.constant 0 : index
    %c145 = arith.constant 145 : index
    %125 = vector.load %arg14[%c0_74, %c0_75, %c145] : memref<2x16x512xf32, #tpu.memory_space<vmem>>, vector<2x16x256xf32>
    %c0_76 = arith.constant 0 : index
    %c18 = arith.constant 18 : index
    %126 = vector.load %arg1[%c0_76, %c18] : memref<16x25xf32, #tpu.memory_space<vmem>>, vector<16x1xf32>
    %127 = vector.shape_cast %126 : vector<16x1xf32> to vector<1x16x1xf32>
    %128 = vector.broadcast %127 : vector<1x16x1xf32> to vector<2x16x256xf32>
    %129 = arith.mulf %125, %128 : vector<2x16x256xf32>
    %130 = arith.addf %124, %129 : vector<2x16x256xf32>
    %c0_77 = arith.constant 0 : index
    %c0_78 = arith.constant 0 : index
    %c161 = arith.constant 161 : index
    %131 = vector.load %arg14[%c0_77, %c0_78, %c161] : memref<2x16x512xf32, #tpu.memory_space<vmem>>, vector<2x16x256xf32>
    %c0_79 = arith.constant 0 : index
    %c23 = arith.constant 23 : index
    %132 = vector.load %arg1[%c0_79, %c23] : memref<16x25xf32, #tpu.memory_space<vmem>>, vector<16x1xf32>
    %133 = vector.shape_cast %132 : vector<16x1xf32> to vector<1x16x1xf32>
    %134 = vector.broadcast %133 : vector<1x16x1xf32> to vector<2x16x256xf32>
    %135 = arith.mulf %131, %134 : vector<2x16x256xf32>
    %136 = arith.addf %130, %135 : vector<2x16x256xf32>
    %c3_80 = arith.constant 3 : index
    %c0_81 = arith.constant 0 : index
    %137 = vector.load %arg5[%c3_80, %c0_81] : memref<5x256xf32, #tpu.memory_space<vmem>>, vector<1x256xf32>
    %138 = vector.shape_cast %137 : vector<1x256xf32> to vector<1x1x256xf32>
    %139 = vector.broadcast %138 : vector<1x1x256xf32> to vector<2x16x256xf32>
    %140 = arith.mulf %136, %139 : vector<2x16x256xf32>
    %141 = arith.addf %107, %140 : vector<2x16x256xf32>
    %c0_82 = arith.constant 0 : index
    %c0_83 = arith.constant 0 : index
    %c98 = arith.constant 98 : index
    %142 = vector.load %arg14[%c0_82, %c0_83, %c98] : memref<2x16x512xf32, #tpu.memory_space<vmem>>, vector<2x16x256xf32>
    %c0_84 = arith.constant 0 : index
    %c4 = arith.constant 4 : index
    %143 = vector.load %arg1[%c0_84, %c4] : memref<16x25xf32, #tpu.memory_space<vmem>>, vector<16x1xf32>
    %144 = vector.shape_cast %143 : vector<16x1xf32> to vector<1x16x1xf32>
    %145 = vector.broadcast %144 : vector<1x16x1xf32> to vector<2x16x256xf32>
    %146 = arith.mulf %142, %145 : vector<2x16x256xf32>
    %c0_85 = arith.constant 0 : index
    %c0_86 = arith.constant 0 : index
    %c114 = arith.constant 114 : index
    %147 = vector.load %arg14[%c0_85, %c0_86, %c114] : memref<2x16x512xf32, #tpu.memory_space<vmem>>, vector<2x16x256xf32>
    %c0_87 = arith.constant 0 : index
    %c9 = arith.constant 9 : index
    %148 = vector.load %arg1[%c0_87, %c9] : memref<16x25xf32, #tpu.memory_space<vmem>>, vector<16x1xf32>
    %149 = vector.shape_cast %148 : vector<16x1xf32> to vector<1x16x1xf32>
    %150 = vector.broadcast %149 : vector<1x16x1xf32> to vector<2x16x256xf32>
    %151 = arith.mulf %147, %150 : vector<2x16x256xf32>
    %152 = arith.addf %146, %151 : vector<2x16x256xf32>
    %c0_88 = arith.constant 0 : index
    %c0_89 = arith.constant 0 : index
    %c130 = arith.constant 130 : index
    %153 = vector.load %arg14[%c0_88, %c0_89, %c130] : memref<2x16x512xf32, #tpu.memory_space<vmem>>, vector<2x16x256xf32>
    %c0_90 = arith.constant 0 : index
    %c14 = arith.constant 14 : index
    %154 = vector.load %arg1[%c0_90, %c14] : memref<16x25xf32, #tpu.memory_space<vmem>>, vector<16x1xf32>
    %155 = vector.shape_cast %154 : vector<16x1xf32> to vector<1x16x1xf32>
    %156 = vector.broadcast %155 : vector<1x16x1xf32> to vector<2x16x256xf32>
    %157 = arith.mulf %153, %156 : vector<2x16x256xf32>
    %158 = arith.addf %152, %157 : vector<2x16x256xf32>
    %c0_91 = arith.constant 0 : index
    %c0_92 = arith.constant 0 : index
    %c146 = arith.constant 146 : index
    %159 = vector.load %arg14[%c0_91, %c0_92, %c146] : memref<2x16x512xf32, #tpu.memory_space<vmem>>, vector<2x16x256xf32>
    %c0_93 = arith.constant 0 : index
    %c19 = arith.constant 19 : index
    %160 = vector.load %arg1[%c0_93, %c19] : memref<16x25xf32, #tpu.memory_space<vmem>>, vector<16x1xf32>
    %161 = vector.shape_cast %160 : vector<16x1xf32> to vector<1x16x1xf32>
    %162 = vector.broadcast %161 : vector<1x16x1xf32> to vector<2x16x256xf32>
    %163 = arith.mulf %159, %162 : vector<2x16x256xf32>
    %164 = arith.addf %158, %163 : vector<2x16x256xf32>
    %c0_94 = arith.constant 0 : index
    %c0_95 = arith.constant 0 : index
    %c162 = arith.constant 162 : index
    %165 = vector.load %arg14[%c0_94, %c0_95, %c162] : memref<2x16x512xf32, #tpu.memory_space<vmem>>, vector<2x16x256xf32>
    %c0_96 = arith.constant 0 : index
    %c24 = arith.constant 24 : index
    %166 = vector.load %arg1[%c0_96, %c24] : memref<16x25xf32, #tpu.memory_space<vmem>>, vector<16x1xf32>
    %167 = vector.shape_cast %166 : vector<16x1xf32> to vector<1x16x1xf32>
    %168 = vector.broadcast %167 : vector<1x16x1xf32> to vector<2x16x256xf32>
    %169 = arith.mulf %165, %168 : vector<2x16x256xf32>
    %170 = arith.addf %164, %169 : vector<2x16x256xf32>
    %c4_97 = arith.constant 4 : index
    %c0_98 = arith.constant 0 : index
    %171 = vector.load %arg5[%c4_97, %c0_98] : memref<5x256xf32, #tpu.memory_space<vmem>>, vector<1x256xf32>
    %172 = vector.shape_cast %171 : vector<1x256xf32> to vector<1x1x256xf32>
    %173 = vector.broadcast %172 : vector<1x1x256xf32> to vector<2x16x256xf32>
    %174 = arith.mulf %170, %173 : vector<2x16x256xf32>
    %175 = arith.addf %141, %174 : vector<2x16x256xf32>
    %cst_99 = arith.constant 0.000000e+00 : f32
    %176 = vector.broadcast %cst_99 : f32 to vector<2x16x256xf32>
    %177 = arith.maximumf %175, %176 : vector<2x16x256xf32>
    %c0_100 = arith.constant 0 : index
    %c0_101 = arith.constant 0 : index
    %c128_102 = arith.constant 128 : index
    %178 = vector.load %arg14[%c0_100, %c0_101, %c128_102] : memref<2x16x512xf32, #tpu.memory_space<vmem>>, vector<2x16x256xf32>
    tpu.vector_store %arg14[%c0_100, %c0_101, %c128_102], %177 {strides = array<i32>} : memref<2x16x512xf32, #tpu.memory_space<vmem>>, vector<2x16x256xf32>,
    %c0_103 = arith.constant 0 : index
    %c0_104 = arith.constant 0 : index
    %179 = vector.load %arg4[%c0_103, %c0_104] : memref<16x1xf32, #tpu.memory_space<vmem>>, vector<16x1xf32>
    %180 = vector.shape_cast %179 : vector<16x1xf32> to vector<1x16x1xf32>
    %181 = vector.broadcast %180 : vector<1x16x1xf32> to vector<2x16x256xf32>
    %c0_105 = arith.constant 0 : index
    %c0_106 = arith.constant 0 : index
    %c94_107 = arith.constant 94 : index
    %182 = vector.load %arg14[%c0_105, %c0_106, %c94_107] : memref<2x16x512xf32, #tpu.memory_space<vmem>>, vector<2x16x256xf32>
    %c0_108 = arith.constant 0 : index
    %c0_109 = arith.constant 0 : index
    %183 = vector.load %arg3[%c0_108, %c0_109] : memref<16x25xf32, #tpu.memory_space<vmem>>, vector<16x1xf32>
    %184 = vector.shape_cast %183 : vector<16x1xf32> to vector<1x16x1xf32>
    %185 = vector.broadcast %184 : vector<1x16x1xf32> to vector<2x16x256xf32>
    %186 = arith.mulf %182, %185 : vector<2x16x256xf32>
    %c0_110 = arith.constant 0 : index
    %c0_111 = arith.constant 0 : index
    %c110_112 = arith.constant 110 : index
    %187 = vector.load %arg14[%c0_110, %c0_111, %c110_112] : memref<2x16x512xf32, #tpu.memory_space<vmem>>, vector<2x16x256xf32>
    %c0_113 = arith.constant 0 : index
    %c5_114 = arith.constant 5 : index
    %188 = vector.load %arg3[%c0_113, %c5_114] : memref<16x25xf32, #tpu.memory_space<vmem>>, vector<16x1xf32>
    %189 = vector.shape_cast %188 : vector<16x1xf32> to vector<1x16x1xf32>
    %190 = vector.broadcast %189 : vector<1x16x1xf32> to vector<2x16x256xf32>
    %191 = arith.mulf %187, %190 : vector<2x16x256xf32>
    %192 = arith.addf %186, %191 : vector<2x16x256xf32>
    %c0_115 = arith.constant 0 : index
    %c0_116 = arith.constant 0 : index
    %c126_117 = arith.constant 126 : index
    %193 = vector.load %arg14[%c0_115, %c0_116, %c126_117] : memref<2x16x512xf32, #tpu.memory_space<vmem>>, vector<2x16x256xf32>
    %c0_118 = arith.constant 0 : index
    %c10_119 = arith.constant 10 : index
    %194 = vector.load %arg3[%c0_118, %c10_119] : memref<16x25xf32, #tpu.memory_space<vmem>>, vector<16x1xf32>
    %195 = vector.shape_cast %194 : vector<16x1xf32> to vector<1x16x1xf32>
    %196 = vector.broadcast %195 : vector<1x16x1xf32> to vector<2x16x256xf32>
    %197 = arith.mulf %193, %196 : vector<2x16x256xf32>
    %198 = arith.addf %192, %197 : vector<2x16x256xf32>
    %c0_120 = arith.constant 0 : index
    %c0_121 = arith.constant 0 : index
    %c142_122 = arith.constant 142 : index
    %199 = vector.load %arg14[%c0_120, %c0_121, %c142_122] : memref<2x16x512xf32, #tpu.memory_space<vmem>>, vector<2x16x256xf32>
    %c0_123 = arith.constant 0 : index
    %c15_124 = arith.constant 15 : index
    %200 = vector.load %arg3[%c0_123, %c15_124] : memref<16x25xf32, #tpu.memory_space<vmem>>, vector<16x1xf32>
    %201 = vector.shape_cast %200 : vector<16x1xf32> to vector<1x16x1xf32>
    %202 = vector.broadcast %201 : vector<1x16x1xf32> to vector<2x16x256xf32>
    %203 = arith.mulf %199, %202 : vector<2x16x256xf32>
    %204 = arith.addf %198, %203 : vector<2x16x256xf32>
    %c0_125 = arith.constant 0 : index
    %c0_126 = arith.constant 0 : index
    %c158_127 = arith.constant 158 : index
    %205 = vector.load %arg14[%c0_125, %c0_126, %c158_127] : memref<2x16x512xf32, #tpu.memory_space<vmem>>, vector<2x16x256xf32>
    %c0_128 = arith.constant 0 : index
    %c20_129 = arith.constant 20 : index
    %206 = vector.load %arg3[%c0_128, %c20_129] : memref<16x25xf32, #tpu.memory_space<vmem>>, vector<16x1xf32>
    %207 = vector.shape_cast %206 : vector<16x1xf32> to vector<1x16x1xf32>
    %208 = vector.broadcast %207 : vector<1x16x1xf32> to vector<2x16x256xf32>
    %209 = arith.mulf %205, %208 : vector<2x16x256xf32>
    %210 = arith.addf %204, %209 : vector<2x16x256xf32>
    %c0_130 = arith.constant 0 : index
    %c0_131 = arith.constant 0 : index
    %211 = vector.load %arg5[%c0_130, %c0_131] : memref<5x256xf32, #tpu.memory_space<vmem>>, vector<1x256xf32>
    %212 = vector.shape_cast %211 : vector<1x256xf32> to vector<1x1x256xf32>
    %213 = vector.broadcast %212 : vector<1x1x256xf32> to vector<2x16x256xf32>
    %214 = arith.mulf %210, %213 : vector<2x16x256xf32>
    %215 = arith.addf %181, %214 : vector<2x16x256xf32>
    %c0_132 = arith.constant 0 : index
    %c0_133 = arith.constant 0 : index
    %c95_134 = arith.constant 95 : index
    %216 = vector.load %arg14[%c0_132, %c0_133, %c95_134] : memref<2x16x512xf32, #tpu.memory_space<vmem>>, vector<2x16x256xf32>
    %c0_135 = arith.constant 0 : index
    %c1_136 = arith.constant 1 : index
    %217 = vector.load %arg3[%c0_135, %c1_136] : memref<16x25xf32, #tpu.memory_space<vmem>>, vector<16x1xf32>
    %218 = vector.shape_cast %217 : vector<16x1xf32> to vector<1x16x1xf32>
    %219 = vector.broadcast %218 : vector<1x16x1xf32> to vector<2x16x256xf32>
    %220 = arith.mulf %216, %219 : vector<2x16x256xf32>
    %c0_137 = arith.constant 0 : index
    %c0_138 = arith.constant 0 : index
    %c111_139 = arith.constant 111 : index
    %221 = vector.load %arg14[%c0_137, %c0_138, %c111_139] : memref<2x16x512xf32, #tpu.memory_space<vmem>>, vector<2x16x256xf32>
    %c0_140 = arith.constant 0 : index
    %c6_141 = arith.constant 6 : index
    %222 = vector.load %arg3[%c0_140, %c6_141] : memref<16x25xf32, #tpu.memory_space<vmem>>, vector<16x1xf32>
    %223 = vector.shape_cast %222 : vector<16x1xf32> to vector<1x16x1xf32>
    %224 = vector.broadcast %223 : vector<1x16x1xf32> to vector<2x16x256xf32>
    %225 = arith.mulf %221, %224 : vector<2x16x256xf32>
    %226 = arith.addf %220, %225 : vector<2x16x256xf32>
    %c0_142 = arith.constant 0 : index
    %c0_143 = arith.constant 0 : index
    %c127_144 = arith.constant 127 : index
    %227 = vector.load %arg14[%c0_142, %c0_143, %c127_144] : memref<2x16x512xf32, #tpu.memory_space<vmem>>, vector<2x16x256xf32>
    %c0_145 = arith.constant 0 : index
    %c11_146 = arith.constant 11 : index
    %228 = vector.load %arg3[%c0_145, %c11_146] : memref<16x25xf32, #tpu.memory_space<vmem>>, vector<16x1xf32>
    %229 = vector.shape_cast %228 : vector<16x1xf32> to vector<1x16x1xf32>
    %230 = vector.broadcast %229 : vector<1x16x1xf32> to vector<2x16x256xf32>
    %231 = arith.mulf %227, %230 : vector<2x16x256xf32>
    %232 = arith.addf %226, %231 : vector<2x16x256xf32>
    %c0_147 = arith.constant 0 : index
    %c0_148 = arith.constant 0 : index
    %c143_149 = arith.constant 143 : index
    %233 = vector.load %arg14[%c0_147, %c0_148, %c143_149] : memref<2x16x512xf32, #tpu.memory_space<vmem>>, vector<2x16x256xf32>
    %c0_150 = arith.constant 0 : index
    %c16_151 = arith.constant 16 : index
    %234 = vector.load %arg3[%c0_150, %c16_151] : memref<16x25xf32, #tpu.memory_space<vmem>>, vector<16x1xf32>
    %235 = vector.shape_cast %234 : vector<16x1xf32> to vector<1x16x1xf32>
    %236 = vector.broadcast %235 : vector<1x16x1xf32> to vector<2x16x256xf32>
    %237 = arith.mulf %233, %236 : vector<2x16x256xf32>
    %238 = arith.addf %232, %237 : vector<2x16x256xf32>
    %c0_152 = arith.constant 0 : index
    %c0_153 = arith.constant 0 : index
    %c159_154 = arith.constant 159 : index
    %239 = vector.load %arg14[%c0_152, %c0_153, %c159_154] : memref<2x16x512xf32, #tpu.memory_space<vmem>>, vector<2x16x256xf32>
    %c0_155 = arith.constant 0 : index
    %c21_156 = arith.constant 21 : index
    %240 = vector.load %arg3[%c0_155, %c21_156] : memref<16x25xf32, #tpu.memory_space<vmem>>, vector<16x1xf32>
    %241 = vector.shape_cast %240 : vector<16x1xf32> to vector<1x16x1xf32>
    %242 = vector.broadcast %241 : vector<1x16x1xf32> to vector<2x16x256xf32>
    %243 = arith.mulf %239, %242 : vector<2x16x256xf32>
    %244 = arith.addf %238, %243 : vector<2x16x256xf32>
    %c1_157 = arith.constant 1 : index
    %c0_158 = arith.constant 0 : index
    %245 = vector.load %arg5[%c1_157, %c0_158] : memref<5x256xf32, #tpu.memory_space<vmem>>, vector<1x256xf32>
    %246 = vector.shape_cast %245 : vector<1x256xf32> to vector<1x1x256xf32>
    %247 = vector.broadcast %246 : vector<1x1x256xf32> to vector<2x16x256xf32>
    %248 = arith.mulf %244, %247 : vector<2x16x256xf32>
    %249 = arith.addf %215, %248 : vector<2x16x256xf32>
    %c0_159 = arith.constant 0 : index
    %c0_160 = arith.constant 0 : index
    %c96_161 = arith.constant 96 : index
    %250 = vector.load %arg14[%c0_159, %c0_160, %c96_161] : memref<2x16x512xf32, #tpu.memory_space<vmem>>, vector<2x16x256xf32>
    %c0_162 = arith.constant 0 : index
    %c2_163 = arith.constant 2 : index
    %251 = vector.load %arg3[%c0_162, %c2_163] : memref<16x25xf32, #tpu.memory_space<vmem>>, vector<16x1xf32>
    %252 = vector.shape_cast %251 : vector<16x1xf32> to vector<1x16x1xf32>
    %253 = vector.broadcast %252 : vector<1x16x1xf32> to vector<2x16x256xf32>
    %254 = arith.mulf %250, %253 : vector<2x16x256xf32>
    %c0_164 = arith.constant 0 : index
    %c0_165 = arith.constant 0 : index
    %c112_166 = arith.constant 112 : index
    %255 = vector.load %arg14[%c0_164, %c0_165, %c112_166] : memref<2x16x512xf32, #tpu.memory_space<vmem>>, vector<2x16x256xf32>
    %c0_167 = arith.constant 0 : index
    %c7_168 = arith.constant 7 : index
    %256 = vector.load %arg3[%c0_167, %c7_168] : memref<16x25xf32, #tpu.memory_space<vmem>>, vector<16x1xf32>
    %257 = vector.shape_cast %256 : vector<16x1xf32> to vector<1x16x1xf32>
    %258 = vector.broadcast %257 : vector<1x16x1xf32> to vector<2x16x256xf32>
    %259 = arith.mulf %255, %258 : vector<2x16x256xf32>
    %260 = arith.addf %254, %259 : vector<2x16x256xf32>
    %c0_169 = arith.constant 0 : index
    %c0_170 = arith.constant 0 : index
    %c128_171 = arith.constant 128 : index
    %261 = vector.load %arg14[%c0_169, %c0_170, %c128_171] : memref<2x16x512xf32, #tpu.memory_space<vmem>>, vector<2x16x256xf32>
    %c0_172 = arith.constant 0 : index
    %c12_173 = arith.constant 12 : index
    %262 = vector.load %arg3[%c0_172, %c12_173] : memref<16x25xf32, #tpu.memory_space<vmem>>, vector<16x1xf32>
    %263 = vector.shape_cast %262 : vector<16x1xf32> to vector<1x16x1xf32>
    %264 = vector.broadcast %263 : vector<1x16x1xf32> to vector<2x16x256xf32>
    %265 = arith.mulf %261, %264 : vector<2x16x256xf32>
    %266 = arith.addf %260, %265 : vector<2x16x256xf32>
    %c0_174 = arith.constant 0 : index
    %c0_175 = arith.constant 0 : index
    %c144_176 = arith.constant 144 : index
    %267 = vector.load %arg14[%c0_174, %c0_175, %c144_176] : memref<2x16x512xf32, #tpu.memory_space<vmem>>, vector<2x16x256xf32>
    %c0_177 = arith.constant 0 : index
    %c17_178 = arith.constant 17 : index
    %268 = vector.load %arg3[%c0_177, %c17_178] : memref<16x25xf32, #tpu.memory_space<vmem>>, vector<16x1xf32>
    %269 = vector.shape_cast %268 : vector<16x1xf32> to vector<1x16x1xf32>
    %270 = vector.broadcast %269 : vector<1x16x1xf32> to vector<2x16x256xf32>
    %271 = arith.mulf %267, %270 : vector<2x16x256xf32>
    %272 = arith.addf %266, %271 : vector<2x16x256xf32>
    %c0_179 = arith.constant 0 : index
    %c0_180 = arith.constant 0 : index
    %c160_181 = arith.constant 160 : index
    %273 = vector.load %arg14[%c0_179, %c0_180, %c160_181] : memref<2x16x512xf32, #tpu.memory_space<vmem>>, vector<2x16x256xf32>
    %c0_182 = arith.constant 0 : index
    %c22_183 = arith.constant 22 : index
    %274 = vector.load %arg3[%c0_182, %c22_183] : memref<16x25xf32, #tpu.memory_space<vmem>>, vector<16x1xf32>
    %275 = vector.shape_cast %274 : vector<16x1xf32> to vector<1x16x1xf32>
    %276 = vector.broadcast %275 : vector<1x16x1xf32> to vector<2x16x256xf32>
    %277 = arith.mulf %273, %276 : vector<2x16x256xf32>
    %278 = arith.addf %272, %277 : vector<2x16x256xf32>
    %279 = arith.addf %249, %278 : vector<2x16x256xf32>
    %c0_184 = arith.constant 0 : index
    %c0_185 = arith.constant 0 : index
    %c97_186 = arith.constant 97 : index
    %280 = vector.load %arg14[%c0_184, %c0_185, %c97_186] : memref<2x16x512xf32, #tpu.memory_space<vmem>>, vector<2x16x256xf32>
    %c0_187 = arith.constant 0 : index
    %c3_188 = arith.constant 3 : index
    %281 = vector.load %arg3[%c0_187, %c3_188] : memref<16x25xf32, #tpu.memory_space<vmem>>, vector<16x1xf32>
    %282 = vector.shape_cast %281 : vector<16x1xf32> to vector<1x16x1xf32>
    %283 = vector.broadcast %282 : vector<1x16x1xf32> to vector<2x16x256xf32>
    %284 = arith.mulf %280, %283 : vector<2x16x256xf32>
    %c0_189 = arith.constant 0 : index
    %c0_190 = arith.constant 0 : index
    %c113_191 = arith.constant 113 : index
    %285 = vector.load %arg14[%c0_189, %c0_190, %c113_191] : memref<2x16x512xf32, #tpu.memory_space<vmem>>, vector<2x16x256xf32>
    %c0_192 = arith.constant 0 : index
    %c8_193 = arith.constant 8 : index
    %286 = vector.load %arg3[%c0_192, %c8_193] : memref<16x25xf32, #tpu.memory_space<vmem>>, vector<16x1xf32>
    %287 = vector.shape_cast %286 : vector<16x1xf32> to vector<1x16x1xf32>
    %288 = vector.broadcast %287 : vector<1x16x1xf32> to vector<2x16x256xf32>
    %289 = arith.mulf %285, %288 : vector<2x16x256xf32>
    %290 = arith.addf %284, %289 : vector<2x16x256xf32>
    %c0_194 = arith.constant 0 : index
    %c0_195 = arith.constant 0 : index
    %c129_196 = arith.constant 129 : index
    %291 = vector.load %arg14[%c0_194, %c0_195, %c129_196] : memref<2x16x512xf32, #tpu.memory_space<vmem>>, vector<2x16x256xf32>
    %c0_197 = arith.constant 0 : index
    %c13_198 = arith.constant 13 : index
    %292 = vector.load %arg3[%c0_197, %c13_198] : memref<16x25xf32, #tpu.memory_space<vmem>>, vector<16x1xf32>
    %293 = vector.shape_cast %292 : vector<16x1xf32> to vector<1x16x1xf32>
    %294 = vector.broadcast %293 : vector<1x16x1xf32> to vector<2x16x256xf32>
    %295 = arith.mulf %291, %294 : vector<2x16x256xf32>
    %296 = arith.addf %290, %295 : vector<2x16x256xf32>
    %c0_199 = arith.constant 0 : index
    %c0_200 = arith.constant 0 : index
    %c145_201 = arith.constant 145 : index
    %297 = vector.load %arg14[%c0_199, %c0_200, %c145_201] : memref<2x16x512xf32, #tpu.memory_space<vmem>>, vector<2x16x256xf32>
    %c0_202 = arith.constant 0 : index
    %c18_203 = arith.constant 18 : index
    %298 = vector.load %arg3[%c0_202, %c18_203] : memref<16x25xf32, #tpu.memory_space<vmem>>, vector<16x1xf32>
    %299 = vector.shape_cast %298 : vector<16x1xf32> to vector<1x16x1xf32>
    %300 = vector.broadcast %299 : vector<1x16x1xf32> to vector<2x16x256xf32>
    %301 = arith.mulf %297, %300 : vector<2x16x256xf32>
    %302 = arith.addf %296, %301 : vector<2x16x256xf32>
    %c0_204 = arith.constant 0 : index
    %c0_205 = arith.constant 0 : index
    %c161_206 = arith.constant 161 : index
    %303 = vector.load %arg14[%c0_204, %c0_205, %c161_206] : memref<2x16x512xf32, #tpu.memory_space<vmem>>, vector<2x16x256xf32>
    %c0_207 = arith.constant 0 : index
    %c23_208 = arith.constant 23 : index
    %304 = vector.load %arg3[%c0_207, %c23_208] : memref<16x25xf32, #tpu.memory_space<vmem>>, vector<16x1xf32>
    %305 = vector.shape_cast %304 : vector<16x1xf32> to vector<1x16x1xf32>
    %306 = vector.broadcast %305 : vector<1x16x1xf32> to vector<2x16x256xf32>
    %307 = arith.mulf %303, %306 : vector<2x16x256xf32>
    %308 = arith.addf %302, %307 : vector<2x16x256xf32>
    %c3_209 = arith.constant 3 : index
    %c0_210 = arith.constant 0 : index
    %309 = vector.load %arg5[%c3_209, %c0_210] : memref<5x256xf32, #tpu.memory_space<vmem>>, vector<1x256xf32>
    %310 = vector.shape_cast %309 : vector<1x256xf32> to vector<1x1x256xf32>
    %311 = vector.broadcast %310 : vector<1x1x256xf32> to vector<2x16x256xf32>
    %312 = arith.mulf %308, %311 : vector<2x16x256xf32>
    %313 = arith.addf %279, %312 : vector<2x16x256xf32>
    %c0_211 = arith.constant 0 : index
    %c0_212 = arith.constant 0 : index
    %c98_213 = arith.constant 98 : index
    %314 = vector.load %arg14[%c0_211, %c0_212, %c98_213] : memref<2x16x512xf32, #tpu.memory_space<vmem>>, vector<2x16x256xf32>
    %c0_214 = arith.constant 0 : index
    %c4_215 = arith.constant 4 : index
    %315 = vector.load %arg3[%c0_214, %c4_215] : memref<16x25xf32, #tpu.memory_space<vmem>>, vector<16x1xf32>
    %316 = vector.shape_cast %315 : vector<16x1xf32> to vector<1x16x1xf32>
    %317 = vector.broadcast %316 : vector<1x16x1xf32> to vector<2x16x256xf32>
    %318 = arith.mulf %314, %317 : vector<2x16x256xf32>
    %c0_216 = arith.constant 0 : index
    %c0_217 = arith.constant 0 : index
    %c114_218 = arith.constant 114 : index
    %319 = vector.load %arg14[%c0_216, %c0_217, %c114_218] : memref<2x16x512xf32, #tpu.memory_space<vmem>>, vector<2x16x256xf32>
    %c0_219 = arith.constant 0 : index
    %c9_220 = arith.constant 9 : index
    %320 = vector.load %arg3[%c0_219, %c9_220] : memref<16x25xf32, #tpu.memory_space<vmem>>, vector<16x1xf32>
    %321 = vector.shape_cast %320 : vector<16x1xf32> to vector<1x16x1xf32>
    %322 = vector.broadcast %321 : vector<1x16x1xf32> to vector<2x16x256xf32>
    %323 = arith.mulf %319, %322 : vector<2x16x256xf32>
    %324 = arith.addf %318, %323 : vector<2x16x256xf32>
    %c0_221 = arith.constant 0 : index
    %c0_222 = arith.constant 0 : index
    %c130_223 = arith.constant 130 : index
    %325 = vector.load %arg14[%c0_221, %c0_222, %c130_223] : memref<2x16x512xf32, #tpu.memory_space<vmem>>, vector<2x16x256xf32>
    %c0_224 = arith.constant 0 : index
    %c14_225 = arith.constant 14 : index
    %326 = vector.load %arg3[%c0_224, %c14_225] : memref<16x25xf32, #tpu.memory_space<vmem>>, vector<16x1xf32>
    %327 = vector.shape_cast %326 : vector<16x1xf32> to vector<1x16x1xf32>
    %328 = vector.broadcast %327 : vector<1x16x1xf32> to vector<2x16x256xf32>
    %329 = arith.mulf %325, %328 : vector<2x16x256xf32>
    %330 = arith.addf %324, %329 : vector<2x16x256xf32>
    %c0_226 = arith.constant 0 : index
    %c0_227 = arith.constant 0 : index
    %c146_228 = arith.constant 146 : index
    %331 = vector.load %arg14[%c0_226, %c0_227, %c146_228] : memref<2x16x512xf32, #tpu.memory_space<vmem>>, vector<2x16x256xf32>
    %c0_229 = arith.constant 0 : index
    %c19_230 = arith.constant 19 : index
    %332 = vector.load %arg3[%c0_229, %c19_230] : memref<16x25xf32, #tpu.memory_space<vmem>>, vector<16x1xf32>
    %333 = vector.shape_cast %332 : vector<16x1xf32> to vector<1x16x1xf32>
    %334 = vector.broadcast %333 : vector<1x16x1xf32> to vector<2x16x256xf32>
    %335 = arith.mulf %331, %334 : vector<2x16x256xf32>
    %336 = arith.addf %330, %335 : vector<2x16x256xf32>
    %c0_231 = arith.constant 0 : index
    %c0_232 = arith.constant 0 : index
    %c162_233 = arith.constant 162 : index
    %337 = vector.load %arg14[%c0_231, %c0_232, %c162_233] : memref<2x16x512xf32, #tpu.memory_space<vmem>>, vector<2x16x256xf32>
    %c0_234 = arith.constant 0 : index
    %c24_235 = arith.constant 24 : index
    %338 = vector.load %arg3[%c0_234, %c24_235] : memref<16x25xf32, #tpu.memory_space<vmem>>, vector<16x1xf32>
    %339 = vector.shape_cast %338 : vector<16x1xf32> to vector<1x16x1xf32>
    %340 = vector.broadcast %339 : vector<1x16x1xf32> to vector<2x16x256xf32>
    %341 = arith.mulf %337, %340 : vector<2x16x256xf32>
    %342 = arith.addf %336, %341 : vector<2x16x256xf32>
    %c4_236 = arith.constant 4 : index
    %c0_237 = arith.constant 0 : index
    %343 = vector.load %arg5[%c4_236, %c0_237] : memref<5x256xf32, #tpu.memory_space<vmem>>, vector<1x256xf32>
    %344 = vector.shape_cast %343 : vector<1x256xf32> to vector<1x1x256xf32>
    %345 = vector.broadcast %344 : vector<1x1x256xf32> to vector<2x16x256xf32>
    %346 = arith.mulf %342, %345 : vector<2x16x256xf32>
    %347 = arith.addf %313, %346 : vector<2x16x256xf32>
    %cst_238 = arith.constant 0.000000e+00 : f32
    %348 = vector.broadcast %cst_238 : f32 to vector<2x16x256xf32>
    %349 = arith.maximumf %347, %348 : vector<2x16x256xf32>
    %350 = arith.addf %349, %5 : vector<2x16x256xf32>
    %c0_239 = arith.constant 0 : index
    %c0_240 = arith.constant 0 : index
    %351 = vector.load %arg7[%c0_239, %c0_240] : memref<2x16xf32, #tpu.memory_space<vmem>>, vector<2x16xf32>
    %c0_241 = arith.constant 0 : index
    %c0_242 = arith.constant 0 : index
    %352 = vector.load %arg8[%c0_241, %c0_242] : memref<2x1xf32, #tpu.memory_space<vmem>>, vector<2x1xf32>
    %c0_243 = arith.constant 0 : index
    %c0_244 = arith.constant 0 : index
    %353 = vector.load %arg9[%c0_243, %c0_244] : memref<16x2xf32, #tpu.memory_space<vmem>>, vector<16x2xf32>
    %c0_245 = arith.constant 0 : index
    %c0_246 = arith.constant 0 : index
    %354 = vector.load %arg10[%c0_245, %c0_246] : memref<16x1xf32, #tpu.memory_space<vmem>>, vector<16x1xf32>
    %cst_247 = arith.constant 0.000000e+00 : f32
    %355 = vector.broadcast %cst_247 : f32 to vector<16x1xf32>
    %356 = vector.extract_strided_slice %350 {offsets = [0, 0, 0], sizes = [1, 16, 256], strides = [1, 1, 1]} : vector<2x16x256xf32> to vector<1x16x256xf32>
    %357 = vector.shape_cast %356 : vector<1x16x256xf32> to vector<16x256xf32>
    %358 = vector.broadcast %0 : vector<1x256xf32> to vector<16x256xf32>
    %359 = arith.mulf %357, %358 : vector<16x256xf32>
    %cst_248 = arith.constant dense<0.000000e+00> : vector<16xf32>
    %360 = vector.multi_reduction <add>, %359, %cst_248 [1] : vector<16x256xf32> to vector<16xf32>
    %361 = vector.shape_cast %360 : vector<16xf32> to vector<16x1xf32>
    %cst_249 = arith.constant dense<0.000000e+00> : vector<2x1xf32>
    %362 = tpu.matmul %351, %361, %cst_249 {dimension_numbers = #tpu.dot_dimension_numbers<[1], [0], [0], [1], [0, 0, 1, 1], [], []>} : vector<2x16xf32>, vector<16x1xf32>, vector<2x1xf32> -> vector<2x1xf32>
    %363 = arith.addf %362, %352 : vector<2x1xf32>
    %cst_250 = arith.constant 0.000000e+00 : f32
    %364 = vector.broadcast %cst_250 : f32 to vector<2x1xf32>
    %365 = arith.maximumf %363, %364 : vector<2x1xf32>
    %cst_251 = arith.constant dense<0.000000e+00> : vector<16x1xf32>
    %366 = tpu.matmul %353, %365, %cst_251 {dimension_numbers = #tpu.dot_dimension_numbers<[1], [0], [0], [1], [0, 0, 1, 1], [], []>} : vector<16x2xf32>, vector<2x1xf32>, vector<16x1xf32> -> vector<16x1xf32>
    %367 = arith.addf %366, %354 : vector<16x1xf32>
    %368 = arith.negf %367 : vector<16x1xf32>
    %369 = math.exp %368 : vector<16x1xf32>
    %cst_252 = arith.constant 1.000000e+00 : f32
    %370 = vector.broadcast %cst_252 : f32 to vector<16x1xf32>
    %371 = arith.addf %370, %369 : vector<16x1xf32>
    %372 = arith.divf %370, %371 : vector<16x1xf32>
    %cst_253 = arith.constant 1.000000e+00 : f32
    %373 = vector.broadcast %cst_253 : f32 to vector<16x1xf32>
    %374 = arith.addf %373, %372 : vector<16x1xf32>
    %375 = vector.broadcast %374 : vector<16x1xf32> to vector<16x256xf32>
    %376 = arith.mulf %357, %375 : vector<16x256xf32>
    %cst_254 = arith.constant dense<0.000000e+00> : vector<16xf32>
    %377 = vector.multi_reduction <add>, %376, %cst_254 [1] : vector<16x256xf32> to vector<16xf32>
    %378 = vector.shape_cast %377 : vector<16xf32> to vector<16x1xf32>
    %379 = arith.addf %355, %378 : vector<16x1xf32>
    %380 = vector.extract_strided_slice %350 {offsets = [1, 0, 0], sizes = [1, 16, 256], strides = [1, 1, 1]} : vector<2x16x256xf32> to vector<1x16x256xf32>
    %381 = vector.shape_cast %380 : vector<1x16x256xf32> to vector<16x256xf32>
    %382 = vector.broadcast %0 : vector<1x256xf32> to vector<16x256xf32>
    %383 = arith.mulf %381, %382 : vector<16x256xf32>
    %cst_255 = arith.constant dense<0.000000e+00> : vector<16xf32>
    %384 = vector.multi_reduction <add>, %383, %cst_255 [1] : vector<16x256xf32> to vector<16xf32>
    %385 = vector.shape_cast %384 : vector<16xf32> to vector<16x1xf32>
    %cst_256 = arith.constant dense<0.000000e+00> : vector<2x1xf32>
    %386 = tpu.matmul %351, %385, %cst_256 {dimension_numbers = #tpu.dot_dimension_numbers<[1], [0], [0], [1], [0, 0, 1, 1], [], []>} : vector<2x16xf32>, vector<16x1xf32>, vector<2x1xf32> -> vector<2x1xf32>
    %387 = arith.addf %386, %352 : vector<2x1xf32>
    %cst_257 = arith.constant 0.000000e+00 : f32
    %388 = vector.broadcast %cst_257 : f32 to vector<2x1xf32>
    %389 = arith.maximumf %387, %388 : vector<2x1xf32>
    %cst_258 = arith.constant dense<0.000000e+00> : vector<16x1xf32>
    %390 = tpu.matmul %353, %389, %cst_258 {dimension_numbers = #tpu.dot_dimension_numbers<[1], [0], [0], [1], [0, 0, 1, 1], [], []>} : vector<16x2xf32>, vector<2x1xf32>, vector<16x1xf32> -> vector<16x1xf32>
    %391 = arith.addf %390, %354 : vector<16x1xf32>
    %392 = arith.negf %391 : vector<16x1xf32>
    %393 = math.exp %392 : vector<16x1xf32>
    %cst_259 = arith.constant 1.000000e+00 : f32
    %394 = vector.broadcast %cst_259 : f32 to vector<16x1xf32>
    %395 = arith.addf %394, %393 : vector<16x1xf32>
    %396 = arith.divf %394, %395 : vector<16x1xf32>
    %cst_260 = arith.constant 1.000000e+00 : f32
    %397 = vector.broadcast %cst_260 : f32 to vector<16x1xf32>
    %398 = arith.addf %397, %396 : vector<16x1xf32>
    %399 = vector.broadcast %398 : vector<16x1xf32> to vector<16x256xf32>
    %400 = arith.mulf %381, %399 : vector<16x256xf32>
    %cst_261 = arith.constant dense<0.000000e+00> : vector<16xf32>
    %401 = vector.multi_reduction <add>, %400, %cst_261 [1] : vector<16x256xf32> to vector<16xf32>
    %402 = vector.shape_cast %401 : vector<16xf32> to vector<16x1xf32>
    %403 = arith.addf %379, %402 : vector<16x1xf32>
    %cst_262 = arith.constant 0.001953125 : f32
    %404 = vector.broadcast %cst_262 : f32 to vector<16x1xf32>
    %405 = arith.mulf %403, %404 : vector<16x1xf32>
    %cst_263 = arith.constant 0.000000e+00 : f32
    %406 = vector.broadcast %cst_263 : f32 to vector<16x1xf32>
    %407 = vector.broadcast %405 : vector<16x1xf32> to vector<16x256xf32>
    %408 = arith.subf %376, %407 : vector<16x256xf32>
    %409 = arith.mulf %408, %408 : vector<16x256xf32>
    %cst_264 = arith.constant dense<0.000000e+00> : vector<16xf32>
    %410 = vector.multi_reduction <add>, %409, %cst_264 [1] : vector<16x256xf32> to vector<16xf32>
    %411 = vector.shape_cast %410 : vector<16xf32> to vector<16x1xf32>
    %412 = arith.addf %406, %411 : vector<16x1xf32>
    %413 = vector.broadcast %405 : vector<16x1xf32> to vector<16x256xf32>
    %414 = arith.subf %400, %413 : vector<16x256xf32>
    %415 = arith.mulf %414, %414 : vector<16x256xf32>
    %cst_265 = arith.constant dense<0.000000e+00> : vector<16xf32>
    %416 = vector.multi_reduction <add>, %415, %cst_265 [1] : vector<16x256xf32> to vector<16xf32>
    %417 = vector.shape_cast %416 : vector<16xf32> to vector<16x1xf32>
    %418 = arith.addf %412, %417 : vector<16x1xf32>
    %cst_266 = arith.constant 0.001953125 : f32
    %419 = vector.broadcast %cst_266 : f32 to vector<16x1xf32>
    %420 = arith.mulf %418, %419 : vector<16x1xf32>
    %c0_267 = arith.constant 0 : index
    %c0_268 = arith.constant 0 : index
    %421 = vector.load %arg11[%c0_267, %c0_268] : memref<16x1xf32, #tpu.memory_space<vmem>>, vector<16x1xf32>
    %cst_269 = arith.constant 9.99999974E-6 : f32
    %422 = vector.broadcast %cst_269 : f32 to vector<16x1xf32>
    %423 = arith.addf %420, %422 : vector<16x1xf32>
    %424 = math.rsqrt %423 : vector<16x1xf32>
    %425 = arith.mulf %421, %424 : vector<16x1xf32>
    %c0_270 = arith.constant 0 : index
    %c0_271 = arith.constant 0 : index
    %426 = vector.load %arg12[%c0_270, %c0_271] : memref<16x1xf32, #tpu.memory_space<vmem>>, vector<16x1xf32>
    %427 = arith.mulf %405, %425 : vector<16x1xf32>
    %428 = arith.subf %426, %427 : vector<16x1xf32>
    %429 = vector.broadcast %425 : vector<16x1xf32> to vector<16x256xf32>
    %430 = arith.mulf %376, %429 : vector<16x256xf32>
    %431 = vector.broadcast %428 : vector<16x1xf32> to vector<16x256xf32>
    %432 = arith.addf %430, %431 : vector<16x256xf32>
    %433 = arith.negf %432 : vector<16x256xf32>
    %434 = math.exp %433 : vector<16x256xf32>
    %cst_272 = arith.constant 1.000000e+00 : f32
    %435 = vector.broadcast %cst_272 : f32 to vector<16x256xf32>
    %436 = arith.addf %435, %434 : vector<16x256xf32>
    %437 = arith.divf %435, %436 : vector<16x256xf32>
    %c0_273 = arith.constant 0 : index
    %c0_274 = arith.constant 0 : index
    %c0_275 = arith.constant 0 : index
    %438 = vector.load %arg13[%c0_273, %c0_274, %c0_275] : memref<2x16x256xf32, #tpu.memory_space<vmem>>, vector<1x16x256xf32>
    %439 = vector.shape_cast %438 : vector<1x16x256xf32> to vector<16x256xf32>
    %440 = vector.shape_cast %437 : vector<16x256xf32> to vector<1x16x256xf32>
    tpu.vector_store %arg13[%c0_273, %c0_274, %c0_275], %440 {strides = array<i32>} : memref<2x16x256xf32, #tpu.memory_space<vmem>>, vector<1x16x256xf32>,
    %441 = vector.broadcast %425 : vector<16x1xf32> to vector<16x256xf32>
    %442 = arith.mulf %400, %441 : vector<16x256xf32>
    %443 = vector.broadcast %428 : vector<16x1xf32> to vector<16x256xf32>
    %444 = arith.addf %442, %443 : vector<16x256xf32>
    %445 = arith.negf %444 : vector<16x256xf32>
    %446 = math.exp %445 : vector<16x256xf32>
    %cst_276 = arith.constant 1.000000e+00 : f32
    %447 = vector.broadcast %cst_276 : f32 to vector<16x256xf32>
    %448 = arith.addf %447, %446 : vector<16x256xf32>
    %449 = arith.divf %447, %448 : vector<16x256xf32>
    %c1_277 = arith.constant 1 : index
    %c0_278 = arith.constant 0 : index
    %c0_279 = arith.constant 0 : index
    %450 = vector.load %arg13[%c1_277, %c0_278, %c0_279] : memref<2x16x256xf32, #tpu.memory_space<vmem>>, vector<1x16x256xf32>
    %451 = vector.shape_cast %450 : vector<1x16x256xf32> to vector<16x256xf32>
    %452 = vector.shape_cast %449 : vector<16x256xf32> to vector<1x16x256xf32>
    tpu.vector_store %arg13[%c1_277, %c0_278, %c0_279], %452 {strides = array<i32>} : memref<2x16x256xf32, #tpu.memory_space<vmem>>, vector<1x16x256xf32>,
    return
  }
}

</mosaic_0001>

<bundles_post_ra>
// kernel: feature_enhance_block.1
= control target key start
LH: loop header
LB: loop body
LE: loop exit
PB: predicated region body
PF: predicated region fallthrough
CT: control target
= control target key end

     0   :  { %v10640_v0 = vmov 5   ;;  %v10644_v1 = vmov 0   ;;  %v10642_v6 = vmov 10   ;;  %v10636_v7 = vmov 15   ;;  %s5857_s19 = smov 112   ;;  %s5858_s15 = smov 96   ;;  %s10618_s2 = inlined_call_operand.vmem [shape: f32[16,1], index: 2, kind: input, shape index: {}]   ;;  %s10619_s1 = inlined_call_operand.vmem [shape: f32[16,25], index: 1, kind: input, shape index: {}]   ;;  %s10620_s0 = inlined_call_operand.vmem [shape: f32[2,16,256], index: 0, kind: input, shape index: {}]   ;;  %s10621_s5 = inlined_call_operand.vmem [shape: f32[5,256], index: 5, kind: input, shape index: {}]   ;;  %s10622_s3 = inlined_call_operand.vmem [shape: f32[16,25], index: 3, kind: input, shape index: {}]   ;;  %s10623_s4 = inlined_call_operand.vmem [shape: f32[16,1], index: 4, kind: input, shape index: {}]   ;;  %s10624_s6 = inlined_call_operand.vmem [shape: f32[1,256], index: 6, kind: input, shape index: {}]   ;;  %s10625_s7 = inlined_call_operand.vmem [shape: f32[2,16], index: 7, kind: input, shape index: {}]   ;;  %s10626_s8 = inlined_call_operand.vmem [shape: f32[2,1], index: 8, kind: input, shape index: {}]   ;;  %s10627_s9 = inlined_call_operand.vmem [shape: f32[16,2], index: 9, kind: input, shape index: {}]   ;;  %s10628_s10 = inlined_call_operand.vmem [shape: f32[16,1], index: 10, kind: input, shape index: {}]   ;;  %s10629_s11 = inlined_call_operand.vmem [shape: f32[16,1], index: 11, kind: input, shape index: {}]   ;;  %s10630_s12 = inlined_call_operand.vmem [shape: f32[16,1], index: 12, kind: input, shape index: {}]   ;;  %s10631_s13 = inlined_call_operand.vmem [shape: f32[2,16,256], index: 13, kind: output, shape index: {}]  }
   0x1   :  { %5659 = vset.pattern.permute.xlu2 %v10640_v0  ;;  %5658 = vset.pattern.permute.xlu1 %v10644_v1  ;;  %v69_v2 = vld [vmem:[%s10618_s2] sm:$0xff]  ;;  %v5977_v4 = vld [vmem:[%s10619_s1 + $0x8] sm:$0xff]  ;;  %v6010_v14 = vld [vmem:[%s10620_s0 + $0x18] sm:$0xff]  ;;  %v10634_v39 = vmov 20   ;;  %s5861_s16 = smov 64   ;;  %s5864_s20 = smov 94  }
   0x2   :  { %v5969_v3 = vld [vmem:[%s10619_s1] sm:$0xff]  ;;  %5657 = vset.pattern.permute.xlu0 %v10644_v1  ;;  %10871 = vst [vmem:[#allocation4_spill] sm:$0xff] %v5977_v4  ;;  %v70_v5 = vld [vmem:[%s10618_s2 + $0x8] sm:$0xff]  ;;  %v6015_v15 = vld [vmem:[%s10620_s0 + $0x10] sm:$0xff]  ;;  %s5860_s2 = smov 80   ;;  %v10650_v0 = vmov 11  }
   0x3   :  { %10870 = vst [vmem:[#allocation3_spill] sm:$0xff] %v5969_v3  ;;  %118 = vperm.xlu2 %5659, %v5969_v3   ;;  %73 = vperm.xlu0 %5657, %v69_v2   ;;  %v5995_v8 = vld [vmem:[%s10620_s0 + $0x8] sm:$0xff]  ;;  %v6000_v9 = vld [vmem:[%s10620_s0] sm:$0xff]  ;;  %v6040_v24 = vld [vmem:[%s10620_s0 + $0x38] sm:$0xff]  ;;  %s5868_s23 = smov 95   ;;  %vm173_vm0 = vcmask 916480  }
   0x4   :  { %97 = vperm.xlu1 %5658, %v5969_v3   ;;  %10872 = vst [vmem:[#allocation5_spill] sm:$0xff] %v5995_v8  ;;  %v6025_v20 = vld [vmem:[%s10620_s0 + $0x28] sm:$0xff]  ;;  %v6030_v21 = vld [vmem:[%s10620_s0 + $0x20] sm:$0xff]  ;;  %v6045_v25 = vld [vmem:[%s10620_s0 + $0x30] sm:$0xff]  ;;  %vm262_vm1 = vcmask 785408   ;;  %vm363_vm2 = vcmask 654336  }
   0x5   :  { %10873 = vst [vmem:[#allocation6_spill] sm:$0xff] %v6000_v9  ;;  %vm452_vm3 = vcmask 523264   ;;  %vm903_vm4 = vcmask 777216   ;;  %s5870_s24 = smov 127   ;;  %s5875_s21 = smov 126   ;;  %vm1791_vm5 = vcmask 793600  }
   0x6   :  { %10874 = vst [vmem:[#allocation7_spill] sm:$0xff] %v6010_v14  ;;  %s5881_s26 = smov 97   ;;  %s5883_s27 = smov 125   ;;  %vm2258_vm6 = vcmask 801792   ;;  %vm493_vm7 = vcmask 769024   ;;  %vm956_vm8 = vcmask 1039360  }
   0x7   :  { %s5889_s17 = smov 124   ;;  %vm1377_vm9 = vcmask 1031168   ;;  %vm1844_vm10 = vcmask 1022976   ;;  %vm2311_vm11 = vcmask 1014784   ;;  %s5890_s18 = smov 34   ;;  %vm2392_vm12 = vcmask 277504  }
   0x8   :  { %vm4796_vm13 = vcmask 130048   ;;  %vm4828_vm14 = vcmask 1041408   ;;  %vm4821_vm15 = vcmask 15360  }
   0xb   :  { %122 = vperm.xlu2 %5659, %v5977_v4   ;;  %78 = vperm.xlu0 %5657, %v70_v5  }
   0xc   :  { %102 = vperm.xlu1 %5658, %v5977_v4  }
  0x13   :  { %5660 = vset.pattern.permute.xlu0 %v10642_v6 }
  0x14   :  { %5661 = vset.pattern.permute.xlu1 %v10642_v6  ;;  %207 = vperm.xlu0 %5660, %v5969_v3  }
  0x15   :  { %211 = vperm.xlu1 %5661, %v5977_v4  }
  0x1c   :  { %5662 = vset.pattern.permute.xlu0 %v10636_v7 }
  0x1d   :  { %5663 = vset.pattern.permute.xlu1 %v10636_v7  ;;  %308 = vperm.xlu0 %5662, %v5969_v3  }
  0x1e   :  { %312 = vperm.xlu1 %5663, %v5977_v4  }
  0x25   :  { %5664 = vset.pattern.permute.xlu0 %v10634_v39 }
  0x26   :  { %5665 = vset.pattern.permute.xlu1 %v10634_v39 }
  0x5d   :  { %v119_v10 = vpop.permute.xlu2 %118 }
  0x5e   :  { %v125_v11 = vmul.f32 0.0, %v119_v10  ;;  %v127_v12 = vmul.f32 %v119_v10, %v5995_v8  ;;  %v126_v13 = vmul.f32 %v119_v10, %v6000_v9  ;;  %v133_v22 = vmul.f32 %v119_v10, %v6025_v20 }
  0x5f   :  { %v132_v23 = vmul.f32 %v119_v10, %v6030_v21 }
  0x60   :  { %149 = vrot.lane.b32.xlu0 %v125_v11, %s5857_s19  ;;  %153 = vrot.lane.b32.xlu2 %v127_v12, %s5857_s19 }
  0x61   :  { %151 = vrot.lane.b32.xlu1 %v126_v13, %s5857_s19 }
  0x65   :  { %v123_v16 = vpop.permute.xlu2 %122 }
  0x66   :  { %v128_v17 = vmul.f32 0.0, %v123_v16  ;;  %v130_v18 = vmul.f32 %v123_v16, %v6010_v14  ;;  %v129_v19 = vmul.f32 %v123_v16, %v6015_v15  ;;  %v136_v28 = vmul.f32 %v123_v16, %v6040_v24 }
  0x67   :  { %v135_v29 = vmul.f32 %v123_v16, %v6045_v25 }
  0x68   :  { %155 = vrot.lane.b32.xlu0 %v128_v17, %s5857_s19  ;;  %159 = vrot.lane.b32.xlu2 %v130_v18, %s5857_s19 }
  0x69   :  { %157 = vrot.lane.b32.xlu1 %v129_v19, %s5857_s19 }
  0x70   :  { %161 = vrot.lane.b32.xlu0 %v125_v11, %s5857_s19  ;;  %165 = vrot.lane.b32.xlu2 %v133_v22, %s5857_s19 }
  0x71   :  { %163 = vrot.lane.b32.xlu1 %v132_v23, %s5857_s19 }
  0x75   :  { %v6047_v26 = vpop.permute.xlu0 %73 }
  0x76   :  { %10875 = vst [vmem:[#allocation8_spill] sm:$0xff] %v6047_v26  ;;  %v6049_v27 = vpop.permute.xlu1 %97 }
  0x77   :  { %10876 = vst [vmem:[#allocation9_spill] sm:$0xff] %v6049_v27 }
  0x78   :  { %167 = vrot.lane.b32.xlu0 %v128_v17, %s5857_s19  ;;  %171 = vrot.lane.b32.xlu2 %v136_v28, %s5857_s19 }
  0x79   :  { %169 = vrot.lane.b32.xlu1 %v135_v29, %s5857_s19 }
  0x7d   :  { %v6056_v30 = vpop.permute.xlu0 %78 }
  0x7e   :  { %10877 = vst [vmem:[#allocation10_spill] sm:$0xff] %v6056_v30  ;;  %v6058_v31 = vpop.permute.xlu1 %102 }
  0x7f   :  { %10878 = vst [vmem:[#allocation11_spill] sm:$0xff] %v6058_v31 }
  0x86   :  { %v208_v32 = vpop.permute.xlu0 %207 }
  0x87   :  { %v212_v33 = vpop.permute.xlu1 %211  ;;  %v214_v35 = vmul.f32 0.0, %v208_v32  ;;  %v215_v36 = vmul.f32 %v208_v32, %v6000_v9  ;;  %v216_v38 = vmul.f32 %v208_v32, %v5995_v8  ;;  %v221_v41 = vmul.f32 %v208_v32, %v6030_v21 }
  0x88   :  { %v217_v34 = vmul.f32 0.0, %v212_v33  ;;  %v218_v37 = vmul.f32 %v212_v33, %v6015_v15  ;;  %v219_v40 = vmul.f32 %v212_v33, %v6010_v14  ;;  %v222_v44 = vmul.f32 %v208_v32, %v6025_v20 }
  0x89   :  { %238 = vrot.lane.b32.xlu2 %v214_v35, %s5858_s15  ;;  %240 = vrot.lane.b32.xlu1 %v215_v36, %s5858_s15  ;;  %v224_v45 = vmul.f32 %v212_v33, %v6045_v25  ;;  %v225_v49 = vmul.f32 %v212_v33, %v6040_v24 }
  0x8a   :  { %244 = vrot.lane.b32.xlu0 %v217_v34, %s5858_s15 }
  0x8f   :  { %v309_v46 = vpop.permute.xlu0 %308 }
  0x90   :  { %v313_v42 = vpop.permute.xlu1 %312  ;;  %v321_v47 = vmul.f32 %v309_v46, %v6030_v21  ;;  %v316_v48 = vmul.f32 %v309_v46, %v5995_v8  ;;  %v315_v51 = vmul.f32 %v309_v46, %v6000_v9  ;;  %v317_v53 = vmul.f32 0.0, %v309_v46 }
  0x91   :  { %242 = vrot.lane.b32.xlu2 %v216_v38, %s5858_s15  ;;  %246 = vrot.lane.b32.xlu1 %v218_v37, %s5858_s15  ;;  %v318_v43 = vmul.f32 %v313_v42, %v6015_v15  ;;  %v324_v50 = vmul.f32 %v313_v42, %v6045_v25  ;;  %v319_v52 = vmul.f32 %v313_v42, %v6010_v14  ;;  %v320_v55 = vmul.f32 0.0, %v313_v42 }
  0x92   :  { %250 = vrot.lane.b32.xlu0 %v214_v35, %s5858_s15  ;;  %v322_v54 = vmul.f32 %v309_v46, %v6025_v20  ;;  %v325_v56 = vmul.f32 %v313_v42, %v6040_v24  ;;  %v10632_v42 = vmov 6  }
  0x99   :  { %248 = vrot.lane.b32.xlu2 %v219_v40, %s5858_s15  ;;  %252 = vrot.lane.b32.xlu1 %v221_v41, %s5858_s15 }
  0x9a   :  { %256 = vrot.lane.b32.xlu0 %v217_v34, %s5858_s15 }
  0xa1   :  { %254 = vrot.lane.b32.xlu2 %v222_v44, %s5858_s15  ;;  %258 = vrot.lane.b32.xlu1 %v224_v45, %s5858_s15 }
  0xa2   :  { %345 = vrot.lane.b32.xlu0 %v318_v43, %s5860_s2 }
  0xa9   :  { %260 = vrot.lane.b32.xlu2 %v225_v49, %s5858_s15  ;;  %341 = vrot.lane.b32.xlu1 %v316_v48, %s5860_s2  ;;  %v10638_v48 = vmov 1  }
  0xaa   :  { %351 = vrot.lane.b32.xlu0 %v321_v47, %s5860_s2  ;;  %5666 = vset.pattern.permute.xlu2 %v10638_v48 }
  0xb1   :  { %339 = vrot.lane.b32.xlu2 %v315_v51, %s5860_s2  ;;  %347 = vrot.lane.b32.xlu1 %v319_v52, %s5860_s2 }
  0xb2   :  { %357 = vrot.lane.b32.xlu0 %v324_v50, %s5860_s2 }
  0xb9   :  { %343 = vrot.lane.b32.xlu2 %v317_v53, %s5860_s2  ;;  %353 = vrot.lane.b32.xlu1 %v322_v54, %s5860_s2 }
  0xba   :  { %397 = vperm.xlu0 %5664, %v5969_v3   ;;  %v6132_v17 = vpop.permute.xlu2 %153 }
  0xbb   :  { %10893 = vst [vmem:[#allocation26_spill] sm:$0xff] %v6132_v17 }
  0xc1   :  { %349 = vrot.lane.b32.xlu2 %v320_v55, %s5860_s2  ;;  %359 = vrot.lane.b32.xlu1 %v325_v56, %s5860_s2 }
  0xc2   :  { %v6142_v28 = vpop.permute.xlu2 %159  ;;  %5667 = vset.pattern.permute.xlu0 %v10638_v48 }
  0xc3   :  { %10898 = vst [vmem:[#allocation31_spill] sm:$0xff] %v6142_v28 }
  0xc9   :  { %355 = vrot.lane.b32.xlu2 %v317_v53, %s5860_s2  ;;  %401 = vperm.xlu1 %5665, %v5977_v4  }
  0xca   :  { %v6148_v33 = vpop.permute.xlu2 %165 }
  0xcb   :  { %10901 = vst [vmem:[#allocation34_spill] sm:$0xff] %v6148_v33 }
  0xd1   :  { %361 = vrot.lane.b32.xlu2 %v320_v55, %s5860_s2  ;;  %5668 = vset.pattern.permute.xlu1 %v10632_v42  ;;  %v485_v55 = vld [vmem:[%s10621_s5] ss:$8 sm:$0x3] }
  0xd2   :  { %v6104_v57 = vpop.permute.xlu0 %149  ;;  %v6156_v38 = vpop.permute.xlu2 %171  ;;  %v488_v56 = vperm.slane %v485_v55, 1 }
  0xd3   :  { %10879 = vst [vmem:[#allocation12_spill] sm:$0xff] %v6104_v57  ;;  %v6106_v58 = vpop.permute.xlu1 %151 }
  0xd4   :  { %10880 = vst [vmem:[#allocation13_spill] sm:$0xff] %v6106_v58 }
  0xd5   :  { %10903 = vst [vmem:[#allocation36_spill] sm:$0xff] %v6156_v38 }
  0xda   :  { %v6108_v59 = vpop.permute.xlu0 %155 }
  0xdb   :  { %10881 = vst [vmem:[#allocation14_spill] sm:$0xff] %v6108_v59  ;;  %v6110_v60 = vpop.permute.xlu1 %157 }
  0xdc   :  { %10882 = vst [vmem:[#allocation15_spill] sm:$0xff] %v6110_v60 }
  0xe2   :  { %v6112_v61 = vpop.permute.xlu0 %161 }
  0xe3   :  { %10883 = vst [vmem:[#allocation16_spill] sm:$0xff] %v6112_v61  ;;  %v6114_v62 = vpop.permute.xlu1 %163  ;;  %v6162_v43 = vpop.permute.xlu2 %238 }
  0xe4   :  { %10884 = vst [vmem:[#allocation17_spill] sm:$0xff] %v6114_v62 }
  0xe5   :  { %10905 = vst [vmem:[#allocation38_spill] sm:$0xff] %v6162_v43 }
  0xea   :  { %v6116_v63 = vpop.permute.xlu0 %167 }
  0xeb   :  { %10885 = vst [vmem:[#allocation18_spill] sm:$0xff] %v6116_v63  ;;  %v6118_v2 = vpop.permute.xlu1 %169  ;;  %v6171_v49 = vpop.permute.xlu2 %242 }
  0xec   :  { %10886 = vst [vmem:[#allocation19_spill] sm:$0xff] %v6118_v2 }
  0xed   :  { %10906 = vst [vmem:[#allocation39_spill] sm:$0xff] %v6171_v49 }
  0xf3   :  { %v6178_v52 = vpop.permute.xlu2 %248 }
  0xf4   :  { %10907 = vst [vmem:[#allocation40_spill] sm:$0xff] %v6178_v52 }
  0xfb   :  { %v6122_v10 = vpop.permute.xlu1 %240 }
  0xfc   :  { %v6120_v5 = vpop.permute.xlu0 %244  ;;  %10888 = vst [vmem:[#allocation21_spill] sm:$0xff] %v6122_v10 }
  0xfd   :  { %10887 = vst [vmem:[#allocation20_spill] sm:$0xff] %v6120_v5 }
 0x103   :  { %v6126_v12 = vpop.permute.xlu1 %246 }
 0x104   :  { %v6124_v11 = vpop.permute.xlu0 %250  ;;  %10890 = vst [vmem:[#allocation23_spill] sm:$0xff] %v6126_v12 }
 0x105   :  { %10889 = vst [vmem:[#allocation22_spill] sm:$0xff] %v6124_v11 }
 0x10b   :  { %v6130_v16 = vpop.permute.xlu1 %252 }
 0x10c   :  { %v6128_v13 = vpop.permute.xlu0 %256  ;;  %10892 = vst [vmem:[#allocation25_spill] sm:$0xff] %v6130_v16 }
 0x10d   :  { %10891 = vst [vmem:[#allocation24_spill] sm:$0xff] %v6128_v13 }
 0x113   :  { %v6136_v19 = vpop.permute.xlu1 %258 }
 0x114   :  { %v6134_v18 = vpop.permute.xlu0 %345  ;;  %10895 = vst [vmem:[#allocation28_spill] sm:$0xff] %v6136_v19 }
 0x115   :  { %10894 = vst [vmem:[#allocation27_spill] sm:$0xff] %v6134_v18 }
 0x11b   :  { %v6140_v23 = vpop.permute.xlu1 %341 }
 0x11c   :  { %v6138_v22 = vpop.permute.xlu0 %351  ;;  %10897 = vst [vmem:[#allocation30_spill] sm:$0xff] %v6140_v23 }
 0x11d   :  { %10896 = vst [vmem:[#allocation29_spill] sm:$0xff] %v6138_v22 }
 0x123   :  { %v6146_v32 = vpop.permute.xlu1 %347 }
 0x124   :  { %v6144_v29 = vpop.permute.xlu0 %357  ;;  %10900 = vst [vmem:[#allocation33_spill] sm:$0xff] %v6146_v32 }
 0x125   :  { %10899 = vst [vmem:[#allocation32_spill] sm:$0xff] %v6144_v29 }
 0x12b   :  { %v6150_v35 = vpop.permute.xlu1 %353 }
 0x12c   :  { %v398_v34 = vpop.permute.xlu0 %397  ;;  %10902 = vst [vmem:[#allocation35_spill] sm:$0xff] %v6150_v35 }
 0x12d   :  { %v404_v36 = vmul.f32 %v398_v34, %v6000_v9  ;;  %v405_v37 = vmul.f32 %v398_v34, %v5995_v8  ;;  %v406_v40 = vmul.f32 0.0, %v398_v34  ;;  %v411_v50 = vmul.f32 %v398_v34, %v6025_v20 }
 0x12e   :  { %v410_v51 = vmul.f32 %v398_v34, %v6030_v21  ;;  %v487_v34 = vperm.slane %v485_v55, 0 }
 0x12f   :  { %428 = vrot.lane.b32.xlu2 %v404_v36, %s5861_s16  ;;  %430 = vrot.lane.b32.xlu1 %v405_v37, %s5861_s16  ;;  %v6188_v36 = vpop.permute.xlu2 %254 }
 0x130   :  { %10908 = vst [vmem:[#allocation41_spill] sm:$0xff] %v6188_v36 }
 0x133   :  { %v6158_v41 = vpop.permute.xlu1 %359 }
 0x134   :  { %10904 = vst [vmem:[#allocation37_spill] sm:$0xff] %v6158_v41 }
 0x137   :  { %432 = vrot.lane.b32.xlu2 %v406_v40, %s5861_s16  ;;  %v6196_v37 = vpop.permute.xlu2 %260 }
 0x138   :  { %10909 = vst [vmem:[#allocation42_spill] sm:$0xff] %v6196_v37 }
 0x13b   :  { %v402_v44 = vpop.permute.xlu1 %401 }
 0x13c   :  { %v408_v45 = vmul.f32 %v402_v44, %v6010_v14  ;;  %v407_v46 = vmul.f32 %v402_v44, %v6015_v15  ;;  %v409_v47 = vmul.f32 0.0, %v402_v44  ;;  %v414_v53 = vmul.f32 %v402_v44, %v6040_v24 }
 0x13d   :  { %v413_v54 = vmul.f32 %v402_v44, %v6045_v25 }
 0x13e   :  { %436 = vrot.lane.b32.xlu1 %v408_v45, %s5861_s16  ;;  %434 = vrot.lane.b32.xlu0 %v407_v46, %s5861_s16 }
 0x13f   :  { %438 = vrot.lane.b32.xlu2 %v409_v47, %s5861_s16 }
 0x146   :  { %442 = vrot.lane.b32.xlu1 %v411_v50, %s5861_s16  ;;  %440 = vrot.lane.b32.xlu0 %v410_v51, %s5861_s16 }
 0x147   :  { %444 = vrot.lane.b32.xlu2 %v406_v40, %s5861_s16  ;;  %v6199_v40 = vpop.permute.xlu2 %339 }
 0x148   :  { %10910 = vst [vmem:[#allocation43_spill] sm:$0xff] %v6199_v40 }
 0x14e   :  { %448 = vrot.lane.b32.xlu1 %v414_v53, %s5861_s16  ;;  %446 = vrot.lane.b32.xlu0 %v413_v54, %s5861_s16 }
 0x14f   :  { %450 = vrot.lane.b32.xlu2 %v409_v47, %s5861_s16  ;;  %v6201_v44 = vpop.permute.xlu2 %343 }
 0x150   :  { %10911 = vst [vmem:[#allocation44_spill] sm:$0xff] %v6201_v44 }
 0x156   :  { %491 = vrot.lane.b32.xlu1 %v488_v56, %s5864_s20  ;;  %489 = vrot.lane.b32.xlu0 %v487_v34, %s5864_s20 }
 0x157   :  { %523 = vperm.xlu2 %5666, %v5969_v3   ;;  %v6203_v45 = vpop.permute.xlu2 %349 }
 0x158   :  { %10912 = vst [vmem:[#allocation45_spill] sm:$0xff] %v6203_v45  ;;  %v10670_v45 = vmov 21  }
 0x15e   :  { %543 = vperm.xlu1 %5668, %v5969_v3   ;;  %527 = vperm.xlu0 %5667, %v5977_v4  }
 0x15f   :  { %5669 = vset.pattern.permute.xlu2 %v10632_v42  ;;  %v6205_v46 = vpop.permute.xlu2 %355 }
 0x160   :  { %547 = vperm.xlu2 %5669, %v5977_v4   ;;  %10913 = vst [vmem:[#allocation46_spill] sm:$0xff] %v6205_v46 }
 0x166   :  { %5670 = vset.pattern.permute.xlu1 %v10650_v0 }
 0x167   :  { %v6207_v47 = vpop.permute.xlu2 %361 }
 0x168   :  { %10914 = vst [vmem:[#allocation47_spill] sm:$0xff] %v6207_v47  ;;  %5671 = vset.pattern.permute.xlu2 %v10650_v0 }
 0x189   :  { %v6209_v50 = vpop.permute.xlu2 %428 }
 0x18a   :  { %10915 = vst [vmem:[#allocation48_spill] sm:$0xff] %v6209_v50 }
 0x191   :  { %v6211_v51 = vpop.permute.xlu2 %432 }
 0x192   :  { %10916 = vst [vmem:[#allocation49_spill] sm:$0xff] %v6211_v51 }
 0x199   :  { %v6215_v54 = vpop.permute.xlu2 %438 }
 0x19a   :  { %10918 = vst [vmem:[#allocation51_spill] sm:$0xff] %v6215_v54 }
 0x1a1   :  { %v6213_v53 = vpop.permute.xlu1 %430  ;;  %v6219_v56 = vpop.permute.xlu2 %444 }
 0x1a2   :  { %10917 = vst [vmem:[#allocation50_spill] sm:$0xff] %v6213_v53 }
 0x1a3   :  { %10920 = vst [vmem:[#allocation53_spill] sm:$0xff] %v6219_v56 }
 0x1a9   :  { %v6225_v39 = vpop.permute.xlu2 %450 }
 0x1aa   :  { %10923 = vst [vmem:[#allocation56_spill] sm:$0xff] %v6225_v39 }
 0x1b0   :  { %v6217_v55 = vpop.permute.xlu1 %436 }
 0x1b1   :  { %10919 = vst [vmem:[#allocation52_spill] sm:$0xff] %v6217_v55  ;;  %v6229_v48 = vpop.permute.xlu2 %523 }
 0x1b2   :  { %v532_v28 = vmul.f32 %v6229_v48, %v5995_v8  ;;  %v6419_v60 = vmul.f32 0.0, %v6229_v48  ;;  %v531_v17 = vmul.f32 %v6229_v48, %v6000_v9 }
 0x1b8   :  { %v6221_v34 = vpop.permute.xlu1 %442 }
 0x1b9   :  { %10921 = vst [vmem:[#allocation54_spill] sm:$0xff] %v6221_v34 }
 0x1ba   :  { %v548_v39 = vpop.permute.xlu2 %547 }
 0x1bb   :  { %v554_v56 = vmul.f32 %v548_v39, %v6015_v15  ;;  %v553_v34 = vmul.f32 0.0, %v548_v39  ;;  %v560_v54 = vmul.f32 %v548_v39, %v6045_v25 }
 0x1c0   :  { %v6223_v42 = vpop.permute.xlu1 %448 }
 0x1c1   :  { %10922 = vst [vmem:[#allocation55_spill] sm:$0xff] %v6223_v42  ;;  %v555_v42 = vmul.f32 %v548_v39, %v6010_v14 }
 0x1c8   :  { %v6227_v7 = vpop.permute.xlu1 %491 }
 0x1c9   :  { %10924 = vst [vmem:[#allocation57_spill] sm:$0xff] %v6227_v7 }
 0x1d0   :  { %v544_v6 = vpop.permute.xlu1 %543 }
 0x1d1   :  { %v552_v1 = vmul.f32 %v544_v6, %v5995_v8  ;;  %v551_v30 = vmul.f32 %v544_v6, %v6000_v9  ;;  %v550_v26 = vmul.f32 0.0, %v544_v6  ;;  %v558_v0 = vmul.f32 %v544_v6, %v6025_v20 }
 0x1d3   :  { %578 = vrot.lane.b32.xlu0 %v552_v1, %s5857_s19  ;;  %576 = vrot.lane.b32.xlu2 %v551_v30, %s5857_s19  ;;  %v557_v1 = vmul.f32 %v544_v6, %v6030_v21  ;;  %v561_v30 = vmul.f32 %v548_v39, %v6040_v24 }
 0x1d4   :  { %574 = vrot.lane.b32.xlu1 %v550_v26, %s5857_s19 }
 0x1db   :  { %584 = vrot.lane.b32.xlu0 %v555_v42, %s5857_s19  ;;  %582 = vrot.lane.b32.xlu2 %v554_v56, %s5857_s19 }
 0x1dc   :  { %580 = vrot.lane.b32.xlu1 %v553_v34, %s5857_s19 }
 0x1e3   :  { %590 = vrot.lane.b32.xlu0 %v558_v0, %s5857_s19  ;;  %588 = vrot.lane.b32.xlu2 %v557_v1, %s5857_s19 }
 0x1e4   :  { %586 = vrot.lane.b32.xlu1 %v550_v26, %s5857_s19 }
 0x1eb   :  { %596 = vrot.lane.b32.xlu0 %v561_v30, %s5857_s19  ;;  %594 = vrot.lane.b32.xlu2 %v560_v54, %s5857_s19 }
 0x1ec   :  { %592 = vrot.lane.b32.xlu1 %v553_v34, %s5857_s19  ;;  %v10657_v34 = vmov 16  }
 0x1ed   :  { %5672 = vset.pattern.permute.xlu0 %v10657_v34 }
 0x1f3   :  { %635 = vperm.xlu2 %5671, %v5977_v4  }
 0x1f4   :  { %631 = vperm.xlu1 %5670, %v5969_v3  }
 0x1fc   :  { %5673 = vset.pattern.permute.xlu1 %v10657_v34 }
 0x22d   :  { %v6255_v6 = vpop.permute.xlu2 %576 }
 0x235   :  { %v6259_v42 = vpop.permute.xlu2 %582 }
 0x23d   :  { %v6265_v39 = vpop.permute.xlu2 %588 }
 0x245   :  { %v6269_v54 = vpop.permute.xlu2 %594 }
 0x246   :  { %v6257_v0 = vpop.permute.xlu1 %574 }
 0x247   :  { %v598_v62 = vsel %vm173_vm0, %v6257_v0, %v6255_v6 }
 0x248   :  { %v618_v27 = vadd.f32 %v598_v62, %v6419_v60 }
 0x24d   :  { %v636_v41 = vpop.permute.xlu2 %635 }
 0x24e   :  { %v6261_v26 = vpop.permute.xlu1 %580  ;;  %v643_v46 = vmul.f32 %v636_v41, %v6010_v14  ;;  %v642_v35 = vmul.f32 %v636_v41, %v6015_v15  ;;  %v641_v50 = vmul.f32 0.0, %v636_v41  ;;  %v648_v29 = vmul.f32 %v636_v41, %v6045_v25 }
 0x256   :  { %v6263_v56 = vpop.permute.xlu1 %586 }
 0x25e   :  { %v6267_v1 = vpop.permute.xlu1 %592 }
 0x266   :  { %v632_v30 = vpop.permute.xlu1 %631 }
 0x267   :  { %v640_v55 = vmul.f32 %v632_v30, %v5995_v8  ;;  %v639_v7 = vmul.f32 %v632_v30, %v6000_v9  ;;  %v638_v47 = vmul.f32 0.0, %v632_v30  ;;  %v646_v34 = vmul.f32 %v632_v30, %v6025_v20 }
 0x269   :  { %666 = vrot.lane.b32.xlu2 %v640_v55, %s5858_s15  ;;  %664 = vrot.lane.b32.xlu1 %v639_v7, %s5858_s15  ;;  %v645_v55 = vmul.f32 %v632_v30, %v6030_v21  ;;  %v649_v7 = vmul.f32 %v636_v41, %v6040_v24 }
 0x26a   :  { %662 = vrot.lane.b32.xlu0 %v638_v47, %s5858_s15 }
 0x271   :  { %672 = vrot.lane.b32.xlu2 %v643_v46, %s5858_s15  ;;  %670 = vrot.lane.b32.xlu1 %v642_v35, %s5858_s15  ;;  %v6293_v35 = vpop.permute.xlu0 %434 }
 0x272   :  { %668 = vrot.lane.b32.xlu0 %v641_v50, %s5858_s15  ;;  %10925 = vst [vmem:[#allocation58_spill] sm:$0xff] %v6293_v35 }
 0x279   :  { %678 = vrot.lane.b32.xlu2 %v646_v34, %s5858_s15  ;;  %676 = vrot.lane.b32.xlu1 %v645_v55, %s5858_s15  ;;  %v6297_v46 = vpop.permute.xlu0 %440 }
 0x27a   :  { %674 = vrot.lane.b32.xlu0 %v638_v47, %s5858_s15  ;;  %10926 = vst [vmem:[#allocation59_spill] sm:$0xff] %v6297_v46 }
 0x281   :  { %684 = vrot.lane.b32.xlu2 %v649_v7, %s5858_s15  ;;  %682 = vrot.lane.b32.xlu1 %v648_v29, %s5858_s15  ;;  %v6299_v34 = vpop.permute.xlu0 %446 }
 0x282   :  { %680 = vrot.lane.b32.xlu0 %v641_v50, %s5858_s15  ;;  %10927 = vst [vmem:[#allocation60_spill] sm:$0xff] %v6299_v34 }
 0x289   :  { %723 = vperm.xlu1 %5673, %v5977_v4   ;;  %v6301_v47 = vpop.permute.xlu0 %489 }
 0x28a   :  { %719 = vperm.xlu0 %5672, %v5969_v3   ;;  %10928 = vst [vmem:[#allocation61_spill] sm:$0xff] %v6301_v47 }
 0x291   :  { %v6303_v30 = vpop.permute.xlu0 %527  ;;  %5675 = vset.pattern.permute.xlu1 %v10670_v45 }
 0x292   :  { %5674 = vset.pattern.permute.xlu0 %v10670_v45 }
 0x299   :  { %v6305_v41 = vpop.permute.xlu0 %578 }
 0x29a   :  { %v599_v59 = vsel %vm173_vm0, %v6255_v6, %v6305_v41  ;;  %v620_v31 = vadd.f32 %v6305_v41, %v532_v28  ;;  %v6441_v28 = vmul.f32 0.0, %v6303_v30 }
 0x2a1   :  { %v6307_v55 = vpop.permute.xlu0 %584 }
 0x2a9   :  { %v6309_v29 = vpop.permute.xlu0 %590 }
 0x2b1   :  { %v6311_v50 = vpop.permute.xlu0 %596 }
 0x2db   :  { %v6313_v7 = vpop.permute.xlu1 %664 }
 0x2dc   :  { %v6315_v35 = vpop.permute.xlu0 %662 }
 0x2dd   :  { %v686_v57 = vsel %vm262_vm1, %v6315_v35, %v6313_v7  ;;  %v535_v35 = vmul.f32 %v6303_v30, %v6010_v14 }
 0x2e3   :  { %v6317_v22 = vpop.permute.xlu1 %670 }
 0x2e4   :  { %v6319_v46 = vpop.permute.xlu0 %668 }
 0x2eb   :  { %v6321_v34 = vpop.permute.xlu1 %676 }
 0x2ec   :  { %v6323_v47 = vpop.permute.xlu0 %674 }
 0x2f3   :  { %v6327_v53 = vpop.permute.xlu1 %682 }
 0x2f4   :  { %v6329_v51 = vpop.permute.xlu0 %680 }
 0x2fb   :  { %v724_v32 = vpop.permute.xlu1 %723 }
 0x2fc   :  { %v720_v18 = vpop.permute.xlu0 %719  ;;  %v729_v40 = vmul.f32 %v724_v32, %v6015_v15  ;;  %v730_v13 = vmul.f32 %v724_v32, %v6010_v14  ;;  %v735_v37 = vmul.f32 %v724_v32, %v6045_v25 }
 0x2fd   :  { %v727_v23 = vmul.f32 %v720_v18, %v5995_v8  ;;  %v726_v44 = vmul.f32 %v720_v18, %v6000_v9  ;;  %v732_v45 = vmul.f32 %v720_v18, %v6030_v21  ;;  %v728_v19 = vmul.f32 0.0, %v720_v18 }
 0x2fe   :  { %756 = vrot.lane.b32.xlu0 %v729_v40, %s5860_s2  ;;  %v733_v11 = vmul.f32 %v720_v18, %v6025_v20  ;;  %v731_v40 = vmul.f32 0.0, %v724_v32 }
 0x2ff   :  { %752 = vrot.lane.b32.xlu1 %v727_v23, %s5860_s2  ;;  %750 = vrot.lane.b32.xlu2 %v726_v44, %s5860_s2  ;;  %v736_v23 = vmul.f32 %v724_v32, %v6040_v24 }
 0x306   :  { %762 = vrot.lane.b32.xlu0 %v732_v45, %s5860_s2 }
 0x307   :  { %758 = vrot.lane.b32.xlu1 %v730_v13, %s5860_s2  ;;  %754 = vrot.lane.b32.xlu2 %v728_v19, %s5860_s2 }
 0x30e   :  { %768 = vrot.lane.b32.xlu0 %v735_v37, %s5860_s2 }
 0x30f   :  { %764 = vrot.lane.b32.xlu1 %v733_v11, %s5860_s2  ;;  %760 = vrot.lane.b32.xlu2 %v731_v40, %s5860_s2 }
 0x316   :  { %807 = vperm.xlu0 %5674, %v5969_v3   ;;  %v706_v3 = vadd.f32 %v686_v57, %v618_v27  ;;  %v534_v27 = vmul.f32 %v6303_v30, %v6015_v15 }
 0x317   :  { %770 = vrot.lane.b32.xlu1 %v736_v23, %s5860_s2  ;;  %766 = vrot.lane.b32.xlu2 %v728_v19, %s5860_s2 }
 0x31f   :  { %811 = vperm.xlu1 %5675, %v5977_v4   ;;  %772 = vrot.lane.b32.xlu2 %v731_v40, %s5860_s2 }
 0x370   :  { %v6353_v13 = vpop.permute.xlu0 %756 }
 0x371   :  { %v6355_v18 = vpop.permute.xlu1 %752 }
 0x378   :  { %v6357_v37 = vpop.permute.xlu0 %762 }
 0x379   :  { %v6359_v11 = vpop.permute.xlu1 %758 }
 0x380   :  { %v6361_v44 = vpop.permute.xlu0 %768 }
 0x381   :  { %v6363_v32 = vpop.permute.xlu1 %764 }
 0x388   :  { %v808_v45 = vpop.permute.xlu0 %807 }
 0x389   :  { %v6365_v23 = vpop.permute.xlu1 %770  ;;  %v815_v19 = vmul.f32 %v808_v45, %v5995_v8  ;;  %v814_v16 = vmul.f32 %v808_v45, %v6000_v9  ;;  %v816_v36 = vmul.f32 0.0, %v808_v45  ;;  %v820_v49 = vmul.f32 %v808_v45, %v6030_v21 }
 0x38a   :  { %v821_v43 = vmul.f32 %v808_v45, %v6025_v20  ;;  %v619_v8 = vadd.f32 %v599_v59, %v531_v17  ;;  %v600_v59 = vsel %vm173_vm0, %v6261_v26, %v6259_v42 }
 0x38b   :  { %840 = vrot.lane.b32.xlu1 %v815_v19, %s5861_s16  ;;  %838 = vrot.lane.b32.xlu2 %v814_v16, %s5861_s16 }
 0x391   :  { %v812_v40 = vpop.permute.xlu1 %811 }
 0x392   :  { %v817_v52 = vmul.f32 %v812_v40, %v6015_v15  ;;  %v818_v5 = vmul.f32 %v812_v40, %v6010_v14  ;;  %v819_v12 = vmul.f32 0.0, %v812_v40  ;;  %v823_v16 = vmul.f32 %v812_v40, %v6045_v25 }
 0x393   :  { %842 = vrot.lane.b32.xlu2 %v816_v36, %s5861_s16  ;;  %v824_v19 = vmul.f32 %v812_v40, %v6040_v24  ;;  %v10704_v14 = vmov 7  }
 0x394   :  { %844 = vrot.lane.b32.xlu0 %v817_v52, %s5861_s16  ;;  %846 = vrot.lane.b32.xlu1 %v818_v5, %s5861_s16  ;;  %v5585_v5 = vld [vmem:[%s10621_s5 + $0x1] ss:$8 sm:$0x3] }
 0x395   :  { %v897_v52 = vperm.slane %v5585_v5, 0  ;;  %v898_v45 = vperm.slane %v5585_v5, 1  ;;  %5678 = vset.pattern.permute.xlu1 %v10704_v14 }
 0x39b   :  { %848 = vrot.lane.b32.xlu2 %v819_v12, %s5861_s16 }
 0x39c   :  { %850 = vrot.lane.b32.xlu0 %v820_v49, %s5861_s16  ;;  %852 = vrot.lane.b32.xlu1 %v821_v43, %s5861_s16  ;;  %v667_v43 = vpop.permute.xlu2 %666 }
 0x39d   :  { %v687_v6 = vsel %vm262_vm1, %v6313_v7, %v667_v43  ;;  %v708_v4 = vadd.f32 %v667_v43, %v620_v31 }
 0x39e   :  { %v707_v62 = vadd.f32 %v687_v6, %v619_v8  ;;  %v601_v8 = vsel %vm173_vm0, %v6259_v42, %v6307_v55 }
 0x3a3   :  { %854 = vrot.lane.b32.xlu2 %v816_v36, %s5861_s16 }
 0x3a4   :  { %856 = vrot.lane.b32.xlu0 %v823_v16, %s5861_s16  ;;  %858 = vrot.lane.b32.xlu1 %v824_v19, %s5861_s16  ;;  %v6392_v49 = vpop.permute.xlu2 %672 }
 0x3a5   :  { %v689_v42 = vsel %vm262_vm1, %v6317_v22, %v6392_v49 }
 0x3ab   :  { %860 = vrot.lane.b32.xlu2 %v819_v12, %s5861_s16 }
 0x3ac   :  { %899 = vrot.lane.b32.xlu0 %v897_v52, %s5868_s23  ;;  %901 = vrot.lane.b32.xlu1 %v898_v45, %s5868_s23  ;;  %v6394_v36 = vpop.permute.xlu2 %678 }
 0x3b4   :  { %v6396_v40 = vpop.permute.xlu2 %684 }
 0x3bc   :  { %v751_v16 = vpop.permute.xlu2 %750 }
 0x3bd   :  { %v794_v17 = vadd.f32 %v751_v16, %v706_v3  ;;  %v623_v3 = vadd.f32 %v6307_v55, %v535_v35 }
 0x3bf   :  { %v711_v35 = vadd.f32 %v6392_v49, %v623_v3  ;;  %v691_v3 = vsel %vm262_vm1, %v6321_v34, %v6394_v36 }
 0x3c4   :  { %v755_v19 = vpop.permute.xlu2 %754 }
 0x3c5   :  { %v775_v9 = vsel %vm363_vm2, %v6355_v18, %v755_v19 }
 0x3c6   :  { %v796_v7 = vadd.f32 %v775_v9, %v708_v4  ;;  %v621_v4 = vadd.f32 %v600_v59, %v6441_v28  ;;  %v688_v9 = vsel %vm262_vm1, %v6319_v46, %v6317_v22  ;;  %v776_v22 = vsel %vm363_vm2, %v6353_v13, %v6359_v11 }
 0x3cc   :  { %v761_v10 = vpop.permute.xlu2 %760 }
 0x3cd   :  { %v777_v46 = vsel %vm363_vm2, %v6359_v11, %v761_v10  ;;  %v10706_v10 = vmov 2  }
 0x3ce   :  { %5676 = vset.pattern.permute.xlu2 %v10706_v10  ;;  %5677 = vset.pattern.permute.xlu0 %v10706_v10 }
 0x3d4   :  { %v6398_v38 = vpop.permute.xlu2 %766 }
 0x3dc   :  { %v6400_v63 = vpop.permute.xlu2 %772 }
 0x3e5   :  { %v839_v45 = vpop.permute.xlu2 %838 }
 0x3e6   :  { %v882_v57 = vadd.f32 %v839_v45, %v794_v17  ;;  %v799_v17 = vadd.f32 %v777_v46, %v711_v35 }
 0x3ed   :  { %v843_v61 = vpop.permute.xlu2 %842 }
 0x3fd   :  { %v841_v5 = vpop.permute.xlu1 %840 }
 0x3fe   :  { %v863_v41 = vsel %vm452_vm3, %v841_v5, %v843_v61  ;;  %v862_v19 = vsel %vm452_vm3, %v839_v45, %v841_v5  ;;  %v849_v61 = vpop.permute.xlu2 %848 }
 0x406   :  { %v6402_v12 = vpop.permute.xlu1 %846  ;;  %v6404_v52 = vpop.permute.xlu0 %844 }
 0x407   :  { %v865_v59 = vsel %vm452_vm3, %v6402_v12, %v849_v61  ;;  %v864_v11 = vsel %vm452_vm3, %v6404_v52, %v6402_v12  ;;  %v537_v12 = vmul.f32 %v6229_v48, %v6030_v21  ;;  %v690_v61 = vsel %vm262_vm1, %v6323_v47, %v6321_v34 }
 0x408   :  { %v541_v34 = vmul.f32 %v6303_v30, %v6040_v24 }
 0x40e   :  { %v6406_v2 = vpop.permute.xlu1 %852  ;;  %v6408_v33 = vpop.permute.xlu0 %850 }
 0x416   :  { %v6426_v58 = vpop.permute.xlu1 %858  ;;  %v6428_v0 = vpop.permute.xlu0 %856 }
 0x417   :  { %10929 = vst [vmem:[#allocation62_spill] sm:$0xff] %v6428_v0  ;;  %v774_v0 = vsel %vm363_vm2, %v751_v16, %v6355_v18  ;;  %v884_v18 = vadd.f32 %v863_v41, %v796_v7  ;;  %v538_v7 = vmul.f32 %v6229_v48, %v6025_v20  ;;  %v779_v48 = vsel %vm363_vm2, %v6363_v32, %v6398_v38 }
 0x418   :  { %v795_v31 = vadd.f32 %v774_v0, %v707_v62  ;;  %v622_v0 = vadd.f32 %v601_v8, %v534_v27  ;;  %v709_v62 = vadd.f32 %v688_v9, %v621_v4 }
 0x41a   :  { %v883_v26 = vadd.f32 %v862_v19, %v795_v31  ;;  %v710_v41 = vadd.f32 %v689_v42, %v622_v0  ;;  %v797_v49 = vadd.f32 %v6353_v13, %v709_v62  ;;  %v602_v19 = vsel %vm173_vm0, %v6263_v56, %v6265_v39 }
 0x41b   :  { %v603_v31 = vsel %vm173_vm0, %v6265_v39, %v6309_v29  ;;  %v887_v13 = vadd.f32 %v865_v59, %v799_v17  ;;  %v624_v56 = vadd.f32 %v602_v19, %v6419_v60  ;;  %v855_v39 = vpop.permute.xlu2 %854  ;;  %v778_v60 = vsel %vm363_vm2, %v6357_v37, %v6363_v32 }
 0x41c   :  { %v798_v27 = vadd.f32 %v776_v22, %v710_v41  ;;  %v885_v8 = vadd.f32 %v6404_v52, %v797_v49  ;;  %v625_v9 = vadd.f32 %v603_v31, %v537_v12  ;;  %v867_v38 = vsel %vm452_vm3, %v6406_v2, %v855_v39 }
 0x41d   :  { %v866_v32 = vsel %vm452_vm3, %v6408_v33, %v6406_v2  ;;  %v604_v0 = vsel %vm173_vm0, %v6267_v1, %v6269_v54  ;;  %v629_v62 = vadd.f32 %v6311_v50, %v541_v34  ;;  %v692_v2 = vsel %vm262_vm1, %v6329_v51, %v6327_v53 }
 0x41e   :  { %v6459_v43 = vpop.permute.xlu1 %901  ;;  %v6461_v16 = vpop.permute.xlu0 %899  ;;  %v713_v42 = vadd.f32 %v691_v3, %v625_v9  ;;  %v693_v1 = vsel %vm262_vm1, %v6327_v53, %v6396_v40 }
 0x41f   :  { %v910_v5 = vmul.f32 %v6459_v43, %v884_v18  ;;  %v908_v45 = vmul.f32 %v6461_v16, %v882_v57  ;;  %v6471_v55 = vsel %vm903_vm4, %v6461_v16, %v6459_v43  ;;  %v626_v57 = vadd.f32 %v6309_v29, %v538_v7 }
 0x420   :  { %v909_v6 = vmul.f32 %v6471_v55, %v883_v26  ;;  %v886_v18 = vadd.f32 %v864_v11, %v798_v27  ;;  %v913_v4 = vmul.f32 %v6459_v43, %v887_v13  ;;  %v911_v52 = vmul.f32 %v6461_v16, %v885_v8 }
 0x421   :  { %936 = vrot.lane.b32.xlu1 %v910_v5, %s5870_s24  ;;  %932 = vrot.lane.b32.xlu2 %v908_v45, %s5870_s24  ;;  %v714_v47 = vadd.f32 %v6394_v36, %v626_v57  ;;  %v712_v26 = vadd.f32 %v690_v61, %v624_v56  ;;  %v540_v45 = vmul.f32 %v6303_v30, %v6045_v25 }
 0x422   :  { %934 = vrot.lane.b32.xlu0 %v909_v6, %s5870_s24  ;;  %v912_v29 = vmul.f32 %v6471_v55, %v886_v18  ;;  %v801_v46 = vadd.f32 %v778_v60, %v713_v42  ;;  %v605_v6 = vsel %vm173_vm0, %v6269_v54, %v6311_v50  ;;  %v627_v30 = vadd.f32 %v604_v0, %v6441_v28 }
 0x423   :  { %v800_v36 = vadd.f32 %v6357_v37, %v712_v26  ;;  %v802_v5 = vadd.f32 %v779_v48, %v714_v47  ;;  %v628_v59 = vadd.f32 %v605_v6, %v540_v45  ;;  %v717_v51 = vadd.f32 %v6396_v40, %v629_v62  ;;  %v861_v17 = vpop.permute.xlu2 %860  ;;  %v10930_v40 = vld [vmem:[#allocation62_spill] sm:$0xff]  ;;  %v10942_v26 = vld [vmem:[#allocation5_spill] sm:$0xff] }
 0x424   :  { %v889_v22 = vadd.f32 %v866_v32, %v801_v46  ;;  %v715_v49 = vadd.f32 %v692_v2, %v627_v30  ;;  %v780_v28 = vsel %vm363_vm2, %v6361_v44, %v6365_v23  ;;  %v869_v11 = vsel %vm452_vm3, %v6426_v58, %v861_v17  ;;  %v6680_v17 = vld [vmem:[%s10620_s0 + $0x18] sm:$0xff] }
 0x425   :  { %v890_v35 = vadd.f32 %v867_v38, %v802_v5  ;;  %v888_v37 = vadd.f32 %v6408_v33, %v800_v36  ;;  %v781_v33 = vsel %vm363_vm2, %v6365_v23, %v6400_v63  ;;  %v716_v53 = vadd.f32 %v693_v1, %v628_v59  ;;  %v10943_v36 = vld [vmem:[#allocation7_spill] sm:$0xff]  ;;  %v6659_v59 = vld [vmem:[%s10620_s0 + $0x8] sm:$0xff] }
 0x426   :  { %v915_v50 = vmul.f32 %v6471_v55, %v889_v22  ;;  %v803_v63 = vadd.f32 %v6361_v44, %v715_v49  ;;  %v805_v7 = vadd.f32 %v781_v33, %v717_v51  ;;  %v868_v19 = vsel %vm452_vm3, %v10930_v40, %v6426_v58  ;;  %v10931_v44 = vld [vmem:[#allocation3_spill] sm:$0xff]  ;;  %v10932_v58 = vld [vmem:[#allocation4_spill] sm:$0xff]  ;;  %v6648_v22 = vld [vmem:[%s10620_s0 + $0x10] sm:$0xff] }
 0x427   :  { %v916_v41 = vmul.f32 %v6459_v43, %v890_v35  ;;  %v914_v54 = vmul.f32 %v6461_v16, %v888_v37  ;;  %v804_v27 = vadd.f32 %v780_v28, %v716_v53  ;;  %v10700_v37 = vmov 17   ;;  %v6671_v49 = vld [vmem:[%s10620_s0] sm:$0xff] }
 0x428   :  { %v893_v23 = vadd.f32 %v869_v11, %v805_v7  ;;  %v891_v31 = vadd.f32 %v10930_v40, %v803_v63  ;;  %v6686_v11 = vld [vmem:[%s10620_s0 + $0x20] sm:$0xff]  ;;  %v6695_v7 = vld [vmem:[%s10620_s0 + $0x38] sm:$0xff] }
 0x429   :  { %942 = vrot.lane.b32.xlu1 %v913_v4, %s5870_s24  ;;  %938 = vrot.lane.b32.xlu2 %v911_v52, %s5870_s24  ;;  %v892_v13 = vadd.f32 %v868_v19, %v804_v27  ;;  %v10702_v52 = vmov 12   ;;  %v6701_v19 = vld [vmem:[%s10620_s0 + $0x30] sm:$0xff] }
 0x42a   :  { %940 = vrot.lane.b32.xlu0 %v912_v29, %s5870_s24  ;;  %v919_v8 = vmul.f32 %v6459_v43, %v893_v23  ;;  %v917_v12 = vmul.f32 %v6461_v16, %v891_v31  ;;  %v10941_v29 = vld [vmem:[#allocation6_spill] sm:$0xff] }
 0x42b   :  { %v918_v57 = vmul.f32 %v6471_v55, %v892_v13 }
 0x431   :  { %948 = vrot.lane.b32.xlu1 %v916_v41, %s5870_s24  ;;  %944 = vrot.lane.b32.xlu2 %v914_v54, %s5870_s24 }
 0x432   :  { %946 = vrot.lane.b32.xlu0 %v915_v50, %s5870_s24  ;;  %v6665_v50 = vld [vmem:[%s10620_s0 + $0x28] sm:$0xff] }
 0x439   :  { %954 = vrot.lane.b32.xlu1 %v919_v8, %s5870_s24  ;;  %950 = vrot.lane.b32.xlu2 %v917_v12, %s5870_s24 }
 0x43a   :  { %952 = vrot.lane.b32.xlu0 %v918_v57, %s5870_s24 }
 0x441   :  { %1010 = vperm.xlu1 %5678, %v10931_v44   ;;  %990 = vperm.xlu2 %5676, %v10931_v44  }
 0x442   :  { %994 = vperm.xlu0 %5677, %v10932_v58  }
 0x449   :  { %5679 = vset.pattern.permute.xlu2 %v10704_v14  ;;  %5680 = vset.pattern.permute.xlu1 %v10702_v52 }
 0x44a   :  { %1014 = vperm.xlu2 %5679, %v10932_v58   ;;  %5683 = vset.pattern.permute.xlu0 %v10700_v37 }
 0x452   :  { %5681 = vset.pattern.permute.xlu2 %v10702_v52 }
 0x47b   :  { %v6579_v43 = vpop.permute.xlu2 %932 }
 0x47c   :  { %10933 = vst [vmem:[#allocation62_spill] sm:$0xff] %v6579_v43 }
 0x483   :  { %v6581_v16 = vpop.permute.xlu2 %938 }
 0x484   :  { %10934 = vst [vmem:[#allocation3_spill] sm:$0xff] %v6581_v16 }
 0x48b   :  { %v6585_v61 = vpop.permute.xlu2 %944 }
 0x48c   :  { %10936 = vst [vmem:[#allocation63_spill] sm:$0xff] %v6585_v61 }
 0x493   :  { %v6583_v55 = vpop.permute.xlu1 %936  ;;  %v6591_v3 = vpop.permute.xlu2 %950 }
 0x494   :  { %10935 = vst [vmem:[#allocation4_spill] sm:$0xff] %v6583_v55  ;;  %v6707_v23 = vpop.permute.xlu0 %934 }
 0x495   :  { %10939 = vst [vmem:[#allocation66_spill] sm:$0xff] %v6591_v3 }
 0x496   :  { %10944 = vst [vmem:[#allocation6_spill] sm:$0xff] %v6707_v23 }
 0x49b   :  { %v6587_v18 = vpop.permute.xlu1 %942  ;;  %v6595_v4 = vpop.permute.xlu2 %990 }
 0x49c   :  { %10937 = vst [vmem:[#allocation64_spill] sm:$0xff] %v6587_v18  ;;  %v6709_v31 = vpop.permute.xlu0 %940 }
 0x49d   :  { %10945 = vst [vmem:[#allocation5_spill] sm:$0xff] %v6709_v31 }
 0x4a3   :  { %v6589_v56 = vpop.permute.xlu1 %948 }
 0x4a4   :  { %10938 = vst [vmem:[#allocation65_spill] sm:$0xff] %v6589_v56  ;;  %v1015_v34 = vpop.permute.xlu2 %1014  ;;  %v6711_v13 = vpop.permute.xlu0 %946 }
 0x4a5   :  { %v1021_v42 = vmul.f32 %v1015_v34, %v6015_v15  ;;  %v1020_v38 = vmul.f32 0.0, %v1015_v34  ;;  %v1022_v5 = vmul.f32 %v1015_v34, %v10943_v36  ;;  %v1027_v15 = vmul.f32 %v1015_v34, %v6045_v25  ;;  %10946 = vst [vmem:[#allocation7_spill] sm:$0xff] %v6711_v13 }
 0x4a6   :  { %v1028_v0 = vmul.f32 %v1015_v34, %v6040_v24  ;;  %v10698_v36 = vmov 22  }
 0x4ab   :  { %v6593_v39 = vpop.permute.xlu1 %954 }
 0x4ac   :  { %10940 = vst [vmem:[#allocation67_spill] sm:$0xff] %v6593_v39  ;;  %v6713_v8 = vpop.permute.xlu0 %952 }
 0x4ad   :  { %10947 = vst [vmem:[#allocation68_spill] sm:$0xff] %v6713_v8 }
 0x4b3   :  { %v1011_v9 = vpop.permute.xlu1 %1010 }
 0x4b4   :  { %v1017_v48 = vmul.f32 0.0, %v1011_v9  ;;  %v1018_v47 = vmul.f32 %v1011_v9, %v10941_v29  ;;  %v1019_v60 = vmul.f32 %v1011_v9, %v10942_v26  ;;  %v1024_v32 = vmul.f32 %v1011_v9, %v6030_v21  ;;  %v6628_v21 = vld [vmem:[%s10619_s1] sm:$0xff]  ;;  %v6715_v12 = vpop.permute.xlu0 %994 }
 0x4b5   :  { %v1025_v45 = vmul.f32 %v1011_v9, %v6025_v20  ;;  %v6622_v20 = vld [vmem:[%s10619_s1 + $0x8] sm:$0xff]  ;;  %v1000_v8 = vmul.f32 0.0, %v6715_v12 }
 0x4b6   :  { %1041 = vrot.lane.b32.xlu1 %v1017_v48, %s5857_s19  ;;  %1043 = vrot.lane.b32.xlu2 %v1018_v47, %s5857_s19 }
 0x4b7   :  { %1045 = vrot.lane.b32.xlu0 %v1019_v60, %s5857_s19 }
 0x4be   :  { %1049 = vrot.lane.b32.xlu2 %v1021_v42, %s5857_s19  ;;  %1047 = vrot.lane.b32.xlu1 %v1020_v38, %s5857_s19 }
 0x4bf   :  { %1051 = vrot.lane.b32.xlu0 %v1022_v5, %s5857_s19 }
 0x4c6   :  { %1055 = vrot.lane.b32.xlu2 %v1024_v32, %s5857_s19  ;;  %1053 = vrot.lane.b32.xlu1 %v1017_v48, %s5857_s19 }
 0x4c7   :  { %1057 = vrot.lane.b32.xlu0 %v1025_v45, %s5857_s19 }
 0x4ce   :  { %1061 = vrot.lane.b32.xlu2 %v1027_v15, %s5857_s19  ;;  %1059 = vrot.lane.b32.xlu1 %v1020_v38, %s5857_s19 }
 0x4cf   :  { %1063 = vrot.lane.b32.xlu0 %v1028_v0, %s5857_s19 }
 0x4d6   :  { %1102 = vperm.xlu2 %5681, %v6622_v20   ;;  %1098 = vperm.xlu1 %5680, %v6628_v21  }
 0x4de   :  { %5682 = vset.pattern.permute.xlu2 %v10700_v37 }
 0x510   :  { %v6631_v24 = vpop.permute.xlu2 %1043 }
 0x518   :  { %v6633_v25 = vpop.permute.xlu2 %1049 }
 0x520   :  { %v6635_v46 = vpop.permute.xlu2 %1055 }
 0x528   :  { %v6637_v6 = vpop.permute.xlu1 %1041  ;;  %v6639_v35 = vpop.permute.xlu2 %1061 }
 0x529   :  { %v6717_v57 = vpop.permute.xlu0 %1045 }
 0x530   :  { %v6643_v62 = vpop.permute.xlu1 %1047  ;;  %v1103_v2 = vpop.permute.xlu2 %1102 }
 0x531   :  { %v1107_v30 = vmul.f32 %v6648_v22, %v1103_v2  ;;  %v1108_v53 = vmul.f32 %v6680_v17, %v1103_v2  ;;  %v1112_v40 = vmul.f32 %v6695_v7, %v1103_v2  ;;  %v1111_v27 = vmul.f32 %v6701_v19, %v1103_v2  ;;  %v6721_v58 = vpop.permute.xlu0 %1051 }
 0x533   :  { %1125 = vrot.lane.b32.xlu2 %v1107_v30, %s5858_s15 }
 0x538   :  { %v6652_v1 = vpop.permute.xlu1 %1053 }
 0x539   :  { %v6725_v48 = vpop.permute.xlu0 %1057 }
 0x540   :  { %v6654_v41 = vpop.permute.xlu1 %1059 }
 0x541   :  { %v6731_v34 = vpop.permute.xlu0 %1063 }
 0x548   :  { %v1099_v54 = vpop.permute.xlu1 %1098 }
 0x549   :  { %v1106_v33 = vmul.f32 %v6659_v59, %v1099_v54  ;;  %v1110_v51 = vmul.f32 %v6665_v50, %v1099_v54  ;;  %v1105_v28 = vmul.f32 %v6671_v49, %v1099_v54  ;;  %v1109_v63 = vmul.f32 %v6686_v11, %v1099_v54 }
 0x54b   :  { %1123 = vrot.lane.b32.xlu1 %v1106_v33, %s5858_s15  ;;  %1131 = vrot.lane.b32.xlu2 %v1110_v51, %s5858_s15 }
 0x54c   :  { %1121 = vrot.lane.b32.xlu0 %v1105_v28, %s5858_s15 }
 0x553   :  { %1129 = vrot.lane.b32.xlu1 %v1109_v63, %s5858_s15  ;;  %1166 = vperm.xlu2 %5682, %v6628_v21  }
 0x554   :  { %1127 = vrot.lane.b32.xlu0 %v1108_v53, %s5858_s15 }
 0x55b   :  { %1135 = vrot.lane.b32.xlu1 %v1112_v40, %s5858_s15  ;;  %5684 = vset.pattern.permute.xlu2 %v10698_v36 }
 0x55c   :  { %1133 = vrot.lane.b32.xlu0 %v1111_v27, %s5858_s15 }
 0x564   :  { %1170 = vperm.xlu0 %5683, %v6622_v20  }
 0x56c   :  { %5685 = vset.pattern.permute.xlu0 %v10698_v36 }
 0x58d   :  { %v6719_v44 = vpop.permute.xlu2 %1125 }
 0x5a5   :  { %v6723_v9 = vpop.permute.xlu2 %1131 }
 0x5ad   :  { %v1167_v29 = vpop.permute.xlu2 %1166 }
 0x5ae   :  { %v1173_v47 = vmul.f32 %v6671_v49, %v1167_v29  ;;  %v1174_v26 = vmul.f32 %v6659_v59, %v1167_v29  ;;  %v1175_v60 = vmul.f32 0.0, %v1167_v29  ;;  %v1180_v2 = vmul.f32 %v6665_v50, %v1167_v29 }
 0x5af   :  { %v1179_v30 = vmul.f32 %v6686_v11, %v1167_v29 }
 0x5b0   :  { %1197 = vrot.lane.b32.xlu1 %v1173_v47, %s5860_s2  ;;  %1199 = vrot.lane.b32.xlu2 %v1174_v26, %s5860_s2 }
 0x5b8   :  { %1201 = vrot.lane.b32.xlu1 %v1175_v60, %s5860_s2 }
 0x5be   :  { %v6734_v42 = vpop.permute.xlu0 %1121 }
 0x5c6   :  { %v6736_v38 = vpop.permute.xlu0 %1127 }
 0x5ce   :  { %v6740_v5 = vpop.permute.xlu0 %1133 }
 0x5d6   :  { %v1171_v32 = vpop.permute.xlu0 %1170 }
 0x5d7   :  { %v1177_v45 = vmul.f32 %v6680_v17, %v1171_v32  ;;  %v1176_v15 = vmul.f32 %v6648_v22, %v1171_v32  ;;  %v1178_v0 = vmul.f32 0.0, %v1171_v32  ;;  %v1183_v54 = vmul.f32 %v6695_v7, %v1171_v32 }
 0x5d8   :  { %v1182_v33 = vmul.f32 %v6701_v19, %v1171_v32 }
 0x5d9   :  { %1205 = vrot.lane.b32.xlu0 %v1177_v45, %s5860_s2  ;;  %1203 = vrot.lane.b32.xlu2 %v1176_v15, %s5860_s2 }
 0x5da   :  { %1207 = vrot.lane.b32.xlu1 %v1178_v0, %s5860_s2 }
 0x5e1   :  { %1211 = vrot.lane.b32.xlu0 %v1180_v2, %s5860_s2  ;;  %1209 = vrot.lane.b32.xlu2 %v1179_v30, %s5860_s2 }
 0x5e2   :  { %1213 = vrot.lane.b32.xlu1 %v1175_v60, %s5860_s2 }
 0x5e9   :  { %1217 = vrot.lane.b32.xlu0 %v1183_v54, %s5860_s2  ;;  %1215 = vrot.lane.b32.xlu2 %v1182_v33, %s5860_s2 }
 0x5ea   :  { %1219 = vrot.lane.b32.xlu1 %v1178_v0, %s5860_s2 }
 0x5f1   :  { %1258 = vperm.xlu0 %5685, %v6622_v20   ;;  %1254 = vperm.xlu2 %5684, %v6628_v21  }
 0x60a   :  { %v6759_v51 = vpop.permute.xlu2 %1199 }
 0x633   :  { %v6761_v28 = vpop.permute.xlu2 %1203 }
 0x63b   :  { %v6763_v53 = vpop.permute.xlu2 %1209 }
 0x643   :  { %v6765_v63 = vpop.permute.xlu2 %1215 }
 0x64b   :  { %v6767_v40 = vpop.permute.xlu0 %1205  ;;  %v1255_v27 = vpop.permute.xlu2 %1254 }
 0x64c   :  { %v1261_v29 = vmul.f32 %v6671_v49, %v1255_v27  ;;  %v1262_v47 = vmul.f32 %v6659_v59, %v1255_v27  ;;  %v1263_v26 = vmul.f32 0.0, %v1255_v27  ;;  %v1268_v30 = vmul.f32 %v6665_v50, %v1255_v27 }
 0x64d   :  { %v1267_v54 = vmul.f32 %v6686_v11, %v1255_v27 }
 0x64e   :  { %1285 = vrot.lane.b32.xlu1 %v1261_v29, %s5861_s16  ;;  %1287 = vrot.lane.b32.xlu2 %v1262_v47, %s5861_s16  ;;  %v1124_v47 = vpop.permute.xlu1 %1123 }
 0x64f   :  { %v1137_v14 = vsel %vm262_vm1, %v6734_v42, %v1124_v47 }
 0x653   :  { %v6773_v60 = vpop.permute.xlu0 %1211 }
 0x656   :  { %1289 = vrot.lane.b32.xlu1 %v1263_v26, %s5861_s16 }
 0x65b   :  { %v6776_v32 = vpop.permute.xlu0 %1217 }
 0x663   :  { %v1259_v45 = vpop.permute.xlu0 %1258 }
 0x664   :  { %v1265_v15 = vmul.f32 %v6680_v17, %v1259_v45  ;;  %v1264_v0 = vmul.f32 %v6648_v22, %v1259_v45  ;;  %v1266_v2 = vmul.f32 0.0, %v1259_v45  ;;  %v1271_v33 = vmul.f32 %v6695_v7, %v1259_v45 }
 0x665   :  { %v1270_v29 = vmul.f32 %v6701_v19, %v1259_v45 }
 0x666   :  { %1293 = vrot.lane.b32.xlu0 %v1265_v15, %s5861_s16  ;;  %1291 = vrot.lane.b32.xlu2 %v1264_v0, %s5861_s16  ;;  %v6793_v15 = vpop.permute.xlu1 %1129 }
 0x667   :  { %1295 = vrot.lane.b32.xlu1 %v1266_v2, %s5861_s16 }
 0x66e   :  { %1299 = vrot.lane.b32.xlu0 %v1268_v30, %s5861_s16  ;;  %1297 = vrot.lane.b32.xlu2 %v1267_v54, %s5861_s16  ;;  %v6795_v27 = vpop.permute.xlu1 %1135 }
 0x66f   :  { %1301 = vrot.lane.b32.xlu1 %v1263_v26, %s5861_s16  ;;  %v1065_v26 = vsel %vm173_vm0, %v6637_v6, %v6631_v24 }
 0x676   :  { %1305 = vrot.lane.b32.xlu0 %v1271_v33, %s5861_s16  ;;  %1303 = vrot.lane.b32.xlu2 %v1270_v29, %s5861_s16  ;;  %v1198_v0 = vpop.permute.xlu1 %1197  ;;  %v997_v33 = vmul.f32 0.0, %v6595_v4  ;;  %v998_v29 = vmul.f32 %v6671_v49, %v6595_v4 }
 0x677   :  { %1307 = vrot.lane.b32.xlu1 %v1266_v2, %s5861_s16  ;;  %v1066_v2 = vsel %vm173_vm0, %v6631_v24, %v6717_v57  ;;  %v1221_v6 = vsel %vm363_vm2, %v1198_v0, %v6759_v51  ;;  %v1067_v24 = vsel %vm173_vm0, %v6643_v62, %v6633_v25 }
 0x678   :  { %v1085_v52 = vadd.f32 %v1065_v26, %v997_v33  ;;  %v1086_v10 = vadd.f32 %v1066_v2, %v998_v29  ;;  %v999_v2 = vmul.f32 %v6659_v59, %v6595_v4  ;;  %v1088_v29 = vadd.f32 %v1067_v24, %v1000_v8 }
 0x67a   :  { %v1153_v39 = vadd.f32 %v6734_v42, %v1085_v52  ;;  %v1154_v3 = vadd.f32 %v1137_v14, %v1086_v10  ;;  %v1087_v14 = vadd.f32 %v6717_v57, %v999_v2  ;;  %v1156_v10 = vadd.f32 %v6719_v44, %v1088_v29 }
 0x67b   :  { %v1138_v29 = vsel %vm262_vm1, %v6719_v44, %v6736_v38 }
 0x67c   :  { %v1241_v56 = vadd.f32 %v1198_v0, %v1153_v39  ;;  %v1242_v61 = vadd.f32 %v1221_v6, %v1154_v3  ;;  %v1155_v39 = vadd.f32 %v1124_v47, %v1087_v14  ;;  %v10719_v47 = vmov 8  }
 0x67d   :  { %5688 = vset.pattern.permute.xlu1 %v10719_v47 }
 0x67e   :  { %v1202_v30 = vpop.permute.xlu1 %1201 }
 0x67f   :  { %v1222_v3 = vsel %vm363_vm2, %v6759_v51, %v1202_v30 }
 0x680   :  { %v1243_v62 = vadd.f32 %v1222_v3, %v1155_v39  ;;  %v1223_v3 = vsel %vm363_vm2, %v6761_v28, %v6767_v40 }
 0x686   :  { %v1208_v54 = vpop.permute.xlu1 %1207 }
 0x68e   :  { %v6797_v36 = vpop.permute.xlu1 %1213 }
 0x696   :  { %v6802_v45 = vpop.permute.xlu1 %1219 }
 0x6a8   :  { %v1288_v37 = vpop.permute.xlu2 %1287 }
 0x6c0   :  { %v1286_v13 = vpop.permute.xlu1 %1285  ;;  %v1292_v52 = vpop.permute.xlu2 %1291 }
 0x6c1   :  { %v1309_v26 = vsel %vm452_vm3, %v1286_v13, %v1288_v37  ;;  %v1329_v18 = vadd.f32 %v1286_v13, %v1241_v56  ;;  %v1244_v56 = vadd.f32 %v6761_v28, %v1156_v10  ;;  %v1070_v28 = vsel %vm173_vm0, %v6635_v46, %v6725_v48 }
 0x6c2   :  { %v1330_v42 = vadd.f32 %v1309_v26, %v1242_v61  ;;  %v1069_v61 = vsel %vm173_vm0, %v6652_v1, %v6635_v46  ;;  %v1001_v1 = vmul.f32 %v6648_v22, %v6715_v12  ;;  %v1068_v26 = vsel %vm173_vm0, %v6633_v25, %v6721_v58 }
 0x6c3   :  { %1353 = vrot.lane.b32.xlu2 %v1329_v18, %s5875_s21  ;;  %v1332_v0 = vadd.f32 %v1292_v52, %v1244_v56  ;;  %v1091_v6 = vadd.f32 %v1069_v61, %v997_v33  ;;  %v1002_v33 = vmul.f32 %v6680_v17, %v6715_v12  ;;  %v1224_v25 = vsel %vm363_vm2, %v6767_v40, %v1208_v54 }
 0x6c4   :  { %1355 = vrot.lane.b32.xlu0 %v1330_v42, %s5875_s21  ;;  %v1089_v14 = vadd.f32 %v1068_v26, %v1001_v1  ;;  %v10714_v56 = vmov 3   ;;  %v1225_v1 = vsel %vm363_vm2, %v6763_v53, %v6773_v60 }
 0x6c5   :  { %v1159_v51 = vadd.f32 %v6793_v15, %v1091_v6  ;;  %v1090_v10 = vadd.f32 %v6721_v58, %v1002_v33  ;;  %5686 = vset.pattern.permute.xlu2 %v10714_v56  ;;  %5687 = vset.pattern.permute.xlu0 %v10714_v56  ;;  %v1007_v33 = vmul.f32 %v6701_v19, %v6715_v12 }
 0x6c6   :  { %v1157_v39 = vadd.f32 %v1138_v29, %v1089_v14 }
 0x6c7   :  { %v1247_v30 = vadd.f32 %v6763_v53, %v1159_v51  ;;  %v1158_v44 = vadd.f32 %v6736_v38, %v1090_v10  ;;  %v1005_v38 = vmul.f32 %v6665_v50, %v6595_v4  ;;  %v1139_v51 = vsel %vm262_vm1, %v6793_v15, %v6723_v9 }
 0x6c8   :  { %v1290_v13 = vpop.permute.xlu1 %1289  ;;  %v1298_v24 = vpop.permute.xlu2 %1297  ;;  %v1245_v61 = vadd.f32 %v1223_v3, %v1157_v39  ;;  %v1072_v53 = vsel %vm173_vm0, %v6639_v35, %v6731_v34  ;;  %v1228_v3 = vsel %vm363_vm2, %v6776_v32, %v6802_v45 }
 0x6c9   :  { %v1310_v18 = vsel %vm452_vm3, %v1288_v37, %v1290_v13  ;;  %v1071_v37 = vsel %vm173_vm0, %v6654_v41, %v6639_v35  ;;  %v1335_v2 = vadd.f32 %v1298_v24, %v1247_v30  ;;  %v1246_v13 = vadd.f32 %v1224_v25, %v1158_v44 }
 0x6ca   :  { %v1331_v57 = vadd.f32 %v1310_v18, %v1243_v62  ;;  %v1094_v42 = vadd.f32 %v1071_v37, %v1000_v8  ;;  %v1004_v18 = vmul.f32 %v6686_v11, %v6595_v4  ;;  %v1226_v4 = vsel %vm363_vm2, %v6773_v60, %v6797_v36 }
 0x6cb   :  { %1359 = vrot.lane.b32.xlu2 %v1332_v0, %s5875_s21  ;;  %v1227_v35 = vsel %vm363_vm2, %v6765_v63, %v6776_v32 }
 0x6cc   :  { %1357 = vrot.lane.b32.xlu1 %v1331_v57, %s5875_s21  ;;  %v1162_v41 = vadd.f32 %v6740_v5, %v1094_v42  ;;  %v1092_v46 = vadd.f32 %v1070_v28, %v1004_v18  ;;  %v10718_v18 = vmov 13  }
 0x6ce   :  { %v1250_v58 = vadd.f32 %v6765_v63, %v1162_v41  ;;  %v1160_v37 = vadd.f32 %v1139_v51, %v1092_v46  ;;  %v1095_v41 = vadd.f32 %v1072_v53, %v1007_v33 }
 0x6d0   :  { %v1304_v8 = vpop.permute.xlu2 %1303  ;;  %v1248_v26 = vadd.f32 %v1225_v1, %v1160_v37 }
 0x6d1   :  { %v1338_v0 = vadd.f32 %v1304_v8, %v1250_v58 }
 0x6d3   :  { %1365 = vrot.lane.b32.xlu2 %v1335_v2, %s5875_s21 }
 0x6d8   :  { %v1294_v62 = vpop.permute.xlu0 %1293 }
 0x6d9   :  { %v1311_v40 = vsel %vm452_vm3, %v1292_v52, %v1294_v62  ;;  %v1296_v54 = vpop.permute.xlu1 %1295  ;;  %v1093_v52 = vadd.f32 %v6725_v48, %v1005_v38  ;;  %v1008_v48 = vmul.f32 %v6695_v7, %v6715_v12 }
 0x6da   :  { %v1333_v57 = vadd.f32 %v1311_v40, %v1245_v61  ;;  %v1312_v6 = vsel %vm452_vm3, %v1294_v62, %v1296_v54 }
 0x6db   :  { %v1334_v30 = vadd.f32 %v1312_v6, %v1246_v13  ;;  %1371 = vrot.lane.b32.xlu2 %v1338_v0, %s5875_s21  ;;  %v1161_v15 = vadd.f32 %v6723_v9, %v1093_v52  ;;  %v1140_v9 = vsel %vm262_vm1, %v6740_v5, %v6795_v27  ;;  %v1096_v12 = vadd.f32 %v6731_v34, %v1008_v48 }
 0x6dc   :  { %1361 = vrot.lane.b32.xlu0 %v1333_v57, %s5875_s21 }
 0x6dd   :  { %1363 = vrot.lane.b32.xlu1 %v1334_v30, %s5875_s21  ;;  %v1249_v42 = vadd.f32 %v1226_v4, %v1161_v15  ;;  %v1164_v5 = vadd.f32 %v6795_v27, %v1096_v12 }
 0x6df   :  { %v1252_v44 = vadd.f32 %v1228_v3, %v1164_v5 }
 0x6e0   :  { %v1300_v2 = vpop.permute.xlu0 %1299 }
 0x6e1   :  { %v1313_v29 = vsel %vm452_vm3, %v1298_v24, %v1300_v2  ;;  %v1302_v14 = vpop.permute.xlu1 %1301  ;;  %v1163_v24 = vadd.f32 %v1140_v9, %v1095_v41 }
 0x6e2   :  { %v1336_v10 = vadd.f32 %v1313_v29, %v1248_v26  ;;  %v1314_v36 = vsel %vm452_vm3, %v1300_v2, %v1302_v14 }
 0x6e3   :  { %v1337_v60 = vadd.f32 %v1314_v36, %v1249_v42  ;;  %1411 = vperm.xlu2 %5686, %v6628_v21   ;;  %v1251_v39 = vadd.f32 %v1227_v35, %v1163_v24  ;;  %v10716_v36 = vmov 18  }
 0x6e4   :  { %1367 = vrot.lane.b32.xlu0 %v1336_v10, %s5875_s21 }
 0x6e5   :  { %1369 = vrot.lane.b32.xlu1 %v1337_v60, %s5875_s21 }
 0x6e8   :  { %v1306_v25 = vpop.permute.xlu0 %1305 }
 0x6e9   :  { %v1315_v58 = vsel %vm452_vm3, %v1304_v8, %v1306_v25  ;;  %v1308_v61 = vpop.permute.xlu1 %1307 }
 0x6ea   :  { %v1339_v34 = vadd.f32 %v1315_v58, %v1251_v39  ;;  %v1316_v62 = vsel %vm452_vm3, %v1306_v25, %v1308_v61 }
 0x6eb   :  { %v1340_v28 = vadd.f32 %v1316_v62, %v1252_v44  ;;  %5689 = vset.pattern.permute.xlu2 %v10719_v47 }
 0x6ec   :  { %1373 = vrot.lane.b32.xlu0 %v1339_v34, %s5875_s21  ;;  %1435 = vperm.xlu2 %5689, %v6622_v20  }
 0x6ed   :  { %1375 = vrot.lane.b32.xlu1 %v1340_v28, %s5875_s21 }
 0x6f4   :  { %1415 = vperm.xlu0 %5687, %v6622_v20   ;;  %5691 = vset.pattern.permute.xlu2 %v10718_v18 }
 0x6f5   :  { %1431 = vperm.xlu1 %5688, %v6628_v21  }
 0x6fc   :  { %5692 = vset.pattern.permute.xlu0 %v10716_v36 }
 0x6fd   :  { %5690 = vset.pattern.permute.xlu1 %v10718_v18 }
 0x71d   :  { %v6917_v63 = vpop.permute.xlu2 %1353 }
 0x71e   :  { %10948 = vst [vmem:[#allocation69_spill] sm:$0xff] %v6917_v63 }
 0x725   :  { %v6919_v32 = vpop.permute.xlu2 %1359 }
 0x726   :  { %10949 = vst [vmem:[#allocation70_spill] sm:$0xff] %v6919_v32 }
 0x72d   :  { %v6923_v45 = vpop.permute.xlu2 %1365 }
 0x72e   :  { %10951 = vst [vmem:[#allocation72_spill] sm:$0xff] %v6923_v45 }
 0x735   :  { %v6929_v0 = vpop.permute.xlu2 %1371 }
 0x736   :  { %10954 = vst [vmem:[#allocation75_spill] sm:$0xff] %v6929_v0  ;;  %v6997_v61 = vpop.permute.xlu0 %1355 }
 0x737   :  { %10956 = vst [vmem:[#allocation77_spill] sm:$0xff] %v6997_v61 }
 0x73d   :  { %v6933_v54 = vpop.permute.xlu2 %1411 }
 0x73e   :  { %v6921_v27 = vpop.permute.xlu1 %1357  ;;  %v1420_v32 = vmul.f32 %v6659_v59, %v6933_v54  ;;  %v7121_v16 = vmul.f32 0.0, %v6933_v54  ;;  %v1419_v31 = vmul.f32 %v6671_v49, %v6933_v54 }
 0x73f   :  { %10950 = vst [vmem:[#allocation71_spill] sm:$0xff] %v6921_v27 }
 0x746   :  { %v1436_v30 = vpop.permute.xlu2 %1435 }
 0x747   :  { %v1443_v46 = vmul.f32 %v6680_v17, %v1436_v30  ;;  %v1442_v52 = vmul.f32 %v6648_v22, %v1436_v30  ;;  %v1441_v1 = vmul.f32 0.0, %v1436_v30  ;;  %v1449_v15 = vmul.f32 %v6695_v7, %v1436_v30 }
 0x748   :  { %v1448_v33 = vmul.f32 %v6701_v19, %v1436_v30 }
 0x74e   :  { %v7001_v34 = vpop.permute.xlu0 %1361 }
 0x74f   :  { %v6925_v8 = vpop.permute.xlu1 %1363  ;;  %10957 = vst [vmem:[#allocation78_spill] sm:$0xff] %v7001_v34 }
 0x750   :  { %10952 = vst [vmem:[#allocation73_spill] sm:$0xff] %v6925_v8 }
 0x756   :  { %v7003_v62 = vpop.permute.xlu0 %1367 }
 0x757   :  { %v6927_v13 = vpop.permute.xlu1 %1369  ;;  %10958 = vst [vmem:[#allocation79_spill] sm:$0xff] %v7003_v62 }
 0x758   :  { %10953 = vst [vmem:[#allocation74_spill] sm:$0xff] %v6927_v13 }
 0x75e   :  { %v7005_v28 = vpop.permute.xlu0 %1373 }
 0x75f   :  { %v6931_v40 = vpop.permute.xlu1 %1375  ;;  %10959 = vst [vmem:[#allocation80_spill] sm:$0xff] %v7005_v28 }
 0x760   :  { %10955 = vst [vmem:[#allocation76_spill] sm:$0xff] %v6931_v40 }
 0x767   :  { %v1432_v57 = vpop.permute.xlu1 %1431 }
 0x768   :  { %v1440_v6 = vmul.f32 %v6659_v59, %v1432_v57  ;;  %v1439_v38 = vmul.f32 %v6671_v49, %v1432_v57  ;;  %v1438_v51 = vmul.f32 0.0, %v1432_v57  ;;  %v1446_v37 = vmul.f32 %v6665_v50, %v1432_v57 }
 0x769   :  { %v1445_v4 = vmul.f32 %v6686_v11, %v1432_v57  ;;  %v7007_v57 = vpop.permute.xlu0 %1415 }
 0x76a   :  { %1466 = vrot.lane.b32.xlu0 %v1440_v6, %s5857_s19  ;;  %1464 = vrot.lane.b32.xlu2 %v1439_v38, %s5857_s19 }
 0x76b   :  { %1462 = vrot.lane.b32.xlu1 %v1438_v51, %s5857_s19 }
 0x772   :  { %1472 = vrot.lane.b32.xlu0 %v1443_v46, %s5857_s19  ;;  %1470 = vrot.lane.b32.xlu2 %v1442_v52, %s5857_s19 }
 0x773   :  { %1468 = vrot.lane.b32.xlu1 %v1441_v1, %s5857_s19 }
 0x77a   :  { %1478 = vrot.lane.b32.xlu0 %v1446_v37, %s5857_s19  ;;  %1476 = vrot.lane.b32.xlu2 %v1445_v4, %s5857_s19 }
 0x77b   :  { %1474 = vrot.lane.b32.xlu1 %v1438_v51, %s5857_s19 }
 0x782   :  { %1484 = vrot.lane.b32.xlu0 %v1449_v15, %s5857_s19  ;;  %1482 = vrot.lane.b32.xlu2 %v1448_v33, %s5857_s19  ;;  %v10713_v33 = vmov 23  }
 0x783   :  { %1480 = vrot.lane.b32.xlu1 %v1441_v1, %s5857_s19 }
 0x78a   :  { %1523 = vperm.xlu2 %5691, %v6622_v20  }
 0x78b   :  { %1519 = vperm.xlu1 %5690, %v6628_v21  }
 0x793   :  { %5693 = vset.pattern.permute.xlu1 %v10716_v36 }
 0x7c4   :  { %v6959_v26 = vpop.permute.xlu2 %1464 }
 0x7cc   :  { %v6963_v48 = vpop.permute.xlu2 %1470 }
 0x7d4   :  { %v6969_v29 = vpop.permute.xlu2 %1476 }
 0x7dc   :  { %v6973_v10 = vpop.permute.xlu2 %1482  ;;  %v7009_v6 = vpop.permute.xlu0 %1466 }
 0x7dd   :  { %v6961_v2 = vpop.permute.xlu1 %1462  ;;  %v1487_v34 = vsel %vm173_vm0, %v6959_v26, %v7009_v6 }
 0x7de   :  { %v1486_v8 = vsel %vm173_vm0, %v6961_v2, %v6959_v26  ;;  %v1508_v2 = vadd.f32 %v7009_v6, %v1420_v32  ;;  %v1507_v55 = vadd.f32 %v1487_v34, %v1419_v31  ;;  %v7144_v32 = vmul.f32 0.0, %v7007_v57 }
 0x7e4   :  { %v1524_v35 = vpop.permute.xlu2 %1523  ;;  %v7011_v38 = vpop.permute.xlu0 %1472 }
 0x7e5   :  { %v6965_v53 = vpop.permute.xlu1 %1468  ;;  %v1530_v24 = vmul.f32 %v6680_v17, %v1524_v35  ;;  %v1529_v3 = vmul.f32 %v6648_v22, %v1524_v35  ;;  %v1531_v5 = vmul.f32 0.0, %v1524_v35  ;;  %v1536_v44 = vmul.f32 %v6695_v7, %v1524_v35 }
 0x7e6   :  { %v1535_v58 = vmul.f32 %v6701_v19, %v1524_v35  ;;  %v1488_v31 = vsel %vm173_vm0, %v6965_v53, %v6963_v48 }
 0x7ec   :  { %v7013_v51 = vpop.permute.xlu0 %1478 }
 0x7ed   :  { %v6967_v42 = vpop.permute.xlu1 %1474 }
 0x7f4   :  { %v7015_v30 = vpop.permute.xlu0 %1484 }
 0x7f5   :  { %v6971_v14 = vpop.permute.xlu1 %1480 }
 0x7fd   :  { %v1520_v9 = vpop.permute.xlu1 %1519 }
 0x7fe   :  { %v1527_v60 = vmul.f32 %v6659_v59, %v1520_v9  ;;  %v1526_v41 = vmul.f32 %v6671_v49, %v1520_v9  ;;  %v1528_v12 = vmul.f32 0.0, %v1520_v9  ;;  %v1533_v39 = vmul.f32 %v6665_v50, %v1520_v9 }
 0x7ff   :  { %v1532_v25 = vmul.f32 %v6686_v11, %v1520_v9 }
 0x800   :  { %1552 = vrot.lane.b32.xlu1 %v1527_v60, %s5858_s15  ;;  %1550 = vrot.lane.b32.xlu0 %v1526_v41, %s5858_s15 }
 0x801   :  { %1554 = vrot.lane.b32.xlu2 %v1528_v12, %s5858_s15 }
 0x808   :  { %1558 = vrot.lane.b32.xlu1 %v1530_v24, %s5858_s15  ;;  %1556 = vrot.lane.b32.xlu0 %v1529_v3, %s5858_s15 }
 0x809   :  { %1560 = vrot.lane.b32.xlu2 %v1531_v5, %s5858_s15 }
 0x810   :  { %1564 = vrot.lane.b32.xlu1 %v1533_v39, %s5858_s15  ;;  %1562 = vrot.lane.b32.xlu0 %v1532_v25, %s5858_s15 }
 0x811   :  { %1566 = vrot.lane.b32.xlu2 %v1528_v12, %s5858_s15 }
 0x818   :  { %1570 = vrot.lane.b32.xlu1 %v1536_v44, %s5858_s15  ;;  %1568 = vrot.lane.b32.xlu0 %v1535_v58, %s5858_s15 }
 0x819   :  { %1572 = vrot.lane.b32.xlu2 %v1531_v5, %s5858_s15 }
 0x820   :  { %1611 = vperm.xlu1 %5693, %v6622_v20   ;;  %1607 = vperm.xlu0 %5692, %v6628_v21  }
 0x828   :  { %5694 = vset.pattern.permute.xlu0 %v10713_v33  ;;  %5695 = vset.pattern.permute.xlu1 %v10713_v33 }
 0x872   :  { %v7017_v46 = vpop.permute.xlu1 %1552  ;;  %v7019_v52 = vpop.permute.xlu0 %1550 }
 0x873   :  { %v1574_v26 = vsel %vm262_vm1, %v7019_v52, %v7017_v46 }
 0x87a   :  { %v7021_v1 = vpop.permute.xlu1 %1558  ;;  %v7023_v37 = vpop.permute.xlu0 %1556 }
 0x882   :  { %v7025_v4 = vpop.permute.xlu1 %1564  ;;  %v7027_v15 = vpop.permute.xlu0 %1562 }
 0x88a   :  { %v7031_v9 = vpop.permute.xlu1 %1570  ;;  %v7033_v60 = vpop.permute.xlu0 %1568 }
 0x892   :  { %v1612_v41 = vpop.permute.xlu1 %1611  ;;  %v1608_v12 = vpop.permute.xlu0 %1607 }
 0x893   :  { %v1617_v35 = vmul.f32 %v6648_v22, %v1612_v41  ;;  %v1615_v24 = vmul.f32 %v6659_v59, %v1608_v12  ;;  %v1614_v3 = vmul.f32 %v6671_v49, %v1608_v12  ;;  %v1620_v5 = vmul.f32 %v6686_v11, %v1608_v12 }
 0x894   :  { %v1618_v39 = vmul.f32 %v6680_v17, %v1612_v41  ;;  %v1616_v25 = vmul.f32 0.0, %v1608_v12  ;;  %v1623_v44 = vmul.f32 %v6701_v19, %v1612_v41  ;;  %v1621_v58 = vmul.f32 %v6665_v50, %v1608_v12 }
 0x895   :  { %1644 = vrot.lane.b32.xlu0 %v1617_v35, %s5860_s2  ;;  %1640 = vrot.lane.b32.xlu1 %v1615_v24, %s5860_s2  ;;  %v1619_v35 = vmul.f32 0.0, %v1612_v41  ;;  %v1624_v24 = vmul.f32 %v6695_v7, %v1612_v41 }
 0x896   :  { %1638 = vrot.lane.b32.xlu2 %v1614_v3, %s5860_s2 }
 0x89d   :  { %1650 = vrot.lane.b32.xlu0 %v1620_v5, %s5860_s2  ;;  %1646 = vrot.lane.b32.xlu1 %v1618_v39, %s5860_s2 }
 0x89e   :  { %1642 = vrot.lane.b32.xlu2 %v1616_v25, %s5860_s2 }
 0x8a5   :  { %1656 = vrot.lane.b32.xlu0 %v1623_v44, %s5860_s2  ;;  %1652 = vrot.lane.b32.xlu1 %v1621_v58, %s5860_s2 }
 0x8a6   :  { %1648 = vrot.lane.b32.xlu2 %v1619_v35, %s5860_s2 }
 0x8ad   :  { %1695 = vperm.xlu0 %5694, %v6628_v21   ;;  %1658 = vrot.lane.b32.xlu1 %v1624_v24, %s5860_s2 }
 0x8ae   :  { %1654 = vrot.lane.b32.xlu2 %v1616_v25, %s5860_s2 }
 0x8b5   :  { %1699 = vperm.xlu1 %5695, %v6622_v20  }
 0x8b6   :  { %1660 = vrot.lane.b32.xlu2 %v1619_v35, %s5860_s2 }
 0x907   :  { %v7057_v12 = vpop.permute.xlu1 %1640  ;;  %v7059_v3 = vpop.permute.xlu0 %1644 }
 0x90f   :  { %v7061_v5 = vpop.permute.xlu1 %1646  ;;  %v7063_v39 = vpop.permute.xlu0 %1650 }
 0x917   :  { %v7065_v44 = vpop.permute.xlu1 %1652  ;;  %v7067_v41 = vpop.permute.xlu0 %1656 }
 0x91f   :  { %v7069_v21 = vpop.permute.xlu1 %1658  ;;  %v1696_v58 = vpop.permute.xlu0 %1695 }
 0x920   :  { %v1703_v25 = vmul.f32 %v6659_v59, %v1696_v58  ;;  %v1702_v20 = vmul.f32 %v6671_v49, %v1696_v58  ;;  %v1704_v56 = vmul.f32 0.0, %v1696_v58  ;;  %v1708_v36 = vmul.f32 %v6686_v11, %v1696_v58 }
 0x921   :  { %v1709_v18 = vmul.f32 %v6665_v50, %v1696_v58  ;;  %v1506_v59 = vadd.f32 %v1486_v8, %v7121_v16  ;;  %v1423_v49 = vmul.f32 %v6680_v17, %v7007_v57  ;;  %v1595_v8 = vadd.f32 %v1574_v26, %v1507_v55 }
 0x922   :  { %1728 = vrot.lane.b32.xlu1 %v1703_v25, %s5861_s16  ;;  %1726 = vrot.lane.b32.xlu2 %v1702_v20, %s5861_s16  ;;  %v1489_v55 = vsel %vm173_vm0, %v6963_v48, %v7011_v38 }
 0x923   :  { %v1594_v23 = vadd.f32 %v7019_v52, %v1506_v59  ;;  %v1422_v52 = vmul.f32 %v6648_v22, %v7007_v57 }
 0x925   :  { %v1510_v59 = vadd.f32 %v1489_v55, %v1422_v52  ;;  %v1491_v52 = vsel %vm173_vm0, %v6969_v29, %v7013_v51 }
 0x927   :  { %v1700_v35 = vpop.permute.xlu1 %1699 }
 0x928   :  { %v1705_v24 = vmul.f32 %v6648_v22, %v1700_v35  ;;  %v1706_v33 = vmul.f32 %v6680_v17, %v1700_v35  ;;  %v1707_v47 = vmul.f32 0.0, %v1700_v35  ;;  %v1711_v25 = vmul.f32 %v6701_v19, %v1700_v35 }
 0x929   :  { %v1712_v20 = vmul.f32 %v6695_v7, %v1700_v35 }
 0x92a   :  { %1732 = vrot.lane.b32.xlu0 %v1705_v24, %s5861_s16  ;;  %1734 = vrot.lane.b32.xlu1 %v1706_v33, %s5861_s16  ;;  %v5586_v33 = vld [vmem:[%s10621_s5 + $0x3] ss:$8 sm:$0x3] }
 0x92b   :  { %1730 = vrot.lane.b32.xlu2 %v1704_v56, %s5861_s16  ;;  %v1785_v58 = vperm.slane %v5586_v33, 0 }
 0x932   :  { %1738 = vrot.lane.b32.xlu0 %v1708_v36, %s5861_s16  ;;  %1740 = vrot.lane.b32.xlu1 %v1709_v18, %s5861_s16  ;;  %v1786_v36 = vperm.slane %v5586_v33, 1  ;;  %v1555_v18 = vpop.permute.xlu2 %1554 }
 0x933   :  { %1736 = vrot.lane.b32.xlu2 %v1707_v47, %s5861_s16  ;;  %v1575_v27 = vsel %vm262_vm1, %v7017_v46, %v1555_v18 }
 0x934   :  { %v1596_v18 = vadd.f32 %v1575_v27, %v1508_v2  ;;  %v10740_v27 = vmov 9  }
 0x935   :  { %5698 = vset.pattern.permute.xlu1 %v10740_v27 }
 0x93a   :  { %1744 = vrot.lane.b32.xlu0 %v1711_v25, %s5861_s16  ;;  %1746 = vrot.lane.b32.xlu1 %v1712_v20, %s5861_s16  ;;  %v1561_v35 = vpop.permute.xlu2 %1560 }
 0x93b   :  { %1742 = vrot.lane.b32.xlu2 %v1704_v56, %s5861_s16  ;;  %v1577_v53 = vsel %vm262_vm1, %v7021_v1, %v1561_v35 }
 0x942   :  { %1787 = vrot.lane.b32.xlu0 %v1785_v58, %s5881_s26  ;;  %1789 = vrot.lane.b32.xlu1 %v1786_v36, %s5881_s26  ;;  %v7096_v24 = vpop.permute.xlu2 %1566 }
 0x943   :  { %1748 = vrot.lane.b32.xlu2 %v1707_v47, %s5861_s16 }
 0x94a   :  { %v7098_v25 = vpop.permute.xlu2 %1572 }
 0x952   :  { %v1639_v56 = vpop.permute.xlu2 %1638 }
 0x953   :  { %v1682_v34 = vadd.f32 %v1639_v56, %v1594_v23  ;;  %v1511_v23 = vadd.f32 %v7011_v38, %v1423_v49 }
 0x955   :  { %v1599_v49 = vadd.f32 %v1577_v53, %v1511_v23 }
 0x95a   :  { %v1643_v20 = vpop.permute.xlu2 %1642 }
 0x95b   :  { %v1663_v43 = vsel %vm363_vm2, %v7057_v12, %v1643_v20 }
 0x95c   :  { %v1684_v46 = vadd.f32 %v1663_v43, %v1596_v18  ;;  %v1509_v43 = vadd.f32 %v1488_v31, %v7144_v32 }
 0x95e   :  { %v1597_v18 = vadd.f32 %v7023_v37, %v1509_v43 }
 0x962   :  { %v1649_v40 = vpop.permute.xlu2 %1648 }
 0x963   :  { %v1665_v35 = vsel %vm363_vm2, %v7061_v5, %v1649_v40  ;;  %v10733_v40 = vmov 4  }
 0x964   :  { %5696 = vset.pattern.permute.xlu2 %v10733_v40  ;;  %v1687_v31 = vadd.f32 %v1665_v35, %v1599_v49  ;;  %5697 = vset.pattern.permute.xlu0 %v10733_v40 }
 0x96a   :  { %v7100_v0 = vpop.permute.xlu2 %1654 }
 0x972   :  { %v7102_v33 = vpop.permute.xlu2 %1660 }
 0x97c   :  { %v1727_v36 = vpop.permute.xlu2 %1726 }
 0x985   :  { %v1731_v62 = vpop.permute.xlu2 %1730 }
 0x98d   :  { %v1737_v20 = vpop.permute.xlu2 %1736 }
 0x994   :  { %v1729_v28 = vpop.permute.xlu1 %1728 }
 0x995   :  { %v1751_v6 = vsel %vm452_vm3, %v1729_v28, %v1731_v62  ;;  %v1750_v17 = vsel %vm452_vm3, %v1727_v36, %v1729_v28  ;;  %v1770_v62 = vadd.f32 %v1727_v36, %v1682_v34  ;;  %v1426_v34 = vmul.f32 %v6665_v50, %v6933_v54 }
 0x996   :  { %v1772_v2 = vadd.f32 %v1751_v6, %v1684_v46  ;;  %v1490_v46 = vsel %vm173_vm0, %v6967_v42, %v6969_v29  ;;  %v1579_v50 = vsel %vm262_vm1, %v7025_v4, %v7096_v24  ;;  %v1743_v29 = vpop.permute.xlu2 %1742 }
 0x997   :  { %v1514_v55 = vadd.f32 %v7013_v51, %v1426_v34  ;;  %v1512_v42 = vadd.f32 %v1490_v46, %v7121_v16  ;;  %v1666_v16 = vsel %vm363_vm2, %v7063_v39, %v7065_v44 }
 0x999   :  { %v1602_v51 = vadd.f32 %v1579_v50, %v1514_v55  ;;  %v1600_v24 = vadd.f32 %v7027_v15, %v1512_v42 }
 0x99b   :  { %v1688_v53 = vadd.f32 %v7063_v39, %v1600_v24  ;;  %v7335_v24 = vld [vmem:[%s10620_s0 + $0x10] sm:$0xff] }
 0x99c   :  { %v7104_v13 = vpop.permute.xlu1 %1734  ;;  %v7106_v58 = vpop.permute.xlu0 %1732 }
 0x99d   :  { %v1753_v6 = vsel %vm452_vm3, %v7104_v13, %v1737_v20  ;;  %v1578_v20 = vsel %vm262_vm1, %v7027_v15, %v7025_v4  ;;  %v1429_v4 = vmul.f32 %v6695_v7, %v7007_v57  ;;  %v1492_v7 = vsel %vm173_vm0, %v6971_v14, %v6973_v10 }
 0x99e   :  { %v1580_v14 = vsel %vm262_vm1, %v7033_v60, %v7031_v9 }
 0x9a4   :  { %v7108_v47 = vpop.permute.xlu1 %1740  ;;  %v7110_v45 = vpop.permute.xlu0 %1738 }
 0x9a5   :  { %v1776_v39 = vadd.f32 %v7110_v45, %v1688_v53  ;;  %v7350_v53 = vld [vmem:[%s10620_s0 + $0x20] sm:$0xff] }
 0x9ac   :  { %v7127_v63 = vpop.permute.xlu1 %1746  ;;  %v7129_v61 = vpop.permute.xlu0 %1744 }
 0x9ad   :  { %10960 = vst [vmem:[#allocation81_spill] sm:$0xff] %v7129_v61  ;;  %v1662_v61 = vsel %vm363_vm2, %v1639_v56, %v7057_v12 }
 0x9ae   :  { %v1683_v12 = vadd.f32 %v1662_v61, %v1595_v8  ;;  %v1576_v61 = vsel %vm262_vm1, %v7023_v37, %v7021_v1  ;;  %v1664_v1 = vsel %vm363_vm2, %v7059_v3, %v7061_v5  ;;  %v1685_v37 = vadd.f32 %v7059_v3, %v1597_v18  ;;  %v1749_v18 = vpop.permute.xlu2 %1748 }
 0x9af   :  { %v1598_v8 = vadd.f32 %v1576_v61, %v1510_v59  ;;  %v1752_v5 = vsel %vm452_vm3, %v7106_v58, %v7104_v13  ;;  %v1775_v3 = vadd.f32 %v1753_v6, %v1687_v31  ;;  %v1425_v13 = vmul.f32 %v6686_v11, %v6933_v54 }
 0x9b0   :  { %v1771_v28 = vadd.f32 %v1750_v17, %v1683_v12  ;;  %v1773_v12 = vadd.f32 %v7106_v58, %v1685_v37  ;;  %v1667_v11 = vsel %vm363_vm2, %v7065_v44, %v7100_v0  ;;  %v1755_v0 = vsel %vm452_vm3, %v7108_v47, %v1743_v29 }
 0x9b1   :  { %v1686_v17 = vadd.f32 %v1664_v1, %v1598_v8  ;;  %v1513_v23 = vadd.f32 %v1491_v52, %v1425_v13  ;;  %v1690_v15 = vadd.f32 %v1667_v11, %v1602_v51  ;;  %v1754_v44 = vsel %vm452_vm3, %v7110_v45, %v7108_v47 }
 0x9b2   :  { %v1517_v59 = vadd.f32 %v7015_v30, %v1429_v4  ;;  %v1581_v47 = vsel %vm262_vm1, %v7031_v9, %v7098_v25  ;;  %v1669_v45 = vsel %vm363_vm2, %v7069_v21, %v7102_v33  ;;  %v1757_v1 = vsel %vm452_vm3, %v7127_v63, %v1749_v18 }
 0x9b3   :  { %v1601_v43 = vadd.f32 %v1578_v20, %v1513_v23  ;;  %v7314_v20 = vld [vmem:[%s10620_s0 + $0x8] sm:$0xff] }
 0x9b4   :  { %v7161_v56 = vpop.permute.xlu1 %1789  ;;  %v7163_v22 = vpop.permute.xlu0 %1787  ;;  %v1605_v49 = vadd.f32 %v1581_v47, %v1517_v59  ;;  %10970 = vst [vmem:[#allocation89_spill] sm:$0xff] %v7314_v20 }
 0x9b5   :  { %v1796_v48 = vmul.f32 %v7163_v22, %v1770_v62  ;;  %v1798_v36 = vmul.f32 %v7161_v56, %v1772_v2  ;;  %v7173_v38 = vsel %vm1791_vm5, %v7163_v22, %v7161_v56  ;;  %v1774_v62 = vadd.f32 %v1752_v5, %v1686_v17 }
 0x9b6   :  { %v1797_v26 = vmul.f32 %v7173_v38, %v1771_v28  ;;  %v1799_v2 = vmul.f32 %v7163_v22, %v1773_v12  ;;  %v1801_v58 = vmul.f32 %v7161_v56, %v1775_v3  ;;  %v1428_v28 = vmul.f32 %v6701_v19, %v7007_v57 }
 0x9b7   :  { %1820 = vrot.lane.b32.xlu2 %v1796_v48, %s5883_s27  ;;  %1824 = vrot.lane.b32.xlu1 %v1798_v36, %s5883_s27  ;;  %v1800_v54 = vmul.f32 %v7173_v38, %v1774_v62  ;;  %v1689_v61 = vadd.f32 %v1666_v16, %v1601_v43  ;;  %v1493_v48 = vsel %vm173_vm0, %v6973_v10, %v7015_v30  ;;  %v10738_v62 = vmov 14   ;;  %v7344_v43 = vld [vmem:[%s10620_s0 + $0x28] sm:$0xff] }
 0x9b8   :  { %1822 = vrot.lane.b32.xlu0 %v1797_v26, %s5883_s27  ;;  %v1778_v36 = vadd.f32 %v1755_v0, %v1690_v15  ;;  %v1515_v19 = vadd.f32 %v1492_v7, %v7144_v32  ;;  %v1802_v57 = vmul.f32 %v7163_v22, %v1776_v39  ;;  %v1516_v26 = vadd.f32 %v1493_v48, %v1428_v28  ;;  %v7365_v7 = vld [vmem:[%s10620_s0 + $0x30] sm:$0xff] }
 0x9b9   :  { %v1777_v35 = vadd.f32 %v1754_v44, %v1689_v61  ;;  %v1668_v32 = vsel %vm363_vm2, %v7067_v41, %v7069_v21  ;;  %v1693_v8 = vadd.f32 %v1669_v45, %v1605_v49  ;;  %v7359_v44 = vld [vmem:[%s10620_s0 + $0x38] sm:$0xff]  ;;  %v10972_v48 = vmov 0  }
 0x9ba   :  { %v1804_v10 = vmul.f32 %v7161_v56, %v1778_v36  ;;  %v1603_v25 = vadd.f32 %v7033_v60, %v1515_v19  ;;  %v1604_v9 = vadd.f32 %v1580_v14, %v1516_v26  ;;  %v10961_v60 = vld [vmem:[#allocation81_spill] sm:$0xff] }
 0x9bb   :  { %v1803_v30 = vmul.f32 %v7173_v38, %v1777_v35  ;;  %v1756_v6 = vsel %vm452_vm3, %v10961_v60, %v7127_v63  ;;  %v1781_v21 = vadd.f32 %v1757_v1, %v1693_v8  ;;  %v7279_v63 = vld [vmem:[%s10619_s1] sm:$0xff] }
 0x9bc   :  { %v1691_v33 = vadd.f32 %v7067_v41, %v1603_v25  ;;  %v1692_v37 = vadd.f32 %v1668_v32, %v1604_v9  ;;  %v7286_v41 = vld [vmem:[%s10619_s1 + $0x8] sm:$0xff]  ;;  %s5888_s1 = smov 98  }
 0x9bd   :  { %v1807_v46 = vmul.f32 %v7161_v56, %v1781_v21 }
 0x9be   :  { %v1779_v31 = vadd.f32 %v10961_v60, %v1691_v33  ;;  %v1780_v5 = vadd.f32 %v1756_v6, %v1692_v37 }
 0x9bf   :  { %1826 = vrot.lane.b32.xlu2 %v1799_v2, %s5883_s27  ;;  %1830 = vrot.lane.b32.xlu1 %v1801_v58, %s5883_s27  ;;  %v7320_v2 = vld [vmem:[%s10620_s0] sm:$0xff] }
 0x9c0   :  { %1828 = vrot.lane.b32.xlu0 %v1800_v54, %s5883_s27  ;;  %v1805_v34 = vmul.f32 %v7163_v22, %v1779_v31  ;;  %v1806_v17 = vmul.f32 %v7173_v38, %v1780_v5  ;;  %10971 = vst [vmem:[#allocation90_spill] sm:$0xff] %v7320_v2  ;;  %v7329_v54 = vld [vmem:[%s10620_s0 + $0x18] sm:$0xff] }
 0x9c7   :  { %1832 = vrot.lane.b32.xlu2 %v1802_v57, %s5883_s27  ;;  %1836 = vrot.lane.b32.xlu1 %v1804_v10, %s5883_s27  ;;  %v10735_v10 = vmov 19  }
 0x9c8   :  { %1834 = vrot.lane.b32.xlu0 %v1803_v30, %s5883_s27 }
 0x9cf   :  { %1838 = vrot.lane.b32.xlu2 %v1805_v34, %s5883_s27  ;;  %1842 = vrot.lane.b32.xlu1 %v1807_v46, %s5883_s27 }
 0x9d0   :  { %1840 = vrot.lane.b32.xlu0 %v1806_v17, %s5883_s27 }
 0x9d7   :  { %1898 = vperm.xlu1 %5698, %v7279_v63   ;;  %1878 = vperm.xlu2 %5696, %v7279_v63  }
 0x9d8   :  { %1882 = vperm.xlu0 %5697, %v7286_v41  }
 0x9df   :  { %5699 = vset.pattern.permute.xlu2 %v10740_v27  ;;  %5700 = vset.pattern.permute.xlu1 %v10738_v62 }
 0x9e0   :  { %1902 = vperm.xlu2 %5699, %v7286_v41   ;;  %5702 = vset.pattern.permute.xlu0 %v10735_v10 }
 0x9e8   :  { %5701 = vset.pattern.permute.xlu2 %v10738_v62 }
 0xa11   :  { %v7291_v56 = vpop.permute.xlu2 %1820 }
 0xa12   :  { %10962 = vst [vmem:[#allocation81_spill] sm:$0xff] %v7291_v56 }
 0xa19   :  { %v7293_v22 = vpop.permute.xlu2 %1826 }
 0xa1a   :  { %10963 = vst [vmem:[#allocation82_spill] sm:$0xff] %v7293_v22 }
 0xa21   :  { %v7297_v52 = vpop.permute.xlu2 %1832 }
 0xa22   :  { %10965 = vst [vmem:[#allocation84_spill] sm:$0xff] %v7297_v52 }
 0xa29   :  { %v7295_v38 = vpop.permute.xlu1 %1824  ;;  %v7303_v13 = vpop.permute.xlu2 %1838 }
 0xa2a   :  { %10964 = vst [vmem:[#allocation83_spill] sm:$0xff] %v7295_v38  ;;  %v7412_v6 = vpop.permute.xlu0 %1822 }
 0xa2b   :  { %10968 = vst [vmem:[#allocation87_spill] sm:$0xff] %v7303_v13 }
 0xa2c   :  { %10973 = vst [vmem:[#allocation91_spill] sm:$0xff] %v7412_v6 }
 0xa31   :  { %v7299_v3 = vpop.permute.xlu1 %1830  ;;  %v7307_v50 = vpop.permute.xlu2 %1878 }
 0xa32   :  { %10966 = vst [vmem:[#allocation85_spill] sm:$0xff] %v7299_v3  ;;  %v7416_v37 = vpop.permute.xlu0 %1828  ;;  %v7536_v52 = vmul.f32 0.0, %v7307_v50 }
 0xa33   :  { %10974 = vst [vmem:[#allocation92_spill] sm:$0xff] %v7416_v37 }
 0xa39   :  { %v7301_v12 = vpop.permute.xlu1 %1836 }
 0xa3a   :  { %10967 = vst [vmem:[#allocation86_spill] sm:$0xff] %v7301_v12  ;;  %v1903_v11 = vpop.permute.xlu2 %1902  ;;  %v7418_v21 = vpop.permute.xlu0 %1834 }
 0xa3b   :  { %v1910_v51 = vmul.f32 %v7329_v54, %v1903_v11  ;;  %v1909_v16 = vmul.f32 %v7335_v24, %v1903_v11  ;;  %v1908_v4 = vmul.f32 0.0, %v1903_v11  ;;  %v1916_v28 = vmul.f32 %v7359_v44, %v1903_v11  ;;  %10975 = vst [vmem:[#allocation93_spill] sm:$0xff] %v7418_v21 }
 0xa3c   :  { %v1915_v61 = vmul.f32 %v7365_v7, %v1903_v11  ;;  %v1886_v21 = vmul.f32 %v7320_v2, %v7307_v50 }
 0xa41   :  { %v7305_v55 = vpop.permute.xlu1 %1842 }
 0xa42   :  { %10969 = vst [vmem:[#allocation88_spill] sm:$0xff] %v7305_v55  ;;  %v7420_v31 = vpop.permute.xlu0 %1840 }
 0xa43   :  { %10976 = vst [vmem:[#allocation94_spill] sm:$0xff] %v7420_v31  ;;  %v1887_v31 = vmul.f32 %v7314_v20, %v7307_v50 }
 0xa49   :  { %v1899_v42 = vpop.permute.xlu1 %1898 }
 0xa4a   :  { %v1907_v29 = vmul.f32 %v7314_v20, %v1899_v42  ;;  %v1906_v58 = vmul.f32 %v7320_v2, %v1899_v42  ;;  %v1905_v23 = vmul.f32 0.0, %v1899_v42  ;;  %v1913_v0 = vmul.f32 %v7344_v43, %v1899_v42  ;;  %v7422_v5 = vpop.permute.xlu0 %1882 }
 0xa4b   :  { %v1912_v15 = vmul.f32 %v7350_v53, %v1899_v42 }
 0xa4c   :  { %1933 = vrot.lane.b32.xlu0 %v1907_v29, %s5857_s19  ;;  %1931 = vrot.lane.b32.xlu2 %v1906_v58, %s5857_s19 }
 0xa4d   :  { %1929 = vrot.lane.b32.xlu1 %v1905_v23, %s5857_s19 }
 0xa54   :  { %1939 = vrot.lane.b32.xlu0 %v1910_v51, %s5857_s19  ;;  %1937 = vrot.lane.b32.xlu2 %v1909_v16, %s5857_s19 }
 0xa55   :  { %1935 = vrot.lane.b32.xlu1 %v1908_v4, %s5857_s19 }
 0xa5c   :  { %1945 = vrot.lane.b32.xlu0 %v1913_v0, %s5857_s19  ;;  %1943 = vrot.lane.b32.xlu2 %v1912_v15, %s5857_s19 }
 0xa5d   :  { %1941 = vrot.lane.b32.xlu1 %v1905_v23, %s5857_s19 }
 0xa64   :  { %1951 = vrot.lane.b32.xlu0 %v1916_v28, %s5857_s19  ;;  %1949 = vrot.lane.b32.xlu2 %v1915_v61, %s5857_s19 }
 0xa65   :  { %1947 = vrot.lane.b32.xlu1 %v1908_v4, %s5857_s19  ;;  %v10736_v4 = vmov 24  }
 0xa6c   :  { %1990 = vperm.xlu2 %5701, %v7286_v41  }
 0xa6d   :  { %1986 = vperm.xlu1 %5700, %v7279_v63  }
 0xa74   :  { %5706 = vset.pattern.permute.xlu2 %v10972_v48 }
 0xa75   :  { %5703 = vset.pattern.permute.xlu1 %v10735_v10 }
 0xaa6   :  { %v7374_v36 = vpop.permute.xlu2 %1931 }
 0xaae   :  { %v7378_v59 = vpop.permute.xlu2 %1937 }
 0xab6   :  { %v7384_v19 = vpop.permute.xlu2 %1943 }
 0xabe   :  { %v7388_v57 = vpop.permute.xlu2 %1949  ;;  %v7424_v34 = vpop.permute.xlu0 %1933 }
 0xabf   :  { %v7376_v39 = vpop.permute.xlu1 %1929  ;;  %v1954_v12 = vsel %vm173_vm0, %v7374_v36, %v7424_v34 }
 0xac0   :  { %v1953_v13 = vsel %vm173_vm0, %v7376_v39, %v7374_v36  ;;  %v1975_v39 = vadd.f32 %v7424_v34, %v1887_v31  ;;  %v1974_v56 = vadd.f32 %v1954_v12, %v1886_v21  ;;  %v7559_v31 = vmul.f32 0.0, %v7422_v5 }
 0xac1   :  { %v1973_v38 = vadd.f32 %v1953_v13, %v7536_v52 }
 0xac6   :  { %v1991_v25 = vpop.permute.xlu2 %1990  ;;  %v7426_v46 = vpop.permute.xlu0 %1939 }
 0xac7   :  { %v7380_v47 = vpop.permute.xlu1 %1935  ;;  %v1997_v32 = vmul.f32 %v7329_v54, %v1991_v25  ;;  %v1996_v18 = vmul.f32 %v7335_v24, %v1991_v25  ;;  %v1998_v9 = vmul.f32 0.0, %v1991_v25  ;;  %v2003_v8 = vmul.f32 %v7359_v44, %v1991_v25 }
 0xac8   :  { %v2002_v60 = vmul.f32 %v7365_v7, %v1991_v25  ;;  %v1955_v12 = vsel %vm173_vm0, %v7380_v47, %v7378_v59 }
 0xac9   :  { %v1976_v47 = vadd.f32 %v1955_v12, %v7559_v31 }
 0xace   :  { %v7428_v17 = vpop.permute.xlu0 %1945 }
 0xacf   :  { %v7382_v35 = vpop.permute.xlu1 %1941 }
 0xad6   :  { %v7430_v42 = vpop.permute.xlu0 %1951 }
 0xad7   :  { %v7386_v14 = vpop.permute.xlu1 %1947 }
 0xadf   :  { %v1987_v26 = vpop.permute.xlu1 %1986 }
 0xae0   :  { %v1994_v45 = vmul.f32 %v7314_v20, %v1987_v26  ;;  %v1993_v30 = vmul.f32 %v7320_v2, %v1987_v26  ;;  %v1995_v49 = vmul.f32 0.0, %v1987_v26  ;;  %v2000_v1 = vmul.f32 %v7344_v43, %v1987_v26 }
 0xae1   :  { %v1999_v33 = vmul.f32 %v7350_v53, %v1987_v26 }
 0xae2   :  { %2019 = vrot.lane.b32.xlu1 %v1994_v45, %s5858_s15  ;;  %2017 = vrot.lane.b32.xlu0 %v1993_v30, %s5858_s15 }
 0xae3   :  { %2021 = vrot.lane.b32.xlu2 %v1995_v49, %s5858_s15 }
 0xaea   :  { %2025 = vrot.lane.b32.xlu1 %v1997_v32, %s5858_s15  ;;  %2023 = vrot.lane.b32.xlu0 %v1996_v18, %s5858_s15 }
 0xaeb   :  { %2027 = vrot.lane.b32.xlu2 %v1998_v9, %s5858_s15 }
 0xaf2   :  { %2031 = vrot.lane.b32.xlu1 %v2000_v1, %s5858_s15  ;;  %2029 = vrot.lane.b32.xlu0 %v1999_v33, %s5858_s15 }
 0xaf3   :  { %2033 = vrot.lane.b32.xlu2 %v1995_v49, %s5858_s15 }
 0xafa   :  { %2037 = vrot.lane.b32.xlu1 %v2003_v8, %s5858_s15  ;;  %2035 = vrot.lane.b32.xlu0 %v2002_v60, %s5858_s15  ;;  %v10977_v8 = vmov 10  }
 0xafb   :  { %2039 = vrot.lane.b32.xlu2 %v1998_v9, %s5858_s15 }
 0xb02   :  { %2078 = vperm.xlu1 %5703, %v7286_v41   ;;  %2074 = vperm.xlu0 %5702, %v7279_v63  }
 0xb0a   :  { %5704 = vset.pattern.permute.xlu0 %v10736_v4  ;;  %5705 = vset.pattern.permute.xlu1 %v10736_v4 }
 0xb54   :  { %v7432_v29 = vpop.permute.xlu1 %2019  ;;  %v7434_v58 = vpop.permute.xlu0 %2017 }
 0xb55   :  { %v2041_v36 = vsel %vm262_vm1, %v7434_v58, %v7432_v29 }
 0xb56   :  { %v2062_v13 = vadd.f32 %v2041_v36, %v1974_v56 }
 0xb5c   :  { %v7436_v23 = vpop.permute.xlu1 %2025  ;;  %v7438_v11 = vpop.permute.xlu0 %2023 }
 0xb64   :  { %v7440_v51 = vpop.permute.xlu1 %2031  ;;  %v7442_v16 = vpop.permute.xlu0 %2029 }
 0xb6c   :  { %v7446_v0 = vpop.permute.xlu1 %2037  ;;  %v7448_v15 = vpop.permute.xlu0 %2035 }
 0xb74   :  { %v2079_v28 = vpop.permute.xlu1 %2078  ;;  %v2075_v61 = vpop.permute.xlu0 %2074 }
 0xb75   :  { %v2084_v26 = vmul.f32 %v7335_v24, %v2079_v28  ;;  %v2082_v45 = vmul.f32 %v7314_v20, %v2075_v61  ;;  %v2081_v30 = vmul.f32 %v7320_v2, %v2075_v61  ;;  %v2087_v49 = vmul.f32 %v7350_v53, %v2075_v61 }
 0xb76   :  { %v2085_v25 = vmul.f32 %v7329_v54, %v2079_v28  ;;  %v2083_v32 = vmul.f32 0.0, %v2075_v61  ;;  %v2090_v18 = vmul.f32 %v7365_v7, %v2079_v28  ;;  %v2088_v9 = vmul.f32 %v7344_v43, %v2075_v61 }
 0xb77   :  { %2111 = vrot.lane.b32.xlu0 %v2084_v26, %s5860_s2  ;;  %2107 = vrot.lane.b32.xlu1 %v2082_v45, %s5860_s2  ;;  %v2086_v1 = vmul.f32 0.0, %v2079_v28  ;;  %v2091_v33 = vmul.f32 %v7359_v44, %v2079_v28 }
 0xb78   :  { %2105 = vrot.lane.b32.xlu2 %v2081_v30, %s5860_s2 }
 0xb7f   :  { %2117 = vrot.lane.b32.xlu0 %v2087_v49, %s5860_s2  ;;  %2113 = vrot.lane.b32.xlu1 %v2085_v25, %s5860_s2 }
 0xb80   :  { %2109 = vrot.lane.b32.xlu2 %v2083_v32, %s5860_s2 }
 0xb87   :  { %2123 = vrot.lane.b32.xlu0 %v2090_v18, %s5860_s2  ;;  %2119 = vrot.lane.b32.xlu1 %v2088_v9, %s5860_s2 }
 0xb88   :  { %2115 = vrot.lane.b32.xlu2 %v2086_v1, %s5860_s2 }
 0xb8f   :  { %2162 = vperm.xlu0 %5704, %v7279_v63   ;;  %2125 = vrot.lane.b32.xlu1 %v2091_v33, %s5860_s2 }
 0xb90   :  { %2121 = vrot.lane.b32.xlu2 %v2083_v32, %s5860_s2 }
 0xb97   :  { %2166 = vperm.xlu1 %5705, %v7286_v41   ;;  %5710 = vset.pattern.permute.xlu0 %v10977_v8 }
 0xb98   :  { %2127 = vrot.lane.b32.xlu2 %v2086_v1, %s5860_s2 }
 0xb9f   :  { %5707 = vset.pattern.permute.xlu1 %v10972_v48 }
 0xbe9   :  { %v7474_v60 = vpop.permute.xlu1 %2107  ;;  %v7476_v61 = vpop.permute.xlu0 %2111 }
 0xbf1   :  { %v7478_v26 = vpop.permute.xlu1 %2113  ;;  %v7480_v28 = vpop.permute.xlu0 %2117 }
 0xbf9   :  { %v7482_v63 = vpop.permute.xlu1 %2119  ;;  %v7484_v45 = vpop.permute.xlu0 %2123 }
 0xc01   :  { %v7486_v30 = vpop.permute.xlu1 %2125  ;;  %v2163_v41 = vpop.permute.xlu0 %2162 }
 0xc02   :  { %v2170_v49 = vmul.f32 %v7314_v20, %v2163_v41  ;;  %v2169_v25 = vmul.f32 %v7320_v2, %v2163_v41  ;;  %v2171_v1 = vmul.f32 0.0, %v2163_v41  ;;  %v2175_v33 = vmul.f32 %v7350_v53, %v2163_v41 }
 0xc03   :  { %v2176_v40 = vmul.f32 %v7344_v43, %v2163_v41  ;;  %v5587_v41 = vld [vmem:[%s10621_s5 + $0x4] ss:$8 sm:$0x3]  ;;  %v2061_v20 = vadd.f32 %v7434_v58, %v1973_v38 }
 0xc04   :  { %2195 = vrot.lane.b32.xlu1 %v2170_v49, %s5861_s16  ;;  %2193 = vrot.lane.b32.xlu2 %v2169_v25, %s5861_s16 }
 0xc09   :  { %v2167_v32 = vpop.permute.xlu1 %2166 }
 0xc0a   :  { %v2172_v18 = vmul.f32 %v7335_v24, %v2167_v32  ;;  %v2173_v9 = vmul.f32 %v7329_v54, %v2167_v32  ;;  %v2174_v10 = vmul.f32 0.0, %v2167_v32  ;;  %v2178_v49 = vmul.f32 %v7365_v7, %v2167_v32 }
 0xc0b   :  { %v2179_v25 = vmul.f32 %v7359_v44, %v2167_v32 }
 0xc0c   :  { %2199 = vrot.lane.b32.xlu0 %v2172_v18, %s5861_s16  ;;  %2201 = vrot.lane.b32.xlu1 %v2173_v9, %s5861_s16  ;;  %v2252_v18 = vperm.slane %v5587_v41, 0  ;;  %v2253_v9 = vperm.slane %v5587_v41, 1 }
 0xc0d   :  { %2197 = vrot.lane.b32.xlu2 %v2171_v1, %s5861_s16 }
 0xc14   :  { %2205 = vrot.lane.b32.xlu0 %v2175_v33, %s5861_s16  ;;  %2207 = vrot.lane.b32.xlu1 %v2176_v40, %s5861_s16  ;;  %v2022_v40 = vpop.permute.xlu2 %2021 }
 0xc15   :  { %2203 = vrot.lane.b32.xlu2 %v2174_v10, %s5861_s16  ;;  %v2042_v3 = vsel %vm262_vm1, %v7432_v29, %v2022_v40  ;;  %v1889_v29 = vmul.f32 %v7335_v24, %v7422_v5 }
 0xc16   :  { %v2063_v2 = vadd.f32 %v2042_v3, %v1975_v39 }
 0xc1c   :  { %2211 = vrot.lane.b32.xlu0 %v2178_v49, %s5861_s16  ;;  %2213 = vrot.lane.b32.xlu1 %v2179_v25, %s5861_s16  ;;  %v2028_v32 = vpop.permute.xlu2 %2027 }
 0xc1d   :  { %2209 = vrot.lane.b32.xlu2 %v2171_v1, %s5861_s16 }
 0xc24   :  { %2254 = vrot.lane.b32.xlu0 %v2252_v18, %s5888_s1  ;;  %2256 = vrot.lane.b32.xlu1 %v2253_v9, %s5888_s1  ;;  %v7513_v33 = vpop.permute.xlu2 %2033 }
 0xc25   :  { %2215 = vrot.lane.b32.xlu2 %v2174_v10, %s5861_s16 }
 0xc2c   :  { %v7515_v49 = vpop.permute.xlu2 %2039 }
 0xc34   :  { %v2106_v1 = vpop.permute.xlu2 %2105 }
 0xc35   :  { %v2129_v40 = vsel %vm363_vm2, %v2106_v1, %v7474_v60  ;;  %v2149_v21 = vadd.f32 %v2106_v1, %v2061_v20  ;;  %v2044_v20 = vsel %vm262_vm1, %v7436_v23, %v2028_v32  ;;  %v2043_v1 = vsel %vm262_vm1, %v7438_v11, %v7436_v23 }
 0xc36   :  { %v2150_v58 = vadd.f32 %v2129_v40, %v2062_v13  ;;  %v2064_v13 = vadd.f32 %v7438_v11, %v1976_v47  ;;  %v2131_v23 = vsel %vm363_vm2, %v7476_v61, %v7478_v26 }
 0xc3c   :  { %v2110_v25 = vpop.permute.xlu2 %2109 }
 0xc3d   :  { %v2130_v6 = vsel %vm363_vm2, %v7474_v60, %v2110_v25  ;;  %v1956_v60 = vsel %vm173_vm0, %v7378_v59, %v7426_v46 }
 0xc3e   :  { %v2151_v3 = vadd.f32 %v2130_v6, %v2063_v2 }
 0xc44   :  { %v2116_v4 = vpop.permute.xlu2 %2115 }
 0xc45   :  { %v2132_v32 = vsel %vm363_vm2, %v7478_v26, %v2116_v4  ;;  %v2152_v4 = vadd.f32 %v7476_v61, %v2064_v13  ;;  %v1957_v26 = vsel %vm173_vm0, %v7382_v35, %v7384_v19  ;;  %v1892_v61 = vmul.f32 %v7350_v53, %v7307_v50 }
 0xc46   :  { %v1979_v35 = vadd.f32 %v1957_v26, %v7536_v52  ;;  %v2133_v52 = vsel %vm363_vm2, %v7480_v28, %v7482_v63 }
 0xc4c   :  { %v7517_v62 = vpop.permute.xlu2 %2121 }
 0xc54   :  { %v7519_v41 = vpop.permute.xlu2 %2127 }
 0xc5e   :  { %v2194_v9 = vpop.permute.xlu2 %2193 }
 0xc5f   :  { %v2237_v56 = vadd.f32 %v2194_v9, %v2149_v21 }
 0xc67   :  { %v2198_v55 = vpop.permute.xlu2 %2197 }
 0xc6f   :  { %v2204_v25 = vpop.permute.xlu2 %2203 }
 0xc76   :  { %v2196_v27 = vpop.permute.xlu1 %2195 }
 0xc77   :  { %v2218_v34 = vsel %vm452_vm3, %v2196_v27, %v2198_v55  ;;  %v2217_v38 = vsel %vm452_vm3, %v2194_v9, %v2196_v27 }
 0xc78   :  { %v2239_v55 = vadd.f32 %v2218_v34, %v2151_v3  ;;  %v2238_v27 = vadd.f32 %v2217_v38, %v2150_v58  ;;  %v1893_v3 = vmul.f32 %v7344_v43, %v7307_v50  ;;  %v2134_v50 = vsel %vm363_vm2, %v7482_v63, %v7517_v62 }
 0xc7e   :  { %v2202_v48 = vpop.permute.xlu1 %2201  ;;  %v7521_v18 = vpop.permute.xlu0 %2199 }
 0xc7f   :  { %v2220_v12 = vsel %vm452_vm3, %v2202_v48, %v2204_v25  ;;  %v2219_v11 = vsel %vm452_vm3, %v7521_v18, %v2202_v48  ;;  %v1981_v48 = vadd.f32 %v7428_v17, %v1893_v3 }
 0xc86   :  { %v7523_v8 = vpop.permute.xlu1 %2207  ;;  %v7525_v10 = vpop.permute.xlu0 %2205 }
 0xc87   :  { %v2221_v63 = vsel %vm452_vm3, %v7525_v10, %v7523_v8 }
 0xc8e   :  { %v7542_v22 = vpop.permute.xlu1 %2213  ;;  %v7544_v37 = vpop.permute.xlu0 %2211 }
 0xc8f   :  { %10978 = vst [vmem:[#allocation95_spill] sm:$0xff] %v7544_v37  ;;  %v1890_v37 = vmul.f32 %v7329_v54, %v7422_v5 }
 0xc91   :  { %v1978_v39 = vadd.f32 %v7426_v46, %v1890_v37  ;;  %v1977_v46 = vadd.f32 %v1956_v60, %v1889_v29  ;;  %v1958_v29 = vsel %vm173_vm0, %v7384_v19, %v7428_v17  ;;  %v2240_v60 = vadd.f32 %v7521_v18, %v2152_v4  ;;  %v2210_v19 = vpop.permute.xlu2 %2209 }
 0xc92   :  { %v1980_v47 = vadd.f32 %v1958_v29, %v1892_v61  ;;  %v2222_v62 = vsel %vm452_vm3, %v7523_v8, %v2210_v19  ;;  %v2048_v8 = vsel %vm262_vm1, %v7446_v0, %v7515_v49 }
 0xc93   :  { %v2066_v40 = vadd.f32 %v2044_v20, %v1978_v39  ;;  %v2065_v34 = vadd.f32 %v2043_v1, %v1977_v46  ;;  %v2067_v20 = vadd.f32 %v7442_v16, %v1979_v35  ;;  %v10982_v35 = vld [vmem:[#allocation11_spill] sm:$0xff] }
 0xc95   :  { %v2154_v21 = vadd.f32 %v2132_v32, %v2066_v40  ;;  %v2153_v38 = vadd.f32 %v2131_v23, %v2065_v34  ;;  %v2155_v1 = vadd.f32 %v7480_v28, %v2067_v20  ;;  %v1960_v32 = vsel %vm173_vm0, %v7388_v57, %v7430_v42  ;;  %v10988_v20 = vld [vmem:[#allocation14_spill] sm:$0xff] }
 0xc96   :  { %v7575_v2 = vpop.permute.xlu1 %2256  ;;  %v7577_v6 = vpop.permute.xlu0 %2254 }
 0xc97   :  { %v2263_v59 = vmul.f32 %v7577_v6, %v2237_v56  ;;  %v2265_v9 = vmul.f32 %v7575_v2, %v2239_v55  ;;  %v7587_v37 = vsel %vm2258_vm6, %v7577_v6, %v7575_v2  ;;  %v2242_v58 = vadd.f32 %v2220_v12, %v2154_v21 }
 0xc98   :  { %v2264_v36 = vmul.f32 %v7587_v37, %v2238_v27  ;;  %v2046_v56 = vsel %vm262_vm1, %v7440_v51, %v7513_v33  ;;  %v2241_v25 = vadd.f32 %v2219_v11, %v2153_v38  ;;  %v2045_v55 = vsel %vm262_vm1, %v7442_v16, %v7440_v51 }
 0xc99   :  { %2287 = vrot.lane.b32.xlu2 %v2263_v59, %s5889_s17  ;;  %2291 = vrot.lane.b32.xlu1 %v2265_v9, %s5889_s17  ;;  %v2266_v39 = vmul.f32 %v7577_v6, %v2240_v60  ;;  %v2268_v18 = vmul.f32 %v7575_v2, %v2242_v58  ;;  %v2069_v33 = vadd.f32 %v2046_v56, %v1981_v48  ;;  %v2216_v4 = vpop.permute.xlu2 %2215  ;;  %v10981_v48 = vld [vmem:[#allocation89_spill] sm:$0xff] }
 0xc9a   :  { %2289 = vrot.lane.b32.xlu0 %v2264_v36, %s5889_s17  ;;  %v2267_v17 = vmul.f32 %v7587_v37, %v2241_v25  ;;  %v1896_v51 = vmul.f32 %v7359_v44, %v7422_v5  ;;  %v2068_v27 = vadd.f32 %v2045_v55, %v1980_v47  ;;  %v1895_v59 = vmul.f32 %v7365_v7, %v7422_v5 }
 0xc9b   :  { %v2157_v16 = vadd.f32 %v2134_v50, %v2069_v33  ;;  %v1959_v9 = vsel %vm173_vm0, %v7386_v14, %v7388_v57  ;;  %v2243_v28 = vadd.f32 %v7525_v10, %v2155_v1  ;;  %v2047_v14 = vsel %vm262_vm1, %v7448_v15, %v7446_v0  ;;  %v10987_v33 = vld [vmem:[#allocation15_spill] sm:$0xff] }
 0xc9c   :  { %v2156_v46 = vadd.f32 %v2133_v52, %v2068_v27  ;;  %v1984_v40 = vadd.f32 %v7430_v42, %v1896_v51  ;;  %v1982_v5 = vadd.f32 %v1959_v9, %v7559_v31  ;;  %v1983_v34 = vadd.f32 %v1960_v32, %v1895_v59  ;;  %v10989_v52 = vld [vmem:[#allocation31_spill] sm:$0xff]  ;;  %v10990_v27 = vld [vmem:[#allocation17_spill] sm:$0xff]  ;;  %v10994_v9 = vld [vmem:[#allocation18_spill] sm:$0xff] }
 0xc9d   :  { %v2245_v36 = vadd.f32 %v2222_v62, %v2157_v16  ;;  %v2269_v23 = vmul.f32 %v7577_v6, %v2243_v28  ;;  %v2136_v42 = vsel %vm363_vm2, %v7486_v30, %v7519_v41  ;;  %v2135_v31 = vsel %vm363_vm2, %v7484_v45, %v7486_v30  ;;  %v10991_v62 = vld [vmem:[#allocation16_spill] sm:$0xff]  ;;  %v10992_v16 = vld [vmem:[#allocation34_spill] sm:$0xff]  ;;  %v10993_v59 = vld [vmem:[#allocation19_spill] sm:$0xff] }
 0xc9e   :  { %v2244_v13 = vadd.f32 %v2221_v63, %v2156_v46  ;;  %v2072_v12 = vadd.f32 %v2048_v8, %v1984_v40  ;;  %v2070_v49 = vadd.f32 %v7448_v15, %v1982_v5  ;;  %v2071_v0 = vadd.f32 %v2047_v14, %v1983_v34  ;;  %v10979_v15 = vld [vmem:[#allocation95_spill] sm:$0xff] }
 0xc9f   :  { %v2271_v57 = vmul.f32 %v7575_v2, %v2245_v36  ;;  %v2224_v21 = vsel %vm452_vm3, %v7542_v22, %v2216_v4  ;;  %v2223_v3 = vsel %vm452_vm3, %v10979_v15, %v7542_v22  ;;  %v109_v50 = vmul.f32 %v7335_v24, %v10982_v35  ;;  %v10995_v36 = vld [vmem:[#allocation36_spill] sm:$0xff] }
 0xca0   :  { %v2270_v10 = vmul.f32 %v7587_v37, %v2244_v13  ;;  %v2158_v41 = vadd.f32 %v7484_v45, %v2070_v49  ;;  %v2160_v11 = vadd.f32 %v2136_v42, %v2072_v12  ;;  %v2159_v26 = vadd.f32 %v2135_v31, %v2071_v0  ;;  %v10980_v45 = vld [vmem:[#allocation9_spill] sm:$0xff]  ;;  %v10998_v49 = vld [vmem:[#allocation39_spill] sm:$0xff] }
 0xca1   :  { %2293 = vrot.lane.b32.xlu2 %v2266_v39, %s5889_s17  ;;  %2297 = vrot.lane.b32.xlu1 %v2268_v18, %s5889_s17  ;;  %v107_v22 = vmul.f32 %v10981_v48, %v10980_v45  ;;  %v113_v56 = vmul.f32 %v7344_v43, %v10980_v45  ;;  %v105_v25 = vmul.f32 0.0, %v10980_v45  ;;  %v112_v19 = vmul.f32 %v7350_v53, %v10980_v45  ;;  %v10984_v39 = vld [vmem:[#allocation13_spill] sm:$0xff]  ;;  %v10985_v18 = vld [vmem:[#allocation12_spill] sm:$0xff] }
 0xca2   :  { %2295 = vrot.lane.b32.xlu0 %v2267_v17, %s5889_s17  ;;  %v2248_v30 = vadd.f32 %v2224_v21, %v2160_v11  ;;  %v2246_v38 = vadd.f32 %v10979_v15, %v2158_v41  ;;  %v2247_v29 = vadd.f32 %v2223_v3, %v2159_v26  ;;  %v174_v47 = vsel %vm173_vm0, %v10985_v18, %v10984_v39  ;;  %v10986_v17 = vld [vmem:[#allocation26_spill] sm:$0xff]  ;;  %v10996_v42 = vld [vmem:[#allocation21_spill] sm:$0xff]  ;;  %v10999_v21 = vld [vmem:[#allocation23_spill] sm:$0xff] }
 0xca3   :  { %v108_v43 = vmul.f32 0.0, %v10982_v35  ;;  %v176_v53 = vsel %vm173_vm0, %v10988_v20, %v10987_v33  ;;  %v177_v51 = vsel %vm173_vm0, %v10987_v33, %v10989_v52  ;;  %v178_v1 = vsel %vm173_vm0, %v10991_v62, %v10990_v27  ;;  %v11000_v41 = vld [vmem:[#allocation20_spill] sm:$0xff] }
 0xca4   :  { %v2272_v58 = vmul.f32 %v7577_v6, %v2246_v38  ;;  %v2274_v60 = vmul.f32 %v7575_v2, %v2248_v30  ;;  %v2273_v61 = vmul.f32 %v7587_v37, %v2247_v29  ;;  %v110_v6 = vmul.f32 %v7329_v54, %v10982_v35  ;;  %v10983_v37 = vld [vmem:[#allocation90_spill] sm:$0xff]  ;;  %v11001_v15 = vld [vmem:[#allocation40_spill] sm:$0xff]  ;;  %v11002_v30 = vld [vmem:[#allocation41_spill] sm:$0xff] }
 0xca5   :  { %v116_v2 = vmul.f32 %v7359_v44, %v10982_v35  ;;  %v106_v55 = vmul.f32 %v10983_v37, %v10980_v45  ;;  %v115_v54 = vmul.f32 %v7365_v7, %v10982_v35  ;;  %v175_v44 = vsel %vm173_vm0, %v10984_v39, %v10986_v17  ;;  %v11003_v29 = vld [vmem:[#allocation25_spill] sm:$0xff]  ;;  %v11007_v35 = vld [vmem:[#allocation24_spill] sm:$0xff]  ;;  %v11009_v39 = vld [vmem:[#allocation30_spill] sm:$0xff] }
 0xca6   :  { %v196_v24 = vadd.f32 %v10986_v17, %v107_v22  ;;  %v199_v7 = vadd.f32 %v10989_v52, %v110_v6  ;;  %v179_v63 = vsel %vm173_vm0, %v10990_v27, %v10992_v16  ;;  %v180_v46 = vsel %vm173_vm0, %v10994_v9, %v10993_v59  ;;  %v11005_v22 = vld [vmem:[#allocation42_spill] sm:$0xff] }
 0xca7   :  { %v202_v32 = vadd.f32 %v10992_v16, %v113_v56  ;;  %v205_v28 = vadd.f32 %v10995_v36, %v116_v2  ;;  %v194_v40 = vadd.f32 %v174_v47, %v105_v25  ;;  %v181_v8 = vsel %vm173_vm0, %v10993_v59, %v10995_v36  ;;  %v11010_v47 = vld [vmem:[#allocation43_spill] sm:$0xff]  ;;  %v11014_v27 = vld [vmem:[#allocation50_spill] sm:$0xff]  ;;  %v11018_v36 = vld [vmem:[#allocation48_spill] sm:$0xff] }
 0xca8   :  { %v195_v13 = vadd.f32 %v175_v44, %v106_v55  ;;  %v197_v5 = vadd.f32 %v176_v53, %v108_v43  ;;  %v198_v14 = vadd.f32 %v177_v51, %v109_v50  ;;  %v203_v34 = vadd.f32 %v180_v46, %v108_v43  ;;  %v11011_v44 = vld [vmem:[#allocation27_spill] sm:$0xff]  ;;  %v11012_v53 = vld [vmem:[#allocation33_spill] sm:$0xff]  ;;  %v11017_v46 = vld [vmem:[#allocation32_spill] sm:$0xff] }
 0xca9   :  { %2299 = vrot.lane.b32.xlu2 %v2269_v23, %s5889_s17  ;;  %2303 = vrot.lane.b32.xlu1 %v2271_v57, %s5889_s17  ;;  %v200_v23 = vadd.f32 %v178_v1, %v105_v25  ;;  %v201_v57 = vadd.f32 %v179_v63, %v112_v19  ;;  %v264_v31 = vsel %vm262_vm1, %v10996_v42, %v10998_v49  ;;  %v11006_v25 = vld [vmem:[#allocation28_spill] sm:$0xff]  ;;  %v11013_v51 = vld [vmem:[#allocation49_spill] sm:$0xff] }
 0xcaa   :  { %2301 = vrot.lane.b32.xlu0 %v2270_v10, %s5889_s17  ;;  %v10997_v10 = vld [vmem:[#allocation38_spill] sm:$0xff]  ;;  %v204_v4 = vadd.f32 %v181_v8, %v115_v54  ;;  %v285_v0 = vadd.f32 %v10998_v49, %v196_v24  ;;  %v265_v11 = vsel %vm262_vm1, %v11000_v41, %v10999_v21  ;;  %v266_v3 = vsel %vm262_vm1, %v10999_v21, %v11001_v15  ;;  %v11008_v19 = vld [vmem:[#allocation44_spill] sm:$0xff]  ;;  %v11016_v63 = vld [vmem:[#allocation29_spill] sm:$0xff] }
 0xcab   :  { %v263_v12 = vsel %vm262_vm1, %v10997_v10, %v10996_v42  ;;  %v288_v26 = vadd.f32 %v11001_v15, %v199_v7  ;;  %v291_v38 = vadd.f32 %v11002_v30, %v202_v32  ;;  %v284_v48 = vadd.f32 %v264_v31, %v195_v13  ;;  %v11015_v7 = vld [vmem:[#allocation45_spill] sm:$0xff]  ;;  %v11019_v8 = vld [vmem:[#allocation35_spill] sm:$0xff]  ;;  %v11025_v41 = vld [vmem:[#allocation52_spill] sm:$0xff] }
 0xcac   :  { %v283_v45 = vadd.f32 %v263_v12, %v194_v40  ;;  %v294_v56 = vadd.f32 %v11005_v22, %v205_v28  ;;  %v269_v6 = vsel %vm262_vm1, %v11007_v35, %v11006_v25  ;;  %v286_v2 = vadd.f32 %v265_v11, %v197_v5  ;;  %v11020_v5 = vld [vmem:[#allocation46_spill] sm:$0xff]  ;;  %v11022_v10 = vld [vmem:[#allocation47_spill] sm:$0xff]  ;;  %v11023_v49 = vld [vmem:[#allocation57_spill] sm:$0xff] }
 0xcad   :  { %v287_v37 = vadd.f32 %v266_v3, %v198_v14  ;;  %v270_v55 = vsel %vm262_vm1, %v11006_v25, %v11005_v22  ;;  %v365_v18 = vsel %vm363_vm2, %v11009_v39, %v11008_v19  ;;  %v364_v17 = vsel %vm363_vm2, %v11010_v47, %v11009_v39  ;;  %v11024_v31 = vld [vmem:[#allocation61_spill] sm:$0xff]  ;;  %v11026_v11 = vld [vmem:[#allocation58_spill] sm:$0xff]  ;;  %v11031_v39 = vld [vmem:[#allocation8_spill] sm:$0xff] }
 0xcae   :  { %v384_v43 = vadd.f32 %v11010_v47, %v283_v45  ;;  %v387_v33 = vadd.f32 %v11011_v44, %v286_v2  ;;  %v292_v20 = vadd.f32 %v269_v6, %v203_v34  ;;  %v366_v52 = vsel %vm363_vm2, %v11011_v44, %v11012_v53  ;;  %v11021_v34 = vld [vmem:[#allocation37_spill] sm:$0xff]  ;;  %v11034_v44 = vld [vmem:[#allocation4_spill] sm:$0xff] }
 0xcaf   :  { %v454_v62 = vsel %vm452_vm3, %v11014_v27, %v11013_v51  ;;  %v293_v1 = vadd.f32 %v270_v55, %v204_v4  ;;  %v386_v24 = vadd.f32 %v365_v18, %v285_v0  ;;  %v367_v16 = vsel %vm363_vm2, %v11012_v53, %v11015_v7  ;;  %v11037_v7 = vld [vmem:[#allocation71_spill] sm:$0xff] }
 0xcb0   :  { %v385_v9 = vadd.f32 %v364_v17, %v284_v48  ;;  %v393_v32 = vadd.f32 %v11017_v46, %v292_v20  ;;  %v453_v28 = vsel %vm452_vm3, %v11018_v36, %v11014_v27  ;;  %v388_v40 = vadd.f32 %v366_v52, %v287_v37  ;;  %v11030_v48 = vld [vmem:[#allocation53_spill] sm:$0xff] }
 0xcb1   :  { %2305 = vrot.lane.b32.xlu2 %v2272_v58, %s5889_s17  ;;  %2309 = vrot.lane.b32.xlu1 %v2274_v60, %s5889_s17  ;;  %v11004_v58 = vld [vmem:[#allocation22_spill] sm:$0xff]  ;;  %v368_v13 = vsel %vm363_vm2, %v11016_v63, %v11019_v8  ;;  %v369_v14 = vsel %vm363_vm2, %v11019_v8, %v11020_v5  ;;  %v370_v42 = vsel %vm363_vm2, %v11017_v46, %v11021_v34  ;;  %v11041_v5 = vld [vmem:[#allocation81_spill] sm:$0xff] }
 0xcb2   :  { %2307 = vrot.lane.b32.xlu0 %v2273_v61, %s5889_s17  ;;  %v267_v60 = vsel %vm262_vm1, %v11004_v58, %v11003_v29  ;;  %v268_v61 = vsel %vm262_vm1, %v11003_v29, %v11002_v30  ;;  %v371_v12 = vsel %vm363_vm2, %v11021_v34, %v11022_v10  ;;  %v7797_v4 = vsel %vm493_vm7, %v11024_v31, %v11023_v49  ;;  %v11027_v29 = vld [vmem:[#allocation51_spill] sm:$0xff]  ;;  %v11043_v10 = vld [vmem:[#allocation56_spill] sm:$0xff] }
 0xcb3   :  { %v289_v50 = vadd.f32 %v267_v60, %v200_v23  ;;  %v290_v54 = vadd.f32 %v268_v61, %v201_v57  ;;  %v475_v23 = vadd.f32 %v454_v62, %v386_v24  ;;  %v389_v57 = vadd.f32 %v367_v16, %v288_v26  ;;  %v11028_v60 = vld [vmem:[#allocation54_spill] sm:$0xff]  ;;  %v11029_v61 = vld [vmem:[#allocation59_spill] sm:$0xff]  ;;  %v11035_v62 = vld [vmem:[#allocation77_spill] sm:$0xff] }
 0xcb4   :  { %v473_v0 = vadd.f32 %v11018_v36, %v384_v43  ;;  %v474_v21 = vadd.f32 %v453_v28, %v385_v9  ;;  %v455_v15 = vsel %vm452_vm3, %v11026_v11, %v11025_v41  ;;  %v392_v30 = vadd.f32 %v369_v14, %v291_v38  ;;  %v11039_v28 = vld [vmem:[#allocation55_spill] sm:$0xff] }
 0xcb5   :  { %v390_v59 = vadd.f32 %v11016_v63, %v289_v50  ;;  %v500_v3 = vmul.f32 %v11023_v49, %v475_v23  ;;  %v391_v26 = vadd.f32 %v368_v13, %v290_v54  ;;  %v456_v58 = vsel %vm452_vm3, %v11025_v41, %v11027_v29  ;;  %v11032_v50 = vld [vmem:[#allocation6_spill] sm:$0xff]  ;;  %v11038_v63 = vld [vmem:[#allocation60_spill] sm:$0xff]  ;;  %v11040_v13 = vld [vmem:[#allocation91_spill] sm:$0xff] }
 0xcb6   :  { %v457_v45 = vsel %vm452_vm3, %v11029_v61, %v11028_v60  ;;  %v458_v22 = vsel %vm452_vm3, %v11028_v60, %v11030_v48  ;;  %v498_v25 = vmul.f32 %v11024_v31, %v473_v0  ;;  %v499_v35 = vmul.f32 %v7797_v4, %v474_v21  ;;  %v11033_v54 = vld [vmem:[#allocation62_spill] sm:$0xff]  ;;  %v11042_v23 = vld [vmem:[#allocation83_spill] sm:$0xff]  ;;  %v11047_v48 = vld [vmem:[#allocation64_spill] sm:$0xff] }
 0xcb7   :  { %v7815_v6 = vadd.f32 %v370_v42, %v293_v1  ;;  %v395_v38 = vadd.f32 %v371_v12, %v294_v56  ;;  %v476_v2 = vadd.f32 %v11026_v11, %v387_v33  ;;  %v477_v37 = vadd.f32 %v455_v15, %v388_v40  ;;  %v11036_v1 = vld [vmem:[#allocation69_spill] sm:$0xff]  ;;  %v11044_v0 = vld [vmem:[#allocation10_spill] sm:$0xff] }
 0xcb8   :  { %v478_v55 = vadd.f32 %v456_v58, %v389_v57  ;;  %v479_v19 = vadd.f32 %v11029_v61, %v390_v59  ;;  %v512_v18 = vadd.f32 %v500_v3, %v11031_v39  ;;  %v480_v47 = vadd.f32 %v457_v45, %v391_v26  ;;  %v11045_v3 = vld [vmem:[#allocation5_spill] sm:$0xff]  ;;  %v11046_v26 = vld [vmem:[#allocation3_spill] sm:$0xff] }
 0xcb9   :  { %v481_v43 = vadd.f32 %v458_v22, %v392_v30  ;;  %v957_v17 = vsel %vm956_vm8, %v11033_v54, %v11032_v50  ;;  %v958_v20 = vsel %vm956_vm8, %v11032_v50, %v11034_v44  ;;  %v510_v33 = vadd.f32 %v498_v25, %v11031_v39  ;;  %v11048_v54 = vld [vmem:[#allocation78_spill] sm:$0xff] }
 0xcba   :  { %v979_v56 = vadd.f32 %v11034_v44, %v512_v18  ;;  %v511_v53 = vadd.f32 %v499_v35, %v11031_v39  ;;  %v503_v51 = vmul.f32 %v11023_v49, %v478_v55  ;;  %v501_v27 = vmul.f32 %v11024_v31, %v476_v2 }
 0xcbb   :  { %v1378_v24 = vsel %vm1377_vm9, %v11036_v1, %v11035_v62  ;;  %v1379_v16 = vsel %vm1377_vm9, %v11035_v62, %v11037_v7  ;;  %v7838_v59 = vadd.f32 %v11038_v63, %v393_v32  ;;  %v977_v9 = vadd.f32 %v957_v17, %v510_v33  ;;  %v11049_v17 = vld [vmem:[#allocation70_spill] sm:$0xff]  ;;  %v11051_v1 = vld [vmem:[#allocation92_spill] sm:$0xff] }
 0xcbc   :  { %v978_v46 = vadd.f32 %v958_v20, %v511_v53  ;;  %v1400_v36 = vadd.f32 %v11037_v7, %v979_v56  ;;  %v459_v40 = vsel %vm452_vm3, %v11038_v63, %v11039_v28  ;;  %v502_v8 = vmul.f32 %v7797_v4, %v477_v37  ;;  %v11050_v20 = vld [vmem:[#allocation73_spill] sm:$0xff] }
 0xcbd   :  { %v1845_v14 = vsel %vm1844_vm10, %v11041_v5, %v11040_v13  ;;  %v1846_v57 = vsel %vm1844_vm10, %v11040_v13, %v11042_v23  ;;  %v1398_v32 = vadd.f32 %v1378_v24, %v977_v9  ;;  %v460_v12 = vsel %vm452_vm3, %v11039_v28, %v11043_v10  ;;  %v11052_v24 = vld [vmem:[#allocation82_spill] sm:$0xff]  ;;  %v11054_v5 = vld [vmem:[#allocation7_spill] sm:$0xff] }
 0xcbe   :  { %v1399_v34 = vadd.f32 %v1379_v16, %v978_v46  ;;  %v1867_v42 = vadd.f32 %v11042_v23, %v1400_v36  ;;  %v515_v21 = vadd.f32 %v503_v51, %v11044_v0  ;;  %v513_v41 = vadd.f32 %v501_v27, %v11044_v0  ;;  %v11053_v16 = vld [vmem:[#allocation85_spill] sm:$0xff] }
 0xcbf   :  { %v506_v11 = vmul.f32 %v11023_v49, %v481_v43  ;;  %v959_v30 = vsel %vm956_vm8, %v11046_v26, %v11045_v3  ;;  %v1865_v29 = vadd.f32 %v1845_v14, %v1398_v32  ;;  %v514_v45 = vadd.f32 %v502_v8, %v11044_v0  ;;  %v11055_v14 = vld [vmem:[#allocation63_spill] sm:$0xff] }
 0xcc0   :  { %v1866_v58 = vadd.f32 %v1846_v57, %v1399_v34  ;;  %v960_v22 = vsel %vm956_vm8, %v11045_v3, %v11047_v48  ;;  %v982_v2 = vadd.f32 %v11047_v48, %v515_v21  ;;  %v980_v43 = vadd.f32 %v959_v30, %v513_v41  ;;  %v11057_v30 = vld [vmem:[#allocation79_spill] sm:$0xff] }
 0xcc1   :  { %v504_v50 = vmul.f32 %v11024_v31, %v479_v19  ;;  %v1380_v44 = vsel %vm1377_vm9, %v11049_v17, %v11048_v54  ;;  %v1381_v56 = vsel %vm1377_vm9, %v11048_v54, %v11050_v20  ;;  %v981_v33 = vadd.f32 %v960_v22, %v514_v45 }
 0xcc2   :  { %v1403_v53 = vadd.f32 %v11050_v20, %v982_v2  ;;  %v484_v62 = vadd.f32 %v460_v12, %v395_v38  ;;  %v505_v19 = vmul.f32 %v7797_v4, %v480_v47  ;;  %v1847_v7 = vsel %vm1844_vm10, %v11052_v24, %v11051_v1  ;;  %v11056_v12 = vld [vmem:[#allocation65_spill] sm:$0xff]  ;;  %v11061_v2 = vld [vmem:[#allocation84_spill] sm:$0xff]  ;;  %v11064_v20 = vld [vmem:[#allocation66_spill] sm:$0xff] }
 0xcc3   :  { %v1848_v63 = vsel %vm1844_vm10, %v11051_v1, %v11053_v16  ;;  %v1401_v9 = vadd.f32 %v1380_v44, %v980_v43  ;;  %v1402_v46 = vadd.f32 %v1381_v56, %v981_v33  ;;  %v483_v38 = vadd.f32 %v459_v40, %v7815_v6  ;;  %v11063_v44 = vld [vmem:[#allocation68_spill] sm:$0xff] }
 0xcc4   :  { %v1870_v36 = vadd.f32 %v11053_v16, %v1403_v53  ;;  %v518_v47 = vadd.f32 %v506_v11, %v11031_v39  ;;  %v516_v28 = vadd.f32 %v504_v50, %v11031_v39  ;;  %v509_v8 = vmul.f32 %v11023_v49, %v484_v62  ;;  %v11065_v62 = vld [vmem:[#allocation67_spill] sm:$0xff] }
 0xcc5   :  { %v961_v23 = vsel %vm956_vm8, %v11055_v14, %v11054_v5  ;;  %v1868_v57 = vadd.f32 %v1847_v7, %v1401_v9  ;;  %v1869_v32 = vadd.f32 %v1848_v63, %v1402_v46  ;;  %v517_v10 = vadd.f32 %v505_v19, %v11031_v39 }
 0xcc6   :  { %v962_v6 = vsel %vm956_vm8, %v11054_v5, %v11056_v12  ;;  %v985_v49 = vadd.f32 %v11056_v12, %v518_v47  ;;  %v983_v3 = vadd.f32 %v961_v23, %v516_v28  ;;  %v507_v26 = vmul.f32 %v11024_v31, %v7838_v59  ;;  %v11062_v59 = vld [vmem:[#allocation86_spill] sm:$0xff]  ;;  %v11068_v28 = vld [vmem:[#allocation76_spill] sm:$0xff] }
 0xcc7   :  { %v521_v54 = vadd.f32 %v509_v8, %v11044_v0  ;;  %v963_v56 = vsel %vm956_vm8, %v11064_v20, %v11063_v44  ;;  %v964_v19 = vsel %vm956_vm8, %v11063_v44, %v11065_v62  ;;  %v11069_v23 = vld [vmem:[#allocation94_spill] sm:$0xff] }
 0xcc9   :  { %v988_v7 = vadd.f32 %v11065_v62, %v521_v54 }
 0xcf3   :  { %v2288_v52 = vpop.permute.xlu2 %2287 }
 0xd0b   :  { %v2292_v15 = vpop.permute.xlu1 %2291 }
 0xd0c   :  { %v2334_v60 = vadd.f32 %v2292_v15, %v1867_v42  ;;  %v2290_v61 = vpop.permute.xlu0 %2289 }
 0xd0d   :  { %v2312_v25 = vsel %vm2311_vm11, %v2288_v52, %v2290_v61  ;;  %v2313_v35 = vsel %vm2311_vm11, %v2290_v61, %v2292_v15  ;;  %v2294_v52 = vpop.permute.xlu2 %2293  ;;  %v984_v61 = vadd.f32 %v962_v6, %v517_v10 }
 0xd0e   :  { %v2346_v37 = vmax.f32 %v2334_v60, 0.0  ;;  %v2332_v55 = vadd.f32 %v2312_v25, %v1865_v29  ;;  %v2333_v18 = vadd.f32 %v2313_v35, %v1866_v58  ;;  %v11058_v29 = vld [vmem:[#allocation72_spill] sm:$0xff]  ;;  %v11059_v58 = vld [vmem:[#allocation74_spill] sm:$0xff]  ;;  %v508_v25 = vmul.f32 %v7797_v4, %v483_v38  ;;  %v11060_v35 = vld [vmem:[#allocation93_spill] sm:$0xff] }
 0xd0f   :  { %v1382_v39 = vsel %vm1377_vm9, %v11058_v29, %v11057_v30  ;;  %v1383_v60 = vsel %vm1377_vm9, %v11057_v30, %v11059_v58  ;;  %v1406_v45 = vadd.f32 %v11059_v58, %v985_v49  ;;  %v1849_v31 = vsel %vm1844_vm10, %v11061_v2, %v11060_v35  ;;  %v11067_v38 = vld [vmem:[#allocation75_spill] sm:$0xff] }
 0xd10   :  { %v2344_v51 = vmax.f32 %v2332_v55, 0.0  ;;  %v2345_v27 = vmax.f32 %v2333_v18, 0.0  ;;  %2372 = vrot.lane.b32.xlu1 %v2346_v37, %s5890_s18  ;;  %v1850_v37 = vsel %vm1844_vm10, %v11060_v35, %v11062_v59  ;;  %v1404_v55 = vadd.f32 %v1382_v39, %v983_v3 }
 0xd11   :  { %v1405_v18 = vadd.f32 %v1383_v60, %v984_v61  ;;  %v1873_v43 = vadd.f32 %v11062_v59, %v1406_v45  ;;  %v519_v4 = vadd.f32 %v507_v26, %v11044_v0  ;;  %v7958_v61 = vld [vmem:[%s10622_s3] sm:$0xff]  ;;  %v11076_v35 = vmov 1  }
 0xd12   :  { %2368 = vrot.lane.b32.xlu2 %v2344_v51, %s5890_s18  ;;  %2370 = vrot.lane.b32.xlu0 %v2345_v27, %s5890_s18  ;;  %v1871_v33 = vadd.f32 %v1849_v31, %v1404_v55  ;;  %v520_v27 = vadd.f32 %v508_v25, %v11044_v0  ;;  %11072 = vst [vmem:[#allocation95_spill] sm:$0xff] %v7958_v61  ;;  %v2417_v45 = vld [vmem:[%s10623_s4] sm:$0xff]  ;;  %v11075_v25 = vmov 10  }
 0xd13   :  { %v2298_v13 = vpop.permute.xlu1 %2297  ;;  %v1872_v53 = vadd.f32 %v1850_v37, %v1405_v18  ;;  %v986_v46 = vadd.f32 %v963_v56, %v519_v4 }
 0xd14   :  { %v2337_v34 = vadd.f32 %v2298_v13, %v1870_v36  ;;  %v2296_v42 = vpop.permute.xlu0 %2295  ;;  %v11066_v36 = vld [vmem:[#allocation80_spill] sm:$0xff]  ;;  %v987_v8 = vadd.f32 %v964_v19, %v520_v27 }
 0xd15   :  { %v2314_v40 = vsel %vm2311_vm11, %v2294_v52, %v2296_v42  ;;  %v2315_v21 = vsel %vm2311_vm11, %v2296_v42, %v2298_v13  ;;  %v2300_v50 = vpop.permute.xlu2 %2299  ;;  %v1384_v47 = vsel %vm1377_vm9, %v11067_v38, %v11066_v36  ;;  %v1385_v0 = vsel %vm1377_vm9, %v11066_v36, %v11068_v28 }
 0xd16   :  { %v2349_v41 = vmax.f32 %v2337_v34, 0.0  ;;  %v2335_v11 = vadd.f32 %v2314_v40, %v1868_v57  ;;  %v2336_v15 = vadd.f32 %v2315_v21, %v1869_v32  ;;  %v1409_v13 = vadd.f32 %v11068_v28, %v988_v7  ;;  %v11070_v57 = vld [vmem:[#allocation87_spill] sm:$0xff]  ;;  %v11071_v34 = vld [vmem:[#allocation88_spill] sm:$0xff] }
 0xd17   :  { %v1851_v32 = vsel %vm1844_vm10, %v11070_v57, %v11069_v23  ;;  %v1852_v42 = vsel %vm1844_vm10, %v11069_v23, %v11071_v34  ;;  %v1407_v10 = vadd.f32 %v1384_v47, %v986_v46  ;;  %v1408_v12 = vadd.f32 %v1385_v0, %v987_v8 }
 0xd18   :  { %v2347_v48 = vmax.f32 %v2335_v11, 0.0  ;;  %v2348_v22 = vmax.f32 %v2336_v15, 0.0  ;;  %2378 = vrot.lane.b32.xlu1 %v2349_v41, %s5890_s18  ;;  %v1876_v6 = vadd.f32 %v11071_v34, %v1409_v13 }
 0xd19   :  { %v1874_v21 = vadd.f32 %v1851_v32, %v1407_v10  ;;  %v1875_v49 = vadd.f32 %v1852_v42, %v1408_v12 }
 0xd1a   :  { %2374 = vrot.lane.b32.xlu2 %v2347_v48, %s5890_s18  ;;  %2376 = vrot.lane.b32.xlu0 %v2348_v22, %s5890_s18  ;;  %v7967_v48 = vld [vmem:[%s10622_s3 + $0x8] sm:$0xff]  ;;  %v11074_v22 = vmov 5  }
 0xd1b   :  { %v2304_v17 = vpop.permute.xlu1 %2303  ;;  %11073 = vst [vmem:[#allocation9_spill] sm:$0xff] %v7967_v48 }
 0xd1c   :  { %v2340_v52 = vadd.f32 %v2304_v17, %v1873_v43  ;;  %v2302_v51 = vpop.permute.xlu0 %2301 }
 0xd1d   :  { %v2316_v1 = vsel %vm2311_vm11, %v2300_v50, %v2302_v51  ;;  %v2317_v24 = vsel %vm2311_vm11, %v2302_v51, %v2304_v17  ;;  %v2306_v41 = vpop.permute.xlu2 %2305 }
 0xd1e   :  { %v2352_v16 = vmax.f32 %v2340_v52, 0.0  ;;  %v2338_v63 = vadd.f32 %v2316_v1, %v1871_v33  ;;  %v2339_v9 = vadd.f32 %v2317_v24, %v1872_v53 }
 0xd20   :  { %v2350_v5 = vmax.f32 %v2338_v63, 0.0  ;;  %v2351_v14 = vmax.f32 %v2339_v9, 0.0  ;;  %2384 = vrot.lane.b32.xlu1 %v2352_v16, %s5890_s18 }
 0xd22   :  { %2380 = vrot.lane.b32.xlu2 %v2350_v5, %s5890_s18  ;;  %2382 = vrot.lane.b32.xlu0 %v2351_v14, %s5890_s18  ;;  %v11087_v5 = vmov 15  }
 0xd23   :  { %v2310_v40 = vpop.permute.xlu1 %2309 }
 0xd24   :  { %v2343_v11 = vadd.f32 %v2310_v40, %v1876_v6  ;;  %v2308_v15 = vpop.permute.xlu0 %2307 }
 0xd25   :  { %v2318_v3 = vsel %vm2311_vm11, %v2306_v41, %v2308_v15  ;;  %v2319_v26 = vsel %vm2311_vm11, %v2308_v15, %v2310_v40 }
 0xd26   :  { %v2355_v30 = vmax.f32 %v2343_v11, 0.0  ;;  %v2341_v29 = vadd.f32 %v2318_v3, %v1874_v21  ;;  %v2342_v39 = vadd.f32 %v2319_v26, %v1875_v49 }
 0xd28   :  { %v2353_v58 = vmax.f32 %v2341_v29, 0.0  ;;  %v2354_v60 = vmax.f32 %v2342_v39, 0.0  ;;  %2390 = vrot.lane.b32.xlu1 %v2355_v30, %s5890_s18 }
 0xd2a   :  { %2386 = vrot.lane.b32.xlu2 %v2353_v58, %s5890_s18  ;;  %2388 = vrot.lane.b32.xlu0 %v2354_v60, %s5890_s18  ;;  %v11096_v58 = vmov 20  }
 0xd30   :  { %2445 = vperm.xlu1 %5707, %v7958_v61  }
 0xd32   :  { %2421 = vperm.xlu2 %5706, %v2417_v45  }
 0xd38   :  { %5708 = vset.pattern.permute.xlu1 %v11074_v22 }
 0xd39   :  { %2466 = vperm.xlu1 %5708, %v7958_v61  }
 0xd3a   :  { %2450 = vperm.xlu2 %5706, %v7967_v48  }
 0xd41   :  { %5711 = vset.pattern.permute.xlu1 %v11075_v25 }
 0xd42   :  { %5709 = vset.pattern.permute.xlu2 %v11074_v22 }
 0xd43   :  { %2470 = vperm.xlu2 %5709, %v7967_v48  }
 0xd4b   :  { %5716 = vset.pattern.permute.xlu2 %v11076_v35 }
 0xd6c   :  { %v2369_v2 = vpop.permute.xlu2 %2368 }
 0xd74   :  { %v2375_v31 = vpop.permute.xlu2 %2374 }
 0xd7c   :  { %v2381_v37 = vpop.permute.xlu2 %2380 }
 0xd82   :  { %v2373_v59 = vpop.permute.xlu1 %2372 }
 0xd84   :  { %v2387_v43 = vpop.permute.xlu2 %2386  ;;  %v2371_v4 = vpop.permute.xlu0 %2370 }
 0xd85   :  { %v7983_v56 = vsel %vm2392_vm12, %v2369_v2, %v2371_v4  ;;  %v7986_v33 = vsel %vm2392_vm12, %v2371_v4, %v2373_v59 }
 0xd86   :  { %11080 = vst [vmem:[#allocation13_spill] sm:$0xff] %v7983_v56 }
 0xd87   :  { %11081 = vst [vmem:[#allocation12_spill] sm:$0xff] %v7986_v33 }
 0xd8a   :  { %v2379_v55 = vpop.permute.xlu1 %2378 }
 0xd8c   :  { %v7976_v54 = vpop.permute.xlu2 %2421  ;;  %v2377_v20 = vpop.permute.xlu0 %2376 }
 0xd8d   :  { %11077 = vst [vmem:[#allocation89_spill] sm:$0xff] %v7976_v54  ;;  %v7994_v1 = vsel %vm2392_vm12, %v2377_v20, %v2379_v55  ;;  %v7997_v24 = vsel %vm2392_vm12, %v2375_v31, %v2377_v20 }
 0xd8e   :  { %11082 = vst [vmem:[#allocation26_spill] sm:$0xff] %v7994_v1 }
 0xd92   :  { %v2385_v18 = vpop.permute.xlu1 %2384 }
 0xd94   :  { %v7980_v44 = vpop.permute.xlu2 %2450  ;;  %v2383_v7 = vpop.permute.xlu0 %2382 }
 0xd95   :  { %11079 = vst [vmem:[#allocation90_spill] sm:$0xff] %v7980_v44  ;;  %v8005_v9 = vsel %vm2392_vm12, %v2383_v7, %v2385_v18  ;;  %v8008_v46 = vsel %vm2392_vm12, %v2381_v37, %v2383_v7 }
 0xd96   :  { %11083 = vst [vmem:[#allocation15_spill] sm:$0xff] %v8005_v9 }
 0xd97   :  { %11084 = vst [vmem:[#allocation14_spill] sm:$0xff] %v8008_v46 }
 0xd9a   :  { %v2391_v50 = vpop.permute.xlu1 %2390 }
 0xd9c   :  { %v2389_v47 = vpop.permute.xlu0 %2388 }
 0xd9d   :  { %v2471_v62 = vpop.permute.xlu2 %2470  ;;  %v8016_v28 = vsel %vm2392_vm12, %v2389_v47, %v2391_v50  ;;  %v8019_v0 = vsel %vm2392_vm12, %v2387_v43, %v2389_v47 }
 0xd9e   :  { %v2476_v19 = vmul.f32 0.0, %v2471_v62  ;;  %v2478_v16 = vmul.f32 %v2471_v62, %v7994_v1  ;;  %v2477_v63 = vmul.f32 %v2471_v62, %v7997_v24  ;;  %11085 = vst [vmem:[#allocation31_spill] sm:$0xff] %v8016_v28  ;;  %v2484_v8 = vmul.f32 %v2471_v62, %v8016_v28 }
 0xd9f   :  { %11086 = vst [vmem:[#allocation17_spill] sm:$0xff] %v8019_v0  ;;  %v2483_v13 = vmul.f32 %v2471_v62, %v8019_v0 }
 0xda2   :  { %v7978_v17 = vpop.permute.xlu1 %2445 }
 0xda3   :  { %11078 = vst [vmem:[#allocation11_spill] sm:$0xff] %v7978_v17 }
 0xdab   :  { %v2467_v53 = vpop.permute.xlu1 %2466 }
 0xdac   :  { %v2473_v52 = vmul.f32 0.0, %v2467_v53  ;;  %v2475_v51 = vmul.f32 %v2467_v53, %v7986_v33  ;;  %v2474_v27 = vmul.f32 %v2467_v53, %v7983_v56  ;;  %v2481_v36 = vmul.f32 %v2467_v53, %v8005_v9 }
 0xdad   :  { %v2480_v38 = vmul.f32 %v2467_v53, %v8008_v46 }
 0xdae   :  { %2497 = vrot.lane.b32.xlu0 %v2473_v52, %s5857_s19  ;;  %2501 = vrot.lane.b32.xlu2 %v2475_v51, %s5857_s19 }
 0xdaf   :  { %2499 = vrot.lane.b32.xlu1 %v2474_v27, %s5857_s19 }
 0xdb6   :  { %2503 = vrot.lane.b32.xlu0 %v2476_v19, %s5857_s19  ;;  %2507 = vrot.lane.b32.xlu2 %v2478_v16, %s5857_s19 }
 0xdb7   :  { %2505 = vrot.lane.b32.xlu1 %v2477_v63, %s5857_s19 }
 0xdbe   :  { %2509 = vrot.lane.b32.xlu0 %v2473_v52, %s5857_s19  ;;  %2513 = vrot.lane.b32.xlu2 %v2481_v36, %s5857_s19 }
 0xdbf   :  { %2511 = vrot.lane.b32.xlu1 %v2480_v38, %s5857_s19 }
 0xdc6   :  { %2515 = vrot.lane.b32.xlu0 %v2476_v19, %s5857_s19  ;;  %2519 = vrot.lane.b32.xlu2 %v2484_v8, %s5857_s19  ;;  %v11104_v19 = vmov 6  }
 0xdc7   :  { %2517 = vrot.lane.b32.xlu1 %v2483_v13, %s5857_s19 }
 0xdce   :  { %2554 = vperm.xlu0 %5710, %v7958_v61  }
 0xdcf   :  { %2558 = vperm.xlu1 %5711, %v7967_v48  }
 0xdd6   :  { %5712 = vset.pattern.permute.xlu0 %v11087_v5 }
 0xdd7   :  { %5713 = vset.pattern.permute.xlu1 %v11087_v5 }
 0xe08   :  { %v8108_v7 = vpop.permute.xlu2 %2501 }
 0xe09   :  { %11105 = vst [vmem:[#allocation28_spill] sm:$0xff] %v8108_v7 }
 0xe10   :  { %v8116_v38 = vpop.permute.xlu2 %2507 }
 0xe11   :  { %11109 = vst [vmem:[#allocation43_spill] sm:$0xff] %v8116_v38 }
 0xe18   :  { %v8122_v13 = vpop.permute.xlu2 %2513 }
 0xe19   :  { %11112 = vst [vmem:[#allocation49_spill] sm:$0xff] %v8122_v13 }
 0xe20   :  { %v8030_v14 = vpop.permute.xlu0 %2497 }
 0xe21   :  { %11088 = vst [vmem:[#allocation16_spill] sm:$0xff] %v8030_v14  ;;  %v8032_v23 = vpop.permute.xlu1 %2499 }
 0xe22   :  { %11089 = vst [vmem:[#allocation34_spill] sm:$0xff] %v8032_v23 }
 0xe28   :  { %v8034_v57 = vpop.permute.xlu0 %2503 }
 0xe29   :  { %11090 = vst [vmem:[#allocation19_spill] sm:$0xff] %v8034_v57  ;;  %v8036_v32 = vpop.permute.xlu1 %2505 }
 0xe2a   :  { %11091 = vst [vmem:[#allocation18_spill] sm:$0xff] %v8036_v32 }
 0xe30   :  { %v8038_v34 = vpop.permute.xlu0 %2509 }
 0xe31   :  { %11092 = vst [vmem:[#allocation36_spill] sm:$0xff] %v8038_v34  ;;  %v8040_v42 = vpop.permute.xlu1 %2511 }
 0xe32   :  { %11093 = vst [vmem:[#allocation21_spill] sm:$0xff] %v8040_v42 }
 0xe38   :  { %v8042_v10 = vpop.permute.xlu0 %2515 }
 0xe39   :  { %11094 = vst [vmem:[#allocation38_spill] sm:$0xff] %v8042_v10  ;;  %v8044_v12 = vpop.permute.xlu1 %2517 }
 0xe3a   :  { %11095 = vst [vmem:[#allocation39_spill] sm:$0xff] %v8044_v12 }
 0xe40   :  { %v2555_v6 = vpop.permute.xlu0 %2554 }
 0xe41   :  { %v2559_v40 = vpop.permute.xlu1 %2558  ;;  %v2562_v21 = vmul.f32 %v2555_v6, %v7983_v56  ;;  %v2561_v49 = vmul.f32 0.0, %v2555_v6  ;;  %v2563_v15 = vmul.f32 %v2555_v6, %v7986_v33  ;;  %v2568_v3 = vmul.f32 %v2555_v6, %v8008_v46 }
 0xe42   :  { %v2564_v41 = vmul.f32 0.0, %v2559_v40  ;;  %v2565_v11 = vmul.f32 %v2559_v40, %v7997_v24  ;;  %v2566_v26 = vmul.f32 %v2559_v40, %v7994_v1  ;;  %v2571_v30 = vmul.f32 %v2559_v40, %v8019_v0 }
 0xe43   :  { %2587 = vrot.lane.b32.xlu1 %v2562_v21, %s5858_s15  ;;  %2585 = vrot.lane.b32.xlu2 %v2561_v49, %s5858_s15  ;;  %v2569_v29 = vmul.f32 %v2555_v6, %v8005_v9  ;;  %v2572_v39 = vmul.f32 %v2559_v40, %v8016_v28  ;;  %v8128_v6 = vpop.permute.xlu2 %2519 }
 0xe44   :  { %2591 = vrot.lane.b32.xlu0 %v2564_v41, %s5858_s15  ;;  %11115 = vst [vmem:[#allocation29_spill] sm:$0xff] %v8128_v6 }
 0xe4b   :  { %2593 = vrot.lane.b32.xlu1 %v2565_v11, %s5858_s15  ;;  %2589 = vrot.lane.b32.xlu2 %v2563_v15, %s5858_s15 }
 0xe4c   :  { %2597 = vrot.lane.b32.xlu0 %v2561_v49, %s5858_s15 }
 0xe53   :  { %2599 = vrot.lane.b32.xlu1 %v2568_v3, %s5858_s15  ;;  %2595 = vrot.lane.b32.xlu2 %v2566_v26, %s5858_s15 }
 0xe54   :  { %2603 = vrot.lane.b32.xlu0 %v2564_v41, %s5858_s15 }
 0xe5b   :  { %2605 = vrot.lane.b32.xlu1 %v2571_v30, %s5858_s15  ;;  %2601 = vrot.lane.b32.xlu2 %v2569_v29, %s5858_s15 }
 0xe5c   :  { %2654 = vperm.xlu0 %5712, %v7958_v61  }
 0xe63   :  { %2658 = vperm.xlu1 %5713, %v7967_v48   ;;  %2607 = vrot.lane.b32.xlu2 %v2572_v39, %s5858_s15 }
 0xe64   :  { %5714 = vset.pattern.permute.xlu0 %v11096_v58 }
 0xe6b   :  { %5715 = vset.pattern.permute.xlu1 %v11096_v58 }
 0xe9d   :  { %v8136_v15 = vpop.permute.xlu2 %2585 }
 0xe9e   :  { %11116 = vst [vmem:[#allocation32_spill] sm:$0xff] %v8136_v15 }
 0xea5   :  { %v8143_v29 = vpop.permute.xlu2 %2589 }
 0xea6   :  { %11117 = vst [vmem:[#allocation48_spill] sm:$0xff] %v8143_v29 }
 0xeb5   :  { %v8070_v60 = vpop.permute.xlu1 %2587 }
 0xeb6   :  { %11097 = vst [vmem:[#allocation23_spill] sm:$0xff] %v8070_v60  ;;  %v8072_v45 = vpop.permute.xlu0 %2591 }
 0xeb7   :  { %11098 = vst [vmem:[#allocation20_spill] sm:$0xff] %v8072_v45 }
 0xebd   :  { %v8074_v22 = vpop.permute.xlu1 %2593 }
 0xebe   :  { %11099 = vst [vmem:[#allocation40_spill] sm:$0xff] %v8074_v22  ;;  %v8076_v25 = vpop.permute.xlu0 %2597 }
 0xebf   :  { %11100 = vst [vmem:[#allocation41_spill] sm:$0xff] %v8076_v25 }
 0xec5   :  { %v8078_v2 = vpop.permute.xlu1 %2599 }
 0xec6   :  { %11101 = vst [vmem:[#allocation25_spill] sm:$0xff] %v8078_v2  ;;  %v8080_v31 = vpop.permute.xlu0 %2603 }
 0xec7   :  { %11102 = vst [vmem:[#allocation22_spill] sm:$0xff] %v8080_v31 }
 0xecd   :  { %v8082_v59 = vpop.permute.xlu1 %2605 }
 0xece   :  { %11103 = vst [vmem:[#allocation42_spill] sm:$0xff] %v8082_v59  ;;  %v2655_v37 = vpop.permute.xlu0 %2654 }
 0xecf   :  { %v2662_v55 = vmul.f32 %v2655_v37, %v7986_v33  ;;  %v2661_v18 = vmul.f32 %v2655_v37, %v7983_v56  ;;  %v2663_v50 = vmul.f32 0.0, %v2655_v37  ;;  %v2667_v53 = vmul.f32 %v2655_v37, %v8008_v46 }
 0xed0   :  { %v2668_v52 = vmul.f32 %v2655_v37, %v8005_v9 }
 0xed1   :  { %2687 = vrot.lane.b32.xlu1 %v2662_v55, %s5860_s2  ;;  %2685 = vrot.lane.b32.xlu2 %v2661_v18, %s5860_s2  ;;  %v2829_v55 = vld [vmem:[%s10621_s5] ss:$8 sm:$0x3] }
 0xed2   :  { %v2831_v18 = vperm.slane %v2829_v55, 0 }
 0xed5   :  { %v2659_v43 = vpop.permute.xlu1 %2658 }
 0xed6   :  { %v2664_v4 = vmul.f32 %v2659_v43, %v7997_v24  ;;  %v2665_v20 = vmul.f32 %v2659_v43, %v7994_v1  ;;  %v2666_v51 = vmul.f32 0.0, %v2659_v43  ;;  %v2670_v27 = vmul.f32 %v2659_v43, %v8019_v0 }
 0xed7   :  { %v2671_v62 = vmul.f32 %v2659_v43, %v8016_v28 }
 0xed8   :  { %2691 = vrot.lane.b32.xlu0 %v2664_v4, %s5860_s2  ;;  %v2832_v4 = vperm.slane %v2829_v55, 1 }
 0xed9   :  { %2693 = vrot.lane.b32.xlu1 %v2665_v20, %s5860_s2  ;;  %2689 = vrot.lane.b32.xlu2 %v2663_v50, %s5860_s2 }
 0xee0   :  { %2697 = vrot.lane.b32.xlu0 %v2667_v53, %s5860_s2  ;;  %v11120_v53 = vmov 16  }
 0xee1   :  { %2699 = vrot.lane.b32.xlu1 %v2668_v52, %s5860_s2  ;;  %2695 = vrot.lane.b32.xlu2 %v2666_v51, %s5860_s2 }
 0xee8   :  { %2703 = vrot.lane.b32.xlu0 %v2670_v27, %s5860_s2 }
 0xee9   :  { %2705 = vrot.lane.b32.xlu1 %v2671_v62, %s5860_s2  ;;  %2701 = vrot.lane.b32.xlu2 %v2663_v50, %s5860_s2  ;;  %v8154_v50 = vpop.permute.xlu2 %2595 }
 0xeea   :  { %11118 = vst [vmem:[#allocation35_spill] sm:$0xff] %v8154_v50 }
 0xef0   :  { %2742 = vperm.xlu0 %5714, %v7958_v61  }
 0xef1   :  { %2746 = vperm.xlu1 %5715, %v7967_v48   ;;  %2707 = vrot.lane.b32.xlu2 %v2666_v51, %s5860_s2  ;;  %v8162_v20 = vpop.permute.xlu2 %2601  ;;  %v11122_v51 = vmov 11  }
 0xef2   :  { %11119 = vst [vmem:[#allocation46_spill] sm:$0xff] %v8162_v20 }
 0xef8   :  { %5717 = vset.pattern.permute.xlu0 %v11076_v35 }
 0xef9   :  { %5718 = vset.pattern.permute.xlu1 %v11104_v19  ;;  %v8167_v52 = vpop.permute.xlu2 %2607 }
 0xefa   :  { %11121 = vst [vmem:[#allocation37_spill] sm:$0xff] %v8167_v52 }
 0xf2b   :  { %v8172_v27 = vpop.permute.xlu2 %2685 }
 0xf2c   :  { %11123 = vst [vmem:[#allocation47_spill] sm:$0xff] %v8172_v27 }
 0xf33   :  { %v8175_v62 = vpop.permute.xlu2 %2689 }
 0xf34   :  { %11124 = vst [vmem:[#allocation57_spill] sm:$0xff] %v8175_v62 }
 0xf43   :  { %v8110_v16 = vpop.permute.xlu1 %2687 }
 0xf44   :  { %11106 = vst [vmem:[#allocation24_spill] sm:$0xff] %v8110_v16 }
 0xf4a   :  { %v8112_v63 = vpop.permute.xlu0 %2691 }
 0xf4b   :  { %11107 = vst [vmem:[#allocation44_spill] sm:$0xff] %v8112_v63  ;;  %v8114_v36 = vpop.permute.xlu1 %2693 }
 0xf4c   :  { %11108 = vst [vmem:[#allocation30_spill] sm:$0xff] %v8114_v36 }
 0xf52   :  { %v8118_v47 = vpop.permute.xlu0 %2697 }
 0xf53   :  { %11110 = vst [vmem:[#allocation27_spill] sm:$0xff] %v8118_v47  ;;  %v8120_v8 = vpop.permute.xlu1 %2699 }
 0xf54   :  { %11111 = vst [vmem:[#allocation33_spill] sm:$0xff] %v8120_v8 }
 0xf5a   :  { %v8124_v5 = vpop.permute.xlu0 %2703 }
 0xf5b   :  { %11113 = vst [vmem:[#allocation50_spill] sm:$0xff] %v8124_v5  ;;  %v8126_v35 = vpop.permute.xlu1 %2705 }
 0xf5c   :  { %11114 = vst [vmem:[#allocation45_spill] sm:$0xff] %v8126_v35 }
 0xf62   :  { %v2743_v40 = vpop.permute.xlu0 %2742 }
 0xf63   :  { %v2747_v21 = vpop.permute.xlu1 %2746  ;;  %v2750_v49 = vmul.f32 %v2743_v40, %v7986_v33  ;;  %v2749_v41 = vmul.f32 %v2743_v40, %v7983_v56  ;;  %v2751_v26 = vmul.f32 0.0, %v2743_v40  ;;  %v2755_v30 = vmul.f32 %v2743_v40, %v8008_v46 }
 0xf64   :  { %v2752_v11 = vmul.f32 %v2747_v21, %v7997_v24  ;;  %v2753_v3 = vmul.f32 %v2747_v21, %v7994_v1  ;;  %v2756_v39 = vmul.f32 %v2743_v40, %v8005_v9  ;;  %v2754_v58 = vmul.f32 0.0, %v2747_v21  ;;  %v8177_v40 = vpop.permute.xlu2 %2695 }
 0xf65   :  { %2775 = vrot.lane.b32.xlu1 %v2750_v49, %s5861_s16  ;;  %2773 = vrot.lane.b32.xlu2 %v2749_v41, %s5861_s16  ;;  %v2758_v37 = vmul.f32 %v2747_v21, %v8019_v0  ;;  %v2759_v43 = vmul.f32 %v2747_v21, %v8016_v28  ;;  %11125 = vst [vmem:[#allocation61_spill] sm:$0xff] %v8177_v40 }
 0xf66   :  { %2779 = vrot.lane.b32.xlu0 %v2752_v11, %s5861_s16 }
 0xf6c   :  { %v8179_v21 = vpop.permute.xlu2 %2701 }
 0xf6d   :  { %2781 = vrot.lane.b32.xlu1 %v2753_v3, %s5861_s16  ;;  %2777 = vrot.lane.b32.xlu2 %v2751_v26, %s5861_s16  ;;  %11126 = vst [vmem:[#allocation52_spill] sm:$0xff] %v8179_v21 }
 0xf6e   :  { %2785 = vrot.lane.b32.xlu0 %v2755_v30, %s5861_s16 }
 0xf74   :  { %v8181_v49 = vpop.permute.xlu2 %2707 }
 0xf75   :  { %2787 = vrot.lane.b32.xlu1 %v2756_v39, %s5861_s16  ;;  %2783 = vrot.lane.b32.xlu2 %v2754_v58, %s5861_s16  ;;  %11127 = vst [vmem:[#allocation58_spill] sm:$0xff] %v8181_v49 }
 0xf76   :  { %2791 = vrot.lane.b32.xlu0 %v2758_v37, %s5861_s16 }
 0xf7d   :  { %2793 = vrot.lane.b32.xlu1 %v2759_v43, %s5861_s16  ;;  %2789 = vrot.lane.b32.xlu2 %v2751_v26, %s5861_s16 }
 0xf7e   :  { %2833 = vrot.lane.b32.xlu0 %v2831_v18, %s5864_s20 }
 0xf85   :  { %2835 = vrot.lane.b32.xlu1 %v2832_v4, %s5864_s20  ;;  %2795 = vrot.lane.b32.xlu2 %v2754_v58, %s5861_s16 }
 0xf86   :  { %2870 = vperm.xlu0 %5717, %v7967_v48  }
 0xf8d   :  { %2886 = vperm.xlu1 %5718, %v7958_v61   ;;  %2866 = vperm.xlu2 %5716, %v7958_v61  }
 0xf8e   :  { %5722 = vset.pattern.permute.xlu0 %v11120_v53 }
 0xf95   :  { %5719 = vset.pattern.permute.xlu2 %v11104_v19  ;;  %5720 = vset.pattern.permute.xlu1 %v11122_v51 }
 0xf96   :  { %2890 = vperm.xlu2 %5719, %v7967_v48  }
 0xf9e   :  { %5721 = vset.pattern.permute.xlu2 %v11122_v51 }
 0xfbf   :  { %v8183_v41 = vpop.permute.xlu2 %2773 }
 0xfc0   :  { %11128 = vst [vmem:[#allocation51_spill] sm:$0xff] %v8183_v41 }
 0xfc7   :  { %v8185_v11 = vpop.permute.xlu2 %2777 }
 0xfc8   :  { %11129 = vst [vmem:[#allocation54_spill] sm:$0xff] %v8185_v11 }
 0xfcf   :  { %v8189_v3 = vpop.permute.xlu2 %2783 }
 0xfd0   :  { %11131 = vst [vmem:[#allocation53_spill] sm:$0xff] %v8189_v3 }
 0xfd7   :  { %v8187_v19 = vpop.permute.xlu1 %2775  ;;  %v8193_v30 = vpop.permute.xlu2 %2789 }
 0xfd8   :  { %11130 = vst [vmem:[#allocation59_spill] sm:$0xff] %v8187_v19 }
 0xfd9   :  { %11133 = vst [vmem:[#allocation6_spill] sm:$0xff] %v8193_v30 }
 0xfdf   :  { %v8191_v26 = vpop.permute.xlu1 %2781  ;;  %v8199_v37 = vpop.permute.xlu2 %2795 }
 0xfe0   :  { %11132 = vst [vmem:[#allocation8_spill] sm:$0xff] %v8191_v26 }
 0xfe1   :  { %11136 = vst [vmem:[#allocation77_spill] sm:$0xff] %v8199_v37 }
 0xfe7   :  { %v8195_v39 = vpop.permute.xlu1 %2787  ;;  %v8203_v18 = vpop.permute.xlu2 %2866 }
 0xfe8   :  { %11134 = vst [vmem:[#allocation62_spill] sm:$0xff] %v8195_v39  ;;  %v8384_v10 = vmul.f32 0.0, %v8203_v18  ;;  %v2875_v12 = vmul.f32 %v8203_v18, %v7986_v33  ;;  %v2874_v35 = vmul.f32 %v8203_v18, %v7983_v56 }
 0xfef   :  { %v8197_v58 = vpop.permute.xlu1 %2793 }
 0xff0   :  { %11135 = vst [vmem:[#allocation4_spill] sm:$0xff] %v8197_v58  ;;  %v2891_v19 = vpop.permute.xlu2 %2890 }
 0xff1   :  { %v2896_v11 = vmul.f32 0.0, %v2891_v19  ;;  %v2898_v26 = vmul.f32 %v2891_v19, %v7994_v1  ;;  %v2897_v3 = vmul.f32 %v2891_v19, %v7997_v24  ;;  %v2903_v16 = vmul.f32 %v2891_v19, %v8019_v0 }
 0xff7   :  { %v8201_v55 = vpop.permute.xlu1 %2835 }
 0xff8   :  { %11137 = vst [vmem:[#allocation69_spill] sm:$0xff] %v8201_v55 }
 0xfff   :  { %v2887_v43 = vpop.permute.xlu1 %2886 }
0x1000   :  { %v2895_v4 = vmul.f32 %v2887_v43, %v7986_v33  ;;  %v2893_v51 = vmul.f32 0.0, %v2887_v43  ;;  %v2894_v41 = vmul.f32 %v2887_v43, %v7983_v56  ;;  %v2901_v27 = vmul.f32 %v2887_v43, %v8005_v9 }
0x1002   :  { %2921 = vrot.lane.b32.xlu0 %v2895_v4, %s5857_s19  ;;  %2917 = vrot.lane.b32.xlu1 %v2893_v51, %s5857_s19  ;;  %v2900_v4 = vmul.f32 %v2887_v43, %v8008_v46 }
0x1003   :  { %2919 = vrot.lane.b32.xlu2 %v2894_v41, %s5857_s19  ;;  %v2904_v41 = vmul.f32 %v2891_v19, %v8016_v28 }
0x100a   :  { %2927 = vrot.lane.b32.xlu0 %v2898_v26, %s5857_s19  ;;  %2923 = vrot.lane.b32.xlu1 %v2896_v11, %s5857_s19 }
0x100b   :  { %2925 = vrot.lane.b32.xlu2 %v2897_v3, %s5857_s19 }
0x1012   :  { %2933 = vrot.lane.b32.xlu0 %v2901_v27, %s5857_s19  ;;  %2929 = vrot.lane.b32.xlu1 %v2893_v51, %s5857_s19  ;;  %v11138_v27 = vmov 2  }
0x1013   :  { %2931 = vrot.lane.b32.xlu2 %v2900_v4, %s5857_s19 }
0x101a   :  { %2939 = vrot.lane.b32.xlu0 %v2904_v41, %s5857_s19  ;;  %2935 = vrot.lane.b32.xlu1 %v2896_v11, %s5857_s19 }
0x101b   :  { %2937 = vrot.lane.b32.xlu2 %v2903_v16, %s5857_s19 }
0x1022   :  { %2974 = vperm.xlu1 %5720, %v7958_v61  }
0x1023   :  { %2978 = vperm.xlu2 %5721, %v7967_v48  }
0x102a   :  { %5723 = vset.pattern.permute.xlu1 %v11120_v53 }
0x102b   :  { %5726 = vset.pattern.permute.xlu2 %v11138_v27 }
0x105d   :  { %v8229_v3 = vpop.permute.xlu2 %2919 }
0x1065   :  { %v8233_v43 = vpop.permute.xlu2 %2925 }
0x106d   :  { %v8239_v11 = vpop.permute.xlu2 %2931 }
0x1074   :  { %v8231_v26 = vpop.permute.xlu1 %2917 }
0x1075   :  { %v8243_v4 = vpop.permute.xlu2 %2937  ;;  %v2941_v37 = vsel %vm173_vm0, %v8231_v26, %v8229_v3 }
0x1076   :  { %v2961_v44 = vadd.f32 %v2941_v37, %v8384_v10 }
0x107c   :  { %v8235_v19 = vpop.permute.xlu1 %2923 }
0x107d   :  { %v2979_v36 = vpop.permute.xlu2 %2978 }
0x107e   :  { %v2984_v40 = vmul.f32 0.0, %v2979_v36  ;;  %v2986_v50 = vmul.f32 %v2979_v36, %v7994_v1  ;;  %v2985_v7 = vmul.f32 %v2979_v36, %v7997_v24  ;;  %v2991_v60 = vmul.f32 %v2979_v36, %v8019_v0 }
0x1084   :  { %v8237_v51 = vpop.permute.xlu1 %2929 }
0x108c   :  { %v8241_v16 = vpop.permute.xlu1 %2935 }
0x1094   :  { %v2975_v41 = vpop.permute.xlu1 %2974 }
0x1095   :  { %v2983_v53 = vmul.f32 %v2975_v41, %v7986_v33  ;;  %v2982_v62 = vmul.f32 %v2975_v41, %v7983_v56  ;;  %v2981_v29 = vmul.f32 0.0, %v2975_v41  ;;  %v2989_v15 = vmul.f32 %v2975_v41, %v8005_v9 }
0x1097   :  { %3009 = vrot.lane.b32.xlu2 %v2983_v53, %s5858_s15  ;;  %3007 = vrot.lane.b32.xlu1 %v2982_v62, %s5858_s15  ;;  %v2988_v53 = vmul.f32 %v2975_v41, %v8008_v46  ;;  %v2992_v62 = vmul.f32 %v2979_v36, %v8016_v28 }
0x1098   :  { %3005 = vrot.lane.b32.xlu0 %v2981_v29, %s5858_s15 }
0x109f   :  { %3015 = vrot.lane.b32.xlu2 %v2986_v50, %s5858_s15  ;;  %3013 = vrot.lane.b32.xlu1 %v2985_v7, %s5858_s15  ;;  %v8265_v7 = vpop.permute.xlu0 %2779  ;;  %v11141_v50 = vmov 21  }
0x10a0   :  { %3011 = vrot.lane.b32.xlu0 %v2984_v40, %s5858_s15  ;;  %11139 = vst [vmem:[#allocation71_spill] sm:$0xff] %v8265_v7 }
0x10a7   :  { %3021 = vrot.lane.b32.xlu2 %v2989_v15, %s5858_s15  ;;  %3019 = vrot.lane.b32.xlu1 %v2988_v53, %s5858_s15  ;;  %v8269_v15 = vpop.permute.xlu0 %2785 }
0x10a8   :  { %3017 = vrot.lane.b32.xlu0 %v2981_v29, %s5858_s15  ;;  %11140 = vst [vmem:[#allocation60_spill] sm:$0xff] %v8269_v15 }
0x10af   :  { %3027 = vrot.lane.b32.xlu2 %v2992_v62, %s5858_s15  ;;  %3025 = vrot.lane.b32.xlu1 %v2991_v60, %s5858_s15  ;;  %v8273_v29 = vpop.permute.xlu0 %2791 }
0x10b0   :  { %3023 = vrot.lane.b32.xlu0 %v2984_v40, %s5858_s15  ;;  %11142 = vst [vmem:[#allocation55_spill] sm:$0xff] %v8273_v29 }
0x10b7   :  { %3066 = vperm.xlu1 %5723, %v7967_v48   ;;  %v8275_v36 = vpop.permute.xlu0 %2833 }
0x10b8   :  { %3062 = vperm.xlu0 %5722, %v7958_v61   ;;  %11143 = vst [vmem:[#allocation91_spill] sm:$0xff] %v8275_v36 }
0x10bf   :  { %5725 = vset.pattern.permute.xlu1 %v11141_v50  ;;  %v8277_v41 = vpop.permute.xlu0 %2870 }
0x10c0   :  { %5724 = vset.pattern.permute.xlu0 %v11141_v50 }
0x10c7   :  { %v8279_v60 = vpop.permute.xlu0 %2921 }
0x10c8   :  { %v2942_v52 = vsel %vm173_vm0, %v8229_v3, %v8279_v60 }
0x10cf   :  { %v8281_v40 = vpop.permute.xlu0 %2927 }
0x10d7   :  { %v8283_v53 = vpop.permute.xlu0 %2933 }
0x10df   :  { %v8285_v62 = vpop.permute.xlu0 %2939 }
0x1109   :  { %v8287_v38 = vpop.permute.xlu1 %3007 }
0x110a   :  { %v8289_v7 = vpop.permute.xlu0 %3005 }
0x110b   :  { %v3029_v49 = vsel %vm262_vm1, %v8289_v7, %v8287_v38 }
0x1111   :  { %v8291_v14 = vpop.permute.xlu1 %3013 }
0x1112   :  { %v8293_v50 = vpop.permute.xlu0 %3011 }
0x1119   :  { %v8295_v23 = vpop.permute.xlu1 %3019 }
0x111a   :  { %v8297_v63 = vpop.permute.xlu0 %3017 }
0x1121   :  { %v8299_v45 = vpop.permute.xlu1 %3025 }
0x1122   :  { %v8301_v22 = vpop.permute.xlu0 %3023 }
0x1129   :  { %v3067_v57 = vpop.permute.xlu1 %3066 }
0x112a   :  { %v3063_v32 = vpop.permute.xlu0 %3062  ;;  %v3072_v54 = vmul.f32 %v3067_v57, %v7997_v24  ;;  %v3073_v39 = vmul.f32 %v3067_v57, %v7994_v1  ;;  %v3078_v20 = vmul.f32 %v3067_v57, %v8019_v0 }
0x112b   :  { %v3070_v15 = vmul.f32 %v3063_v32, %v7986_v33  ;;  %v3069_v47 = vmul.f32 %v3063_v32, %v7983_v56  ;;  %v3075_v36 = vmul.f32 %v3063_v32, %v8008_v46  ;;  %v3071_v30 = vmul.f32 0.0, %v3063_v32 }
0x112c   :  { %3099 = vrot.lane.b32.xlu0 %v3072_v54, %s5860_s2  ;;  %v3076_v29 = vmul.f32 %v3063_v32, %v8005_v9  ;;  %v3074_v54 = vmul.f32 0.0, %v3067_v57  ;;  %v11144_v32 = vmov 7  }
0x112d   :  { %3095 = vrot.lane.b32.xlu1 %v3070_v15, %s5860_s2  ;;  %3093 = vrot.lane.b32.xlu2 %v3069_v47, %s5860_s2  ;;  %v3079_v47 = vmul.f32 %v3067_v57, %v8016_v28 }
0x1134   :  { %3105 = vrot.lane.b32.xlu0 %v3075_v36, %s5860_s2 }
0x1135   :  { %3101 = vrot.lane.b32.xlu1 %v3073_v39, %s5860_s2  ;;  %3097 = vrot.lane.b32.xlu2 %v3071_v30, %s5860_s2 }
0x113c   :  { %3111 = vrot.lane.b32.xlu0 %v3078_v20, %s5860_s2 }
0x113d   :  { %3107 = vrot.lane.b32.xlu1 %v3076_v29, %s5860_s2  ;;  %3103 = vrot.lane.b32.xlu2 %v3074_v54, %s5860_s2 }
0x1144   :  { %3150 = vperm.xlu0 %5724, %v7958_v61   ;;  %v3049_v61 = vadd.f32 %v3029_v49, %v2961_v44  ;;  %v2878_v44 = vmul.f32 %v8277_v41, %v7994_v1 }
0x1145   :  { %3113 = vrot.lane.b32.xlu1 %v3079_v47, %s5860_s2  ;;  %3109 = vrot.lane.b32.xlu2 %v3071_v30, %s5860_s2 }
0x114c   :  { %5727 = vset.pattern.permute.xlu0 %v11138_v27 }
0x114d   :  { %3154 = vperm.xlu1 %5725, %v7967_v48   ;;  %3115 = vrot.lane.b32.xlu2 %v3074_v54, %s5860_s2  ;;  %v2962_v48 = vadd.f32 %v2942_v52, %v2874_v35 }
0x1155   :  { %5728 = vset.pattern.permute.xlu1 %v11144_v32  ;;  %v2963_v32 = vadd.f32 %v8279_v60, %v2875_v12  ;;  %v2943_v12 = vsel %vm173_vm0, %v8235_v19, %v8233_v43  ;;  %v2877_v60 = vmul.f32 %v8277_v41, %v7997_v24 }
0x119e   :  { %v8327_v20 = vpop.permute.xlu0 %3099 }
0x119f   :  { %v8329_v39 = vpop.permute.xlu1 %3095 }
0x11a6   :  { %v8331_v15 = vpop.permute.xlu0 %3105 }
0x11a7   :  { %v8333_v57 = vpop.permute.xlu1 %3101 }
0x11ae   :  { %v8335_v29 = vpop.permute.xlu0 %3111 }
0x11af   :  { %v8337_v36 = vpop.permute.xlu1 %3107 }
0x11b6   :  { %v3151_v30 = vpop.permute.xlu0 %3150 }
0x11b7   :  { %v8339_v27 = vpop.permute.xlu1 %3113  ;;  %v3158_v47 = vmul.f32 %v3151_v30, %v7986_v33  ;;  %v3157_v54 = vmul.f32 %v3151_v30, %v7983_v56  ;;  %v3159_v21 = vmul.f32 0.0, %v3151_v30  ;;  %v3163_v5 = vmul.f32 %v3151_v30, %v8008_v46 }
0x11b8   :  { %v3164_v13 = vmul.f32 %v3151_v30, %v8005_v9 }
0x11b9   :  { %3183 = vrot.lane.b32.xlu1 %v3158_v47, %s5861_s16  ;;  %3181 = vrot.lane.b32.xlu2 %v3157_v54, %s5861_s16 }
0x11bf   :  { %v3155_v8 = vpop.permute.xlu1 %3154 }
0x11c0   :  { %v3160_v25 = vmul.f32 %v3155_v8, %v7997_v24  ;;  %v3161_v2 = vmul.f32 %v3155_v8, %v7994_v1  ;;  %v3162_v55 = vmul.f32 0.0, %v3155_v8  ;;  %v3166_v47 = vmul.f32 %v3155_v8, %v8019_v0 }
0x11c1   :  { %3185 = vrot.lane.b32.xlu2 %v3159_v21, %s5861_s16  ;;  %v3167_v54 = vmul.f32 %v3155_v8, %v8016_v28 }
0x11c2   :  { %3187 = vrot.lane.b32.xlu0 %v3160_v25, %s5861_s16  ;;  %3189 = vrot.lane.b32.xlu1 %v3161_v2, %s5861_s16  ;;  %v5588_v25 = vld [vmem:[%s10621_s5 + $0x1] ss:$8 sm:$0x3] }
0x11c3   :  { %v3239_v2 = vperm.slane %v5588_v25, 0  ;;  %v3240_v30 = vperm.slane %v5588_v25, 1 }
0x11c9   :  { %3191 = vrot.lane.b32.xlu2 %v3162_v55, %s5861_s16 }
0x11ca   :  { %3193 = vrot.lane.b32.xlu0 %v3163_v5, %s5861_s16  ;;  %3195 = vrot.lane.b32.xlu1 %v3164_v13, %s5861_s16  ;;  %v3010_v13 = vpop.permute.xlu2 %3009 }
0x11cb   :  { %v3030_v33 = vsel %vm262_vm1, %v8287_v38, %v3010_v13  ;;  %v3051_v56 = vadd.f32 %v3010_v13, %v2963_v32 }
0x11d1   :  { %3197 = vrot.lane.b32.xlu2 %v3159_v21, %s5861_s16 }
0x11d2   :  { %3199 = vrot.lane.b32.xlu0 %v3166_v47, %s5861_s16  ;;  %3201 = vrot.lane.b32.xlu1 %v3167_v54, %s5861_s16  ;;  %v3016_v8 = vpop.permute.xlu2 %3015 }
0x11d9   :  { %3203 = vrot.lane.b32.xlu2 %v3162_v55, %s5861_s16 }
0x11da   :  { %3241 = vrot.lane.b32.xlu0 %v3239_v2, %s5868_s23  ;;  %3243 = vrot.lane.b32.xlu1 %v3240_v30, %s5868_s23  ;;  %v8366_v5 = vpop.permute.xlu2 %3021 }
0x11e2   :  { %v8368_v21 = vpop.permute.xlu2 %3027 }
0x11ea   :  { %v3094_v47 = vpop.permute.xlu2 %3093 }
0x11eb   :  { %v3117_v7 = vsel %vm363_vm2, %v3094_v47, %v8329_v39  ;;  %v3137_v38 = vadd.f32 %v3094_v47, %v3049_v61  ;;  %v2966_v61 = vadd.f32 %v8281_v40, %v2878_v44  ;;  %v3032_v47 = vsel %vm262_vm1, %v8291_v14, %v3016_v8 }
0x11ec   :  { %v2946_v44 = vsel %vm173_vm0, %v8239_v11, %v8283_v53 }
0x11f2   :  { %v3098_v54 = vpop.permute.xlu2 %3097 }
0x11f3   :  { %v3118_v3 = vsel %vm363_vm2, %v8329_v39, %v3098_v54 }
0x11f4   :  { %v3139_v35 = vadd.f32 %v3118_v3, %v3051_v56  ;;  %v3031_v56 = vsel %vm262_vm1, %v8293_v50, %v8291_v14  ;;  %v3054_v3 = vadd.f32 %v3016_v8, %v2966_v61  ;;  %v3119_v14 = vsel %vm363_vm2, %v8327_v20, %v8333_v57 }
0x11fa   :  { %v3104_v34 = vpop.permute.xlu2 %3103 }
0x11fb   :  { %v3120_v50 = vsel %vm363_vm2, %v8333_v57, %v3104_v34  ;;  %v2881_v57 = vmul.f32 %v8203_v18, %v8005_v9 }
0x11fc   :  { %v3142_v34 = vadd.f32 %v3120_v50, %v3054_v3  ;;  %v2883_v50 = vmul.f32 %v8277_v41, %v8019_v0 }
0x1202   :  { %v8370_v42 = vpop.permute.xlu2 %3109 }
0x120a   :  { %v8372_v59 = vpop.permute.xlu2 %3115 }
0x1213   :  { %v3182_v2 = vpop.permute.xlu2 %3181 }
0x121b   :  { %v3186_v58 = vpop.permute.xlu2 %3185 }
0x122b   :  { %v3184_v31 = vpop.permute.xlu1 %3183 }
0x122c   :  { %v3206_v37 = vsel %vm452_vm3, %v3184_v31, %v3186_v58  ;;  %v3205_v52 = vsel %vm452_vm3, %v3182_v2, %v3184_v31  ;;  %v3192_v58 = vpop.permute.xlu2 %3191 }
0x122d   :  { %v3227_v32 = vadd.f32 %v3206_v37, %v3139_v35  ;;  %v2945_v35 = vsel %vm173_vm0, %v8237_v51, %v8239_v11  ;;  %v3033_v51 = vsel %vm262_vm1, %v8297_v63, %v8295_v23 }
0x1234   :  { %v3190_v25 = vpop.permute.xlu1 %3189  ;;  %v8374_v55 = vpop.permute.xlu0 %3187 }
0x1235   :  { %v3207_v8 = vsel %vm452_vm3, %v8374_v55, %v3190_v25  ;;  %v3198_v11 = vpop.permute.xlu2 %3197 }
0x123c   :  { %v8376_v17 = vpop.permute.xlu1 %3195  ;;  %v8378_v30 = vpop.permute.xlu0 %3193 }
0x1244   :  { %v8396_v6 = vpop.permute.xlu1 %3201  ;;  %v8398_v26 = vpop.permute.xlu0 %3199 }
0x1245   :  { %11145 = vst [vmem:[#allocation81_spill] sm:$0xff] %v8396_v6  ;;  %v8409_v6 = vmul.f32 0.0, %v8277_v41 }
0x1246   :  { %11146 = vst [vmem:[#allocation83_spill] sm:$0xff] %v8398_v26  ;;  %v3050_v26 = vadd.f32 %v3030_v33, %v2962_v48  ;;  %v2944_v48 = vsel %vm173_vm0, %v8233_v43, %v8281_v40  ;;  %v3225_v33 = vadd.f32 %v3182_v2, %v3137_v38 }
0x1247   :  { %v2964_v19 = vadd.f32 %v2943_v12, %v8409_v6  ;;  %v2965_v2 = vadd.f32 %v2944_v48, %v2877_v60  ;;  %v3208_v12 = vsel %vm452_vm3, %v3190_v25, %v3192_v58  ;;  %v2969_v25 = vadd.f32 %v8283_v53, %v2881_v57 }
0x1248   :  { %v3138_v49 = vadd.f32 %v3117_v7, %v3050_v26  ;;  %v3034_v58 = vsel %vm262_vm1, %v8295_v23, %v8366_v5 }
0x1249   :  { %v3052_v7 = vadd.f32 %v3031_v56, %v2964_v19  ;;  %v3053_v37 = vadd.f32 %v3032_v47, %v2965_v2  ;;  %v3057_v63 = vadd.f32 %v8366_v5, %v2969_v25  ;;  %v3210_v56 = vsel %vm452_vm3, %v8376_v17, %v3198_v11  ;;  %v11150_v25 = vld [vmem:[#allocation9_spill] sm:$0xff] }
0x124a   :  { %v3226_v31 = vadd.f32 %v3205_v52, %v3138_v49  ;;  %v3230_v49 = vadd.f32 %v3208_v12, %v3142_v34  ;;  %v3209_v5 = vsel %vm452_vm3, %v8378_v30, %v8376_v17  ;;  %v2884_v47 = vmul.f32 %v8277_v41, %v8016_v28  ;;  %v3204_v12 = vpop.permute.xlu2 %3203 }
0x124b   :  { %v3140_v38 = vadd.f32 %v8327_v20, %v3052_v7  ;;  %v3141_v52 = vadd.f32 %v3119_v14, %v3053_v37  ;;  %v2880_v20 = vmul.f32 %v8203_v18, %v8008_v46  ;;  %v3122_v18 = vsel %vm363_vm2, %v8337_v36, %v8370_v42 }
0x124c   :  { %v8428_v39 = vpop.permute.xlu1 %3243  ;;  %v8430_v13 = vpop.permute.xlu0 %3241  ;;  %v2972_v17 = vadd.f32 %v8285_v62, %v2884_v47  ;;  %v3036_v7 = vsel %vm262_vm1, %v8299_v45, %v8368_v21  ;;  %v3124_v41 = vsel %vm363_vm2, %v8339_v27, %v8372_v59 }
0x124d   :  { %v3251_v43 = vmul.f32 %v8428_v39, %v3227_v32  ;;  %v3249_v54 = vmul.f32 %v8430_v13, %v3225_v33  ;;  %v8439_v40 = vsel %vm903_vm4, %v8430_v13, %v8428_v39  ;;  %v3228_v60 = vadd.f32 %v8374_v55, %v3140_v38  ;;  %v11147_v38 = vld [vmem:[#allocation81_spill] sm:$0xff] }
0x124e   :  { %v3250_v26 = vmul.f32 %v8439_v40, %v3226_v31  ;;  %v3229_v48 = vadd.f32 %v3207_v8, %v3141_v52  ;;  %v2967_v33 = vadd.f32 %v2945_v35, %v8384_v10  ;;  %v3254_v32 = vmul.f32 %v8428_v39, %v3230_v49 }
0x124f   :  { %3277 = vrot.lane.b32.xlu1 %v3251_v43, %s5870_s24  ;;  %3273 = vrot.lane.b32.xlu2 %v3249_v54, %s5870_s24  ;;  %v3252_v55 = vmul.f32 %v8430_v13, %v3228_v60  ;;  %v2968_v19 = vadd.f32 %v2946_v44, %v2880_v20  ;;  %v3121_v10 = vsel %vm363_vm2, %v8331_v15, %v8337_v36 }
0x1250   :  { %3275 = vrot.lane.b32.xlu0 %v3250_v26, %s5870_s24  ;;  %v3253_v53 = vmul.f32 %v8439_v40, %v3229_v48  ;;  %v3055_v61 = vadd.f32 %v3033_v51, %v2967_v33  ;;  %v3145_v31 = vadd.f32 %v3122_v18, %v3057_v63  ;;  %v2947_v36 = vsel %vm173_vm0, %v8241_v16, %v8243_v4 }
0x1251   :  { %v3056_v23 = vadd.f32 %v3034_v58, %v2968_v19  ;;  %v2948_v54 = vsel %vm173_vm0, %v8243_v4, %v8285_v62  ;;  %v3035_v16 = vsel %vm262_vm1, %v8301_v22, %v8299_v45  ;;  %v2970_v3 = vadd.f32 %v2947_v36, %v8409_v6 }
0x1252   :  { %v3143_v42 = vadd.f32 %v8331_v15, %v3055_v61  ;;  %v3233_v2 = vadd.f32 %v3210_v56, %v3145_v31  ;;  %v2971_v14 = vadd.f32 %v2948_v54, %v2883_v50  ;;  %v3060_v22 = vadd.f32 %v8368_v21, %v2972_v17  ;;  %v11148_v21 = vld [vmem:[#allocation83_spill] sm:$0xff]  ;;  %v11162_v61 = vld [vmem:[#allocation13_spill] sm:$0xff] }
0x1253   :  { %v3144_v43 = vadd.f32 %v3121_v10, %v3056_v23  ;;  %v3058_v37 = vadd.f32 %v3035_v16, %v2970_v3  ;;  %v3123_v6 = vsel %vm363_vm2, %v8335_v29, %v8339_v27  ;;  %v3212_v34 = vsel %vm452_vm3, %v11147_v38, %v3204_v12  ;;  %v11163_v23 = vld [vmem:[#allocation12_spill] sm:$0xff]  ;;  %v8592_v50 = vld [vmem:[%s10622_s3] sm:$0xff] }
0x1254   :  { %v3231_v15 = vadd.f32 %v8378_v30, %v3143_v42  ;;  %v3257_v4 = vmul.f32 %v8428_v39, %v3233_v2  ;;  %v3059_v45 = vadd.f32 %v3036_v7, %v2971_v14  ;;  %v3148_v8 = vadd.f32 %v3124_v41, %v3060_v22 }
0x1255   :  { %v3232_v26 = vadd.f32 %v3209_v5, %v3144_v43  ;;  %v3146_v59 = vadd.f32 %v8335_v29, %v3058_v37  ;;  %v3211_v35 = vsel %vm452_vm3, %v11148_v21, %v11147_v38  ;;  %v11149_v29 = vld [vmem:[#allocation95_spill] sm:$0xff]  ;;  %v11151_v51 = vmov 7  }
0x1256   :  { %v3255_v30 = vmul.f32 %v8430_v13, %v3231_v15  ;;  %v3147_v57 = vadd.f32 %v3123_v6, %v3059_v45  ;;  %v3236_v27 = vadd.f32 %v3212_v34, %v3148_v8  ;;  %v11152_v48 = vmov 12   ;;  %v8586_v15 = vld [vmem:[%s10622_s3 + $0x8] sm:$0xff] }
0x1257   :  { %3283 = vrot.lane.b32.xlu1 %v3254_v32, %s5870_s24  ;;  %3279 = vrot.lane.b32.xlu2 %v3252_v55, %s5870_s24  ;;  %v3256_v62 = vmul.f32 %v8439_v40, %v3232_v26  ;;  %v3234_v52 = vadd.f32 %v11148_v21, %v3146_v59  ;;  %v11164_v17 = vmov 8   ;;  %v11168_v21 = vmov 22  }
0x1258   :  { %3281 = vrot.lane.b32.xlu0 %v3253_v53, %s5870_s24  ;;  %v3235_v44 = vadd.f32 %v3211_v35, %v3147_v57  ;;  %v3260_v49 = vmul.f32 %v8428_v39, %v3236_v27  ;;  %v11153_v39 = vmov 17  }
0x1259   :  { %v3258_v60 = vmul.f32 %v8430_v13, %v3234_v52 }
0x125a   :  { %v3259_v20 = vmul.f32 %v8439_v40, %v3235_v44 }
0x125f   :  { %3289 = vrot.lane.b32.xlu1 %v3257_v4, %s5870_s24  ;;  %3285 = vrot.lane.b32.xlu2 %v3255_v30, %s5870_s24 }
0x1260   :  { %3287 = vrot.lane.b32.xlu0 %v3256_v62, %s5870_s24 }
0x1267   :  { %3295 = vrot.lane.b32.xlu1 %v3260_v49, %s5870_s24  ;;  %3291 = vrot.lane.b32.xlu2 %v3258_v60, %s5870_s24 }
0x1268   :  { %3293 = vrot.lane.b32.xlu0 %v3259_v20, %s5870_s24 }
0x126f   :  { %3350 = vperm.xlu1 %5728, %v11149_v29   ;;  %3330 = vperm.xlu2 %5726, %v11149_v29  }
0x1270   :  { %3334 = vperm.xlu0 %5727, %v11150_v25  }
0x1277   :  { %5729 = vset.pattern.permute.xlu2 %v11151_v51  ;;  %5730 = vset.pattern.permute.xlu1 %v11152_v48 }
0x1278   :  { %3354 = vperm.xlu2 %5729, %v11150_v25   ;;  %5733 = vset.pattern.permute.xlu0 %v11153_v39 }
0x1280   :  { %5731 = vset.pattern.permute.xlu2 %v11152_v48 }
0x12a9   :  { %v8545_v13 = vpop.permute.xlu2 %3273 }
0x12aa   :  { %11154 = vst [vmem:[#allocation56_spill] sm:$0xff] %v8545_v13 }
0x12b1   :  { %v8547_v40 = vpop.permute.xlu2 %3279 }
0x12b2   :  { %11155 = vst [vmem:[#allocation10_spill] sm:$0xff] %v8547_v40 }
0x12b9   :  { %v8551_v58 = vpop.permute.xlu2 %3285 }
0x12ba   :  { %11157 = vst [vmem:[#allocation3_spill] sm:$0xff] %v8551_v58  ;;  %v11207_v58 = vmov 0  }
0x12c1   :  { %v8549_v33 = vpop.permute.xlu1 %3277  ;;  %v8557_v55 = vpop.permute.xlu2 %3291 }
0x12c2   :  { %11156 = vst [vmem:[#allocation5_spill] sm:$0xff] %v8549_v33  ;;  %v8632_v35 = vpop.permute.xlu0 %3275 }
0x12c3   :  { %11160 = vst [vmem:[#allocation70_spill] sm:$0xff] %v8557_v55 }
0x12c4   :  { %11169 = vst [vmem:[#allocation7_spill] sm:$0xff] %v8632_v35 }
0x12c9   :  { %v8553_v11 = vpop.permute.xlu1 %3283  ;;  %v8561_v18 = vpop.permute.xlu2 %3330 }
0x12ca   :  { %11158 = vst [vmem:[#allocation64_spill] sm:$0xff] %v8553_v11  ;;  %v8635_v57 = vpop.permute.xlu0 %3281 }
0x12cb   :  { %11170 = vst [vmem:[#allocation63_spill] sm:$0xff] %v8635_v57 }
0x12d1   :  { %v8555_v32 = vpop.permute.xlu1 %3289 }
0x12d2   :  { %11159 = vst [vmem:[#allocation78_spill] sm:$0xff] %v8555_v32  ;;  %v3355_v42 = vpop.permute.xlu2 %3354  ;;  %v8637_v27 = vpop.permute.xlu0 %3287 }
0x12d3   :  { %v3360_v31 = vmul.f32 0.0, %v3355_v42  ;;  %v3361_v5 = vmul.f32 %v3355_v42, %v7997_v24  ;;  %v3362_v36 = vmul.f32 %v3355_v42, %v7994_v1  ;;  %v3367_v54 = vmul.f32 %v3355_v42, %v8019_v0  ;;  %11171 = vst [vmem:[#allocation65_spill] sm:$0xff] %v8637_v27 }
0x12d4   :  { %v3368_v2 = vmul.f32 %v3355_v42, %v8016_v28 }
0x12d9   :  { %v8559_v19 = vpop.permute.xlu1 %3295 }
0x12da   :  { %11161 = vst [vmem:[#allocation73_spill] sm:$0xff] %v8559_v19  ;;  %v8639_v52 = vpop.permute.xlu0 %3293 }
0x12db   :  { %11172 = vst [vmem:[#allocation79_spill] sm:$0xff] %v8639_v52 }
0x12e1   :  { %v3351_v53 = vpop.permute.xlu1 %3350 }
0x12e2   :  { %v3357_v63 = vmul.f32 0.0, %v3351_v53  ;;  %v3358_v10 = vmul.f32 %v3351_v53, %v11162_v61  ;;  %v3359_v56 = vmul.f32 %v3351_v53, %v11163_v23  ;;  %v3364_v47 = vmul.f32 %v3351_v53, %v8008_v46  ;;  %v8641_v44 = vpop.permute.xlu0 %3334 }
0x12e3   :  { %v3365_v43 = vmul.f32 %v3351_v53, %v8005_v9 }
0x12e4   :  { %3381 = vrot.lane.b32.xlu1 %v3357_v63, %s5857_s19  ;;  %3383 = vrot.lane.b32.xlu2 %v3358_v10, %s5857_s19 }
0x12e5   :  { %3385 = vrot.lane.b32.xlu0 %v3359_v56, %s5857_s19 }
0x12ec   :  { %3389 = vrot.lane.b32.xlu2 %v3361_v5, %s5857_s19  ;;  %3387 = vrot.lane.b32.xlu1 %v3360_v31, %s5857_s19 }
0x12ed   :  { %3391 = vrot.lane.b32.xlu0 %v3362_v36, %s5857_s19 }
0x12f4   :  { %3395 = vrot.lane.b32.xlu2 %v3364_v47, %s5857_s19  ;;  %3393 = vrot.lane.b32.xlu1 %v3357_v63, %s5857_s19 }
0x12f5   :  { %3397 = vrot.lane.b32.xlu0 %v3365_v43, %s5857_s19 }
0x12fc   :  { %3401 = vrot.lane.b32.xlu2 %v3367_v54, %s5857_s19  ;;  %3399 = vrot.lane.b32.xlu1 %v3360_v31, %s5857_s19 }
0x12fd   :  { %3403 = vrot.lane.b32.xlu0 %v3368_v2, %s5857_s19 }
0x1304   :  { %3442 = vperm.xlu2 %5731, %v8586_v15   ;;  %3438 = vperm.xlu1 %5730, %v8592_v50  }
0x130c   :  { %5732 = vset.pattern.permute.xlu2 %v11153_v39  ;;  %5737 = vset.pattern.permute.xlu1 %v11164_v17 }
0x133e   :  { %v8597_v16 = vpop.permute.xlu2 %3383 }
0x133f   :  { %11165 = vst [vmem:[#allocation92_spill] sm:$0xff] %v8597_v16 }
0x1346   :  { %v8599_v26 = vpop.permute.xlu2 %3389 }
0x1347   :  { %11166 = vst [vmem:[#allocation82_spill] sm:$0xff] %v8599_v26 }
0x134e   :  { %v8601_v3 = vpop.permute.xlu2 %3395 }
0x1356   :  { %v8603_v7 = vpop.permute.xlu1 %3381  ;;  %v8605_v4 = vpop.permute.xlu2 %3401 }
0x1357   :  { %v8643_v49 = vpop.permute.xlu0 %3385 }
0x1358   :  { %11173 = vst [vmem:[#allocation72_spill] sm:$0xff] %v8643_v49 }
0x135e   :  { %v8607_v30 = vpop.permute.xlu1 %3387  ;;  %v3443_v14 = vpop.permute.xlu2 %3442 }
0x135f   :  { %11167 = vst [vmem:[#allocation85_spill] sm:$0xff] %v8607_v30  ;;  %v3447_v41 = vmul.f32 %v3443_v14, %v7997_v24  ;;  %v3448_v34 = vmul.f32 %v3443_v14, %v7994_v1  ;;  %v3452_v59 = vmul.f32 %v3443_v14, %v8016_v28  ;;  %v3451_v8 = vmul.f32 %v3443_v14, %v8019_v0  ;;  %v8647_v20 = vpop.permute.xlu0 %3391 }
0x1360   :  { %11175 = vst [vmem:[#allocation93_spill] sm:$0xff] %v8647_v20 }
0x1361   :  { %3465 = vrot.lane.b32.xlu2 %v3447_v41, %s5858_s15  ;;  %v11179_v41 = vmov 13  }
0x1366   :  { %v8611_v62 = vpop.permute.xlu1 %3393 }
0x1367   :  { %v8651_v25 = vpop.permute.xlu0 %3397 }
0x136e   :  { %v8613_v22 = vpop.permute.xlu1 %3399 }
0x136f   :  { %v8657_v63 = vpop.permute.xlu0 %3403 }
0x1376   :  { %v3439_v37 = vpop.permute.xlu1 %3438 }
0x1377   :  { %v3446_v6 = vmul.f32 %v3439_v37, %v11163_v23  ;;  %v3450_v12 = vmul.f32 %v3439_v37, %v8005_v9  ;;  %v3445_v45 = vmul.f32 %v3439_v37, %v11162_v61  ;;  %v3449_v38 = vmul.f32 %v3439_v37, %v8008_v46 }
0x1379   :  { %3463 = vrot.lane.b32.xlu1 %v3446_v6, %s5858_s15  ;;  %3471 = vrot.lane.b32.xlu2 %v3450_v12, %s5858_s15 }
0x137a   :  { %3461 = vrot.lane.b32.xlu0 %v3445_v45, %s5858_s15 }
0x1381   :  { %3469 = vrot.lane.b32.xlu1 %v3449_v38, %s5858_s15  ;;  %3506 = vperm.xlu2 %5732, %v8592_v50  }
0x1382   :  { %3467 = vrot.lane.b32.xlu0 %v3448_v34, %s5858_s15 }
0x1389   :  { %3475 = vrot.lane.b32.xlu1 %v3452_v59, %s5858_s15  ;;  %5734 = vset.pattern.permute.xlu2 %v11168_v21 }
0x138a   :  { %3473 = vrot.lane.b32.xlu0 %v3451_v8, %s5858_s15 }
0x1392   :  { %3510 = vperm.xlu0 %5733, %v8586_v15  }
0x139a   :  { %5735 = vset.pattern.permute.xlu0 %v11168_v21 }
0x13bb   :  { %v8645_v60 = vpop.permute.xlu2 %3465 }
0x13bc   :  { %11174 = vst [vmem:[#allocation74_spill] sm:$0xff] %v8645_v60 }
0x13d3   :  { %v8649_v29 = vpop.permute.xlu2 %3471 }
0x13d4   :  { %11176 = vst [vmem:[#allocation84_spill] sm:$0xff] %v8649_v29 }
0x13db   :  { %v3507_v51 = vpop.permute.xlu2 %3506 }
0x13dc   :  { %v3514_v48 = vmul.f32 %v3507_v51, %v11163_v23  ;;  %v3513_v39 = vmul.f32 %v3507_v51, %v11162_v61  ;;  %v3515_v53 = vmul.f32 0.0, %v3507_v51  ;;  %v3520_v43 = vmul.f32 %v3507_v51, %v8005_v9 }
0x13dd   :  { %v3519_v54 = vmul.f32 %v3507_v51, %v8008_v46 }
0x13de   :  { %3539 = vrot.lane.b32.xlu2 %v3514_v48, %s5860_s2  ;;  %3537 = vrot.lane.b32.xlu1 %v3513_v39, %s5860_s2 }
0x13e6   :  { %3541 = vrot.lane.b32.xlu1 %v3515_v53, %s5860_s2 }
0x13ec   :  { %v8660_v10 = vpop.permute.xlu0 %3461 }
0x13ed   :  { %11177 = vst [vmem:[#allocation86_spill] sm:$0xff] %v8660_v10 }
0x13f4   :  { %v8662_v56 = vpop.permute.xlu0 %3467 }
0x13f5   :  { %11178 = vst [vmem:[#allocation68_spill] sm:$0xff] %v8662_v56 }
0x13fc   :  { %v8664_v42 = vpop.permute.xlu0 %3473 }
0x1404   :  { %v3511_v31 = vpop.permute.xlu0 %3510 }
0x1405   :  { %v3517_v5 = vmul.f32 %v3511_v31, %v7994_v1  ;;  %v3516_v36 = vmul.f32 %v3511_v31, %v7997_v24  ;;  %v3518_v47 = vmul.f32 0.0, %v3511_v31  ;;  %v3523_v2 = vmul.f32 %v3511_v31, %v8016_v28 }
0x1406   :  { %v3522_v14 = vmul.f32 %v3511_v31, %v8019_v0 }
0x1407   :  { %3545 = vrot.lane.b32.xlu0 %v3517_v5, %s5860_s2  ;;  %3543 = vrot.lane.b32.xlu2 %v3516_v36, %s5860_s2 }
0x1408   :  { %3547 = vrot.lane.b32.xlu1 %v3518_v47, %s5860_s2 }
0x140f   :  { %3551 = vrot.lane.b32.xlu0 %v3520_v43, %s5860_s2  ;;  %3549 = vrot.lane.b32.xlu2 %v3519_v54, %s5860_s2  ;;  %v8716_v54 = vpop.permute.xlu1 %3463 }
0x1410   :  { %3553 = vrot.lane.b32.xlu1 %v3515_v53, %s5860_s2  ;;  %11185 = vst [vmem:[#allocation94_spill] sm:$0xff] %v8716_v54 }
0x1417   :  { %3557 = vrot.lane.b32.xlu0 %v3523_v2, %s5860_s2  ;;  %3555 = vrot.lane.b32.xlu2 %v3522_v14, %s5860_s2  ;;  %v8723_v2 = vpop.permute.xlu1 %3469  ;;  %v11187_v14 = vmov 18  }
0x1418   :  { %3559 = vrot.lane.b32.xlu1 %v3518_v47, %s5860_s2  ;;  %11186 = vst [vmem:[#allocation87_spill] sm:$0xff] %v8723_v2 }
0x141f   :  { %3598 = vperm.xlu0 %5735, %v8586_v15   ;;  %3594 = vperm.xlu2 %5734, %v8592_v50  }
0x1427   :  { %5736 = vset.pattern.permute.xlu0 %v11164_v17  ;;  %5738 = vset.pattern.permute.xlu2 %v11179_v41  ;;  %v11188_v41 = vmov 9  }
0x1438   :  { %v8685_v37 = vpop.permute.xlu2 %3539 }
0x1439   :  { %11180 = vst [vmem:[#allocation66_spill] sm:$0xff] %v8685_v37 }
0x1461   :  { %v8687_v6 = vpop.permute.xlu2 %3543 }
0x1462   :  { %11181 = vst [vmem:[#allocation67_spill] sm:$0xff] %v8687_v6 }
0x1469   :  { %v8689_v12 = vpop.permute.xlu2 %3549 }
0x146a   :  { %11182 = vst [vmem:[#allocation80_spill] sm:$0xff] %v8689_v12 }
0x1471   :  { %v8691_v45 = vpop.permute.xlu2 %3555 }
0x1479   :  { %v8693_v38 = vpop.permute.xlu0 %3545  ;;  %v3595_v34 = vpop.permute.xlu2 %3594 }
0x147a   :  { %11183 = vst [vmem:[#allocation75_spill] sm:$0xff] %v8693_v38  ;;  %v3602_v59 = vmul.f32 %v3595_v34, %v11163_v23  ;;  %v3601_v8 = vmul.f32 %v3595_v34, %v11162_v61  ;;  %v3603_v21 = vmul.f32 0.0, %v3595_v34  ;;  %v3608_v5 = vmul.f32 %v3595_v34, %v8005_v9 }
0x147b   :  { %v3607_v36 = vmul.f32 %v3595_v34, %v8008_v46  ;;  %v8729_v34 = vpop.permute.xlu1 %3475 }
0x147c   :  { %3627 = vrot.lane.b32.xlu2 %v3602_v59, %s5861_s16  ;;  %3625 = vrot.lane.b32.xlu1 %v3601_v8, %s5861_s16  ;;  %v11189_v59 = vmov 14  }
0x1481   :  { %v8699_v17 = vpop.permute.xlu0 %3551 }
0x1482   :  { %11184 = vst [vmem:[#allocation76_spill] sm:$0xff] %v8699_v17 }
0x1483   :  { %v8734_v8 = vpop.permute.xlu1 %3537 }
0x1484   :  { %3629 = vrot.lane.b32.xlu1 %v3603_v21, %s5861_s16  ;;  %11190 = vst [vmem:[#allocation88_spill] sm:$0xff] %v8734_v8 }
0x1489   :  { %v8702_v51 = vpop.permute.xlu0 %3557 }
0x1491   :  { %v3599_v48 = vpop.permute.xlu0 %3598 }
0x1492   :  { %v3605_v39 = vmul.f32 %v3599_v48, %v7994_v1  ;;  %v3604_v53 = vmul.f32 %v3599_v48, %v7997_v24  ;;  %v3606_v31 = vmul.f32 0.0, %v3599_v48  ;;  %v3611_v47 = vmul.f32 %v3599_v48, %v8016_v28 }
0x1493   :  { %v3610_v43 = vmul.f32 %v3599_v48, %v8019_v0  ;;  %v8740_v48 = vpop.permute.xlu1 %3541 }
0x1494   :  { %3633 = vrot.lane.b32.xlu0 %v3605_v39, %s5861_s16  ;;  %3631 = vrot.lane.b32.xlu2 %v3604_v53, %s5861_s16  ;;  %11192 = vst [vmem:[#allocation81_spill] sm:$0xff] %v8740_v48  ;;  %v11193_v39 = vmov 19   ;;  %v11194_v53 = vmov 3  }
0x1495   :  { %3635 = vrot.lane.b32.xlu1 %v3606_v31, %s5861_s16 }
0x149c   :  { %3639 = vrot.lane.b32.xlu0 %v3608_v5, %s5861_s16  ;;  %3637 = vrot.lane.b32.xlu2 %v3607_v36, %s5861_s16  ;;  %v11196_v5 = vmov 4  }
0x149d   :  { %3641 = vrot.lane.b32.xlu1 %v3603_v21, %s5861_s16  ;;  %v11191_v21 = vmov 24  }
0x14a4   :  { %3645 = vrot.lane.b32.xlu0 %v3611_v47, %s5861_s16  ;;  %3643 = vrot.lane.b32.xlu2 %v3610_v43, %s5861_s16  ;;  %v3405_v47 = vsel %vm173_vm0, %v8603_v7, %v8597_v16 }
0x14a5   :  { %3647 = vrot.lane.b32.xlu1 %v3606_v31, %s5861_s16  ;;  %v8746_v31 = vpop.permute.xlu1 %3547 }
0x14a6   :  { %11195 = vst [vmem:[#allocation83_spill] sm:$0xff] %v8746_v31 }
0x14ac   :  { %3774 = vperm.xlu0 %5736, %v8586_v15  }
0x14ad   :  { %3770 = vperm.xlu1 %5737, %v8592_v50   ;;  %v8750_v36 = vpop.permute.xlu1 %3553 }
0x14ae   :  { %11197 = vst [vmem:[#allocation95_spill] sm:$0xff] %v8750_v36 }
0x14b4   :  { %5740 = vset.pattern.permute.xlu0 %v11187_v14 }
0x14b5   :  { %5739 = vset.pattern.permute.xlu1 %v11188_v41  ;;  %3950 = vperm.xlu0 %5740, %v8586_v15   ;;  %v8757_v43 = vpop.permute.xlu1 %3559 }
0x14b6   :  { %4238 = vperm.xlu1 %5739, %v8586_v15  }
0x14bd   :  { %5744 = vset.pattern.permute.xlu0 %v11189_v59 }
0x14be   :  { %4234 = vperm.xlu1 %5739, %v8592_v50   ;;  %4322 = vperm.xlu0 %5744, %v8592_v50  }
0x14c6   :  { %5742 = vset.pattern.permute.xlu1 %v11187_v14  ;;  %5747 = vset.pattern.permute.xlu0 %v11191_v21  ;;  %v8760_v14 = vmul.f32 0.0, %v8561_v18 }
0x14c7   :  { %3946 = vperm.xlu1 %5742, %v8592_v50   ;;  %4498 = vperm.xlu0 %5747, %v8592_v50  }
0x14c8   :  { %11198 = vst [vmem:[#allocation9_spill] sm:$0xff] %v8760_v14  ;;  %v3425_v41 = vadd.f32 %v3405_v47, %v8760_v14 }
0x14cf   :  { %5745 = vset.pattern.permute.xlu1 %v11193_v39  ;;  %5749 = vset.pattern.permute.xlu0 %v11194_v53  ;;  %v3493_v39 = vadd.f32 %v8660_v10, %v3425_v41  ;;  %v11204_v41 = vmov 23  }
0x14d0   :  { %4414 = vperm.xlu1 %5745, %v8586_v15   ;;  %3750 = vperm.xlu0 %5749, %v8592_v50  }
0x14d1   :  { %v3581_v33 = vadd.f32 %v8734_v8, %v3493_v39 }
0x14d8   :  { %4410 = vperm.xlu1 %5745, %v8592_v50   ;;  %5751 = vset.pattern.permute.xlu0 %v11196_v5 }
0x14e0   :  { %5748 = vset.pattern.permute.xlu1 %v11194_v53 }
0x14e1   :  { %3754 = vperm.xlu1 %5748, %v8586_v15  }
0x14e9   :  { %5750 = vset.pattern.permute.xlu1 %v11196_v5 }
0x14ee   :  { %v8766_v53 = vpop.permute.xlu1 %3625 }
0x14ef   :  { %11199 = vst [vmem:[#allocation13_spill] sm:$0xff] %v8766_v53  ;;  %v3669_v11 = vadd.f32 %v8766_v53, %v3581_v33 }
0x14f1   :  { %3693 = vrot.lane.b32.xlu2 %v3669_v11, %s5875_s21 }
0x14f6   :  { %v8772_v7 = vpop.permute.xlu1 %3629 }
0x14f7   :  { %11200 = vst [vmem:[#allocation96_spill] sm:$0xff] %v8772_v7 }
0x14f9   :  { %3862 = vperm.xlu2 %5738, %v8586_v15  }
0x1501   :  { %3858 = vperm.xlu2 %5738, %v8592_v50  }
0x1506   :  { %v8774_v13 = vpop.permute.xlu0 %3633 }
0x1507   :  { %11201 = vst [vmem:[#allocation97_spill] sm:$0xff] %v8774_v13  ;;  %v8778_v5 = vpop.permute.xlu1 %3635 }
0x1508   :  { %11202 = vst [vmem:[#allocation98_spill] sm:$0xff] %v8778_v5 }
0x1509   :  { %5741 = vset.pattern.permute.xlu2 %v11189_v59 }
0x150a   :  { %4326 = vperm.xlu2 %5741, %v8586_v15  }
0x150e   :  { %v8780_v47 = vpop.permute.xlu0 %3639 }
0x150f   :  { %11203 = vst [vmem:[#allocation99_spill] sm:$0xff] %v8780_v47  ;;  %v8786_v11 = vpop.permute.xlu1 %3641 }
0x1510   :  { %11205 = vst [vmem:[#allocation100_spill] sm:$0xff] %v8786_v11 }
0x1512   :  { %5743 = vset.pattern.permute.xlu2 %v11204_v41  ;;  %v8798_v41 = vpop.permute.xlu2 %3627 }
0x1513   :  { %4038 = vperm.xlu2 %5743, %v8586_v15   ;;  %11206 = vst [vmem:[#allocation101_spill] sm:$0xff] %v8798_v41 }
0x1516   :  { %v8784_v33 = vpop.permute.xlu0 %3645 }
0x1517   :  { %v8794_v35 = vpop.permute.xlu1 %3647 }
0x151b   :  { %4034 = vperm.xlu2 %5743, %v8592_v50  }
0x151e   :  { %v8789_v39 = vpop.permute.xlu0 %3774 }
0x151f   :  { %v3787_v59 = vmul.f32 %v8789_v39, %v8019_v0  ;;  %v8801_v40 = vmul.f32 0.0, %v8789_v39  ;;  %v8804_v57 = vpop.permute.xlu1 %3770  ;;  %v3788_v27 = vmul.f32 %v8789_v39, %v8016_v28 }
0x1520   :  { %v3785_v55 = vmul.f32 %v8804_v57, %v8005_v9 }
0x1521   :  { %3821 = vrot.lane.b32.xlu1 %v3787_v59, %s5857_s19  ;;  %v8809_v59 = vpop.permute.xlu2 %3631 }
0x1522   :  { %11208 = vst [vmem:[#allocation102_spill] sm:$0xff] %v8809_v59 }
0x1523   :  { %5746 = vset.pattern.permute.xlu2 %v11191_v21  ;;  %v3784_v21 = vmul.f32 %v8804_v57, %v8008_v46 }
0x1524   :  { %4502 = vperm.xlu2 %5746, %v8586_v15  }
0x1529   :  { %4218 = vperm.xlu1 %5750, %v8586_v15   ;;  %v8819_v15 = vmul.f32 0.0, %v8804_v57  ;;  %v8821_v32 = vpop.permute.xlu2 %3637 }
0x152a   :  { %11209 = vst [vmem:[#allocation103_spill] sm:$0xff] %v8821_v32 }
0x152c   :  { %3819 = vrot.lane.b32.xlu2 %v8801_v40, %s5857_s19 }
0x152d   :  { %5754 = vset.pattern.permute.xlu2 %v11207_v58 }
0x1531   :  { %3815 = vrot.lane.b32.xlu1 %v3784_v21, %s5857_s19  ;;  %v8827_v52 = vpop.permute.xlu2 %3643 }
0x1532   :  { %5753 = vset.pattern.permute.xlu1 %v11207_v58 }
0x1534   :  { %3823 = vrot.lane.b32.xlu2 %v3788_v27, %s5857_s19 }
0x153c   :  { %3813 = vrot.lane.b32.xlu2 %v8819_v15, %s5857_s19 }
0x1544   :  { %3817 = vrot.lane.b32.xlu2 %v3785_v55, %s5857_s19  ;;  %v8845_v55 = vpop.permute.xlu1 %4238 }
0x1545   :  { %v4251_v8 = vmul.f32 %v8845_v55, %v8019_v0  ;;  %v4252_v37 = vmul.f32 %v8845_v55, %v8016_v28 }
0x154b   :  { %v8830_v21 = vpop.permute.xlu2 %3693 }
0x154c   :  { %11210 = vst [vmem:[#allocation104_spill] sm:$0xff] %v8830_v21  ;;  %v8848_v21 = vmul.f32 0.0, %v8845_v55 }
0x1553   :  { %v8832_v19 = vpop.permute.xlu2 %3862 }
0x1554   :  { %v3874_v27 = vmul.f32 %v8832_v19, %v8019_v0  ;;  %v3875_v53 = vmul.f32 %v8832_v19, %v8016_v28  ;;  %v8839_v41 = vmul.f32 0.0, %v8832_v19 }
0x1556   :  { %3907 = vrot.lane.b32.xlu0 %v3874_v27, %s5858_s15  ;;  %3909 = vrot.lane.b32.xlu1 %v3875_v53, %s5858_s15 }
0x1557   :  { %3911 = vrot.lane.b32.xlu2 %v8839_v41, %s5858_s15 }
0x155b   :  { %v8850_v7 = vpop.permute.xlu2 %3858 }
0x155c   :  { %v3871_v27 = vmul.f32 %v8850_v7, %v8008_v46  ;;  %v3872_v48 = vmul.f32 %v8850_v7, %v8005_v9  ;;  %v8872_v10 = vmul.f32 0.0, %v8850_v7 }
0x155e   :  { %4285 = vrot.lane.b32.xlu1 %v4251_v8, %s5857_s19  ;;  %4283 = vrot.lane.b32.xlu0 %v8848_v21, %s5857_s19  ;;  %v8869_v8 = vpop.permute.xlu0 %3950 }
0x155f   :  { %4287 = vrot.lane.b32.xlu2 %v4252_v37, %s5857_s19  ;;  %v2418_v37 = vld [vmem:[%s10623_s4 + $0x8] sm:$0xff]  ;;  %v3962_v16 = vmul.f32 %v8869_v8, %v8019_v0  ;;  %v3963_v49 = vmul.f32 %v8869_v8, %v8016_v28 }
0x1564   :  { %v8860_v53 = vpop.permute.xlu2 %4326 }
0x1565   :  { %v4339_v6 = vmul.f32 %v8860_v53, %v8016_v28 }
0x1566   :  { %3901 = vrot.lane.b32.xlu1 %v3871_v27, %s5858_s15  ;;  %4214 = vperm.xlu0 %5751, %v8592_v50   ;;  %v8886_v50 = vmul.f32 0.0, %v8869_v8 }
0x1567   :  { %3903 = vrot.lane.b32.xlu2 %v3872_v48, %s5858_s15  ;;  %v8888_v48 = vpop.permute.xlu1 %4234 }
0x1568   :  { %v8891_v27 = vmul.f32 0.0, %v8888_v48 }
0x156d   :  { %v8877_v54 = vpop.permute.xlu2 %4038 }
0x156e   :  { %3905 = vrot.lane.b32.xlu1 %v8872_v10, %s5858_s15  ;;  %5752 = vset.pattern.permute.xlu0 %v11207_v58  ;;  %v4249_v58 = vmul.f32 %v8888_v48, %v8005_v9  ;;  %v8944_v60 = vmul.f32 0.0, %v8877_v54  ;;  %v4051_v26 = vmul.f32 %v8877_v54, %v8016_v28 }
0x156f   :  { %3995 = vrot.lane.b32.xlu2 %v3962_v16, %s5860_s2  ;;  %2426 = vperm.xlu0 %5752, %v2418_v37   ;;  %v4338_v16 = vmul.f32 %v8860_v53, %v8019_v0  ;;  %v4248_v37 = vmul.f32 %v8888_v48, %v8008_v46  ;;  %v8913_v13 = vpop.permute.xlu1 %3946 }
0x1570   :  { %v3959_v31 = vmul.f32 %v8913_v13, %v8008_v46  ;;  %v3960_v38 = vmul.f32 %v8913_v13, %v8005_v9 }
0x1575   :  { %v8897_v5 = vpop.permute.xlu2 %4034 }
0x1576   :  { %3999 = vrot.lane.b32.xlu1 %v8886_v50, %s5860_s2  ;;  %v4047_v32 = vmul.f32 %v8897_v5, %v8008_v46  ;;  %v8992_v36 = vmul.f32 0.0, %v8897_v5 }
0x1577   :  { %4277 = vrot.lane.b32.xlu2 %v8891_v27, %s5857_s19  ;;  %3997 = vrot.lane.b32.xlu0 %v3963_v49, %s5860_s2  ;;  %v8916_v49 = vmul.f32 0.0, %v8860_v53 }
0x157e   :  { %4281 = vrot.lane.b32.xlu1 %v4249_v58, %s5857_s19  ;;  %v8911_v59 = vpop.permute.xlu2 %4502  ;;  %v8927_v58 = vmul.f32 0.0, %v8913_v13 }
0x157f   :  { %4371 = vrot.lane.b32.xlu2 %v4338_v16, %s5858_s15  ;;  %4279 = vrot.lane.b32.xlu0 %v4248_v37, %s5857_s19  ;;  %v4050_v37 = vmul.f32 %v8877_v54, %v8019_v0  ;;  %v9037_v14 = vmul.f32 0.0, %v8911_v59 }
0x1586   :  { %4375 = vrot.lane.b32.xlu1 %v8916_v49, %s5858_s15  ;;  %v8929_v16 = vpop.permute.xlu2 %3819 }
0x1587   :  { %3989 = vrot.lane.b32.xlu2 %v3959_v31, %s5860_s2  ;;  %4373 = vrot.lane.b32.xlu0 %v4339_v6, %s5858_s15  ;;  %11211 = vst [vmem:[#allocation105_spill] sm:$0xff] %v8929_v16  ;;  %v8939_v31 = vpop.permute.xlu1 %4414  ;;  %v8941_v6 = vpop.permute.xlu0 %4322 }
0x1588   :  { %v4335_v30 = vmul.f32 %v8941_v6, %v8008_v46  ;;  %v4426_v20 = vmul.f32 %v8939_v31, %v8019_v0  ;;  %v4336_v11 = vmul.f32 %v8941_v6, %v8005_v9  ;;  %v4427_v47 = vmul.f32 %v8939_v31, %v8016_v28 }
0x158e   :  { %3993 = vrot.lane.b32.xlu1 %v8927_v58, %s5860_s2  ;;  %v8946_v56 = vpop.permute.xlu2 %3823 }
0x158f   :  { %4083 = vrot.lane.b32.xlu2 %v4050_v37, %s5861_s16  ;;  %3991 = vrot.lane.b32.xlu0 %v3960_v38, %s5860_s2  ;;  %11212 = vst [vmem:[#allocation106_spill] sm:$0xff] %v8946_v56  ;;  %v8956_v38 = vpop.permute.xlu1 %4410  ;;  %v8959_v37 = vmul.f32 0.0, %v8941_v6  ;;  %v9006_v12 = vpop.permute.xlu0 %4498 }
0x1590   :  { %v9053_v29 = vmul.f32 0.0, %v9006_v12 }
0x1596   :  { %4087 = vrot.lane.b32.xlu1 %v8944_v60, %s5861_s16  ;;  %v8967_v56 = vpop.permute.xlu2 %3813 }
0x1597   :  { %4365 = vrot.lane.b32.xlu2 %v4335_v30, %s5858_s15  ;;  %4085 = vrot.lane.b32.xlu0 %v4051_v26, %s5861_s16  ;;  %11213 = vst [vmem:[#allocation107_spill] sm:$0xff] %v8967_v56  ;;  %v8971_v26 = vpop.permute.xlu1 %3754  ;;  %v8974_v30 = vmul.f32 0.0, %v8939_v31 }
0x1598   :  { %11214 = vst [vmem:[#allocation108_spill] sm:$0xff] %v8971_v26  ;;  %v4048_v26 = vmul.f32 %v8897_v5, %v8005_v9 }
0x159e   :  { %4369 = vrot.lane.b32.xlu1 %v8959_v37, %s5858_s15 }
0x159f   :  { %4459 = vrot.lane.b32.xlu2 %v4426_v20, %s5860_s2  ;;  %4367 = vrot.lane.b32.xlu0 %v4336_v11, %s5858_s15  ;;  %v5589_v20 = vld [vmem:[%s10621_s5 + $0x3] ss:$8 sm:$0x3]  ;;  %v8987_v11 = vpop.permute.xlu2 %3817  ;;  %v8989_v16 = vpop.permute.xlu1 %3821 }
0x15a0   :  { %11215 = vst [vmem:[#allocation109_spill] sm:$0xff] %v8987_v11  ;;  %v4123_v56 = vperm.slane %v5589_v20, 0  ;;  %v4423_v11 = vmul.f32 %v8956_v38, %v8008_v46 }
0x15a1   :  { %11216 = vst [vmem:[#allocation110_spill] sm:$0xff] %v8989_v16  ;;  %v4424_v16 = vmul.f32 %v8956_v38, %v8005_v9 }
0x15a6   :  { %4463 = vrot.lane.b32.xlu1 %v8974_v30, %s5860_s2 }
0x15a7   :  { %4077 = vrot.lane.b32.xlu2 %v4047_v32, %s5861_s16  ;;  %4461 = vrot.lane.b32.xlu0 %v4427_v47, %s5860_s2  ;;  %v4124_v47 = vperm.slane %v5589_v20, 1  ;;  %v9008_v17 = vpop.permute.xlu1 %4218  ;;  %v4515_v20 = vmul.f32 %v8911_v59, %v8016_v28 }
0x15a8   :  { %11218 = vst [vmem:[#allocation112_spill] sm:$0xff] %v9008_v17  ;;  %v4512_v17 = vmul.f32 %v9006_v12, %v8005_v9 }
0x15ae   :  { %4081 = vrot.lane.b32.xlu1 %v8992_v36, %s5861_s16 }
0x15af   :  { %4125 = vrot.lane.b32.xlu2 %v4123_v56, %s5881_s26  ;;  %4079 = vrot.lane.b32.xlu0 %v4048_v26, %s5861_s16  ;;  %v4514_v26 = vmul.f32 %v8911_v59, %v8019_v0 }
0x15b1   :  { %v9000_v32 = vpop.permute.xlu2 %3911 }
0x15b2   :  { %11217 = vst [vmem:[#allocation111_spill] sm:$0xff] %v9000_v32  ;;  %v9020_v32 = vmul.f32 0.0, %v8956_v38 }
0x15b6   :  { %4453 = vrot.lane.b32.xlu1 %v4423_v11, %s5860_s2  ;;  %v9028_v11 = vpop.permute.xlu1 %3815 }
0x15b7   :  { %4455 = vrot.lane.b32.xlu2 %v4424_v16, %s5860_s2  ;;  %4127 = vrot.lane.b32.xlu0 %v4124_v47, %s5881_s26  ;;  %v9026_v16 = vpop.permute.xlu0 %3750  ;;  %11221 = vst [vmem:[#allocation115_spill] sm:$0xff] %v9028_v11 }
0x15b8   :  { %11220 = vst [vmem:[#allocation114_spill] sm:$0xff] %v9026_v16 }
0x15b9   :  { %v9013_v56 = vpop.permute.xlu2 %4287 }
0x15ba   :  { %11219 = vst [vmem:[#allocation113_spill] sm:$0xff] %v9013_v56  ;;  %v4511_v56 = vmul.f32 %v9006_v12, %v8008_v46 }
0x15be   :  { %4547 = vrot.lane.b32.xlu1 %v4514_v26, %s5861_s16  ;;  %v5590_v26 = vld [vmem:[%s10621_s5 + $0x4] ss:$8 sm:$0x3] }
0x15bf   :  { %4549 = vrot.lane.b32.xlu2 %v4515_v20, %s5861_s16  ;;  %4457 = vrot.lane.b32.xlu0 %v9020_v32, %s5860_s2  ;;  %v4587_v16 = vperm.slane %v5590_v26, 0  ;;  %v4588_v2 = vperm.slane %v5590_v26, 1  ;;  %v3782_v26 = vmul.f32 %v8789_v39, %v7994_v1 }
0x15c1   :  { %v9030_v47 = vpop.permute.xlu2 %3903 }
0x15c2   :  { %11222 = vst [vmem:[#allocation116_spill] sm:$0xff] %v9030_v47 }
0x15c6   :  { %4541 = vrot.lane.b32.xlu1 %v4511_v56, %s5861_s16 }
0x15c7   :  { %4543 = vrot.lane.b32.xlu2 %v4512_v17, %s5861_s16  ;;  %4551 = vrot.lane.b32.xlu0 %v9037_v14, %s5861_s16 }
0x15c8   :  { %v9046_v20 = vpop.permute.xlu0 %3907  ;;  %v9048_v47 = vpop.permute.xlu1 %3909 }
0x15c9   :  { %11223 = vst [vmem:[#allocation117_spill] sm:$0xff] %v9046_v20  ;;  %v9050_v11 = vpop.permute.xlu2 %3995 }
0x15ca   :  { %11224 = vst [vmem:[#allocation118_spill] sm:$0xff] %v9050_v11  ;;  %v3781_v11 = vmul.f32 %v8789_v39, %v7997_v24 }
0x15ce   :  { %4589 = vrot.lane.b32.xlu1 %v4587_v16, %s5888_s1 }
0x15cf   :  { %4591 = vrot.lane.b32.xlu2 %v4588_v2, %s5888_s1  ;;  %4545 = vrot.lane.b32.xlu0 %v9053_v29, %s5861_s16 }
0x15d0   :  { %v9059_v17 = vpop.permute.xlu0 %4283  ;;  %v9061_v56 = vpop.permute.xlu1 %4285 }
0x15d1   :  { %11225 = vst [vmem:[#allocation119_spill] sm:$0xff] %v9059_v17  ;;  %v9063_v20 = vpop.permute.xlu2 %4277 }
0x15d2   :  { %11226 = vst [vmem:[#allocation120_spill] sm:$0xff] %v9061_v56  ;;  %v3779_v56 = vmul.f32 %v8804_v57, %v11163_v23 }
0x15d3   :  { %11227 = vst [vmem:[#allocation121_spill] sm:$0xff] %v9063_v20  ;;  %v3778_v20 = vmul.f32 %v8804_v57, %v11162_v61 }
0x15d6   :  { %3809 = vrot.lane.b32.xlu1 %v3781_v11, %s5857_s19 }
0x15d7   :  { %3811 = vrot.lane.b32.xlu2 %v3782_v26, %s5857_s19  ;;  %3807 = vrot.lane.b32.xlu0 %v8801_v40, %s5857_s19  ;;  %v3869_v26 = vmul.f32 %v8832_v19, %v7994_v1 }
0x15d8   :  { %v9073_v2 = vpop.permute.xlu0 %4214  ;;  %v9075_v16 = vpop.permute.xlu1 %3901 }
0x15d9   :  { %11228 = vst [vmem:[#allocation122_spill] sm:$0xff] %v9073_v2  ;;  %v9077_v17 = vpop.permute.xlu2 %4371  ;;  %v3868_v2 = vmul.f32 %v8832_v19, %v7997_v24 }
0x15da   :  { %11229 = vst [vmem:[#allocation123_spill] sm:$0xff] %v9077_v17  ;;  %v3865_v17 = vmul.f32 %v8850_v7, %v11162_v61 }
0x15de   :  { %3803 = vrot.lane.b32.xlu1 %v3778_v20, %s5857_s19 }
0x15df   :  { %3805 = vrot.lane.b32.xlu2 %v3779_v56, %s5857_s19  ;;  %3801 = vrot.lane.b32.xlu0 %v8819_v15, %s5857_s19  ;;  %v4245_v56 = vmul.f32 %v8845_v55, %v7997_v24 }
0x15e0   :  { %v9087_v40 = vpop.permute.xlu1 %3905 }
0x15e1   :  { %v9089_v39 = vpop.permute.xlu2 %3989  ;;  %v9091_v11 = vpop.permute.xlu0 %2426 }
0x15e2   :  { %11230 = vst [vmem:[#allocation124_spill] sm:$0xff] %v9091_v11  ;;  %v4246_v11 = vmul.f32 %v8845_v55, %v7994_v1 }
0x15e6   :  { %3897 = vrot.lane.b32.xlu1 %v3869_v26, %s5858_s15  ;;  %v3866_v26 = vmul.f32 %v8850_v7, %v11163_v23 }
0x15e7   :  { %3899 = vrot.lane.b32.xlu2 %v8839_v41, %s5858_s15  ;;  %3895 = vrot.lane.b32.xlu0 %v3868_v2, %s5858_s15 }
0x15e8   :  { %v9101_v57 = vpop.permute.xlu1 %3999 }
0x15e9   :  { %v9103_v15 = vpop.permute.xlu2 %4083  ;;  %v9105_v20 = vpop.permute.xlu0 %3997 }
0x15ee   :  { %4273 = vrot.lane.b32.xlu1 %v4245_v56, %s5857_s19  ;;  %v3957_v56 = vmul.f32 %v8869_v8, %v7994_v1 }
0x15ef   :  { %4275 = vrot.lane.b32.xlu2 %v4246_v11, %s5857_s19  ;;  %4271 = vrot.lane.b32.xlu0 %v8848_v21, %s5857_s19 }
0x15f0   :  { %v9115_v19 = vpop.permute.xlu1 %4281 }
0x15f1   :  { %11231 = vst [vmem:[#allocation125_spill] sm:$0xff] %v9115_v19  ;;  %v9117_v41 = vpop.permute.xlu2 %4365  ;;  %v9119_v2 = vpop.permute.xlu0 %4279  ;;  %v4243_v19 = vmul.f32 %v8888_v48, %v11163_v23 }
0x15f2   :  { %11232 = vst [vmem:[#allocation126_spill] sm:$0xff] %v9117_v41  ;;  %v3956_v41 = vmul.f32 %v8869_v8, %v7997_v24 }
0x15f3   :  { %11233 = vst [vmem:[#allocation127_spill] sm:$0xff] %v9119_v2  ;;  %v4332_v2 = vmul.f32 %v8860_v53, %v7997_v24 }
0x15f6   :  { %3891 = vrot.lane.b32.xlu1 %v3866_v26, %s5858_s15  ;;  %v4242_v26 = vmul.f32 %v8888_v48, %v11162_v61 }
0x15f7   :  { %3893 = vrot.lane.b32.xlu2 %v8872_v10, %s5858_s15  ;;  %3889 = vrot.lane.b32.xlu0 %v3865_v17, %s5858_s15 }
0x15f8   :  { %v9129_v21 = vpop.permute.xlu1 %4375 }
0x15f9   :  { %v9131_v55 = vpop.permute.xlu2 %4459  ;;  %v9133_v11 = vpop.permute.xlu0 %4373 }
0x15fa   :  { %11234 = vst [vmem:[#allocation128_spill] sm:$0xff] %v9131_v55  ;;  %v3953_v55 = vmul.f32 %v8913_v13, %v11162_v61 }
0x15fe   :  { %3985 = vrot.lane.b32.xlu1 %v3957_v56, %s5860_s2  ;;  %v4333_v56 = vmul.f32 %v8860_v53, %v7994_v1 }
0x15ff   :  { %3987 = vrot.lane.b32.xlu2 %v8886_v50, %s5860_s2  ;;  %3983 = vrot.lane.b32.xlu0 %v3956_v41, %s5860_s2 }
0x1600   :  { %v9143_v10 = vpop.permute.xlu1 %3993 }
0x1601   :  { %v9145_v7 = vpop.permute.xlu2 %4077  ;;  %v9147_v17 = vpop.permute.xlu0 %3991 }
0x1606   :  { %4267 = vrot.lane.b32.xlu1 %v4242_v26, %s5857_s19  ;;  %v3954_v26 = vmul.f32 %v8913_v13, %v11163_v23 }
0x1607   :  { %4269 = vrot.lane.b32.xlu2 %v4243_v19, %s5857_s19  ;;  %4265 = vrot.lane.b32.xlu0 %v8891_v27, %s5857_s19 }
0x1608   :  { %v9157_v8 = vpop.permute.xlu1 %4087 }
0x1609   :  { %v9159_v50 = vpop.permute.xlu2 %4125  ;;  %v9161_v41 = vpop.permute.xlu0 %4085 }
0x160e   :  { %4361 = vrot.lane.b32.xlu1 %v4333_v56, %s5858_s15  ;;  %v4045_v56 = vmul.f32 %v8877_v54, %v7994_v1 }
0x160f   :  { %4363 = vrot.lane.b32.xlu2 %v8916_v49, %s5858_s15  ;;  %4359 = vrot.lane.b32.xlu0 %v4332_v2, %s5858_s15 }
0x1610   :  { %v9171_v48 = vpop.permute.xlu1 %4369 }
0x1611   :  { %v9173_v27 = vpop.permute.xlu2 %4455  ;;  %v9175_v19 = vpop.permute.xlu0 %4367 }
0x1612   :  { %11235 = vst [vmem:[#allocation129_spill] sm:$0xff] %v9173_v27  ;;  %v4044_v27 = vmul.f32 %v8877_v54, %v7997_v24 }
0x1613   :  { %11236 = vst [vmem:[#allocation130_spill] sm:$0xff] %v9175_v19  ;;  %v4329_v19 = vmul.f32 %v8941_v6, %v11162_v61 }
0x1616   :  { %3979 = vrot.lane.b32.xlu1 %v3954_v26, %s5860_s2  ;;  %v4330_v26 = vmul.f32 %v8941_v6, %v11163_v23 }
0x1617   :  { %3981 = vrot.lane.b32.xlu2 %v8927_v58, %s5860_s2  ;;  %3977 = vrot.lane.b32.xlu0 %v3953_v55, %s5860_s2 }
0x1618   :  { %v9185_v53 = vpop.permute.xlu1 %4463 }
0x1619   :  { %v9187_v49 = vpop.permute.xlu2 %4549  ;;  %v9189_v2 = vpop.permute.xlu0 %4461 }
0x161e   :  { %4073 = vrot.lane.b32.xlu1 %v4045_v56, %s5861_s16  ;;  %v4421_v56 = vmul.f32 %v8939_v31, %v7994_v1 }
0x161f   :  { %4075 = vrot.lane.b32.xlu2 %v8944_v60, %s5861_s16  ;;  %4071 = vrot.lane.b32.xlu0 %v4044_v27, %s5861_s16 }
0x1620   :  { %v9199_v13 = vpop.permute.xlu1 %4081 }
0x1621   :  { %v9201_v58 = vpop.permute.xlu2 %4543  ;;  %v9203_v55 = vpop.permute.xlu0 %4079 }
0x1622   :  { %11237 = vst [vmem:[#allocation131_spill] sm:$0xff] %v9201_v58  ;;  %v4420_v58 = vmul.f32 %v8939_v31, %v7997_v24 }
0x1626   :  { %4355 = vrot.lane.b32.xlu1 %v4330_v26, %s5858_s15  ;;  %v4042_v26 = vmul.f32 %v8897_v5, %v11163_v23 }
0x1627   :  { %4357 = vrot.lane.b32.xlu2 %v8959_v37, %s5858_s15  ;;  %4353 = vrot.lane.b32.xlu0 %v4329_v19, %s5858_s15 }
0x1628   :  { %v9213_v60 = vpop.permute.xlu1 %4453 }
0x1629   :  { %11238 = vst [vmem:[#allocation132_spill] sm:$0xff] %v9213_v60  ;;  %v9215_v54 = vpop.permute.xlu2 %4591  ;;  %v9217_v27 = vpop.permute.xlu0 %4127  ;;  %v4041_v60 = vmul.f32 %v8897_v5, %v11162_v61 }
0x162e   :  { %4449 = vrot.lane.b32.xlu1 %v4421_v56, %s5860_s2  ;;  %v4418_v56 = vmul.f32 %v8956_v38, %v11163_v23 }
0x162f   :  { %4451 = vrot.lane.b32.xlu2 %v8974_v30, %s5860_s2  ;;  %4447 = vrot.lane.b32.xlu0 %v4420_v58, %s5860_s2 }
0x1630   :  { %v9227_v6 = vpop.permute.xlu1 %4547 }
0x1631   :  { %v9229_v37 = vpop.permute.xlu2 %3811  ;;  %v9231_v19 = vpop.permute.xlu0 %4457 }
0x1632   :  { %11239 = vst [vmem:[#allocation133_spill] sm:$0xff] %v9229_v37  ;;  %v4417_v37 = vmul.f32 %v8956_v38, %v11162_v61 }
0x1636   :  { %4067 = vrot.lane.b32.xlu1 %v4042_v26, %s5861_s16  ;;  %v4509_v26 = vmul.f32 %v8911_v59, %v7994_v1 }
0x1637   :  { %4069 = vrot.lane.b32.xlu2 %v8992_v36, %s5861_s16  ;;  %4065 = vrot.lane.b32.xlu0 %v4041_v60, %s5861_s16 }
0x1638   :  { %v9241_v31 = vpop.permute.xlu1 %4541 }
0x1639   :  { %v9243_v30 = vpop.permute.xlu2 %3805  ;;  %v9245_v58 = vpop.permute.xlu0 %4551 }
0x163a   :  { %11240 = vst [vmem:[#allocation134_spill] sm:$0xff] %v9243_v30  ;;  %v4508_v30 = vmul.f32 %v8911_v59, %v7997_v24  ;;  %v3411_v59 = vsel %vm173_vm0, %v8613_v22, %v8605_v4 }
0x163e   :  { %4443 = vrot.lane.b32.xlu1 %v4418_v56, %s5860_s2  ;;  %v3412_v56 = vsel %vm173_vm0, %v8605_v4, %v8657_v63 }
0x163f   :  { %4445 = vrot.lane.b32.xlu2 %v9020_v32, %s5860_s2  ;;  %4441 = vrot.lane.b32.xlu0 %v4417_v37, %s5860_s2 }
0x1640   :  { %v9255_v36 = vpop.permute.xlu1 %4589 }
0x1641   :  { %v9257_v5 = vpop.permute.xlu2 %3899  ;;  %v9259_v60 = vpop.permute.xlu0 %4545 }
0x1642   :  { %11241 = vst [vmem:[#allocation135_spill] sm:$0xff] %v9257_v5  ;;  %v3480_v5 = vsel %vm262_vm1, %v8664_v42, %v8729_v34 }
0x1646   :  { %4537 = vrot.lane.b32.xlu1 %v4509_v26, %s5861_s16  ;;  %v3347_v26 = vmul.f32 %v8641_v44, %v8019_v0 }
0x1647   :  { %4539 = vrot.lane.b32.xlu2 %v9037_v14, %s5861_s16  ;;  %4535 = vrot.lane.b32.xlu0 %v4508_v30, %s5861_s16  ;;  %v4506_v14 = vmul.f32 %v9006_v12, %v11163_v23  ;;  %v9286_v30 = vmul.f32 0.0, %v8641_v44 }
0x1648   :  { %v9269_v38 = vpop.permute.xlu1 %3809  ;;  %v3435_v4 = vadd.f32 %v3412_v56, %v3347_v26 }
0x1649   :  { %11242 = vst [vmem:[#allocation136_spill] sm:$0xff] %v9269_v38  ;;  %v9271_v32 = vpop.permute.xlu2 %4275  ;;  %v9273_v37 = vpop.permute.xlu0 %3807  ;;  %v3434_v22 = vadd.f32 %v3411_v59, %v9286_v30  ;;  %v3567_v38 = vsel %vm363_vm2, %v8691_v45, %v8702_v51 }
0x164a   :  { %11243 = vst [vmem:[#allocation137_spill] sm:$0xff] %v9271_v32  ;;  %v3348_v32 = vmul.f32 %v8641_v44, %v8016_v28  ;;  %v3503_v1 = vadd.f32 %v3480_v5, %v3435_v4  ;;  %v3656_v5 = vsel %vm452_vm3, %v8784_v33, %v8794_v35  ;;  %v11249_v35 = vld [vmem:[#allocation87_spill] sm:$0xff] }
0x164b   :  { %11244 = vst [vmem:[#allocation138_spill] sm:$0xff] %v9273_v37  ;;  %v4505_v37 = vmul.f32 %v9006_v12, %v11162_v61  ;;  %v3568_v12 = vsel %vm363_vm2, %v8702_v51, %v8757_v43  ;;  %v3409_v51 = vsel %vm173_vm0, %v8611_v62, %v8601_v3  ;;  %v3344_v43 = vmul.f32 %v8561_v18, %v8008_v46 }
0x164c   :  { %v3436_v23 = vadd.f32 %v8657_v63, %v3348_v32  ;;  %v3502_v63 = vadd.f32 %v8664_v42, %v3434_v22  ;;  %v3655_v32 = vsel %vm452_vm3, %v8827_v52, %v8784_v33  ;;  %v11250_v22 = vld [vmem:[#allocation9_spill] sm:$0xff] }
0x164e   :  { %4531 = vrot.lane.b32.xlu1 %v4506_v14, %s5861_s16  ;;  %v3504_v59 = vadd.f32 %v8729_v34, %v3436_v23  ;;  %v3410_v23 = vsel %vm173_vm0, %v8601_v3, %v8651_v25  ;;  %v3590_v42 = vadd.f32 %v8691_v45, %v3502_v63 }
0x164f   :  { %4533 = vrot.lane.b32.xlu2 %v9053_v29, %s5861_s16  ;;  %4529 = vrot.lane.b32.xlu0 %v4505_v37, %s5861_s16  ;;  %v3591_v37 = vadd.f32 %v3567_v38, %v3503_v1  ;;  %v3345_v1 = vmul.f32 %v8561_v18, %v8005_v9  ;;  %v11248_v38 = vld [vmem:[#allocation84_spill] sm:$0xff]  ;;  %v3432_v3 = vadd.f32 %v3410_v23, %v3344_v43 }
0x1650   :  { %v9307_v56 = vpop.permute.xlu1 %3803  ;;  %v3592_v34 = vadd.f32 %v3568_v12, %v3504_v59  ;;  %v3479_v33 = vsel %vm262_vm1, %v11249_v35, %v11248_v38  ;;  %v3678_v62 = vadd.f32 %v8827_v52, %v3590_v42  ;;  %v11251_v12 = vld [vmem:[#allocation76_spill] sm:$0xff]  ;;  %v11255_v42 = vld [vmem:[#allocation110_spill] sm:$0xff] }
0x1651   :  { %11245 = vst [vmem:[#allocation139_spill] sm:$0xff] %v9307_v56  ;;  %v9314_v26 = vpop.permute.xlu2 %3893  ;;  %v9316_v29 = vpop.permute.xlu0 %3801  ;;  %v3679_v14 = vadd.f32 %v3655_v32, %v3591_v37  ;;  %v3433_v45 = vadd.f32 %v8651_v25, %v3345_v1  ;;  %v11252_v59 = vld [vmem:[#allocation80_spill] sm:$0xff]  ;;  %v11256_v25 = vld [vmem:[#allocation105_spill] sm:$0xff]  ;;  %v11258_v1 = vld [vmem:[#allocation99_spill] sm:$0xff] }
0x1652   :  { %11246 = vst [vmem:[#allocation140_spill] sm:$0xff] %v9314_v26  ;;  %v3680_v4 = vadd.f32 %v3656_v5, %v3592_v34  ;;  %v3431_v26 = vadd.f32 %v3409_v51, %v11250_v22  ;;  %v3565_v63 = vsel %vm363_vm2, %v11252_v59, %v11251_v12  ;;  %v11253_v32 = vld [vmem:[#allocation108_spill] sm:$0xff]  ;;  %v3500_v5 = vadd.f32 %v3479_v33, %v3432_v3  ;;  %v11254_v51 = vld [vmem:[#allocation95_spill] sm:$0xff]  ;;  %v11263_v56 = vld [vmem:[#allocation117_spill] sm:$0xff] }
0x1653   :  { %11247 = vst [vmem:[#allocation141_spill] sm:$0xff] %v9316_v29  ;;  %v9343_v37 = vmul.f32 0.0, %v11253_v32  ;;  %v3566_v23 = vsel %vm363_vm2, %v11251_v12, %v11254_v51  ;;  %v3831_v34 = vsel %vm173_vm0, %v11256_v25, %v11255_v42  ;;  %v11259_v22 = vld [vmem:[#allocation103_spill] sm:$0xff]  ;;  %v11262_v51 = vld [vmem:[#allocation100_spill] sm:$0xff]  ;;  %v3768_v29 = vmul.f32 %v11253_v32, %v8016_v28 }
0x1654   :  { %v3499_v52 = vadd.f32 %v11249_v35, %v3431_v26  ;;  %v3588_v12 = vadd.f32 %v3565_v63, %v3500_v5  ;;  %v3654_v25 = vsel %vm452_vm3, %v11258_v1, %v11262_v51  ;;  %v11264_v5 = vld [vmem:[#allocation111_spill] sm:$0xff] }
0x1656   :  { %3713 = vrot.lane.b32.xlu1 %v3679_v14, %s5875_s21  ;;  %v3501_v14 = vadd.f32 %v11248_v38, %v3433_v45  ;;  %v3587_v3 = vadd.f32 %v11252_v59, %v3499_v52  ;;  %v3767_v38 = vmul.f32 %v11253_v32, %v8019_v0 }
0x1657   :  { %3715 = vrot.lane.b32.xlu2 %v3680_v4, %s5875_s21  ;;  %3711 = vrot.lane.b32.xlu0 %v3678_v62, %s5875_s21  ;;  %v3653_v4 = vsel %vm452_vm3, %v11259_v22, %v11258_v1  ;;  %v11260_v62 = vld [vmem:[#allocation106_spill] sm:$0xff]  ;;  %v3920_v1 = vsel %vm262_vm1, %v9048_v47, %v11264_v5 }
0x1658   :  { %v9354_v43 = vpop.permute.xlu1 %3897  ;;  %v3832_v26 = vsel %vm173_vm0, %v11255_v42, %v11260_v62  ;;  %v3589_v45 = vadd.f32 %v3566_v23, %v3501_v14  ;;  %v3854_v42 = vadd.f32 %v3831_v34, %v9343_v37  ;;  %v3675_v59 = vadd.f32 %v11259_v22, %v3587_v3 }
0x1659   :  { %11257 = vst [vmem:[#allocation84_spill] sm:$0xff] %v9354_v43  ;;  %v9363_v35 = vpop.permute.xlu2 %3987  ;;  %v9365_v33 = vpop.permute.xlu0 %3895  ;;  %v3676_v63 = vadd.f32 %v3653_v4, %v3588_v12  ;;  %v3855_v52 = vadd.f32 %v3832_v26, %v3767_v38  ;;  %v3856_v23 = vadd.f32 %v11260_v62, %v3768_v29  ;;  %v11265_v43 = vld [vmem:[#allocation118_spill] sm:$0xff]  ;;  %v4008_v22 = vsel %vm363_vm2, %v9105_v20, %v9101_v57 }
0x165a   :  { %11261 = vst [vmem:[#allocation87_spill] sm:$0xff] %v9363_v35  ;;  %v3919_v35 = vsel %vm262_vm1, %v11263_v56, %v9048_v47  ;;  %v3677_v51 = vadd.f32 %v3654_v25, %v3589_v45  ;;  %v3942_v14 = vadd.f32 %v11263_v56, %v3854_v42  ;;  %v4007_v34 = vsel %vm363_vm2, %v11265_v43, %v9105_v20  ;;  %v11266_v56 = vld [vmem:[#allocation114_spill] sm:$0xff]  ;;  %v11267_v20 = vld [vmem:[#allocation109_spill] sm:$0xff]  ;;  %v11269_v42 = vld [vmem:[#allocation107_spill] sm:$0xff] }
0x165b   :  { %v3943_v32 = vadd.f32 %v3919_v35, %v3855_v52  ;;  %v3944_v4 = vadd.f32 %v3920_v1, %v3856_v23  ;;  %v4095_v47 = vsel %vm452_vm3, %v9103_v15, %v9161_v41  ;;  %v9398_v29 = vmul.f32 0.0, %v11266_v56  ;;  %v11268_v35 = vld [vmem:[#allocation115_spill] sm:$0xff] }
0x165c   :  { %v4096_v26 = vsel %vm452_vm3, %v9161_v41, %v9157_v8  ;;  %v3830_v3 = vsel %vm173_vm0, %v11268_v35, %v11267_v20  ;;  %v4030_v12 = vadd.f32 %v11265_v43, %v3942_v14  ;;  %v3765_v8 = vmul.f32 %v11266_v56, %v8005_v9 }
0x165d   :  { %v4031_v62 = vadd.f32 %v4007_v34, %v3943_v32  ;;  %v4032_v25 = vadd.f32 %v4008_v22, %v3944_v4  ;;  %v9416_v32 = vsel %vm1791_vm5, %v9159_v50, %v9217_v27  ;;  %v3764_v41 = vmul.f32 %v11266_v56, %v8008_v46 }
0x165e   :  { %3707 = vrot.lane.b32.xlu1 %v3676_v63, %s5875_s21  ;;  %v3829_v43 = vsel %vm173_vm0, %v11269_v42, %v11268_v35  ;;  %v11270_v63 = vld [vmem:[#allocation116_spill] sm:$0xff]  ;;  %v4118_v5 = vadd.f32 %v9103_v15, %v4030_v12  ;;  %v4005_v4 = vsel %vm363_vm2, %v9089_v39, %v9147_v17  ;;  %v4093_v35 = vsel %vm452_vm3, %v9145_v7, %v9203_v55  ;;  %v11274_v42 = vld [vmem:[#allocation113_spill] sm:$0xff] }
0x165f   :  { %3709 = vrot.lane.b32.xlu2 %v3677_v51, %s5875_s21  ;;  %3705 = vrot.lane.b32.xlu0 %v3675_v59, %s5875_s21  ;;  %v4119_v59 = vadd.f32 %v4095_v47, %v4031_v62  ;;  %v3917_v52 = vsel %vm262_vm1, %v9075_v16, %v11270_v63  ;;  %v4120_v1 = vadd.f32 %v4096_v26, %v4032_v25 }
0x1660   :  { %v9403_v57 = vpop.permute.xlu1 %4273  ;;  %v3853_v51 = vadd.f32 %v11267_v20, %v3765_v8  ;;  %v3852_v23 = vadd.f32 %v3830_v3, %v3764_v41  ;;  %v3918_v14 = vsel %vm262_vm1, %v11270_v63, %v9087_v40  ;;  %v3851_v22 = vadd.f32 %v3829_v43, %v9398_v29  ;;  %v11271_v3 = vld [vmem:[#allocation112_spill] sm:$0xff]  ;;  %v11273_v8 = vld [vmem:[#allocation119_spill] sm:$0xff] }
0x1661   :  { %v9409_v38 = vpop.permute.xlu2 %4269  ;;  %v9411_v45 = vpop.permute.xlu0 %4271  ;;  %v4143_v34 = vmul.f32 %v9416_v32, %v4119_v59  ;;  %v4144_v47 = vmul.f32 %v9217_v27, %v4120_v1  ;;  %v4142_v15 = vmul.f32 %v9159_v50, %v4118_v5  ;;  %v4006_v26 = vsel %vm363_vm2, %v9147_v17, %v9143_v10 }
0x1662   :  { %v3940_v62 = vadd.f32 %v3917_v52, %v3852_v23  ;;  %v3939_v40 = vadd.f32 %v9075_v16, %v3851_v22  ;;  %v3941_v20 = vadd.f32 %v3918_v14, %v3853_v51  ;;  %v4232_v12 = vmul.f32 %v11271_v3, %v8016_v28  ;;  %v11272_v16 = vld [vmem:[#allocation120_spill] sm:$0xff] }
0x1663   :  { %v4094_v10 = vsel %vm452_vm3, %v9203_v55, %v9199_v13  ;;  %v4295_v41 = vsel %vm173_vm0, %v11273_v8, %v11272_v16  ;;  %v4296_v43 = vsel %vm173_vm0, %v11272_v16, %v11274_v42  ;;  %v9469_v1 = vmul.f32 0.0, %v11271_v3  ;;  %v11279_v8 = vld [vmem:[#allocation121_spill] sm:$0xff] }
0x1664   :  { %v4028_v25 = vadd.f32 %v4005_v4, %v3940_v62  ;;  %v4027_v59 = vadd.f32 %v9089_v39, %v3939_v40  ;;  %v4029_v63 = vadd.f32 %v4006_v26, %v3941_v20  ;;  %v4231_v13 = vmul.f32 %v11271_v3, %v8019_v0  ;;  %v11275_v39 = vld [vmem:[#allocation123_spill] sm:$0xff]  ;;  %v11276_v26 = vld [vmem:[#allocation128_spill] sm:$0xff] }
0x1665   :  { %v4384_v55 = vsel %vm262_vm1, %v9133_v11, %v9129_v21  ;;  %v4320_v23 = vadd.f32 %v11274_v42, %v4232_v12  ;;  %v4383_v14 = vsel %vm262_vm1, %v11275_v39, %v9133_v11  ;;  %v4318_v4 = vadd.f32 %v4295_v41, %v9469_v1 }
0x1666   :  { %4177 = vrot.lane.b32.xlu1 %v4143_v34, %s5883_s27  ;;  %v4116_v51 = vadd.f32 %v4093_v35, %v4028_v25  ;;  %v4115_v34 = vadd.f32 %v9145_v7, %v4027_v59  ;;  %v4117_v22 = vadd.f32 %v4094_v10, %v4029_v63  ;;  %v4471_v40 = vsel %vm363_vm2, %v11276_v26, %v9189_v2  ;;  %v11280_v59 = vld [vmem:[#allocation125_spill] sm:$0xff] }
0x1667   :  { %4179 = vrot.lane.b32.xlu2 %v4144_v47, %s5883_s27  ;;  %4175 = vrot.lane.b32.xlu0 %v4142_v15, %s5883_s27  ;;  %v4319_v47 = vadd.f32 %v4296_v43, %v4231_v13  ;;  %v4472_v15 = vsel %vm363_vm2, %v9189_v2, %v9185_v53  ;;  %v4408_v21 = vadd.f32 %v4384_v55, %v4320_v23  ;;  %v11277_v2 = vld [vmem:[#allocation122_spill] sm:$0xff] }
0x1668   :  { %v9455_v17 = vpop.permute.xlu1 %3891  ;;  %v4140_v62 = vmul.f32 %v9416_v32, %v4116_v51  ;;  %v4141_v20 = vmul.f32 %v9217_v27, %v4117_v22  ;;  %v4139_v11 = vmul.f32 %v9159_v50, %v4115_v34  ;;  %v4560_v35 = vsel %vm452_vm3, %v9187_v49, %v9245_v58  ;;  %v11278_v58 = vld [vmem:[#allocation127_spill] sm:$0xff] }
0x1669   :  { %v9464_v52 = vpop.permute.xlu2 %4363  ;;  %v9466_v5 = vpop.permute.xlu0 %3889  ;;  %v4407_v7 = vadd.f32 %v4383_v14, %v4319_v47  ;;  %v4406_v53 = vadd.f32 %v11275_v39, %v4318_v4  ;;  %v4496_v12 = vadd.f32 %v4472_v15, %v4408_v21  ;;  %v4559_v25 = vsel %vm452_vm3, %v9227_v6, %v9187_v49  ;;  %v11282_v14 = vld [vmem:[#allocation130_spill] sm:$0xff] }
0x166a   :  { %v4229_v10 = vmul.f32 %v11277_v2, %v8005_v9  ;;  %v9504_v16 = vmul.f32 0.0, %v11277_v2  ;;  %v4293_v41 = vsel %vm173_vm0, %v11279_v8, %v11278_v58  ;;  %v4294_v49 = vsel %vm173_vm0, %v11278_v58, %v11280_v59  ;;  %v11283_v15 = vld [vmem:[#allocation126_spill] sm:$0xff] }
0x166b   :  { %v4495_v42 = vadd.f32 %v4471_v40, %v4407_v7  ;;  %v4494_v63 = vadd.f32 %v11276_v26, %v4406_v53  ;;  %v4584_v13 = vadd.f32 %v4560_v35, %v4496_v12  ;;  %v9522_v23 = vsel %vm2258_vm6, %v9255_v36, %v9215_v54  ;;  %v11284_v40 = vld [vmem:[#allocation129_spill] sm:$0xff] }
0x166c   :  { %11281 = vst [vmem:[#allocation9_spill] sm:$0xff] %v9522_v23  ;;  %v4228_v39 = vmul.f32 %v11277_v2, %v8008_v46  ;;  %v4382_v34 = vsel %vm262_vm1, %v11282_v14, %v9171_v48  ;;  %v4317_v4 = vadd.f32 %v11280_v59, %v4229_v10  ;;  %v4315_v47 = vadd.f32 %v4293_v41, %v9504_v16  ;;  %v11285_v48 = vld [vmem:[#allocation132_spill] sm:$0xff]  ;;  %v11286_v10 = vld [vmem:[#allocation131_spill] sm:$0xff] }
0x166d   :  { %v4583_v22 = vadd.f32 %v4559_v25, %v4495_v42  ;;  %v4582_v21 = vadd.f32 %v9227_v6, %v4494_v63  ;;  %v4469_v35 = vsel %vm363_vm2, %v11285_v48, %v11284_v40  ;;  %v4608_v53 = vmul.f32 %v9215_v54, %v4584_v13  ;;  %v11304_v46 = vld [vmem:[#allocation92_spill] sm:$0xff] }
0x166e   :  { %4171 = vrot.lane.b32.xlu1 %v4140_v62, %s5883_s27  ;;  %v4381_v62 = vsel %vm262_vm1, %v11283_v15, %v11282_v14  ;;  %v4316_v26 = vadd.f32 %v4294_v49, %v4228_v39  ;;  %v4405_v7 = vadd.f32 %v4382_v34, %v4317_v4  ;;  %v4558_v6 = vsel %vm452_vm3, %v11286_v10, %v9259_v60 }
0x166f   :  { %4173 = vrot.lane.b32.xlu2 %v4141_v20, %s5883_s27  ;;  %4169 = vrot.lane.b32.xlu0 %v4139_v11, %s5883_s27  ;;  %v4470_v20 = vsel %vm363_vm2, %v11284_v40, %v9231_v19  ;;  %v4607_v11 = vmul.f32 %v9522_v23, %v4583_v22  ;;  %v4606_v12 = vmul.f32 %v9255_v36, %v4582_v21  ;;  %v5847_v40 = vld [vmem:[%s10620_s0 + $0x30] sm:$0xff] }
0x1670   :  { %v9509_v43 = vpop.permute.xlu1 %3985  ;;  %v4404_v25 = vadd.f32 %v4381_v62, %v4316_v26  ;;  %v4403_v19 = vadd.f32 %v11283_v15, %v4315_v47  ;;  %v4493_v58 = vadd.f32 %v4470_v20, %v4405_v7  ;;  %v4557_v8 = vsel %vm452_vm3, %v9241_v31, %v11286_v10  ;;  %v5846_v26 = vld [vmem:[%s10620_s0 + $0x20] sm:$0xff] }
0x1671   :  { %v9515_v55 = vpop.permute.xlu2 %3981  ;;  %v9517_v51 = vpop.permute.xlu0 %3983  ;;  %v44_v20 = vld [vmem:[%s10624_s6] sm:$0x3]  ;;  %v3338_v0 = vmul.f32 %v8561_v18, %v11162_v61 }
0x1672   :  { %v4492_v41 = vadd.f32 %v4469_v35, %v4404_v25  ;;  %v4491_v59 = vadd.f32 %v11285_v48, %v4403_v19  ;;  %v4581_v49 = vadd.f32 %v4558_v6, %v4493_v58  ;;  %v4748_v35 = vperm.slane %v44_v20, 0  ;;  %v11290_v6 = vld [vmem:[#allocation85_spill] sm:$0xff] }
0x1673   :  { %v4749_v10 = vperm.slane %v44_v20, 1  ;;  %v3341_v58 = vmul.f32 %v8641_v44, %v7997_v24  ;;  %v11298_v20 = vld [vmem:[#allocation138_spill] sm:$0xff] }
0x1674   :  { %v4580_v39 = vadd.f32 %v4557_v8, %v4492_v41  ;;  %v4579_v34 = vadd.f32 %v9241_v31, %v4491_v59  ;;  %v4605_v4 = vmul.f32 %v9215_v54, %v4581_v49  ;;  %v5845_v31 = vld [vmem:[%s10620_s0 + $0x38] sm:$0xff] }
0x1675   :  { %v11291_v8 = vld [vmem:[#allocation26_spill] sm:$0xff] }
0x1676   :  { %4641 = vrot.lane.b32.xlu1 %v4607_v11, %s5889_s17  ;;  %v4604_v22 = vmul.f32 %v9522_v23, %v4580_v39  ;;  %v4603_v47 = vmul.f32 %v9255_v36, %v4579_v34  ;;  %v3342_v41 = vmul.f32 %v8641_v44, %v11291_v8  ;;  %v11293_v59 = vld [vmem:[#allocation74_spill] sm:$0xff]  ;;  %v5848_v44 = vld [vmem:[%s10620_s0 + $0x28] sm:$0xff] }
0x1677   :  { %4643 = vrot.lane.b32.xlu2 %v4608_v53, %s5889_s17  ;;  %4639 = vrot.lane.b32.xlu0 %v4606_v12, %s5889_s17  ;;  %v11288_v53 = vld [vmem:[#allocation93_spill] sm:$0xff]  ;;  %v11289_v12 = vld [vmem:[#allocation82_spill] sm:$0xff] }
0x1678   :  { %v4268_v42 = vpop.permute.xlu1 %4267  ;;  %v3408_v25 = vsel %vm173_vm0, %v11289_v12, %v11288_v53  ;;  %v3407_v19 = vsel %vm173_vm0, %v11290_v6, %v11289_v12  ;;  %v3430_v34 = vadd.f32 %v11288_v53, %v3342_v41  ;;  %v11300_v6 = vld [vmem:[#allocation102_spill] sm:$0xff] }
0x1679   :  { %v9555_v63 = vpop.permute.xlu2 %4075  ;;  %v9559_v60 = vsel %vm173_vm0, %v4268_v42, %v9409_v38  ;;  %v4266_v13 = vpop.permute.xlu0 %4265  ;;  %v3428_v39 = vadd.f32 %v3407_v19, %v9286_v30  ;;  %v11297_v30 = vld [vmem:[#allocation136_spill] sm:$0xff] }
0x167a   :  { %11287 = vst [vmem:[#allocation76_spill] sm:$0xff] %v9559_v60  ;;  %v9562_v14 = vsel %vm173_vm0, %v4266_v13, %v4268_v42  ;;  %v11292_v42 = vld [vmem:[#allocation68_spill] sm:$0xff]  ;;  %v3429_v13 = vadd.f32 %v3408_v25, %v3341_v58 }
0x167b   :  { %v3478_v49 = vsel %vm262_vm1, %v11293_v59, %v11292_v42  ;;  %v3496_v12 = vadd.f32 %v11293_v59, %v3428_v39  ;;  %v3498_v25 = vadd.f32 %v11292_v42, %v3430_v34 }
0x167e   :  { %4635 = vrot.lane.b32.xlu1 %v4604_v22, %s5889_s17  ;;  %v11294_v22 = vld [vmem:[#allocation75_spill] sm:$0xff] }
0x167f   :  { %4637 = vrot.lane.b32.xlu2 %v4605_v4, %s5889_s17  ;;  %4633 = vrot.lane.b32.xlu0 %v4603_v47, %s5889_s17  ;;  %v11295_v4 = vld [vmem:[#allocation67_spill] sm:$0xff] }
0x1680   :  { %v9571_v15 = vpop.permute.xlu1 %4361  ;;  %v3563_v47 = vsel %vm363_vm2, %v11295_v4, %v11294_v22  ;;  %v3584_v42 = vadd.f32 %v11295_v4, %v3496_v12  ;;  %v11307_v4 = vld [vmem:[#allocation81_spill] sm:$0xff] }
0x1681   :  { %v9573_v62 = vpop.permute.xlu2 %4357  ;;  %v9575_v21 = vpop.permute.xlu0 %4359 }
0x1686   :  { %4711 = vrot.lane.b32.xlu1 %v5845_v31, %s5864_s20  ;;  %v3497_v31 = vadd.f32 %v3478_v49, %v3429_v13  ;;  %v11301_v49 = vld [vmem:[#allocation12_spill] sm:$0xff] }
0x1687   :  { %4705 = vrot.lane.b32.xlu2 %v5846_v26, %s5864_s20  ;;  %4709 = vrot.lane.b32.xlu0 %v5847_v40, %s5864_s20  ;;  %v11296_v26 = vld [vmem:[#allocation83_spill] sm:$0xff]  ;;  %v3339_v13 = vmul.f32 %v8561_v18, %v11301_v49 }
0x1688   :  { %v9592_v11 = vpop.permute.xlu1 %3979  ;;  %v3564_v40 = vsel %vm363_vm2, %v11294_v22, %v11296_v26  ;;  %v3585_v22 = vadd.f32 %v3563_v47, %v3497_v31  ;;  %v11305_v47 = vld [vmem:[#allocation94_spill] sm:$0xff] }
0x1689   :  { %v9594_v7 = vpop.permute.xlu2 %4451  ;;  %v9596_v48 = vpop.permute.xlu0 %3977  ;;  %v3586_v39 = vadd.f32 %v3564_v40, %v3498_v25  ;;  %v11306_v31 = vld [vmem:[#allocation86_spill] sm:$0xff]  ;;  %v11309_v25 = vld [vmem:[#allocation88_spill] sm:$0xff] }
0x168a   :  { %v3477_v23 = vsel %vm262_vm1, %v11306_v31, %v11305_v47  ;;  %v11308_v40 = vld [vmem:[#allocation66_spill] sm:$0xff] }
0x168b   :  { %v3562_v18 = vsel %vm363_vm2, %v11308_v40, %v11307_v4 }
0x168e   :  { %4750 = vrot.lane.b32.xlu1 %v4748_v35, %s5864_s20  ;;  %v3827_v35 = vsel %vm173_vm0, %v11298_v20, %v11297_v30  ;;  %v11303_v20 = vld [vmem:[#allocation72_spill] sm:$0xff] }
0x168f   :  { %4752 = vrot.lane.b32.xlu2 %v4749_v10, %s5864_s20  ;;  %4707 = vrot.lane.b32.xlu0 %v5848_v44, %s5864_s20  ;;  %v11299_v10 = vld [vmem:[#allocation97_spill] sm:$0xff]  ;;  %v11302_v44 = vld [vmem:[#allocation98_spill] sm:$0xff]  ;;  %v3406_v59 = vsel %vm173_vm0, %v11304_v46, %v11303_v20  ;;  %v3848_v34 = vadd.f32 %v3827_v35, %v9343_v37  ;;  %v3427_v9 = vadd.f32 %v11303_v20, %v3339_v13 }
0x1690   :  { %v4074_v53 = vpop.permute.xlu1 %4073  ;;  %v3651_v19 = vsel %vm452_vm3, %v11300_v6, %v11299_v10  ;;  %v3652_v26 = vsel %vm452_vm3, %v11299_v10, %v11302_v44  ;;  %v3672_v10 = vadd.f32 %v11300_v6, %v3584_v42  ;;  %v3426_v60 = vadd.f32 %v3406_v59, %v3338_v0  ;;  %v11310_v0 = vld [vmem:[#allocation108_spill] sm:$0xff] }
0x1691   :  { %v9633_v58 = vpop.permute.xlu2 %4069  ;;  %v4072_v41 = vpop.permute.xlu0 %4071  ;;  %v3673_v28 = vadd.f32 %v3651_v19, %v3585_v22  ;;  %v3674_v44 = vadd.f32 %v3652_v26, %v3586_v39  ;;  %v3936_v46 = vadd.f32 %v9365_v33, %v3848_v34  ;;  %v3495_v37 = vadd.f32 %v11305_v47, %v3427_v9  ;;  %v11311_v19 = vld [vmem:[#allocation133_spill] sm:$0xff]  ;;  %v11312_v22 = vld [vmem:[#allocation96_spill] sm:$0xff] }
0x1692   :  { %v3494_v12 = vadd.f32 %v3477_v23, %v3426_v60  ;;  %v3561_v6 = vsel %vm363_vm2, %v11309_v25, %v11308_v40  ;;  %v3828_v9 = vsel %vm173_vm0, %v11297_v30, %v11311_v19  ;;  %v11313_v26 = vld [vmem:[#allocation101_spill] sm:$0xff]  ;;  %v3761_v23 = vmul.f32 %v11310_v0, %v7997_v24  ;;  %v11314_v60 = vld [vmem:[#allocation135_spill] sm:$0xff]  ;;  %v11315_v59 = vld [vmem:[#allocation84_spill] sm:$0xff] }
0x1693   :  { %v4024_v35 = vadd.f32 %v9517_v51, %v3936_v46  ;;  %v3650_v20 = vsel %vm452_vm3, %v11313_v26, %v11312_v22  ;;  %v3916_v42 = vsel %vm262_vm1, %v11315_v59, %v11314_v60  ;;  %v3583_v31 = vadd.f32 %v3562_v18, %v3495_v37  ;;  %v11316_v30 = vld [vmem:[#allocation13_spill] sm:$0xff]  ;;  %v11317_v25 = vld [vmem:[#allocation87_spill] sm:$0xff] }
0x1694   :  { %v3915_v46 = vsel %vm262_vm1, %v9365_v33, %v11315_v59  ;;  %v3582_v4 = vadd.f32 %v3561_v6, %v3494_v12  ;;  %v3849_v40 = vadd.f32 %v3828_v9, %v3761_v23  ;;  %v4003_v37 = vsel %vm363_vm2, %v9517_v51, %v9509_v43  ;;  %v11319_v51 = vld [vmem:[#allocation141_spill] sm:$0xff] }
0x1695   :  { %v4112_v39 = vadd.f32 %v4072_v41, %v4024_v35  ;;  %v4004_v35 = vsel %vm363_vm2, %v9509_v43, %v11317_v25  ;;  %v4091_v12 = vsel %vm452_vm3, %v4072_v41, %v4074_v53  ;;  %v11318_v43 = vld [vmem:[#allocation139_spill] sm:$0xff]  ;;  %v4002_v25 = vsel %vm363_vm2, %v9592_v11, %v9515_v55 }
0x1696   :  { %3701 = vrot.lane.b32.xlu1 %v3673_v28, %s5875_s21  ;;  %v3762_v28 = vmul.f32 %v11310_v0, %v11291_v8  ;;  %v3671_v0 = vadd.f32 %v3650_v20, %v3583_v31  ;;  %v3825_v23 = vsel %vm173_vm0, %v11319_v51, %v11318_v43  ;;  %v11321_v31 = vld [vmem:[#allocation140_spill] sm:$0xff] }
0x1697   :  { %3703 = vrot.lane.b32.xlu2 %v3674_v44, %s5875_s21  ;;  %3699 = vrot.lane.b32.xlu0 %v3672_v10, %s5875_s21  ;;  %v3649_v10 = vsel %vm452_vm3, %v11316_v30, %v11313_v26  ;;  %v3937_v26 = vadd.f32 %v3915_v46, %v3849_v40  ;;  %v3914_v30 = vsel %vm262_vm1, %v9455_v17, %v11321_v31 }
0x1698   :  { %v9669_v13 = vpop.permute.xlu1 %4355  ;;  %v3850_v44 = vadd.f32 %v11311_v19, %v3762_v28  ;;  %v3670_v18 = vadd.f32 %v3649_v10, %v3582_v4  ;;  %v4092_v28 = vsel %vm452_vm3, %v4074_v53, %v9555_v63  ;;  %v4136_v19 = vmul.f32 %v9159_v50, %v4112_v39  ;;  %v11320_v53 = vld [vmem:[#allocation134_spill] sm:$0xff] }
0x1699   :  { %v9679_v34 = vpop.permute.xlu2 %4445  ;;  %v9681_v47 = vpop.permute.xlu0 %4353  ;;  %v4025_v6 = vadd.f32 %v4003_v37, %v3937_v26  ;;  %v3826_v41 = vsel %vm173_vm0, %v11318_v43, %v11320_v53  ;;  %v3758_v39 = vmul.f32 %v11266_v56, %v11162_v61  ;;  %v3913_v46 = vsel %vm262_vm1, %v9466_v5, %v9455_v17 }
0x169a   :  { %v3938_v22 = vadd.f32 %v3916_v42, %v3850_v44  ;;  %v3759_v42 = vmul.f32 %v11266_v56, %v11301_v49  ;;  %v3845_v44 = vadd.f32 %v3825_v23, %v9398_v29  ;;  %v4001_v29 = vsel %vm363_vm2, %v9596_v48, %v9592_v11 }
0x169b   :  { %v4113_v60 = vadd.f32 %v4091_v12, %v4025_v6  ;;  %v3846_v40 = vadd.f32 %v3826_v41, %v3758_v39  ;;  %v4226_v23 = vmul.f32 %v11271_v3, %v11291_v8 }
0x169c   :  { %v4026_v33 = vadd.f32 %v4004_v35, %v3938_v22  ;;  %v3847_v10 = vadd.f32 %v11320_v53, %v3759_v42 }
0x169d   :  { %v4137_v56 = vmul.f32 %v9416_v32, %v4113_v60  ;;  %v3934_v22 = vadd.f32 %v3913_v46, %v3846_v40  ;;  %v4380_v60 = vsel %vm262_vm1, %v9571_v15, %v9464_v52 }
0x169e   :  { %3697 = vrot.lane.b32.xlu1 %v3671_v0, %s5875_s21  ;;  %v4114_v9 = vadd.f32 %v4092_v28, %v4026_v33  ;;  %v3935_v35 = vadd.f32 %v3914_v30, %v3847_v10  ;;  %v3933_v0 = vadd.f32 %v9466_v5, %v3845_v44 }
0x169f   :  { %4163 = vrot.lane.b32.xlu2 %v4136_v19, %s5883_s27  ;;  %3695 = vrot.lane.b32.xlu0 %v3670_v18, %s5875_s21  ;;  %v4022_v26 = vadd.f32 %v4001_v29, %v3934_v22 }
0x16a0   :  { %v4450_v20 = vpop.permute.xlu1 %4449  ;;  %v4138_v4 = vmul.f32 %v9217_v27, %v4114_v9  ;;  %v4023_v17 = vadd.f32 %v4002_v25, %v3935_v35  ;;  %v4021_v37 = vadd.f32 %v9596_v48, %v3933_v0  ;;  %v4309_v0 = vadd.f32 %v9562_v14, %v9504_v16 }
0x16a1   :  { %v4540_v63 = vpop.permute.xlu2 %4539  ;;  %v4448_v59 = vpop.permute.xlu0 %4447 }
0x16a2   :  { %v4467_v30 = vsel %vm363_vm2, %v4448_v59, %v4450_v20 }
0x16a6   :  { %4167 = vrot.lane.b32.xlu1 %v4138_v4, %s5883_s27 }
0x16a7   :  { %4165 = vrot.lane.b32.xlu0 %v4137_v56, %s5883_s27 }
0x16a8   :  { %v4068_v18 = vpop.permute.xlu1 %4067 }
0x16a9   :  { %v4090_v55 = vsel %vm452_vm3, %v4068_v18, %v9633_v58  ;;  %v4066_v28 = vpop.permute.xlu0 %4065  ;;  %v4534_v19 = vpop.permute.xlu2 %4533  ;;  %v4291_v58 = vsel %vm173_vm0, %v9411_v45, %v9403_v57  ;;  %v4379_v45 = vsel %vm262_vm1, %v9575_v21, %v9571_v15 }
0x16aa   :  { %v4111_v5 = vadd.f32 %v4090_v55, %v4023_v17  ;;  %v4089_v33 = vsel %vm452_vm3, %v4066_v28, %v4068_v18  ;;  %v4109_v12 = vadd.f32 %v4066_v28, %v4021_v37  ;;  %v4312_v53 = vadd.f32 %v4291_v58, %v9469_v1  ;;  %v11324_v37 = vld [vmem:[#allocation9_spill] sm:$0xff] }
0x16ab   :  { %v4110_v11 = vadd.f32 %v4089_v33, %v4022_v26  ;;  %v4223_v1 = vmul.f32 %v11277_v2, %v11301_v49  ;;  %v4397_v26 = vadd.f32 %v9681_v47, %v4309_v0 }
0x16ac   :  { %v4135_v6 = vmul.f32 %v9217_v27, %v4111_v5  ;;  %v4133_v9 = vmul.f32 %v9159_v50, %v4109_v12  ;;  %v11322_v27 = vld [vmem:[#allocation137_spill] sm:$0xff] }
0x16ad   :  { %v4134_v43 = vmul.f32 %v9416_v32, %v4110_v11  ;;  %v4292_v50 = vsel %vm173_vm0, %v9403_v57, %v11322_v27  ;;  %v4225_v32 = vmul.f32 %v11271_v3, %v7997_v24  ;;  %v4314_v42 = vadd.f32 %v11322_v27, %v4226_v23  ;;  %v5851_v27 = vld [vmem:[%s10620_s0 + $0x18] sm:$0xff] }
0x16ae   :  { %4157 = vrot.lane.b32.xlu2 %v4133_v9, %s5883_s27  ;;  %4161 = vrot.lane.b32.xlu1 %v4135_v6, %s5883_s27  ;;  %v4468_v57 = vsel %vm363_vm2, %v4450_v20, %v9594_v7  ;;  %v4400_v3 = vadd.f32 %v9575_v21, %v4312_v53  ;;  %v4311_v35 = vadd.f32 %v9409_v38, %v4223_v1  ;;  %v11323_v38 = vld [vmem:[#allocation76_spill] sm:$0xff] }
0x16af   :  { %4159 = vrot.lane.b32.xlu0 %v4134_v43, %s5883_s27  ;;  %v4313_v39 = vadd.f32 %v4292_v50, %v4225_v32  ;;  %v4402_v31 = vadd.f32 %v4380_v60, %v4314_v42  ;;  %v4222_v21 = vmul.f32 %v11277_v2, %v11162_v61  ;;  %v4378_v20 = vsel %vm262_vm1, %v9669_v13, %v9573_v62  ;;  %v5852_v42 = vld [vmem:[%s10620_s0 + $0x8] sm:$0xff] }
0x16b0   :  { %v4444_v48 = vpop.permute.xlu1 %4443  ;;  %v4488_v44 = vadd.f32 %v4448_v59, %v4400_v3  ;;  %v4399_v62 = vadd.f32 %v4378_v20, %v4311_v35  ;;  %v11333_v35 = vld [vmem:[#allocation77_spill] sm:$0xff] }
0x16b1   :  { %v4442_v51 = vpop.permute.xlu0 %4441  ;;  %v9760_v41 = vpop.permute.xlu2 %3715  ;;  %v4401_v52 = vadd.f32 %v4379_v45, %v4313_v39  ;;  %v4490_v10 = vadd.f32 %v4468_v57, %v4402_v31  ;;  %v4310_v17 = vadd.f32 %v11323_v38, %v4222_v21  ;;  %v4466_v2 = vsel %vm363_vm2, %v4444_v48, %v9679_v34  ;;  %v11325_v57 = vld [vmem:[#allocation31_spill] sm:$0xff]  ;;  %v11326_v31 = vld [vmem:[#allocation90_spill] sm:$0xff]  ;;  %v11334_v21 = vld [vmem:[#allocation4_spill] sm:$0xff] }
0x16b2   :  { %v4465_v16 = vsel %vm363_vm2, %v4442_v51, %v4444_v48  ;;  %v4487_v55 = vadd.f32 %v4466_v2, %v4399_v62  ;;  %v4485_v28 = vadd.f32 %v4442_v51, %v4397_v26  ;;  %v2464_v3 = vmul.f32 %v11326_v31, %v11325_v57  ;;  %v11340_v26 = vld [vmem:[#allocation21_spill] sm:$0xff] }
0x16b3   :  { %v4489_v4 = vadd.f32 %v4467_v30, %v4401_v52  ;;  %v11327_v30 = vld [vmem:[#allocation29_spill] sm:$0xff]  ;;  %v2804_v20 = vsel %vm452_vm3, %v11334_v21, %v11333_v35  ;;  %v11351_v35 = vld [vmem:[#allocation14_spill] sm:$0xff] }
0x16b4   :  { %v2552_v52 = vadd.f32 %v11327_v30, %v2464_v3 }
0x16b8   :  { %v4538_v46 = vpop.permute.xlu1 %4537 }
0x16b9   :  { %v4556_v15 = vsel %vm452_vm3, %v4538_v46, %v4540_v63  ;;  %v4536_v40 = vpop.permute.xlu0 %4535  ;;  %v4377_v63 = vsel %vm262_vm1, %v9681_v47, %v9669_v13  ;;  %v9789_v14 = vpop.permute.xlu2 %3709 }
0x16ba   :  { %v4578_v25 = vadd.f32 %v4556_v15, %v4490_v10  ;;  %v4555_v56 = vsel %vm452_vm3, %v4536_v40, %v4538_v46  ;;  %v4576_v7 = vadd.f32 %v4536_v40, %v4488_v44  ;;  %v4398_v13 = vadd.f32 %v4377_v63, %v4310_v17  ;;  %v11328_v10 = vld [vmem:[#allocation58_spill] sm:$0xff]  ;;  %v11329_v44 = vld [vmem:[#allocation45_spill] sm:$0xff] }
0x16bb   :  { %v4577_v59 = vadd.f32 %v4555_v56, %v4489_v4  ;;  %v2716_v46 = vsel %vm363_vm2, %v11329_v44, %v11328_v10  ;;  %v11330_v4 = vld [vmem:[#allocation37_spill] sm:$0xff]  ;;  %v11332_v56 = vld [vmem:[#allocation38_spill] sm:$0xff] }
0x16bc   :  { %v4602_v29 = vmul.f32 %v9215_v54, %v4578_v25  ;;  %v4600_v22 = vmul.f32 %v9255_v36, %v4576_v7  ;;  %v4486_v34 = vadd.f32 %v4465_v16, %v4398_v13  ;;  %v2640_v15 = vadd.f32 %v11330_v4, %v2552_v52  ;;  %v11331_v25 = vld [vmem:[#allocation39_spill] sm:$0xff]  ;;  %v11337_v17 = vld [vmem:[#allocation17_spill] sm:$0xff]  ;;  %v11341_v16 = vld [vmem:[#allocation36_spill] sm:$0xff] }
0x16bd   :  { %v4601_v18 = vmul.f32 %v11324_v37, %v4577_v59  ;;  %v2527_v7 = vsel %vm173_vm0, %v11332_v56, %v11331_v25  ;;  %v9854_v59 = vmul.f32 0.0, %v11326_v31  ;;  %v2528_v0 = vsel %vm173_vm0, %v11331_v25, %v11327_v30  ;;  %v11347_v52 = vld [vmem:[#allocation52_spill] sm:$0xff]  ;;  %v11348_v10 = vld [vmem:[#allocation33_spill] sm:$0xff] }
0x16be   :  { %4627 = vrot.lane.b32.xlu2 %v4600_v22, %s5889_s17  ;;  %4631 = vrot.lane.b32.xlu1 %v4602_v29, %s5889_s17  ;;  %v2740_v63 = vadd.f32 %v2716_v46, %v2640_v15  ;;  %v11335_v29 = vld [vmem:[#allocation15_spill] sm:$0xff]  ;;  %v2463_v2 = vmul.f32 %v11326_v31, %v11337_v17  ;;  %v2525_v13 = vsel %vm173_vm0, %v11341_v16, %v11340_v26  ;;  %v11350_v25 = vld [vmem:[#allocation124_spill] sm:$0xff] }
0x16bf   :  { %4629 = vrot.lane.b32.xlu0 %v4601_v18, %s5889_s17  ;;  %v11336_v22 = vld [vmem:[#allocation11_spill] sm:$0xff]  ;;  %v11339_v18 = vld [vmem:[#allocation22_spill] sm:$0xff]  ;;  %v2714_v46 = vsel %vm363_vm2, %v11348_v10, %v11347_v52 }
0x16c0   :  { %v4532_v5 = vpop.permute.xlu1 %4531  ;;  %v2461_v38 = vmul.f32 %v11336_v22, %v11335_v29 }
0x16c1   :  { %v4554_v33 = vsel %vm452_vm3, %v4532_v5, %v4534_v19  ;;  %v4530_v12 = vpop.permute.xlu0 %4529  ;;  %v9802_v51 = vpop.permute.xlu2 %4179 }
0x16c2   :  { %v4575_v11 = vadd.f32 %v4554_v33, %v4487_v55  ;;  %v4553_v47 = vsel %vm452_vm3, %v4530_v12, %v4532_v5  ;;  %v4573_v6 = vadd.f32 %v4530_v12, %v4485_v28  ;;  %v2550_v55 = vadd.f32 %v2527_v7, %v9854_v59 }
0x16c3   :  { %v4574_v9 = vadd.f32 %v4553_v47, %v4486_v34  ;;  %v2828_v5 = vadd.f32 %v2804_v20, %v2740_v63  ;;  %v9874_v34 = vmul.f32 0.0, %v11336_v22  ;;  %v2551_v33 = vadd.f32 %v2528_v0, %v2463_v2  ;;  %v11352_v0 = vld [vmem:[#allocation46_spill] sm:$0xff] }
0x16c4   :  { %v4599_v43 = vmul.f32 %v9215_v54, %v4575_v11  ;;  %v4597_v48 = vmul.f32 %v9255_v36, %v4573_v6  ;;  %v5849_v54 = vld [vmem:[%s10620_s0] sm:$0xff]  ;;  %v5850_v36 = vld [vmem:[%s10620_s0 + $0x10] sm:$0xff]  ;;  %v2460_v20 = vmul.f32 %v11336_v22, %v11351_v35  ;;  %v11353_v2 = vld [vmem:[#allocation6_spill] sm:$0xff] }
0x16c5   :  { %v4598_v58 = vmul.f32 %v11324_v37, %v4574_v9  ;;  %v11338_v37 = vld [vmem:[#allocation42_spill] sm:$0xff]  ;;  %v11342_v11 = vld [vmem:[#allocation49_spill] sm:$0xff] }
0x16c6   :  { %4621 = vrot.lane.b32.xlu2 %v4597_v48, %s5889_s17  ;;  %4625 = vrot.lane.b32.xlu1 %v4599_v43, %s5889_s17  ;;  %v2615_v62 = vsel %vm262_vm1, %v11339_v18, %v11338_v37  ;;  %v2616_v28 = vsel %vm262_vm1, %v11338_v37, %v11330_v4  ;;  %v2549_v47 = vadd.f32 %v11342_v11, %v2461_v38  ;;  %v11343_v9 = vld [vmem:[#allocation50_spill] sm:$0xff]  ;;  %v11344_v48 = vld [vmem:[#allocation69_spill] sm:$0xff]  ;;  %v11349_v4 = vld [vmem:[#allocation55_spill] sm:$0xff] }
0x16c7   :  { %4623 = vrot.lane.b32.xlu0 %v4598_v58, %s5889_s17  ;;  %v2638_v6 = vadd.f32 %v2615_v62, %v2550_v55  ;;  %v2715_v43 = vsel %vm363_vm2, %v11343_v9, %v11329_v44  ;;  %v2852_v58 = vmul.f32 %v11344_v48, %v2828_v5  ;;  %v2639_v3 = vadd.f32 %v2616_v28, %v2551_v33  ;;  %v11354_v37 = vld [vmem:[#allocation62_spill] sm:$0xff]  ;;  %v11355_v62 = vld [vmem:[#allocation91_spill] sm:$0xff] }
0x16c8   :  { %v9804_v19 = vpop.permute.xlu1 %3713  ;;  %v2803_v15 = vsel %vm452_vm3, %v11349_v4, %v11334_v21  ;;  %v2637_v63 = vadd.f32 %v11352_v0, %v2549_v47  ;;  %v2802_v18 = vsel %vm452_vm3, %v11354_v37, %v11353_v2  ;;  %v11356_v28 = vld [vmem:[#allocation27_spill] sm:$0xff] }
0x16c9   :  { %v9806_v23 = vpop.permute.xlu0 %3711  ;;  %v9824_v60 = vpop.permute.xlu2 %4173  ;;  %v2738_v44 = vadd.f32 %v11343_v9, %v2638_v6  ;;  %v2864_v56 = vadd.f32 %v2852_v58, %v11350_v25  ;;  %v2739_v38 = vadd.f32 %v2715_v43, %v2639_v3  ;;  %v2713_v5 = vsel %vm363_vm2, %v11356_v28, %v11348_v10 }
0x16cb   :  { %v2826_v21 = vadd.f32 %v11349_v4, %v2738_v44  ;;  %v2827_v55 = vadd.f32 %v2803_v15, %v2739_v38 }
0x16cd   :  { %v2850_v6 = vmul.f32 %v11355_v62, %v2826_v21 }
0x16ce   :  { %4697 = vrot.lane.b32.xlu1 %v5849_v54, %s5864_s20  ;;  %4701 = vrot.lane.b32.xlu2 %v5850_v36, %s5864_s20  ;;  %v2526_v54 = vsel %vm173_vm0, %v11340_v26, %v11342_v11  ;;  %v2547_v36 = vadd.f32 %v2525_v13, %v9874_v34  ;;  %v9911_v26 = vsel %vm493_vm7, %v11355_v62, %v11344_v48  ;;  %v11357_v11 = vld [vmem:[#allocation73_spill] sm:$0xff] }
0x16cf   :  { %4703 = vrot.lane.b32.xlu0 %v5851_v27, %s5864_s20  ;;  %v11345_v27 = vld [vmem:[#allocation25_spill] sm:$0xff]  ;;  %v2548_v16 = vadd.f32 %v2526_v54, %v2460_v20  ;;  %v2737_v13 = vadd.f32 %v2714_v46, %v2637_v63  ;;  %v3328_v47 = vadd.f32 %v11357_v11, %v2864_v56  ;;  %v2851_v58 = vmul.f32 %v9911_v26, %v2827_v55  ;;  %v11359_v20 = vld [vmem:[#allocation79_spill] sm:$0xff] }
0x16d0   :  { %v9820_v50 = vpop.permute.xlu1 %3707  ;;  %v2614_v29 = vsel %vm262_vm1, %v11345_v27, %v11352_v0  ;;  %v11360_v0 = vld [vmem:[#allocation70_spill] sm:$0xff]  ;;  %v3304_v38 = vsel %vm956_vm8, %v11359_v20, %v11357_v11  ;;  %v11364_v11 = vld [vmem:[#allocation3_spill] sm:$0xff] }
0x16d1   :  { %v9822_v32 = vpop.permute.xlu0 %3705  ;;  %v9834_v39 = vpop.permute.xlu2 %4643  ;;  %v2636_v9 = vadd.f32 %v2614_v29, %v2548_v16  ;;  %v2825_v43 = vadd.f32 %v2802_v18, %v2737_v13  ;;  %v2863_v10 = vadd.f32 %v2851_v58, %v11350_v25  ;;  %v3303_v63 = vsel %vm956_vm8, %v11360_v0, %v11359_v20  ;;  %v11361_v18 = vld [vmem:[#allocation89_spill] sm:$0xff] }
0x16d2   :  { %v3723_v29 = vsel %vm1377_vm9, %v9806_v23, %v9804_v19 }
0x16d3   :  { %v2736_v3 = vadd.f32 %v2713_v5, %v2636_v9  ;;  %v2849_v52 = vmul.f32 %v11344_v48, %v2825_v43  ;;  %v3327_v13 = vadd.f32 %v3304_v38, %v2863_v10 }
0x16d5   :  { %v2861_v21 = vadd.f32 %v2849_v52, %v11361_v18 }
0x16d6   :  { %4699 = vrot.lane.b32.xlu2 %v5852_v42, %s5864_s20  ;;  %v11346_v42 = vld [vmem:[#allocation41_spill] sm:$0xff] }
0x16d7   :  { %v2613_v57 = vsel %vm262_vm1, %v11346_v42, %v11345_v27  ;;  %v3748_v42 = vadd.f32 %v9760_v41, %v3328_v47 }
0x16d8   :  { %v9830_v53 = vpop.permute.xlu1 %4177  ;;  %v2635_v17 = vadd.f32 %v2613_v57, %v2547_v36  ;;  %v11358_v36 = vld [vmem:[#allocation60_spill] sm:$0xff]  ;;  %v2862_v57 = vadd.f32 %v2850_v6, %v11350_v25 }
0x16d9   :  { %v9832_v45 = vpop.permute.xlu0 %4175  ;;  %v9876_v12 = vpop.permute.xlu2 %4637  ;;  %v2801_v54 = vsel %vm452_vm3, %v11358_v36, %v11354_v37  ;;  %v4212_v15 = vadd.f32 %v9802_v51, %v3748_v42  ;;  %v4188_v5 = vsel %vm1844_vm10, %v9830_v53, %v9802_v51 }
0x16da   :  { %v2735_v33 = vadd.f32 %v11356_v28, %v2635_v17  ;;  %v2824_v35 = vadd.f32 %v2801_v54, %v2736_v3  ;;  %v3724_v17 = vsel %vm1377_vm9, %v9804_v19, %v9760_v41  ;;  %v3326_v2 = vadd.f32 %v3303_v63, %v2862_v57  ;;  %v11362_v41 = vld [vmem:[#allocation78_spill] sm:$0xff] }
0x16db   :  { %v4676_v37 = vadd.f32 %v9834_v39, %v4212_v15  ;;  %v4187_v23 = vsel %vm1844_vm10, %v9832_v45, %v9830_v53  ;;  %v3325_v19 = vadd.f32 %v11362_v41, %v2861_v21  ;;  %v3747_v6 = vadd.f32 %v3724_v17, %v3327_v13 }
0x16dc   :  { %v2823_v27 = vadd.f32 %v11358_v36, %v2735_v33  ;;  %v2848_v16 = vmul.f32 %v9911_v26, %v2824_v35  ;;  %v3746_v28 = vadd.f32 %v3723_v29, %v3326_v2  ;;  %v11363_v33 = vld [vmem:[#allocation65_spill] sm:$0xff]  ;;  %v3722_v57 = vsel %vm1377_vm9, %v9820_v50, %v9789_v14 }
0x16dd   :  { %v3301_v47 = vsel %vm956_vm8, %v11364_v11, %v11363_v33  ;;  %v3302_v45 = vsel %vm956_vm8, %v11363_v33, %v11362_v41  ;;  %v4688_v43 = vmax.f32 %v4676_v37, 0.0  ;;  %v3745_v53 = vadd.f32 %v9789_v14, %v3325_v19 }
0x16de   :  { %v2847_v4 = vmul.f32 %v11355_v62, %v2823_v27  ;;  %v4210_v58 = vadd.f32 %v4187_v23, %v3746_v28  ;;  %v2860_v51 = vadd.f32 %v2848_v16, %v11361_v18  ;;  %v3721_v27 = vsel %vm1377_vm9, %v9822_v32, %v9820_v50 }
0x16df   :  { %v4211_v54 = vadd.f32 %v4188_v5, %v3747_v6 }
0x16e0   :  { %v9842_v1 = vpop.permute.xlu1 %4171  ;;  %v2859_v55 = vadd.f32 %v2847_v4, %v11361_v18 }
0x16e1   :  { %v9845_v40 = vpop.permute.xlu0 %4169  ;;  %v9928_v46 = vpop.permute.xlu2 %4705  ;;  %v4186_v20 = vsel %vm1844_vm10, %v9842_v1, %v9824_v60 }
0x16e2   :  { %v4185_v4 = vsel %vm1844_vm10, %v9845_v40, %v9842_v1 }
0x16e8   :  { %v4642_v30 = vpop.permute.xlu1 %4641 }
0x16e9   :  { %v4640_v7 = vpop.permute.xlu0 %4639  ;;  %v4652_v36 = vsel %vm2311_vm11, %v4642_v30, %v9834_v39  ;;  %v3324_v39 = vadd.f32 %v3302_v45, %v2860_v51  ;;  %v9978_v15 = vpop.permute.xlu2 %4752 }
0x16ea   :  { %v4651_v9 = vsel %vm2311_vm11, %v4640_v7, %v4642_v30  ;;  %v3323_v7 = vadd.f32 %v3301_v47, %v2859_v55  ;;  %v4209_v30 = vadd.f32 %v9824_v60, %v3745_v53  ;;  %v4675_v32 = vadd.f32 %v4652_v36, %v4211_v54  ;;  %v11365_v53 = vld [vmem:[#allocation18_spill] sm:$0xff] }
0x16eb   :  { %v4674_v3 = vadd.f32 %v4651_v9, %v4210_v58  ;;  %v3744_v50 = vadd.f32 %v3722_v57, %v3324_v39  ;;  %v11368_v57 = vld [vmem:[#allocation20_spill] sm:$0xff] }
0x16ec   :  { %v3743_v35 = vadd.f32 %v3721_v27, %v3323_v7  ;;  %v4673_v0 = vadd.f32 %v9876_v12, %v4209_v30  ;;  %v4687_v37 = vmax.f32 %v4675_v32, 0.0  ;;  %v11366_v27 = vld [vmem:[#allocation19_spill] sm:$0xff]  ;;  %v11367_v7 = vld [vmem:[#allocation40_spill] sm:$0xff] }
0x16ed   :  { %v4686_v38 = vmax.f32 %v4674_v3, 0.0  ;;  %v4208_v2 = vadd.f32 %v4186_v20, %v3744_v50  ;;  %v2523_v54 = vsel %vm173_vm0, %v11366_v27, %v11365_v53  ;;  %v2611_v3 = vsel %vm262_vm1, %v11368_v57, %v11367_v7  ;;  %v11369_v32 = vld [vmem:[#allocation44_spill] sm:$0xff]  ;;  %v11370_v20 = vld [vmem:[#allocation34_spill] sm:$0xff] }
0x16ee   :  { %v4207_v29 = vadd.f32 %v4185_v4, %v3743_v35  ;;  %v4685_v21 = vmax.f32 %v4673_v0, 0.0  ;;  %v2544_v39 = vadd.f32 %v2523_v54, %v9854_v59  ;;  %v11382_v57 = vld [vmem:[#allocation24_spill] sm:$0xff] }
0x16f0   :  { %v4636_v44 = vpop.permute.xlu1 %4635  ;;  %v2632_v4 = vadd.f32 %v2611_v3, %v2544_v39 }
0x16f1   :  { %v4634_v56 = vpop.permute.xlu0 %4633  ;;  %v4650_v40 = vsel %vm2311_vm11, %v4636_v44, %v9876_v12  ;;  %v10022_v9 = vpop.permute.xlu2 %3703 }
0x16f2   :  { %v4649_v63 = vsel %vm2311_vm11, %v4634_v56, %v4636_v44  ;;  %v4672_v16 = vadd.f32 %v4650_v40, %v4208_v2  ;;  %v2732_v35 = vadd.f32 %v11369_v32, %v2632_v4  ;;  %v2455_v40 = vmul.f32 %v11336_v22, %v11301_v49  ;;  %v11374_v2 = vld [vmem:[#allocation23_spill] sm:$0xff] }
0x16f3   :  { %v4671_v60 = vadd.f32 %v4649_v63, %v4207_v29  ;;  %v2458_v63 = vmul.f32 %v11326_v31, %v11291_v8  ;;  %v11372_v29 = vld [vmem:[#allocation71_spill] sm:$0xff]  ;;  %v2457_v8 = vmul.f32 %v11326_v31, %v7997_v24  ;;  %v2454_v49 = vmul.f32 %v11336_v22, %v11162_v61  ;;  %v11380_v22 = vld [vmem:[#allocation48_spill] sm:$0xff] }
0x16f4   :  { %v4684_v19 = vmax.f32 %v4672_v16, 0.0 }
0x16f5   :  { %v4683_v5 = vmax.f32 %v4671_v60, 0.0 }
0x16f7   :  { %v10018_v47 = vadd.f32 %v9928_v46, %v4683_v5  ;;  %v11377_v5 = vld [vmem:[#allocation35_spill] sm:$0xff] }
0x16f8   :  { %v4712_v42 = vpop.permute.xlu1 %4711 }
0x16f9   :  { %v9972_v52 = vadd.f32 %v4712_v42, %v4688_v43  ;;  %v4710_v10 = vpop.permute.xlu0 %4709  ;;  %v4164_v36 = vpop.permute.xlu2 %4163 }
0x16fa   :  { %v4716_v17 = vsel %vm493_vm7, %v4710_v10, %v4712_v42  ;;  %v9991_v1 = vadd.f32 %v4710_v10, %v4686_v38  ;;  %v2820_v38 = vadd.f32 %v11372_v29, %v2732_v35  ;;  %v11383_v35 = vld [vmem:[#allocation47_spill] sm:$0xff] }
0x16fb   :  { %v4950_v14 = vmul.f32 %v9978_v15, %v9972_v52  ;;  %v9993_v13 = vadd.f32 %v4716_v17, %v4687_v37  ;;  %v11373_v17 = vld [vmem:[#allocation43_spill] sm:$0xff]  ;;  %v11375_v37 = vld [vmem:[#allocation32_spill] sm:$0xff] }
0x16fc   :  { %v2524_v59 = vsel %vm173_vm0, %v11365_v53, %v11373_v17  ;;  %v2609_v60 = vsel %vm262_vm1, %v11375_v37, %v11374_v2 }
0x16fd   :  { %4967 = vrot.lane.b32.xlu2 %v4950_v14, %s5890_s18  ;;  %v11371_v14 = vld [vmem:[#allocation16_spill] sm:$0xff] }
0x16fe   :  { %v2521_v50 = vsel %vm173_vm0, %v11371_v14, %v11370_v20 }
0x16ff   :  { %v2541_v16 = vadd.f32 %v2521_v50, %v9874_v34  ;;  %v2545_v34 = vadd.f32 %v2524_v59, %v2457_v8 }
0x1700   :  { %v9995_v23 = vpop.permute.xlu1 %4750 }
0x1701   :  { %v10000_v56 = vsel %vm493_vm7, %v9995_v23, %v9978_v15  ;;  %v4708_v12 = vpop.permute.xlu0 %4707  ;;  %v4948_v44 = vmul.f32 %v9995_v23, %v9991_v1  ;;  %v4945_v6 = vmul.f32 %v9995_v23, %v10018_v47  ;;  %v2629_v31 = vadd.f32 %v2609_v60, %v2541_v16  ;;  %v11388_v60 = vld [vmem:[#allocation63_spill] sm:$0xff] }
0x1702   :  { %v10004_v55 = vadd.f32 %v4708_v12, %v4685_v21  ;;  %v4949_v28 = vmul.f32 %v10000_v56, %v9993_v13  ;;  %v4715_v41 = vsel %vm493_vm7, %v9928_v46, %v4708_v12  ;;  %v2546_v21 = vadd.f32 %v11373_v17, %v2458_v63  ;;  %v11384_v63 = vld [vmem:[#allocation53_spill] sm:$0xff]  ;;  %v11386_v17 = vld [vmem:[#allocation54_spill] sm:$0xff] }
0x1703   :  { %4963 = vrot.lane.b32.xlu0 %v4948_v44, %s5890_s18  ;;  %v10014_v11 = vadd.f32 %v4715_v41, %v4684_v19  ;;  %v2844_v12 = vmul.f32 %v11355_v62, %v2820_v38  ;;  %v11376_v44 = vld [vmem:[#allocation28_spill] sm:$0xff]  ;;  %v2612_v41 = vsel %vm262_vm1, %v11367_v7, %v11377_v5  ;;  %v11378_v19 = vld [vmem:[#allocation61_spill] sm:$0xff]  ;;  %v2729_v14 = vadd.f32 %v11383_v35, %v2629_v31 }
0x1704   :  { %v4947_v33 = vmul.f32 %v9978_v15, %v10004_v55  ;;  %4965 = vrot.lane.b32.xlu1 %v4949_v28, %s5890_s18  ;;  %v2543_v28 = vadd.f32 %v11376_v44, %v2455_v40  ;;  %v2634_v24 = vadd.f32 %v11377_v5, %v2546_v21  ;;  %v2522_v61 = vsel %vm173_vm0, %v11370_v20, %v11376_v44  ;;  %v11381_v7 = vld [vmem:[#allocation57_spill] sm:$0xff]  ;;  %v11385_v38 = vld [vmem:[#allocation8_spill] sm:$0xff]  ;;  %v11387_v20 = vld [vmem:[#allocation59_spill] sm:$0xff] }
0x1705   :  { %v4946_v45 = vmul.f32 %v10000_v56, %v10014_v11  ;;  %v2856_v53 = vadd.f32 %v2844_v12, %v11350_v25  ;;  %v2710_v3 = vsel %vm363_vm2, %v11382_v57, %v11381_v7  ;;  %v2633_v4 = vadd.f32 %v2612_v41, %v2545_v34  ;;  %v11389_v21 = vld [vmem:[#allocation10_spill] sm:$0xff]  ;;  %v11390_v44 = vld [vmem:[#allocation51_spill] sm:$0xff] }
0x1706   :  { %4961 = vrot.lane.b32.xlu2 %v4947_v33, %s5890_s18  ;;  %v11379_v33 = vld [vmem:[#allocation30_spill] sm:$0xff]  ;;  %v2631_v54 = vadd.f32 %v11380_v22, %v2543_v28  ;;  %v2800_v40 = vsel %vm452_vm3, %v11385_v38, %v11384_v63  ;;  %v2798_v59 = vsel %vm452_vm3, %v11387_v20, %v11386_v17  ;;  %v2799_v37 = vsel %vm452_vm3, %v11372_v29, %v11385_v38  ;;  %v11393_v38 = vld [vmem:[#allocation104_spill] sm:$0xff] }
0x1707   :  { %v2711_v39 = vsel %vm363_vm2, %v11369_v32, %v11379_v33  ;;  %v3299_v32 = vsel %vm956_vm8, %v11389_v21, %v11388_v60  ;;  %v2817_v28 = vadd.f32 %v11390_v44, %v2729_v14  ;;  %v2542_v41 = vadd.f32 %v2522_v61, %v2454_v49  ;;  %v11394_v21 = vld [vmem:[#allocation64_spill] sm:$0xff] }
0x1708   :  { %v10026_v43 = vpop.permute.xlu1 %3701  ;;  %v10037_v42 = vpop.permute.xlu2 %4157  ;;  %v2731_v8 = vadd.f32 %v2710_v3, %v2631_v54  ;;  %v2733_v12 = vadd.f32 %v2711_v39, %v2633_v4  ;;  %v3320_v5 = vadd.f32 %v3299_v32, %v2856_v53  ;;  %v2709_v54 = vsel %vm363_vm2, %v11383_v35, %v11382_v57  ;;  %v11392_v39 = vld [vmem:[#allocation56_spill] sm:$0xff] }
0x1709   :  { %v3700_v58 = vpop.permute.xlu0 %3699  ;;  %v2841_v31 = vmul.f32 %v11355_v62, %v2817_v28  ;;  %v2797_v3 = vsel %vm452_vm3, %v11390_v44, %v11387_v20  ;;  %v11391_v62 = vld [vmem:[#allocation7_spill] sm:$0xff]  ;;  %v3300_v32 = vsel %vm956_vm8, %v11388_v60, %v11394_v21 }
0x170a   :  { %v3719_v16 = vsel %vm1377_vm9, %v3700_v58, %v10026_v43  ;;  %v2819_v34 = vadd.f32 %v2798_v59, %v2731_v8  ;;  %v3297_v4 = vsel %vm956_vm8, %v11392_v39, %v11391_v62 }
0x170b   :  { %4957 = vrot.lane.b32.xlu0 %v4945_v6, %s5890_s18  ;;  %v2712_v6 = vsel %vm363_vm2, %v11379_v33, %v11378_v19  ;;  %v2610_v19 = vsel %vm262_vm1, %v11374_v2, %v11380_v22  ;;  %v3740_v58 = vadd.f32 %v3719_v16, %v3320_v5 }
0x170c   :  { %4959 = vrot.lane.b32.xlu1 %v4946_v45, %s5890_s18  ;;  %v2734_v50 = vadd.f32 %v2712_v6, %v2634_v24  ;;  %v2821_v24 = vadd.f32 %v2799_v37, %v2733_v12  ;;  %v2630_v61 = vadd.f32 %v2610_v19, %v2542_v41  ;;  %v2843_v2 = vmul.f32 %v11344_v48, %v2819_v34 }
0x170e   :  { %v2822_v33 = vadd.f32 %v2800_v40, %v2734_v50  ;;  %v2845_v22 = vmul.f32 %v9911_v26, %v2821_v24  ;;  %v2730_v14 = vadd.f32 %v2709_v54, %v2630_v61  ;;  %v2853_v50 = vadd.f32 %v2841_v31, %v11361_v18 }
0x170f   :  { %v2855_v20 = vadd.f32 %v2843_v2, %v11361_v18 }
0x1710   :  { %v10030_v51 = vpop.permute.xlu1 %3697  ;;  %v2846_v49 = vmul.f32 %v11344_v48, %v2822_v33  ;;  %v2857_v48 = vadd.f32 %v2845_v22, %v11350_v25  ;;  %v2818_v17 = vadd.f32 %v2797_v3, %v2730_v14  ;;  %v3317_v59 = vadd.f32 %v3297_v4, %v2853_v50  ;;  %v11395_v33 = vld [vmem:[#allocation5_spill] sm:$0xff] }
0x1711   :  { %v10032_v46 = vpop.permute.xlu0 %3695 }
0x1712   :  { %v2858_v57 = vadd.f32 %v2846_v49, %v11350_v25  ;;  %v3717_v40 = vsel %vm1377_vm9, %v11393_v38, %v10032_v46  ;;  %v3720_v25 = vsel %vm1377_vm9, %v10026_v43, %v10022_v9  ;;  %v2842_v12 = vmul.f32 %v9911_v26, %v2818_v17 }
0x1713   :  { %v3321_v44 = vadd.f32 %v3300_v32, %v2857_v48  ;;  %v3737_v28 = vadd.f32 %v3717_v40, %v3317_v59  ;;  %v3319_v43 = vadd.f32 %v11395_v33, %v2855_v20  ;;  %v3298_v26 = vsel %vm956_vm8, %v11391_v62, %v11395_v33 }
0x1714   :  { %v3718_v2 = vsel %vm1377_vm9, %v10032_v46, %v10030_v51 }
0x1715   :  { %v3739_v61 = vadd.f32 %v10030_v51, %v3319_v43 }
0x1718   :  { %v10042_v10 = vpop.permute.xlu1 %4167  ;;  %v4628_v0 = vpop.permute.xlu2 %4627 }
0x1719   :  { %v10045_v30 = vpop.permute.xlu0 %4165 }
0x171a   :  { %v4183_v29 = vsel %vm1844_vm10, %v4164_v36, %v10045_v30  ;;  %v4184_v60 = vsel %vm1844_vm10, %v10045_v30, %v10042_v10  ;;  %v2854_v30 = vadd.f32 %v2842_v12, %v11361_v18 }
0x171b   :  { %v4204_v7 = vadd.f32 %v4183_v29, %v3740_v58  ;;  %v3741_v29 = vadd.f32 %v3720_v25, %v3321_v44 }
0x171d   :  { %v4205_v54 = vadd.f32 %v4184_v60, %v3741_v29 }
0x1720   :  { %v10076_v45 = vpop.permute.xlu1 %4161  ;;  %v4622_v6 = vpop.permute.xlu2 %4621 }
0x1721   :  { %v10080_v27 = vpop.permute.xlu0 %4159 }
0x1722   :  { %v4181_v16 = vsel %vm1844_vm10, %v10037_v42, %v10080_v27 }
0x1723   :  { %v4201_v34 = vadd.f32 %v4181_v16, %v3737_v28 }
0x1728   :  { %v4702_v8 = vpop.permute.xlu2 %4701 }
0x1730   :  { %v4632_v53 = vpop.permute.xlu1 %4631  ;;  %v4700_v40 = vpop.permute.xlu2 %4699 }
0x1731   :  { %v4630_v36 = vpop.permute.xlu0 %4629 }
0x1732   :  { %v4647_v35 = vsel %vm2311_vm11, %v4628_v0, %v4630_v36  ;;  %v3322_v0 = vadd.f32 %v11394_v21, %v2858_v57 }
0x1733   :  { %v4668_v63 = vadd.f32 %v4647_v35, %v4204_v7  ;;  %v3318_v7 = vadd.f32 %v3298_v26, %v2854_v30 }
0x1734   :  { %v3742_v41 = vadd.f32 %v10022_v9, %v3322_v0  ;;  %v4648_v9 = vsel %vm2311_vm11, %v4630_v36, %v4632_v53 }
0x1735   :  { %v4680_v37 = vmax.f32 %v4668_v63, 0.0  ;;  %v4669_v3 = vadd.f32 %v4648_v9, %v4205_v54  ;;  %v3738_v18 = vadd.f32 %v3718_v2, %v3318_v7 }
0x1736   :  { %v4206_v31 = vadd.f32 %v10042_v10, %v3742_v41  ;;  %v4203_v10 = vadd.f32 %v10076_v45, %v3739_v61  ;;  %v4741_v61 = vld [vmem:[%s10625_s7] sm:$0x3] }
0x1737   :  { %v10145_v5 = vadd.f32 %v4702_v8, %v4680_v37  ;;  %v4681_v14 = vmax.f32 %v4669_v3, 0.0  ;;  %v4742_v3 = vld [vmem:[%s10626_s8] sm:$0x3] }
0x1738   :  { %v4626_v19 = vpop.permute.xlu1 %4625  ;;  %v4670_v22 = vadd.f32 %v4632_v53, %v4206_v31 }
0x1739   :  { %v4761_v42 = vmul.f32 %v9995_v23, %v10145_v5  ;;  %v4624_v24 = vpop.permute.xlu0 %4623  ;;  %v4667_v39 = vadd.f32 %v4626_v19, %v4203_v10 }
0x173a   :  { %v4645_v58 = vsel %vm2311_vm11, %v4622_v6, %v4624_v24  ;;  %v4182_v6 = vsel %vm1844_vm10, %v10080_v27, %v10076_v45  ;;  %v4682_v62 = vmax.f32 %v4670_v22, 0.0  ;;  %v4646_v4 = vsel %vm2311_vm11, %v4624_v24, %v4626_v19 }
0x173b   :  { %v4665_v49 = vadd.f32 %v4645_v58, %v4201_v34  ;;  %4776 = vrot.lane.b32.xlu0 %v4761_v42, %s5890_s18  ;;  %v4202_v35 = vadd.f32 %v4182_v6, %v3738_v18  ;;  %v4679_v63 = vmax.f32 %v4667_v39, 0.0 }
0x173d   :  { %v4677_v36 = vmax.f32 %v4665_v49, 0.0  ;;  %v4666_v48 = vadd.f32 %v4646_v4, %v4202_v35  ;;  %v4745_v35 = vld [vmem:[%s10628_s10] sm:$0xff] }
0x173f   :  { %v4678_v59 = vmax.f32 %v4666_v48, 0.0 }
0x1740   :  { %v4698_v57 = vpop.permute.xlu1 %4697 }
0x1741   :  { %v10171_v50 = vadd.f32 %v4698_v57, %v4677_v36  ;;  %v4704_v51 = vpop.permute.xlu0 %4703  ;;  %v4713_v20 = vsel %vm493_vm7, %v4698_v57, %v4700_v40  ;;  %v4743_v36 = vld [vmem:[%s10627_s9] sm:$0xff] }
0x1742   :  { %v4714_v46 = vsel %vm493_vm7, %v4702_v8, %v4704_v51  ;;  %v10174_v53 = vadd.f32 %v4704_v51, %v4682_v62  ;;  %v10190_v37 = vadd.f32 %v4713_v20, %v4678_v59  ;;  %v4744_v62 = vld [vmem:[%s10627_s9 + $0x8] sm:$0xff] }
0x1743   :  { %v4758_v45 = vmul.f32 %v9995_v23, %v10171_v50  ;;  %v10178_v27 = vadd.f32 %v4714_v46, %v4681_v14  ;;  %v10188_v23 = vadd.f32 %v4700_v40, %v4679_v63 }
0x1744   :  { %v4763_v38 = vmul.f32 %v9978_v15, %v10174_v53  ;;  %v4759_v32 = vmul.f32 %v10000_v56, %v10190_v37 }
0x1745   :  { %v4762_v17 = vmul.f32 %v10000_v56, %v10178_v27  ;;  %4770 = vrot.lane.b32.xlu0 %v4758_v45, %s5890_s18  ;;  %v4760_v21 = vmul.f32 %v9978_v15, %v10188_v23 }
0x1746   :  { %4780 = vrot.lane.b32.xlu2 %v4763_v38, %s5890_s18 }
0x1747   :  { %4778 = vrot.lane.b32.xlu1 %v4762_v17, %s5890_s18 }
0x174e   :  { %4774 = vrot.lane.b32.xlu2 %v4760_v21, %s5890_s18 }
0x174f   :  { %4772 = vrot.lane.b32.xlu1 %v4759_v32, %s5890_s18 }
0x1757   :  { %v4968_v0 = vpop.permute.xlu2 %4967 }
0x1760   :  { %v4962_v41 = vpop.permute.xlu2 %4961 }
0x1775   :  { %v4964_v25 = vpop.permute.xlu0 %4963 }
0x1776   :  { %v4966_v16 = vpop.permute.xlu1 %4965 }
0x1777   :  { %v4971_v8 = vsel %vm2392_vm12, %v4964_v25, %v4966_v16  ;;  %v4972_v12 = vsel %vm2392_vm12, %v4966_v16, %v4968_v0 }
0x1778   :  { %v4980_v44 = vadd.f32 %v4972_v12, %v4971_v8  ;;  %v4746_v12 = vld [vmem:[%s10628_s10 + $0x8] sm:$0xff] }
0x177a   :  { %4981 = vadd.xlane.f32.xlu0 %v4980_v44 }
0x177d   :  { %v4958_v28 = vpop.permute.xlu0 %4957 }
0x177e   :  { %v4960_v60 = vpop.permute.xlu1 %4959 }
0x177f   :  { %v4969_v15 = vsel %vm2392_vm12, %v4958_v28, %v4960_v60  ;;  %v4970_v56 = vsel %vm2392_vm12, %v4960_v60, %v4962_v41 }
0x1780   :  { %v4977_v19 = vadd.f32 %v4970_v56, %v4969_v15 }
0x1782   :  { %4978 = vadd.xlane.f32.xlu1 %v4977_v19 }
0x17a0   :  { %v4781_v33 = vpop.permute.xlu2 %4780 }
0x17a8   :  { %v4775_v26 = vpop.permute.xlu2 %4774 }
0x17ad   :  { %v4777_v43 = vpop.permute.xlu0 %4776 }
0x17b7   :  { %v4771_v31 = vpop.permute.xlu0 %4770 }
0x17b9   :  { %v4779_v29 = vpop.permute.xlu1 %4778 }
0x17ba   :  { %v4784_v34 = vsel %vm2392_vm12, %v4777_v43, %v4779_v29  ;;  %v4785_v42 = vsel %vm2392_vm12, %v4779_v29, %v4781_v33 }
0x17bb   :  { %v4793_v24 = vadd.f32 %v4785_v42, %v4784_v34 }
0x17bd   :  { %4794 = vadd.xlane.f32.xlu2 %v4793_v24 }
0x17c1   :  { %v4773_v9 = vpop.permute.xlu1 %4772 }
0x17c2   :  { %v4782_v58 = vsel %vm2392_vm12, %v4771_v31, %v4773_v9  ;;  %v4783_v30 = vsel %vm2392_vm12, %v4773_v9, %v4775_v26 }
0x17c3   :  { %v4790_v54 = vadd.f32 %v4783_v30, %v4782_v58 }
0x17c5   :  { %4791 = vadd.xlane.f32.xlu2 %v4790_v54 }
0x17ed   :  { %v4982_v49 = vpop.xlane.xlu0 %4981 }
0x17ee   :  { %4997 = vmatpush.msra.mxu2 %v4982_v49 }
0x17f5   :  { %v4979_v2 = vpop.xlane.xlu1 %4978 }
0x17f6   :  { %4998 = vmatpush.msra.mxu2 %v4979_v2 }
0x17f7   :  { %5597 = vmatmul.msk.f32.vlgmr.msra.gmra.mxu2 %vm4796_vm13, %v4741_v61 }
0x1830   :  { %v4795_v22 = vpop.xlane.xlu2 %4794 }
0x1831   :  { %4814 = vmatpush.msra.mxu0 %v4795_v22 }
0x1838   :  { %v4792_v7 = vpop.xlane.xlu2 %4791 }
0x1839   :  { %4815 = vmatpush.msra.mxu0 %v4792_v7 }
0x183a   :  { %5591 = vmatmul.msk.f32.vlgmr.msra.gmra.mxu0 %vm4796_vm13, %v4741_v61 }
0x187a   :  { %v5000_v10 = vpop.f32.mrf.mxu2 }
0x187b   :  { %v5001_v6 = vadd.f32 %v5000_v10, %v4742_v3 }
0x187d   :  { %v5003_v18 = vmax.f32 %v5001_v6, 0.0 }
0x187f   :  { %5598 = vmatpush.msk.msra.mxu3 %vm4828_vm14, %v5003_v18 }
0x1880   :  { %5599 = vmatmul.msk.f32.vlgmr.msra.gmra.mxu3 %vm4821_vm15, %v4743_v36 }
0x1888   :  { %5600 = vmatmul.msk.f32.gmra.mxu3 %vm4821_vm15, %v4744_v62 }
0x18b7   :  { %v4817_v39 = vpop.f32.mrf.mxu0 }
0x18b8   :  { %v4818_v4 = vadd.f32 %v4817_v39, %v4742_v3 }
0x18ba   :  { %v4820_v57 = vmax.f32 %v4818_v4, 0.0 }
0x18bc   :  { %5592 = vmatpush.msk.msra.mxu1 %vm4828_vm14, %v4820_v57 }
0x18bd   :  { %5593 = vmatmul.msk.f32.vlgmr.msra.gmra.mxu1 %vm4821_vm15, %v4743_v36 }
0x18c5   :  { %5594 = vmatmul.msk.f32.gmra.mxu1 %vm4821_vm15, %v4744_v62 }
0x1903   :  { %v5024_v14 = vpop.f32.mrf.mxu3 }
0x1904   :  { %v5025_v51 = vadd.f32 %v5024_v14, %v4745_v35 }
0x1906   :  { %v5601_v46 = vmul.f32 -1.442695, %v5025_v51 }
0x1908   :  { %5755 = vpow2.f32 %v5601_v46 }
0x190b   :  { %v5027_v8 = vpop.f32.mrf.mxu3 }
0x190c   :  { %v5028_v44 = vadd.f32 %v5027_v8, %v4746_v12 }
0x190e   :  { %v5756_v48 = vpop.eup %5755  ;;  %v5602_v28 = vmul.f32 -1.442695, %v5028_v44 }
0x190f   :  { %v5036_v45 = vadd.f32 1.0, %v5756_v48 }
0x1911   :  { %5757 = vrcp.f32 %v5036_v45  ;;  %v5049_v40 = vand.u32 2147483648, %v5036_v45  ;;  %vm5043_vm0 = vweird.f32 %v5036_v45  ;;  %v5047_v20 = vand.u32 2147483647, %v5036_v45 }
0x1912   :  { %5759 = vpow2.f32 %v5602_v28 }
0x1913   :  { %v5050_v21 = vor.u32 1.1754944e-38, %v5049_v40  ;;  %vm5048_vm3 = vcmp.eq.f32.partialorder %v5047_v20, 8.507059e+37 }
0x1917   :  { %v5758_v63 = vpop.eup %5757 }
0x1918   :  { %v5039_v38 = vmul.f32 %v5758_v63, %v5036_v45  ;;  %vm5044_vm1 = vweird.f32 %v5758_v63  ;;  %v5760_v19 = vpop.eup %5759 }
0x1919   :  { %vm5045_vm2 = vmor %vm5043_vm0, %vm5044_vm1  ;;  %v5037_v42 = vadd.f32 1.0, %v5760_v19 }
0x191a   :  { %v5040_v17 = vsub.f32 1.0, %v5039_v38 }
0x191b   :  { %vm5058_vm10 = vweird.f32 %v5037_v42  ;;  %v5064_v48 = vand.u32 2147483648, %v5037_v42  ;;  %v5062_v38 = vand.u32 2147483647, %v5037_v42 }
0x191c   :  { %v5041_v59 = vmul.f32 %v5758_v63, %v5040_v17 }
0x191d   :  { %v5065_v20 = vor.u32 1.1754944e-38, %v5064_v48  ;;  %vm5063_vm0 = vcmp.eq.f32.partialorder %v5062_v38, 8.507059e+37 }
0x191e   :  { %v5042_v32 = vadd.f32 %v5758_v63, %v5041_v59 }
0x1920   :  { %v5046_v0 = vsel %vm5045_vm2, %v5758_v63, %v5042_v32 }
0x1921   :  { %v5051_v25 = vsel %vm5048_vm3, %v5050_v21, %v5046_v0 }
0x1922   :  { %v5068_v16 = vadd.f32 1.0, %v5051_v25 }
0x1924   :  { %5072 = vperm.xlu2 %5754, %v5068_v16  }
0x193a   :  { %v4849_v41 = vpop.f32.mrf.mxu1 }
0x193b   :  { %v4850_v60 = vadd.f32 %v4849_v41, %v4745_v35 }
0x193d   :  { %v5595_v15 = vmul.f32 -1.442695, %v4850_v60 }
0x193f   :  { %5761 = vpow2.f32 %v5595_v15 }
0x1942   :  { %v4852_v56 = vpop.f32.mrf.mxu1 }
0x1943   :  { %v4853_v33 = vadd.f32 %v4852_v56, %v4746_v12 }
0x1945   :  { %v5762_v43 = vpop.eup %5761  ;;  %v5596_v29 = vmul.f32 -1.442695, %v4853_v33 }
0x1946   :  { %v4861_v34 = vadd.f32 1.0, %v5762_v43 }
0x1947   :  { %5763 = vpow2.f32 %v5596_v29 }
0x1948   :  { %5765 = vrcp.f32 %v4861_v34  ;;  %v4874_v54 = vand.u32 2147483648, %v4861_v34  ;;  %v4872_v2 = vand.u32 2147483647, %v4861_v34  ;;  %vm4868_vm5 = vweird.f32 %v4861_v34 }
0x1949   :  { %5767 = vrcp.f32 %v5037_v42 }
0x194a   :  { %v4875_v3 = vor.u32 1.1754944e-38, %v4874_v54  ;;  %vm4873_vm7 = vcmp.eq.f32.partialorder %v4872_v2, 8.507059e+37 }
0x194d   :  { %v5764_v24 = vpop.eup %5763 }
0x194e   :  { %v5766_v26 = vpop.eup %5765  ;;  %v4862_v31 = vadd.f32 1.0, %v5764_v24 }
0x194f   :  { %v4864_v9 = vmul.f32 %v5766_v26, %v4861_v34  ;;  %v5768_v58 = vpop.eup %5767  ;;  %vm4869_vm4 = vweird.f32 %v5766_v26 }
0x1950   :  { %5769 = vrcp.f32 %v4862_v31  ;;  %v5054_v49 = vmul.f32 %v5768_v58, %v5037_v42  ;;  %vm4870_vm6 = vmor %vm4868_vm5, %vm4869_vm4  ;;  %v4889_v4 = vand.u32 2147483648, %v4862_v31  ;;  %v4887_v35 = vand.u32 2147483647, %v4862_v31 }
0x1951   :  { %v4865_v30 = vsub.f32 1.0, %v4864_v9  ;;  %vm4883_vm9 = vweird.f32 %v4862_v31  ;;  %vm5059_vm11 = vweird.f32 %v5768_v58 }
0x1952   :  { %v5055_v6 = vsub.f32 1.0, %v5054_v49  ;;  %v4890_v46 = vor.u32 1.1754944e-38, %v4889_v4  ;;  %vm4888_vm14 = vcmp.eq.f32.partialorder %v4887_v35, 8.507059e+37  ;;  %vm5060_vm15 = vmor %vm5058_vm10, %vm5059_vm11 }
0x1953   :  { %v4866_v61 = vmul.f32 %v5766_v26, %v4865_v30 }
0x1954   :  { %v5056_v14 = vmul.f32 %v5768_v58, %v5055_v6 }
0x1955   :  { %v4867_v22 = vadd.f32 %v5766_v26, %v4866_v61 }
0x1956   :  { %v5770_v7 = vpop.eup %5769  ;;  %v5057_v63 = vadd.f32 %v5768_v58, %v5056_v14 }
0x1957   :  { %v4879_v10 = vmul.f32 %v5770_v7, %v4862_v31  ;;  %v4871_v18 = vsel %vm4870_vm6, %v5766_v26, %v4867_v22  ;;  %vm4884_vm8 = vweird.f32 %v5770_v7 }
0x1958   :  { %v4876_v36 = vsel %vm4873_vm7, %v4875_v3, %v4871_v18  ;;  %vm4885_vm13 = vmor %vm4883_vm9, %vm4884_vm8  ;;  %v5061_v59 = vsel %vm5060_vm15, %v5768_v58, %v5057_v63 }
0x1959   :  { %v4880_v62 = vsub.f32 1.0, %v4879_v10  ;;  %v4893_v39 = vadd.f32 1.0, %v4876_v36  ;;  %v5066_v21 = vsel %vm5063_vm0, %v5065_v20, %v5061_v59 }
0x195a   :  { %v5069_v32 = vadd.f32 1.0, %v5066_v21 }
0x195b   :  { %4897 = vperm.xlu0 %5752, %v4893_v39   ;;  %v4881_v57 = vmul.f32 %v5770_v7, %v4880_v62 }
0x195d   :  { %v4882_v51 = vadd.f32 %v5770_v7, %v4881_v57 }
0x195f   :  { %v4886_v45 = vsel %vm4885_vm13, %v5770_v7, %v4882_v51 }
0x1960   :  { %v4891_v40 = vsel %vm4888_vm14, %v4890_v46, %v4886_v45 }
0x1961   :  { %v4894_v17 = vadd.f32 1.0, %v4891_v40 }
0x1963   :  { %4902 = vperm.xlu1 %5753, %v4894_v17  }
0x196b   :  { %5077 = vperm.xlu1 %5753, %v5069_v32  }
0x19cd   :  { %v4898_v0 = vpop.permute.xlu0 %4897 }
0x19ce   :  { %v10225_v25 = vmul.f32 %v4898_v0, %v10171_v50  ;;  %v10228_v16 = vmul.f32 %v4898_v0, %v10190_v37  ;;  %v10235_v12 = vmul.f32 %v4898_v0, %v10188_v23  ;;  %v5073_v50 = vpop.permute.xlu2 %5072 }
0x19cf   :  { %v10250_v37 = vmul.f32 %v5073_v50, %v10014_v11  ;;  %v10265_v41 = vmul.f32 %v5073_v50, %v10004_v55 }
0x19d0   :  { %4919 = vrot.lane.b32.xlu1 %v10228_v16, %s5890_s18  ;;  %4917 = vrot.lane.b32.xlu2 %v10225_v25, %s5890_s18 }
0x19d5   :  { %v4903_v8 = vpop.permute.xlu1 %4902 }
0x19d6   :  { %v10238_v44 = vmul.f32 %v4903_v8, %v10145_v5  ;;  %v10241_v28 = vmul.f32 %v4903_v8, %v10178_v27  ;;  %v10253_v23 = vmul.f32 %v4903_v8, %v10174_v53  ;;  %v10256_v5 = vmul.f32 %v5073_v50, %v10018_v47 }
0x19d8   :  { %4921 = vrot.lane.b32.xlu2 %v10235_v12, %s5890_s18  ;;  %4925 = vrot.lane.b32.xlu1 %v10241_v28, %s5890_s18 }
0x19d9   :  { %4923 = vrot.lane.b32.xlu0 %v10238_v44, %s5890_s18 }
0x19dd   :  { %v5078_v27 = vpop.permute.xlu1 %5077 }
0x19de   :  { %v10268_v11 = vmul.f32 %v5078_v27, %v9993_v13  ;;  %v10271_v53 = vmul.f32 %v5078_v27, %v9991_v1  ;;  %v10280_v47 = vmul.f32 %v5078_v27, %v9972_v52 }
0x19e0   :  { %4927 = vrot.lane.b32.xlu2 %v10253_v23, %s5890_s18  ;;  %5094 = vrot.lane.b32.xlu1 %v10250_v37, %s5890_s18 }
0x19e1   :  { %5092 = vrot.lane.b32.xlu0 %v10256_v5, %s5890_s18 }
0x19e8   :  { %5096 = vrot.lane.b32.xlu2 %v10265_v41, %s5890_s18  ;;  %5100 = vrot.lane.b32.xlu1 %v10268_v11, %s5890_s18 }
0x19e9   :  { %5098 = vrot.lane.b32.xlu0 %v10271_v53, %s5890_s18 }
0x19f0   :  { %5102 = vrot.lane.b32.xlu2 %v10280_v47, %s5890_s18 }
0x1a2a   :  { %v4918_v13 = vpop.permute.xlu2 %4917 }
0x1a32   :  { %v4922_v55 = vpop.permute.xlu2 %4921 }
0x1a3a   :  { %v4928_v19 = vpop.permute.xlu2 %4927 }
0x1a42   :  { %v4920_v60 = vpop.permute.xlu1 %4919  ;;  %v5097_v42 = vpop.permute.xlu2 %5096 }
0x1a43   :  { %v4929_v1 = vsel %vm2392_vm12, %v4918_v13, %v4920_v60  ;;  %v4930_v15 = vsel %vm2392_vm12, %v4920_v60, %v4922_v55 }
0x1a44   :  { %v4937_v56 = vadd.f32 %v4930_v15, %v4929_v1 }
0x1a46   :  { %4938 = vadd.xlane.f32.xlu0 %v4937_v56 }
0x1a4a   :  { %v4926_v33 = vpop.permute.xlu1 %4925  ;;  %v5103_v30 = vpop.permute.xlu2 %5102 }
0x1a4b   :  { %v4924_v43 = vpop.permute.xlu0 %4923  ;;  %v4932_v29 = vsel %vm2392_vm12, %v4926_v33, %v4928_v19 }
0x1a4c   :  { %v4931_v52 = vsel %vm2392_vm12, %v4924_v43, %v4926_v33 }
0x1a4d   :  { %v4940_v34 = vadd.f32 %v4932_v29, %v4931_v52 }
0x1a4f   :  { %4941 = vadd.xlane.f32.xlu1 %v4940_v34 }
0x1a52   :  { %v5095_v24 = vpop.permute.xlu1 %5094 }
0x1a53   :  { %v5093_v26 = vpop.permute.xlu0 %5092  ;;  %v5105_v31 = vsel %vm2392_vm12, %v5095_v24, %v5097_v42 }
0x1a54   :  { %v5104_v9 = vsel %vm2392_vm12, %v5093_v26, %v5095_v24 }
0x1a55   :  { %v5112_v58 = vadd.f32 %v5105_v31, %v5104_v9 }
0x1a57   :  { %5113 = vadd.xlane.f32.xlu2 %v5112_v58 }
0x1a5a   :  { %v5101_v54 = vpop.permute.xlu1 %5100 }
0x1a5b   :  { %v5099_v49 = vpop.permute.xlu0 %5098  ;;  %v5107_v61 = vsel %vm2392_vm12, %v5101_v54, %v5103_v30 }
0x1a5c   :  { %v5106_v2 = vsel %vm2392_vm12, %v5099_v49, %v5101_v54 }
0x1a5d   :  { %v5115_v22 = vadd.f32 %v5107_v61, %v5106_v2 }
0x1a5f   :  { %5116 = vadd.xlane.f32.xlu0 %v5115_v22 }
0x1ab9   :  { %v4939_v7 = vpop.xlane.xlu0 %4938 }
0x1ac2   :  { %v4942_v35 = vpop.xlane.xlu1 %4941 }
0x1aca   :  { %v5114_v3 = vpop.xlane.xlu2 %5113 }
0x1acb   :  { %v5118_v10 = vadd.f32 %v5114_v3, %v4939_v7 }
0x1acd   :  { %v10292_v6 = vmul.f32 0.001953125, %v5118_v10 }
0x1acf   :  { %v5123_v18 = vsub.f32 %v10228_v16, %v10292_v6  ;;  %v5122_v36 = vsub.f32 %v10225_v25, %v10292_v6  ;;  %v5124_v62 = vsub.f32 %v10235_v12, %v10292_v6  ;;  %v5170_v20 = vsub.f32 %v10265_v41, %v10292_v6 }
0x1ad0   :  { %v5168_v59 = vsub.f32 %v10256_v5, %v10292_v6  ;;  %v5169_v21 = vsub.f32 %v10250_v37, %v10292_v6 }
0x1ad1   :  { %v5129_v39 = vmul.f32 %v5123_v18, %v5123_v18  ;;  %v5128_v4 = vmul.f32 %v5122_v36, %v5122_v36  ;;  %v5130_v57 = vmul.f32 %v5124_v62, %v5124_v62  ;;  %v5176_v32 = vmul.f32 %v5170_v20, %v5170_v20 }
0x1ad2   :  { %v5117_v14 = vpop.xlane.xlu0 %5116  ;;  %v5174_v0 = vmul.f32 %v5168_v59, %v5168_v59  ;;  %v5175_v8 = vmul.f32 %v5169_v21, %v5169_v21 }
0x1ad3   :  { %v5119_v51 = vadd.f32 %v5117_v14, %v4942_v35  ;;  %5142 = vrot.lane.b32.xlu2 %v5129_v39, %s5890_s18  ;;  %5140 = vrot.lane.b32.xlu1 %v5128_v4, %s5890_s18 }
0x1ad4   :  { %5144 = vrot.lane.b32.xlu0 %v5130_v57, %s5890_s18 }
0x1ad5   :  { %v10303_v46 = vmul.f32 0.001953125, %v5119_v51 }
0x1ad7   :  { %v5127_v48 = vsub.f32 %v10253_v23, %v10303_v46  ;;  %v5126_v45 = vsub.f32 %v10241_v28, %v10303_v46  ;;  %v5125_v63 = vsub.f32 %v10238_v44, %v10303_v46  ;;  %v5173_v50 = vsub.f32 %v10280_v47, %v10303_v46 }
0x1ad8   :  { %v5171_v27 = vsub.f32 %v10271_v53, %v10303_v46  ;;  %v5172_v13 = vsub.f32 %v10268_v11, %v10303_v46 }
0x1ad9   :  { %v5133_v38 = vmul.f32 %v5127_v48, %v5127_v48  ;;  %v5132_v40 = vmul.f32 %v5126_v45, %v5126_v45  ;;  %v5131_v17 = vmul.f32 %v5125_v63, %v5125_v63  ;;  %v5179_v55 = vmul.f32 %v5173_v50, %v5173_v50 }
0x1ada   :  { %v5177_v60 = vmul.f32 %v5171_v27, %v5171_v27  ;;  %v5178_v1 = vmul.f32 %v5172_v13, %v5172_v13 }
0x1adb   :  { %5150 = vrot.lane.b32.xlu2 %v5133_v38, %s5890_s18  ;;  %5146 = vrot.lane.b32.xlu1 %v5131_v17, %s5890_s18 }
0x1adc   :  { %5148 = vrot.lane.b32.xlu0 %v5132_v40, %s5890_s18 }
0x1ae3   :  { %5190 = vrot.lane.b32.xlu2 %v5176_v32, %s5890_s18  ;;  %5186 = vrot.lane.b32.xlu1 %v5174_v0, %s5890_s18  ;;  %v5216_v0 = vld [vmem:[%s10629_s11] sm:$0xff] }
0x1ae4   :  { %5188 = vrot.lane.b32.xlu0 %v5175_v8, %s5890_s18 }
0x1aeb   :  { %5196 = vrot.lane.b32.xlu2 %v5179_v55, %s5890_s18  ;;  %5192 = vrot.lane.b32.xlu1 %v5177_v60, %s5890_s18  ;;  %v5242_v55 = vld [vmem:[%s10630_s12] sm:$0xff] }
0x1aec   :  { %5194 = vrot.lane.b32.xlu0 %v5178_v1, %s5890_s18 }
0x1b2d   :  { %v5143_v15 = vpop.permute.xlu2 %5142 }
0x1b35   :  { %v5151_v52 = vpop.permute.xlu2 %5150 }
0x1b3d   :  { %v5191_v9 = vpop.permute.xlu2 %5190 }
0x1b45   :  { %v5141_v56 = vpop.permute.xlu1 %5140  ;;  %v5197_v22 = vpop.permute.xlu2 %5196 }
0x1b46   :  { %v5145_v19 = vpop.permute.xlu0 %5144  ;;  %v5152_v33 = vsel %vm2392_vm12, %v5141_v56, %v5143_v15 }
0x1b47   :  { %v5153_v43 = vsel %vm2392_vm12, %v5143_v15, %v5145_v19  ;;  %v5217_v19 = vld [vmem:[%s10629_s11 + $0x8] sm:$0xff] }
0x1b48   :  { %v5160_v29 = vadd.f32 %v5153_v43, %v5152_v33 }
0x1b4a   :  { %5161 = vadd.xlane.f32.xlu1 %v5160_v29  ;;  %v5243_v29 = vld [vmem:[%s10630_s12 + $0x8] sm:$0xff] }
0x1b4d   :  { %v5147_v34 = vpop.permute.xlu1 %5146 }
0x1b4e   :  { %v5149_v42 = vpop.permute.xlu0 %5148 }
0x1b4f   :  { %v5155_v24 = vsel %vm2392_vm12, %v5149_v42, %v5151_v52  ;;  %v5154_v26 = vsel %vm2392_vm12, %v5147_v34, %v5149_v42 }
0x1b50   :  { %v5163_v31 = vadd.f32 %v5155_v24, %v5154_v26 }
0x1b52   :  { %5164 = vadd.xlane.f32.xlu0 %v5163_v31 }
0x1b55   :  { %v5187_v58 = vpop.permute.xlu1 %5186 }
0x1b56   :  { %v5189_v30 = vpop.permute.xlu0 %5188 }
0x1b57   :  { %v5199_v54 = vsel %vm2392_vm12, %v5189_v30, %v5191_v9  ;;  %v5198_v49 = vsel %vm2392_vm12, %v5187_v58, %v5189_v30 }
0x1b58   :  { %v5206_v61 = vadd.f32 %v5199_v54, %v5198_v49 }
0x1b5a   :  { %5207 = vadd.xlane.f32.xlu2 %v5206_v61 }
0x1b5d   :  { %v5193_v2 = vpop.permute.xlu1 %5192 }
0x1b5e   :  { %v5195_v7 = vpop.permute.xlu0 %5194 }
0x1b5f   :  { %v5201_v3 = vsel %vm2392_vm12, %v5195_v7, %v5197_v22  ;;  %v5200_v10 = vsel %vm2392_vm12, %v5193_v2, %v5195_v7 }
0x1b60   :  { %v5209_v18 = vadd.f32 %v5201_v3, %v5200_v10 }
0x1b62   :  { %5210 = vadd.xlane.f32.xlu1 %v5209_v18 }
0x1bbd   :  { %v5162_v36 = vpop.xlane.xlu1 %5161 }
0x1bc5   :  { %v5165_v35 = vpop.xlane.xlu0 %5164 }
0x1bcd   :  { %v5208_v62 = vpop.xlane.xlu2 %5207 }
0x1bce   :  { %v5212_v39 = vadd.f32 %v5208_v62, %v5162_v36 }
0x1bd0   :  { %v5214_v4 = vmul.f32 0.001953125, %v5212_v39 }
0x1bd2   :  { %v5218_v57 = vadd.f32 1e-05, %v5214_v4 }
0x1bd4   :  { %5771 = vrsqrt.f32 %v5218_v57  ;;  %vm5226_vm2 = vweird.f32 %v5218_v57 }
0x1bd5   :  { %v5211_v14 = vpop.xlane.xlu1 %5210 }
0x1bd6   :  { %v5213_v51 = vadd.f32 %v5211_v14, %v5165_v35 }
0x1bd8   :  { %v5215_v48 = vmul.f32 0.001953125, %v5213_v51 }
0x1bda   :  { %v5772_v45 = vpop.eup %5771  ;;  %v5219_v63 = vadd.f32 1e-05, %v5215_v48 }
0x1bdb   :  { %v5221_v38 = vmul.f32 %v5772_v45, %v5218_v57  ;;  %vm5227_vm1 = vweird.f32 %v5772_v45 }
0x1bdc   :  { %5773 = vrsqrt.f32 %v5219_v63  ;;  %vm5228_vm3 = vmor %vm5226_vm2, %vm5227_vm1  ;;  %vm5236_vm5 = vweird.f32 %v5219_v63 }
0x1bdd   :  { %v5222_v40 = vmul.f32 %v5772_v45, %v5221_v38 }
0x1bdf   :  { %v5223_v17 = vmul.f32 0.5, %v5222_v40 }
0x1be1   :  { %v5224_v20 = vsub.f32 1.5, %v5223_v17 }
0x1be2   :  { %v5774_v59 = vpop.eup %5773 }
0x1be3   :  { %v5225_v21 = vmul.f32 %v5772_v45, %v5224_v20  ;;  %v5231_v32 = vmul.f32 %v5774_v59, %v5219_v63  ;;  %vm5237_vm4 = vweird.f32 %v5774_v59 }
0x1be4   :  { %vm5238_vm6 = vmor %vm5236_vm5, %vm5237_vm4 }
0x1be5   :  { %v5232_v8 = vmul.f32 %v5774_v59, %v5231_v32  ;;  %v5229_v50 = vsel %vm5228_vm3, %v5772_v45, %v5225_v21 }
0x1be6   :  { %v5240_v27 = vmul.f32 %v5229_v50, %v5216_v0 }
0x1be7   :  { %v5233_v13 = vmul.f32 0.5, %v5232_v8 }
0x1be8   :  { %5250 = vperm.xlu0 %5752, %v5240_v27   ;;  %v5244_v60 = vmul.f32 %v5240_v27, %v10292_v6 }
0x1be9   :  { %v5234_v1 = vsub.f32 1.5, %v5233_v13 }
0x1bea   :  { %v5246_v15 = vsub.f32 %v5242_v55, %v5244_v60 }
0x1beb   :  { %v5235_v56 = vmul.f32 %v5774_v59, %v5234_v1 }
0x1bec   :  { %5266 = vperm.xlu1 %5753, %v5246_v15  }
0x1bed   :  { %v5239_v33 = vsel %vm5238_vm6, %v5774_v59, %v5235_v56 }
0x1bee   :  { %v5241_v43 = vmul.f32 %v5239_v33, %v5217_v19 }
0x1bf0   :  { %5255 = vperm.xlu2 %5754, %v5241_v43   ;;  %v5245_v6 = vmul.f32 %v5241_v43, %v10303_v46 }
0x1bf2   :  { %v5247_v52 = vsub.f32 %v5243_v29, %v5245_v6 }
0x1bf4   :  { %5271 = vperm.xlu0 %5752, %v5247_v52  }
0x1c4a   :  { %v5256_v10 = vpop.permute.xlu2 %5255 }
0x1c4b   :  { %v5262_v36 = vmul.f32 %v5256_v10, %v10241_v28  ;;  %v5263_v39 = vmul.f32 %v5256_v10, %v10253_v23  ;;  %v5427_v35 = vmul.f32 %v5256_v10, %v10271_v53  ;;  %v5428_v14 = vmul.f32 %v5256_v10, %v10268_v11 }
0x1c4c   :  { %v5429_v45 = vmul.f32 %v5256_v10, %v10280_v47 }
0x1c5a   :  { %v5251_v34 = vpop.permute.xlu0 %5250 }
0x1c5b   :  { %v5258_v42 = vmul.f32 %v5251_v34, %v10225_v25  ;;  %v5259_v24 = vmul.f32 %v5251_v34, %v10228_v16  ;;  %v5260_v26 = vmul.f32 %v5251_v34, %v10235_v12  ;;  %v5425_v31 = vmul.f32 %v5251_v34, %v10250_v37 }
0x1c5c   :  { %v5426_v9 = vmul.f32 %v5251_v34, %v10265_v41  ;;  %v5424_v30 = vmul.f32 %v5251_v34, %v10256_v5  ;;  %v5261_v37 = vmul.f32 %v5256_v10, %v10238_v44 }
0x1c5e   :  { %v5267_v58 = vpop.permute.xlu1 %5266 }
0x1c5f   :  { %v5274_v54 = vadd.f32 %v5267_v58, %v5258_v42  ;;  %v5275_v49 = vadd.f32 %v5267_v58, %v5259_v24  ;;  %v5276_v61 = vadd.f32 %v5267_v58, %v5260_v26  ;;  %v5431_v46 = vadd.f32 %v5425_v31, %v5267_v58 }
0x1c60   :  { %v5432_v2 = vadd.f32 %v5426_v9, %v5267_v58  ;;  %v5430_v25 = vadd.f32 %v5424_v30, %v5267_v58 }
0x1c61   :  { %v5603_v22 = vmul.f32 -1.442695, %v5274_v54  ;;  %v5604_v7 = vmul.f32 -1.442695, %v5275_v49  ;;  %v5605_v3 = vmul.f32 -1.442695, %v5276_v61 }
0x1c62   :  { %v5610_v16 = vmul.f32 -1.442695, %v5431_v46  ;;  %v5611_v12 = vmul.f32 -1.442695, %v5432_v2  ;;  %v5609_v41 = vmul.f32 -1.442695, %v5430_v25 }
0x1c63   :  { %5775 = vpow2.f32 %v5603_v22 }
0x1c64   :  { %5777 = vpow2.f32 %v5604_v7 }
0x1c65   :  { %5779 = vpow2.f32 %v5605_v3 }
0x1c66   :  { %v5272_v18 = vpop.permute.xlu0 %5271  ;;  %5781 = vpow2.f32 %v5610_v16 }
0x1c67   :  { %v5277_v5 = vadd.f32 %v5272_v18, %v5261_v37  ;;  %5783 = vpow2.f32 %v5611_v12  ;;  %v5278_v44 = vadd.f32 %v5272_v18, %v5262_v36  ;;  %v5279_v28 = vadd.f32 %v5272_v18, %v5263_v39 }
0x1c68   :  { %5785 = vpow2.f32 %v5609_v41  ;;  %v5433_v23 = vadd.f32 %v5427_v35, %v5272_v18  ;;  %v5434_v40 = vadd.f32 %v5428_v14, %v5272_v18  ;;  %v5435_v11 = vadd.f32 %v5429_v45, %v5272_v18 }
0x1c69   :  { %v5776_v62 = vpop.eup %5775  ;;  %v5606_v4 = vmul.f32 -1.442695, %v5277_v5  ;;  %v5607_v47 = vmul.f32 -1.442695, %v5278_v44  ;;  %v5608_v32 = vmul.f32 -1.442695, %v5279_v28 }
0x1c6a   :  { %v5778_v57 = vpop.eup %5777  ;;  %v10365_v51 = vadd.f32 1.0, %v5776_v62  ;;  %v5612_v0 = vmul.f32 -1.442695, %v5433_v23  ;;  %v5613_v8 = vmul.f32 -1.442695, %v5434_v40 }
0x1c6b   :  { %v5780_v48 = vpop.eup %5779  ;;  %v10368_v63 = vadd.f32 1.0, %v5778_v57  ;;  %5787 = vpow2.f32 %v5606_v4  ;;  %v5614_v27 = vmul.f32 -1.442695, %v5435_v11 }
0x1c6c   :  { %v10370_v38 = vadd.f32 1.0, %v5780_v48  ;;  %5789 = vrcp.f32 %v10365_v51  ;;  %v5782_v17 = vpop.eup %5781  ;;  %vm5309_vm7 = vweird.f32 %v10365_v51  ;;  %v5313_v15 = vand.u32 2147483647, %v10365_v51 }
0x1c6d   :  { %5791 = vrcp.f32 %v10368_v63  ;;  %v5784_v53 = vpop.eup %5783  ;;  %v10375_v20 = vadd.f32 1.0, %v5782_v17  ;;  %v5328_v13 = vand.u32 2147483647, %v10368_v63  ;;  %vm5324_vm9 = vweird.f32 %v10368_v63 }
0x1c6e   :  { %5793 = vrcp.f32 %v10370_v38  ;;  %v5786_v59 = vpop.eup %5785  ;;  %v10377_v21 = vadd.f32 1.0, %v5784_v53  ;;  %vm5339_vm8 = vweird.f32 %v10370_v38  ;;  %v5343_v43 = vand.u32 2147483647, %v10370_v38 }
0x1c6f   :  { %5795 = vrcp.f32 %v10375_v20  ;;  %v10383_v60 = vadd.f32 1.0, %v5786_v59  ;;  %v5345_v29 = vand.u32 2147483648, %v10370_v38  ;;  %vm10396_vm10 = vcmp.eq.f32.partialorder %v5328_v13, 8.507059e+37 }
0x1c70   :  { %5797 = vrcp.f32 %v10377_v21  ;;  %v5330_v31 = vand.u32 2147483648, %v10368_v63  ;;  %v5315_v9 = vand.u32 2147483648, %v10365_v51  ;;  %vm10406_vm14 = vcmp.eq.f32.partialorder %v5313_v15, 8.507059e+37 }
0x1c71   :  { %v5788_v50 = vpop.eup %5787  ;;  %5799 = vpow2.f32 %v5607_v47  ;;  %v5346_v61 = vor.u32 1.1754944e-38, %v5345_v29  ;;  %vm5344_vm3 = vcmp.eq.f32.partialorder %v5343_v43, 8.507059e+37  ;;  %v5501_v59 = vand.u32 2147483648, %v10377_v21 }
0x1c72   :  { %v5790_v55 = vpop.eup %5789  ;;  %v10385_v1 = vadd.f32 1.0, %v5788_v50  ;;  %5801 = vpow2.f32 %v5608_v32  ;;  %v5331_v37 = vor.u32 1.1754944e-38, %v5330_v31  ;;  %v5316_v41 = vor.u32 1.1754944e-38, %v5315_v9 }
0x1c73   :  { %v5792_v56 = vpop.eup %5791  ;;  %v5305_v19 = vmul.f32 %v5790_v55, %v10365_v51  ;;  %vm5310_vm11 = vweird.f32 %v5790_v55 }
0x1c74   :  { %v5794_v33 = vpop.eup %5793  ;;  %5803 = vrcp.f32 %v10385_v1  ;;  %v5320_v6 = vmul.f32 %v5792_v56, %v10368_v63  ;;  %vm5325_vm13 = vweird.f32 %v5792_v56  ;;  %vm5311_vm0 = vmor %vm5309_vm7, %vm5310_vm11  ;;  %v5358_v62 = vand.u32 2147483647, %v10385_v1 }
0x1c75   :  { %5805 = vpow2.f32 %v5612_v0  ;;  %v5335_v52 = vmul.f32 %v5794_v33, %v10370_v38  ;;  %v5306_v42 = vsub.f32 1.0, %v5305_v19  ;;  %v10400_v24 = vpop.eup %5795  ;;  %vm5340_vm15 = vweird.f32 %v5794_v33  ;;  %vm5326_vm1 = vmor %vm5324_vm9, %vm5325_vm13 }
0x1c76   :  { %5807 = vpow2.f32 %v5613_v8  ;;  %v5321_v26 = vsub.f32 1.0, %v5320_v6  ;;  %v10404_v58 = vpop.eup %5797  ;;  %vm5341_vm2 = vmor %vm5339_vm8, %vm5340_vm15  ;;  %v5360_v35 = vand.u32 2147483648, %v10385_v1  ;;  %vm5354_vm4 = vweird.f32 %v10385_v1 }
0x1c77   :  { %5809 = vpow2.f32 %v5614_v27  ;;  %v5336_v30 = vsub.f32 1.0, %v5335_v52  ;;  %v5307_v54 = vmul.f32 %v5790_v55, %v5306_v42  ;;  %v5800_v49 = vpop.eup %5799  ;;  %v5491_v48 = vmul.f32 %v10404_v58, %v10377_v21 }
0x1c78   :  { %v5322_v46 = vmul.f32 %v5792_v56, %v5321_v26  ;;  %v5802_v22 = vpop.eup %5801  ;;  %v10410_v7 = vadd.f32 1.0, %v5800_v49  ;;  %v5499_v38 = vand.u32 2147483647, %v10377_v21  ;;  %vm10449_vm5 = vcmp.eq.f32.partialorder %v5358_v62, 8.507059e+37 }
0x1c79   :  { %v5337_v3 = vmul.f32 %v5794_v33, %v5336_v30  ;;  %v5308_v25 = vadd.f32 %v5790_v55, %v5307_v54  ;;  %v10414_v16 = vadd.f32 1.0, %v5802_v22  ;;  %v5361_v11 = vor.u32 1.1754944e-38, %v5360_v35 }
0x1c7a   :  { %v10412_v10 = vpop.eup %5803  ;;  %v5323_v12 = vadd.f32 %v5792_v56, %v5322_v46  ;;  %5811 = vrcp.f32 %v10410_v7  ;;  %vm5369_vm7 = vweird.f32 %v10410_v7  ;;  %v5492_v47 = vsub.f32 1.0, %v5491_v48 }
0x1c7b   :  { %v5806_v18 = vpop.eup %5805  ;;  %v5338_v5 = vadd.f32 %v5794_v33, %v5337_v3  ;;  %v5312_v36 = vsel %vm5311_vm0, %v5790_v55, %v5308_v25  ;;  %5813 = vrcp.f32 %v10414_v16  ;;  %v5350_v40 = vmul.f32 %v10412_v10, %v10385_v1 }
0x1c7c   :  { %v5808_v39 = vpop.eup %5807  ;;  %v5327_v4 = vsel %vm5326_vm1, %v5792_v56, %v5323_v12  ;;  %v5317_v57 = vsel %vm10406_vm14, %v5316_v41, %v5312_v36  ;;  %5815 = vrcp.f32 %v10383_v60  ;;  %v10437_v45 = vadd.f32 1.0, %v5806_v18 }
0x1c7d   :  { %v5810_v14 = vpop.eup %5809  ;;  %v5342_v51 = vsel %vm5341_vm2, %v5794_v33, %v5338_v5  ;;  %v5332_v44 = vsel %vm10396_vm10, %v5331_v37, %v5327_v4  ;;  %5400 = vrot.lane.b32.xlu2 %v5317_v57, %s5890_s18  ;;  %v10440_v28 = vadd.f32 1.0, %v5808_v39  ;;  %vm5384_vm6 = vweird.f32 %v10414_v16 }
0x1c7e   :  { %v5347_v63 = vsel %vm5344_vm3, %v5346_v61, %v5342_v51  ;;  %5402 = vrot.lane.b32.xlu0 %v5332_v44, %s5890_s18  ;;  %v10445_v23 = vadd.f32 1.0, %v5810_v14  ;;  %5817 = vrcp.f32 %v10437_v45  ;;  %v5388_v0 = vand.u32 2147483647, %v10414_v16 }
0x1c7f   :  { %5404 = vrot.lane.b32.xlu1 %v5347_v63, %s5890_s18  ;;  %v5351_v50 = vsub.f32 1.0, %v5350_v40  ;;  %vm5496_vm8 = vweird.f32 %v10404_v58  ;;  %5819 = vrcp.f32 %v10440_v28  ;;  %v5390_v13 = vand.u32 2147483648, %v10414_v16 }
0x1c80   :  { %v5812_v53 = vpop.eup %5811  ;;  %v5476_v55 = vmul.f32 %v10400_v24, %v10375_v20  ;;  %5821 = vrcp.f32 %v10445_v23  ;;  %vm5355_vm9 = vweird.f32 %v10412_v10  ;;  %vm5495_vm10 = vweird.f32 %v10377_v21 }
0x1c81   :  { %v5814_v32 = vpop.eup %5813  ;;  %v5365_v8 = vmul.f32 %v5812_v53, %v10410_v7  ;;  %v5352_v19 = vmul.f32 %v10412_v10, %v5351_v50  ;;  %v5373_v43 = vand.u32 2147483647, %v10410_v7  ;;  %v5375_v29 = vand.u32 2147483648, %v10410_v7  ;;  %vm5356_vm15 = vmor %vm5354_vm4, %vm5355_vm9 }
0x1c82   :  { %v5380_v27 = vmul.f32 %v5814_v32, %v10414_v16  ;;  %v10465_v15 = vpop.eup %5815  ;;  %v5477_v6 = vsub.f32 1.0, %v5476_v55  ;;  %vm5370_vm11 = vweird.f32 %v5812_v53  ;;  %v5493_v42 = vmul.f32 %v10404_v58, %v5492_v47 }
0x1c83   :  { %v5366_v56 = vsub.f32 1.0, %v5365_v8  ;;  %v5353_v34 = vadd.f32 %v10412_v10, %v5352_v19  ;;  %vm5385_vm13 = vweird.f32 %v5814_v32  ;;  %vm10475_vm14 = vcmp.eq.f32.partialorder %v5388_v0, 8.507059e+37  ;;  %vm5371_vm0 = vmor %vm5369_vm7, %vm5370_vm11 }
0x1c84   :  { %v5381_v33 = vsub.f32 1.0, %v5380_v27  ;;  %v5461_v9 = vmul.f32 %v10465_v15, %v10383_v60  ;;  %v10483_v30 = vpop.eup %5817  ;;  %v5391_v54 = vor.u32 1.1754944e-38, %v5390_v13  ;;  %v5478_v46 = vmul.f32 %v10400_v24, %v5477_v6  ;;  %vm5386_vm1 = vmor %vm5384_vm6, %vm5385_vm13 }
0x1c85   :  { %v5367_v52 = vmul.f32 %v5812_v53, %v5366_v56  ;;  %v5357_v61 = vsel %vm5356_vm15, %v10412_v10, %v5353_v34  ;;  %v10487_v2 = vpop.eup %5819  ;;  %v5376_v1 = vor.u32 1.1754944e-38, %v5375_v29  ;;  %vm5374_vm2 = vcmp.eq.f32.partialorder %v5373_v43, 8.507059e+37 }
0x1c86   :  { %v5382_v26 = vmul.f32 %v5814_v32, %v5381_v33  ;;  %v5362_v3 = vsel %vm10449_vm5, %v5361_v11, %v5357_v61  ;;  %v5462_v25 = vsub.f32 1.0, %v5461_v9  ;;  %v10494_v12 = vpop.eup %5821  ;;  %v5494_v37 = vadd.f32 %v10404_v58, %v5493_v42  ;;  %vm10515_vm5 = vmor %vm5495_vm10, %vm5496_vm8 }
0x1c87   :  { %v5368_v49 = vadd.f32 %v5812_v53, %v5367_v52  ;;  %5406 = vrot.lane.b32.xlu2 %v5362_v3, %s5890_s18  ;;  %vm5466_vm3 = vweird.f32 %v10465_v15  ;;  %v5471_v5 = vand.u32 2147483648, %v10383_v60  ;;  %v5479_v16 = vadd.f32 %v10400_v24, %v5478_v46 }
0x1c88   :  { %v5383_v22 = vadd.f32 %v5814_v32, %v5382_v26  ;;  %v5463_v18 = vmul.f32 %v10465_v15, %v5462_v25  ;;  %vm5481_vm4 = vweird.f32 %v10400_v24  ;;  %v5469_v62 = vand.u32 2147483647, %v10383_v60 }
0x1c89   :  { %v5372_v10 = vsel %vm5371_vm0, %v5812_v53, %v5368_v49  ;;  %v5486_v4 = vand.u32 2147483648, %v10375_v20  ;;  %vm5465_vm6 = vweird.f32 %v10383_v60  ;;  %v5536_v35 = vmul.f32 %v10494_v12, %v10445_v23 }
0x1c8a   :  { %v5387_v7 = vsel %vm5386_vm1, %v5814_v32, %v5383_v22  ;;  %v5377_v41 = vsel %vm5374_vm2, %v5376_v1, %v5372_v10  ;;  %v5464_v57 = vadd.f32 %v10465_v15, %v5463_v18  ;;  %vm10526_vm7 = vcmp.eq.f32.partialorder %v5499_v38, 8.507059e+37  ;;  %vm5467_vm9 = vmor %vm5465_vm6, %vm5466_vm3 }
0x1c8b   :  { %v5392_v36 = vsel %vm10475_vm14, %v5391_v54, %v5387_v7  ;;  %5408 = vrot.lane.b32.xlu0 %v5377_v41, %s5890_s18  ;;  %vm5480_vm8 = vweird.f32 %v10375_v20  ;;  %v5484_v51 = vand.u32 2147483647, %v10375_v20  ;;  %v5521_v44 = vmul.f32 %v10487_v2, %v10440_v28 }
0x1c8c   :  { %5410 = vrot.lane.b32.xlu1 %v5392_v36, %s5890_s18  ;;  %v5498_v60 = vsel %vm10515_vm5, %v10404_v58, %v5494_v37  ;;  %vm10539_vm10 = vmor %vm5480_vm8, %vm5481_vm4  ;;  %v5468_v63 = vsel %vm5467_vm9, %v10465_v15, %v5464_v57  ;;  %v5472_v38 = vor.u32 1.1754944e-38, %v5471_v5  ;;  %v5537_v40 = vsub.f32 1.0, %v5536_v35 }
0x1c8d   :  { %v5502_v20 = vor.u32 1.1754944e-38, %v5501_v59  ;;  %v5483_v17 = vsel %vm10539_vm10, %v10400_v24, %v5479_v16  ;;  %vm5470_vm11 = vcmp.eq.f32.partialorder %v5469_v62, 8.507059e+37  ;;  %v5522_v11 = vsub.f32 1.0, %v5521_v44 }
0x1c8e   :  { %v5487_v53 = vor.u32 1.1754944e-38, %v5486_v4  ;;  %v5473_v47 = vsel %vm5470_vm11, %v5472_v38, %v5468_v63  ;;  %v5538_v58 = vmul.f32 %v10494_v12, %v5537_v40  ;;  %v5506_v32 = vmul.f32 %v10483_v30, %v10437_v45 }
0x1c8f   :  { %v5503_v0 = vsel %vm10526_vm7, %v5502_v20, %v5498_v60  ;;  %vm5485_vm13 = vcmp.eq.f32.partialorder %v5484_v51, 8.507059e+37  ;;  %5556 = vrot.lane.b32.xlu2 %v5473_v47, %s5890_s18  ;;  %v5523_v21 = vmul.f32 %v10487_v2, %v5522_v11  ;;  %vm5540_vm14 = vweird.f32 %v10445_v23 }
0x1c90   :  { %v5488_v59 = vsel %vm5485_vm13, %v5487_v53, %v5483_v17  ;;  %vm5541_vm15 = vweird.f32 %v10494_v12  ;;  %v5507_v24 = vsub.f32 1.0, %v5506_v32  ;;  %vm5526_vm0 = vweird.f32 %v10487_v2 }
0x1c91   :  { %v5524_v8 = vadd.f32 %v10487_v2, %v5523_v21  ;;  %v5531_v50 = vand.u32 2147483648, %v10440_v28  ;;  %v5516_v27 = vand.u32 2147483648, %v10437_v45  ;;  %v5539_v13 = vadd.f32 %v10494_v12, %v5538_v58  ;;  %vm10568_vm2 = vmor %vm5540_vm14, %vm5541_vm15 }
0x1c92   :  { %v5508_v55 = vmul.f32 %v10483_v30, %v5507_v24  ;;  %vm5511_vm1 = vweird.f32 %v10483_v30  ;;  %v5514_v15 = vand.u32 2147483647, %v10437_v45  ;;  %v5546_v19 = vand.u32 2147483648, %v10445_v23 }
0x1c93   :  { %5558 = vrot.lane.b32.xlu0 %v5488_v59, %s5890_s18  ;;  %vm5525_vm3 = vweird.f32 %v10440_v28  ;;  %v5529_v33 = vand.u32 2147483647, %v10440_v28  ;;  %v5544_v43 = vand.u32 2147483647, %v10445_v23  ;;  %vm5510_vm5 = vweird.f32 %v10437_v45 }
0x1c94   :  { %5560 = vrot.lane.b32.xlu1 %v5503_v0, %s5890_s18  ;;  %vm5527_vm4 = vmor %vm5525_vm3, %vm5526_vm0  ;;  %v5509_v29 = vadd.f32 %v10483_v30, %v5508_v55  ;;  %v5517_v52 = vor.u32 1.1754944e-38, %v5516_v27  ;;  %v5543_v34 = vsel %vm10568_vm2, %v10494_v12, %v5539_v13  ;;  %v5532_v42 = vor.u32 1.1754944e-38, %v5531_v50 }
0x1c95   :  { %v5528_v6 = vsel %vm5527_vm4, %v10487_v2, %v5524_v8  ;;  %vm5512_vm6 = vmor %vm5510_vm5, %vm5511_vm1  ;;  %vm5515_vm7 = vcmp.eq.f32.partialorder %v5514_v15, 8.507059e+37  ;;  %v5547_v28 = vor.u32 1.1754944e-38, %v5546_v19  ;;  %vm5530_vm8 = vcmp.eq.f32.partialorder %v5529_v33, 8.507059e+37 }
0x1c96   :  { %v5513_v26 = vsel %vm5512_vm6, %v10483_v30, %v5509_v29  ;;  %vm5545_vm9 = vcmp.eq.f32.partialorder %v5544_v43, 8.507059e+37  ;;  %v5533_v31 = vsel %vm5530_vm8, %v5532_v42, %v5528_v6 }
0x1c97   :  { %v5518_v23 = vsel %vm5515_vm7, %v5517_v52, %v5513_v26  ;;  %v5548_v45 = vsel %vm5545_vm9, %v5547_v28, %v5543_v34 }
0x1c98   :  { %5562 = vrot.lane.b32.xlu2 %v5518_v23, %s5890_s18 }
0x1c9b   :  { %5564 = vrot.lane.b32.xlu0 %v5533_v31, %s5890_s18 }
0x1c9c   :  { %5566 = vrot.lane.b32.xlu1 %v5548_v45, %s5890_s18 }
0x1cd7   :  { %v5401_v9 = vpop.permute.xlu2 %5400 }
0x1ce1   :  { %v5407_v46 = vpop.permute.xlu2 %5406 }
0x1ce9   :  { %v5557_v25 = vpop.permute.xlu2 %5556 }
0x1cf0   :  { %v5403_v54 = vpop.permute.xlu0 %5402 }
0x1cf1   :  { %v5405_v49 = vpop.permute.xlu1 %5404  ;;  %v5412_v61 = vsel %vm2392_vm12, %v5401_v9, %v5403_v54 }
0x1cf2   :  { %v5413_v30 = vsel %vm2392_vm12, %v5403_v54, %v5405_v49  ;;  %5420 = vst [vmem:[%s10631_s13] sm:$0xff] %v5412_v61  ;;  %v5563_v41 = vpop.permute.xlu2 %5562 }
0x1cf3   :  { %5421 = vst [vmem:[%s10631_s13 + $0x8] sm:$0xff] %v5413_v30 }
0x1cfd   :  { %v5409_v2 = vpop.permute.xlu0 %5408 }
0x1cfe   :  { %v5411_v22 = vpop.permute.xlu1 %5410  ;;  %v5414_v1 = vsel %vm2392_vm12, %v5407_v46, %v5409_v2 }
0x1cff   :  { %v5415_v3 = vsel %vm2392_vm12, %v5409_v2, %v5411_v22  ;;  %5422 = vst [vmem:[%s10631_s13 + $0x10] sm:$0xff] %v5414_v1 }
0x1d00   :  { %5423 = vst [vmem:[%s10631_s13 + $0x18] sm:$0xff] %v5415_v3 }
0x1d05   :  { %v5559_v12 = vpop.permute.xlu0 %5558 }
0x1d06   :  { %v5561_v10 = vpop.permute.xlu1 %5560  ;;  %v5568_v37 = vsel %vm2392_vm12, %v5557_v25, %v5559_v12 }
0x1d07   :  { %v5569_v7 = vsel %vm2392_vm12, %v5559_v12, %v5561_v10  ;;  %5615 = vst [vmem:[%s10631_s13 + $0x20] sm:$0xff] %v5568_v37 }
0x1d08   :  { %5616 = vst [vmem:[%s10631_s13 + $0x28] sm:$0xff] %v5569_v7 }
0x1d0d   :  { %v5565_v18 = vpop.permute.xlu0 %5564 }
0x1d0e   :  { %v5567_v5 = vpop.permute.xlu1 %5566  ;;  %v5570_v36 = vsel %vm2392_vm12, %v5563_v41, %v5565_v18 }
0x1d0f   :  { %v5571_v16 = vsel %vm2392_vm12, %v5565_v18, %v5567_v5  ;;  %5617 = vst [vmem:[%s10631_s13 + $0x30] sm:$0xff] %v5570_v36 }
0x1d10   :  { %5618 = vst [vmem:[%s10631_s13 + $0x38] sm:$0xff] %v5571_v16 }

</bundles_post_ra>
